<compile_context>
chip_gen: v6e
topology: v6e:2x2x1
jax: 0.10.0
libtpu: 0.0.40
codegen_flags: <defaults>
</compile_context>

<pallas_src>
import jax
import jax.numpy as jnp
from jax.experimental import pallas as pl
from jax.experimental.pallas import tpu as pltpu


TB = 64                # batch tile; multiple of 32 so TB*196 % 128 == 0
_CDT = jnp.bfloat16    # dtype for the HBM-heavy patch tensors / conv weights


# -----------------------------------------------------------------------------
# Pallas kernels
# -----------------------------------------------------------------------------
def _conv1_pool_kernel(p_ref, w_ref, b_ref, o_ref):
    """conv1 (im2col matmul) + bias + ReLU + fused 2x2/stride-2 max-pool.

    p_ref: (4, 25, N) bf16  one (K=25, N) patch matrix per pool-window offset,
                            N = TB*14*14 pooled positions (lanes).
    w_ref: (8, 25)    bf16  conv1 weights, C_out padded 6->8 (K un-padded).
    b_ref: (8, 1)     f32
    o_ref: (8, N)     bf16  pooled+ReLU feature map, channels on sublanes,
                            lane-dense store (N % 128 == 0).
    """
    w = w_ref[...]
    m = None
    for q in range(4):  # static unroll over the four pool-window offsets
        y = jnp.dot(w, p_ref[q], preferred_element_type=jnp.float32)   # (8, N)
        m = y if m is None else jnp.maximum(m, y)
    # relu(max_q(y_q) + b) == maxpool(relu(conv + b)).
    o_ref[...] = jnp.maximum(m + b_ref[...], 0.0).astype(o_ref.dtype)


def _conv2_mlp_kernel(p_ref, w2_ref, b2_ref, w1r_ref, b1_ref,
                      wf2_ref, bf2_ref, wf3_ref, bf3_ref, o_ref):
    """Fused conv2 + bias + ReLU + 2x2 max-pool + flatten + fc1/ReLU + fc2/ReLU
    + dropout(eval: identity) + fc3 for one batch tile.

    p_ref  : (25*4*TB, 150) bf16  conv2 im2col patches; rows ordered
                                  (pooled pos, pool offset, batch row),
                                  K = (kh,kw,c_in) = 150 un-padded.
    w2_ref : (150, 16) bf16,  b2_ref: (1, 16) f32
    w1r_ref: (25, 16, 128) f32    fc1 weights regrouped per pooled position
    b1_ref : (1, 128) f32
    wf2_ref: (128, 128), bf2_ref: (1, 128) f32
    wf3_ref: (128, 128), bf3_ref: (1, 128) f32   (fc3, classes padded to 128)
    o_ref  : (TB, 128) f32        logits, lane-dense (real classes first).
    """
    tb = o_ref.shape[0]
    # conv2 for every (pos, pool offset, batch row) of the tile in ONE matmul.
    y = jnp.dot(p_ref[...], w2_ref[...],
                preferred_element_type=jnp.float32)        # (25*4*tb, 16) f32
    b2 = b2_ref[...]
    h1 = jnp.zeros((tb, 128), jnp.float32)
    for pos in range(25):                 # static unroll over 5x5 pooled positions
        base = pos * 4 * tb               # static, 8-aligned sublane slices
        m = jnp.maximum(
            jnp.maximum(y[base:base + tb], y[base + tb:base + 2 * tb]),
            jnp.maximum(y[base + 2 * tb:base + 3 * tb],
                        y[base + 3 * tb:base + 4 * tb]))
        f = jnp.maximum(m + b2, 0.0)      # (tb, 16) pooled conv2 features @ pos
        h1 = h1 + jnp.dot(f, w1r_ref[pos], preferred_element_type=jnp.float32)
    h1 = jnp.maximum(h1 + b1_ref[...], 0.0)
    h2 = jnp.maximum(
        jnp.dot(h1, wf2_ref[...], preferred_element_type=jnp.float32) + bf2_ref[...],
        0.0)
    # nn.Dropout(0.5) is identity in eval mode.
    # TODO(synk): train-mode dropout would use pltpu.prng_seed + pltpu.prng_random_bits.
    o_ref[...] = (
        jnp.dot(h2, wf3_ref[...], preferred_element_type=jnp.float32) + bf3_ref[...])


# -----------------------------------------------------------------------------
# LeNet5 forward
# -----------------------------------------------------------------------------
def lenet5_forward(x_nchw, params):
    (c1w, c1b, c2w, c2b, f1w, f1b, f2w, f2b, f3w, f3b) = params
    b = x_nchw.shape[0]
    nc = f3w.shape[0]                     # num_classes
    assert nc <= 128
    tb = 32 if b <= 32 else TB            # small batches: less padding waste
    bp = ((b + tb - 1) // tb) * tb
    nb = bp // tb
    f32 = jnp.float32

    # ---- weight repacking (tiny; no zero-padded contraction dims in HBM) ------
    w1t = jnp.pad(c1w.reshape(6, 25), ((0, 2), (0, 0))).astype(_CDT)      # (8, 25)
    b1c = jnp.pad(c1b, (0, 2)).reshape(8, 1).astype(f32)                  # (8, 1)
    w2r = jnp.transpose(c2w, (2, 3, 1, 0)).reshape(150, 16).astype(_CDT)  # (150, 16)
    b2c = c2b.reshape(1, 16).astype(f32)
    w1r = jnp.pad(jnp.transpose(f1w.reshape(120, 16, 25), (2, 1, 0)),     # (25,16,120)
                  ((0, 0), (0, 0), (0, 8))).astype(f32)                   # (25,16,128)
    b1f = jnp.pad(f1b, (0, 8)).reshape(1, 128).astype(f32)
    w2f = jnp.pad(f2w.T, ((0, 8), (0, 44))).astype(f32)                   # (128, 128)
    b2f = jnp.pad(f2b, (0, 44)).reshape(1, 128).astype(f32)
    w3f = jnp.pad(f3w.T, ((0, 44), (0, 128 - nc))).astype(f32)            # (128, 128)
    b3f = jnp.pad(f3b, (0, 128 - nc)).reshape(1, 128).astype(f32)

    # ---- conv1 im2col grouped by pool offset (bf16, K=25, wrapper glue) -------
    xs = jnp.pad(x_nchw[:, 0], ((0, bp - b), (0, 0), (0, 0)))             # (bp,32,32)
    wins = jnp.stack([xs[:, kh:kh + 28, kw:kw + 28]
                      for kh in range(5) for kw in range(5)], axis=0)     # (25,bp,28,28)
    wins = wins.reshape(25, bp, 14, 2, 14, 2)                             # (k,b,oh,dy,ow,dx)
    p1 = wins.transpose(3, 5, 0, 1, 2, 4).reshape(4, 25, bp * 196).astype(_CDT)

    n_lane = tb * 196                                                     # % 128 == 0
    pool1 = pl.pallas_call(
        _conv1_pool_kernel,
        out_shape=jax.ShapeDtypeStruct((8, bp * 196), _CDT),
        grid_spec=pltpu.PrefetchScalarGridSpec(
            num_scalar_prefetch=0,
            grid=(nb,),
            in_specs=[
                pl.BlockSpec((4, 25, n_lane), lambda i: (0, 0, i)),
                pl.BlockSpec((8, 25), lambda i: (0, 0)),
                pl.BlockSpec((8, 1), lambda i: (0, 0)),
            ],
            out_specs=pl.BlockSpec((8, n_lane), lambda i: (0, i)),
        ),
        compiler_params=pltpu.CompilerParams(
            dimension_semantics=("parallel",),
            vmem_limit_bytes=32 * 1024 * 1024),
        cost_estimate=pl.CostEstimate(
            flops=2 * 4 * 8 * 25 * bp * 196,
            transcendentals=0,
            bytes_accessed=2 * (4 * 25 * bp * 196 + 8 * bp * 196) + 4 * (8 * 25 + 8)),
    )(p1, w1t, b1c)

    # ---- conv2 im2col grouped by (pos, pool offset, batch row), bf16, K=150 ---
    pl1 = pool1[:6].reshape(6, bp, 14, 14).transpose(1, 2, 3, 0)          # (bp,14,14,6)
    wins2 = jnp.stack([pl1[:, kh:kh + 10, kw:kw + 10, :]
                       for kh in range(5) for kw in range(5)], axis=0)    # (25,bp,10,10,6)
    wins2 = wins2.reshape(25, bp, 5, 2, 5, 2, 6)                          # (k,b,oh2,dy,ow2,dx,c)
    p2 = wins2.transpose(2, 4, 3, 5, 1, 0, 6).reshape(25, 4, nb, tb, 150)
    p2 = p2.transpose(2, 0, 1, 3, 4).reshape(nb, 25 * 4 * tb, 150)        # rows=(pos,q,b)

    # ---- kernel B: fused conv2 + ReLU + pool + fc1/fc2/fc3 (Pallas) -----------
    logits = pl.pallas_call(
        _conv2_mlp_kernel,
        out_shape=jax.ShapeDtypeStruct((bp, 128), f32),
        grid_spec=pltpu.PrefetchScalarGridSpec(
            num_scalar_prefetch=0,
            grid=(nb,),
            in_specs=[
                pl.BlockSpec((None, 25 * 4 * tb, 150), lambda i: (i, 0, 0)),
                pl.BlockSpec((150, 16), lambda i: (0, 0)),
                pl.BlockSpec((1, 16), lambda i: (0, 0)),
                pl.BlockSpec((25, 16, 128), lambda i: (0, 0, 0)),
                pl.BlockSpec((1, 128), lambda i: (0, 0)),
                pl.BlockSpec((128, 128), lambda i: (0, 0)),
                pl.BlockSpec((1, 128), lambda i: (0, 0)),
                pl.BlockSpec((128, 128), lambda i: (0, 0)),
                pl.BlockSpec((1, 128), lambda i: (0, 0)),
            ],
            out_specs=pl.BlockSpec((tb, 128), lambda i: (i, 0)),
        ),
        compiler_params=pltpu.CompilerParams(
            dimension_semantics=("parallel",),
            vmem_limit_bytes=32 * 1024 * 1024),
        cost_estimate=pl.CostEstimate(
            flops=bp * (2 * 100 * 150 * 16 + 2 * 25 * 16 * 128 + 2 * 2 * 128 * 128),
            transcendentals=0,
            bytes_accessed=(2 * 100 * 150 * bp + 4 * 128 * bp + 2 * 150 * 16
                            + 4 * (25 * 16 * 128 + 2 * 128 * 128 + 4 * 128 + 16))),
    )(p2, w2r, b2c, w1r, b1f, w2f, b2f, w3f, b3f)

    return logits[:b, :nc]


# -----------------------------------------------------------------------------
# Deterministic parameter init (PyTorch tensor conventions / shapes)
# -----------------------------------------------------------------------------
def init_params(key, num_classes=10):
    def uniform(k, shape, fan_in):
        bound = 1.0 / jnp.sqrt(jnp.float32(fan_in))
        return jax.random.uniform(k, shape, jnp.float32, -bound, bound)

    ks = jax.random.split(key, 10)
    return (
        uniform(ks[0], (6, 1, 5, 5), 25),        # conv1.weight
        uniform(ks[1], (6,), 25),                # conv1.bias
        uniform(ks[2], (16, 6, 5, 5), 150),      # conv2.weight
        uniform(ks[3], (16,), 150),              # conv2.bias
        uniform(ks[4], (120, 400), 400),         # fc1.weight
        uniform(ks[5], (120,), 400),             # fc1.bias
        uniform(ks[6], (84, 120), 120),          # fc2.weight
        uniform(ks[7], (84,), 120),              # fc2.bias
        uniform(ks[8], (num_classes, 84), 84),   # fc3.weight
        uniform(ks[9], (num_classes,), 84),      # fc3.bias
    )


# -----------------------------------------------------------------------------
# Pure-JAX reference (semantics check against the PyTorch forward)
# -----------------------------------------------------------------------------
def lenet5_reference(x, params):
    (c1w, c1b, c2w, c2b, f1w, f1b, f2w, f2b, f3w, f3b) = params
    hp = jax.lax.Precision.HIGHEST
    dn = ("NCHW", "OIHW", "NCHW")
    y = jax.lax.conv_general_dilated(x, c1w, (1, 1), "VALID",
                                     dimension_numbers=dn, precision=hp)
    y = jax.nn.relu(y + c1b[None, :, None, None])
    y = jax.lax.reduce_window(y, -jnp.inf, jax.lax.max, (1, 1, 2, 2), (1, 1, 2, 2), "VALID")
    y = jax.lax.conv_general_dilated(y, c2w, (1, 1), "VALID",
                                     dimension_numbers=dn, precision=hp)
    y = jax.nn.relu(y + c2b[None, :, None, None])
    y = jax.lax.reduce_window(y, -jnp.inf, jax.lax.max, (1, 1, 2, 2), (1, 1, 2, 2), "VALID")
    y = y.reshape(x.shape[0], -1)
    y = jax.nn.relu(jnp.dot(y, f1w.T, precision=hp) + f1b)
    y = jax.nn.relu(jnp.dot(y, f2w.T, precision=hp) + f2b)
    return jnp.dot(y, f3w.T, precision=hp) + f3b


if __name__ == "__main__":
    key = jax.random.PRNGKey(0)
    kx, kp = jax.random.split(key)
    params = init_params(kp)
    fwd = jax.jit(lenet5_forward)

    # LeNet5 requires 1 input channel and 32x32 spatial (16*5*5 = 400 flatten).
    x = jax.random.normal(kx, (2, 1, 32, 32), jnp.float32)
    out = jax.block_until_ready(fwd(x, params))
    assert out.shape == (2, 10) and out.dtype == jnp.float32
    ref = lenet5_reference(x, params)
    assert bool(jnp.allclose(out, ref, atol=1e-2, rtol=1e-2)), "mismatch vs JAX reference"

    # Multi-tile check: 70 images -> tb=64, 2 grid steps, ragged batch padding.
    x2 = jax.random.normal(jax.random.PRNGKey(1), (70, 1, 32, 32), jnp.float32)
    out2 = jax.block_until_ready(fwd(x2, params))
    ref2 = lenet5_reference(x2, params)
    assert out2.shape == (70, 10)
    assert bool(jnp.allclose(out2, ref2, atol=1e-2, rtol=1e-2)), "mismatch (multi-tile)"

    print("KERNEL_OK")
</pallas_src>

<mosaic_0001>
module attributes {stable_mosaic.version = 11 : i64} {
  func.func @_conv1_pool_kernel(%arg0: i32, %arg1: memref<4x25x6272xbf16, #tpu.memory_space<vmem>>, %arg2: memref<8x25xbf16, #tpu.memory_space<vmem>>, %arg3: memref<8x1xf32, #tpu.memory_space<vmem>>, %arg4: memref<8x6272xbf16, #tpu.memory_space<vmem>>) attributes {dimension_semantics = [#tpu.dimension_semantics<parallel>], iteration_bounds = array<i64: 1>, scalar_prefetch = 0 : i64, scratch_operands = 0 : i64, tpu.core_type = #tpu.core_type<tc>, window_params = [{transform_indices = @transform_0, window_bounds = array<i64: 4, 25, 6272>}, {pipeline_mode = #tpu.pipeline_mode<synchronous>, transform_indices = @transform_1, window_bounds = array<i64: 8, 25>}, {pipeline_mode = #tpu.pipeline_mode<synchronous>, transform_indices = @transform_2, window_bounds = array<i64: 8, 1>}, {transform_indices = @transform_3, window_bounds = array<i64: 8, 6272>}]} {
    %c0 = arith.constant 0 : index
    %c0_0 = arith.constant 0 : index
    %0 = vector.load %arg2[%c0, %c0_0] : memref<8x25xbf16, #tpu.memory_space<vmem>>, vector<8x25xbf16>
    %c0_1 = arith.constant 0 : index
    %c0_2 = arith.constant 0 : index
    %c0_3 = arith.constant 0 : index
    %1 = vector.load %arg1[%c0_1, %c0_2, %c0_3] : memref<4x25x6272xbf16, #tpu.memory_space<vmem>>, vector<1x25x6272xbf16>
    %2 = vector.shape_cast %1 : vector<1x25x6272xbf16> to vector<25x6272xbf16>
    %cst = arith.constant dense<0.000000e+00> : vector<8x6272xf32>
    %3 = tpu.matmul %0, %2, %cst {dimension_numbers = #tpu.dot_dimension_numbers<[1], [0], [0], [1], [0, 0, 1, 1], [], []>} : vector<8x25xbf16>, vector<25x6272xbf16>, vector<8x6272xf32> -> vector<8x6272xf32>
    %c1 = arith.constant 1 : index
    %c0_4 = arith.constant 0 : index
    %c0_5 = arith.constant 0 : index
    %4 = vector.load %arg1[%c1, %c0_4, %c0_5] : memref<4x25x6272xbf16, #tpu.memory_space<vmem>>, vector<1x25x6272xbf16>
    %5 = vector.shape_cast %4 : vector<1x25x6272xbf16> to vector<25x6272xbf16>
    %cst_6 = arith.constant dense<0.000000e+00> : vector<8x6272xf32>
    %6 = tpu.matmul %0, %5, %cst_6 {dimension_numbers = #tpu.dot_dimension_numbers<[1], [0], [0], [1], [0, 0, 1, 1], [], []>} : vector<8x25xbf16>, vector<25x6272xbf16>, vector<8x6272xf32> -> vector<8x6272xf32>
    %7 = arith.maximumf %3, %6 : vector<8x6272xf32>
    %c2 = arith.constant 2 : index
    %c0_7 = arith.constant 0 : index
    %c0_8 = arith.constant 0 : index
    %8 = vector.load %arg1[%c2, %c0_7, %c0_8] : memref<4x25x6272xbf16, #tpu.memory_space<vmem>>, vector<1x25x6272xbf16>
    %9 = vector.shape_cast %8 : vector<1x25x6272xbf16> to vector<25x6272xbf16>
    %cst_9 = arith.constant dense<0.000000e+00> : vector<8x6272xf32>
    %10 = tpu.matmul %0, %9, %cst_9 {dimension_numbers = #tpu.dot_dimension_numbers<[1], [0], [0], [1], [0, 0, 1, 1], [], []>} : vector<8x25xbf16>, vector<25x6272xbf16>, vector<8x6272xf32> -> vector<8x6272xf32>
    %11 = arith.maximumf %7, %10 : vector<8x6272xf32>
    %c3 = arith.constant 3 : index
    %c0_10 = arith.constant 0 : index
    %c0_11 = arith.constant 0 : index
    %12 = vector.load %arg1[%c3, %c0_10, %c0_11] : memref<4x25x6272xbf16, #tpu.memory_space<vmem>>, vector<1x25x6272xbf16>
    %13 = vector.shape_cast %12 : vector<1x25x6272xbf16> to vector<25x6272xbf16>
    %cst_12 = arith.constant dense<0.000000e+00> : vector<8x6272xf32>
    %14 = tpu.matmul %0, %13, %cst_12 {dimension_numbers = #tpu.dot_dimension_numbers<[1], [0], [0], [1], [0, 0, 1, 1], [], []>} : vector<8x25xbf16>, vector<25x6272xbf16>, vector<8x6272xf32> -> vector<8x6272xf32>
    %15 = arith.maximumf %11, %14 : vector<8x6272xf32>
    %c0_13 = arith.constant 0 : index
    %c0_14 = arith.constant 0 : index
    %16 = vector.load %arg3[%c0_13, %c0_14] : memref<8x1xf32, #tpu.memory_space<vmem>>, vector<8x1xf32>
    %17 = vector.broadcast %16 : vector<8x1xf32> to vector<8x6272xf32>
    %18 = arith.addf %15, %17 : vector<8x6272xf32>
    %cst_15 = arith.constant 0.000000e+00 : f32
    %19 = vector.broadcast %cst_15 : f32 to vector<8x6272xf32>
    %20 = arith.maximumf %18, %19 : vector<8x6272xf32>
    %21 = arith.truncf %20 : vector<8x6272xf32> to vector<8x6272xbf16>
    %c0_16 = arith.constant 0 : index
    %c0_17 = arith.constant 0 : index
    %22 = vector.load %arg4[%c0_16, %c0_17] : memref<8x6272xbf16, #tpu.memory_space<vmem>>, vector<8x6272xbf16>
    tpu.vector_store %arg4[%c0_16, %c0_17], %21 {strides = array<i32>} : memref<8x6272xbf16, #tpu.memory_space<vmem>>, vector<8x6272xbf16>,
    return
  }
  func.func @transform_0(%arg0: i32) -> (i32, i32, i32) {
    %c0_i32 = arith.constant 0 : i32
    %c0_i32_0 = arith.constant 0 : i32
    %c0_i32_1 = arith.constant 0 : i32
    return %c0_i32, %c0_i32_0, %arg0 : i32, i32, i32
  }
  func.func @transform_1(%arg0: i32) -> (i32, i32) {
    %c0_i32 = arith.constant 0 : i32
    %c0_i32_0 = arith.constant 0 : i32
    %c0_i32_1 = arith.constant 0 : i32
    return %c0_i32, %c0_i32_0 : i32, i32
  }
  func.func @transform_2(%arg0: i32) -> (i32, i32) {
    %c0_i32 = arith.constant 0 : i32
    %c0_i32_0 = arith.constant 0 : i32
    %c0_i32_1 = arith.constant 0 : i32
    return %c0_i32, %c0_i32_0 : i32, i32
  }
  func.func @transform_3(%arg0: i32) -> (i32, i32) {
    %c0_i32 = arith.constant 0 : i32
    %c0_i32_0 = arith.constant 0 : i32
    return %c0_i32, %arg0 : i32, i32
  }
}

module attributes {stable_mosaic.version = 11 : i64} {
  func.func @_conv2_mlp_kernel(%arg0: i32, %arg1: memref<1x3200x150xbf16, #tpu.memory_space<vmem>>, %arg2: memref<150x16xbf16, #tpu.memory_space<vmem>>, %arg3: memref<1x16xf32, #tpu.memory_space<vmem>>, %arg4: memref<25x16x128xf32, #tpu.memory_space<vmem>>, %arg5: memref<1x128xf32, #tpu.memory_space<vmem>>, %arg6: memref<128x128xf32, #tpu.memory_space<vmem>>, %arg7: memref<1x128xf32, #tpu.memory_space<vmem>>, %arg8: memref<128x128xf32, #tpu.memory_space<vmem>>, %arg9: memref<1x128xf32, #tpu.memory_space<vmem>>, %arg10: memref<32x128xf32, #tpu.memory_space<vmem>>) attributes {dimension_semantics = [#tpu.dimension_semantics<parallel>], iteration_bounds = array<i64: 1>, scalar_prefetch = 0 : i64, scratch_operands = 0 : i64, tpu.core_type = #tpu.core_type<tc>, window_params = [{transform_indices = @transform_0, window_bounds = array<i64: 1, 3200, 150>}, {pipeline_mode = #tpu.pipeline_mode<synchronous>, transform_indices = @transform_1, window_bounds = array<i64: 150, 16>}, {pipeline_mode = #tpu.pipeline_mode<synchronous>, transform_indices = @transform_2, window_bounds = array<i64: 1, 16>}, {pipeline_mode = #tpu.pipeline_mode<synchronous>, transform_indices = @transform_3, window_bounds = array<i64: 25, 16, 128>}, {pipeline_mode = #tpu.pipeline_mode<synchronous>, transform_indices = @transform_4, window_bounds = array<i64: 1, 128>}, {pipeline_mode = #tpu.pipeline_mode<synchronous>, transform_indices = @transform_5, window_bounds = array<i64: 128, 128>}, {pipeline_mode = #tpu.pipeline_mode<synchronous>, transform_indices = @transform_6, window_bounds = array<i64: 1, 128>}, {pipeline_mode = #tpu.pipeline_mode<synchronous>, transform_indices = @transform_7, window_bounds = array<i64: 128, 128>}, {pipeline_mode = #tpu.pipeline_mode<synchronous>, transform_indices = @transform_8, window_bounds = array<i64: 1, 128>}, {transform_indices = @transform_9, window_bounds = array<i64: 32, 128>}]} {
    %c0 = arith.constant 0 : index
    %c0_0 = arith.constant 0 : index
    %c0_1 = arith.constant 0 : index
    %0 = vector.load %arg1[%c0, %c0_0, %c0_1] : memref<1x3200x150xbf16, #tpu.memory_space<vmem>>, vector<1x3200x150xbf16>
    %1 = vector.shape_cast %0 : vector<1x3200x150xbf16> to vector<3200x150xbf16>
    %c0_2 = arith.constant 0 : index
    %c0_3 = arith.constant 0 : index
    %2 = vector.load %arg2[%c0_2, %c0_3] : memref<150x16xbf16, #tpu.memory_space<vmem>>, vector<150x16xbf16>
    %cst = arith.constant dense<0.000000e+00> : vector<3200x16xf32>
    %3 = tpu.matmul %1, %2, %cst {dimension_numbers = #tpu.dot_dimension_numbers<[1], [0], [0], [1], [0, 0, 1, 1], [], []>} : vector<3200x150xbf16>, vector<150x16xbf16>, vector<3200x16xf32> -> vector<3200x16xf32>
    %c0_4 = arith.constant 0 : index
    %c0_5 = arith.constant 0 : index
    %4 = vector.load %arg3[%c0_4, %c0_5] : memref<1x16xf32, #tpu.memory_space<vmem>>, vector<1x16xf32>
    %cst_6 = arith.constant 0.000000e+00 : f32
    %5 = vector.broadcast %cst_6 : f32 to vector<32x128xf32>
    %6 = vector.extract_strided_slice %3 {offsets = [0, 0], sizes = [32, 16], strides = [1, 1]} : vector<3200x16xf32> to vector<32x16xf32>
    %7 = vector.extract_strided_slice %3 {offsets = [32, 0], sizes = [32, 16], strides = [1, 1]} : vector<3200x16xf32> to vector<32x16xf32>
    %8 = arith.maximumf %6, %7 : vector<32x16xf32>
    %9 = vector.extract_strided_slice %3 {offsets = [64, 0], sizes = [32, 16], strides = [1, 1]} : vector<3200x16xf32> to vector<32x16xf32>
    %10 = vector.extract_strided_slice %3 {offsets = [96, 0], sizes = [32, 16], strides = [1, 1]} : vector<3200x16xf32> to vector<32x16xf32>
    %11 = arith.maximumf %9, %10 : vector<32x16xf32>
    %12 = arith.maximumf %8, %11 : vector<32x16xf32>
    %13 = vector.broadcast %4 : vector<1x16xf32> to vector<32x16xf32>
    %14 = arith.addf %12, %13 : vector<32x16xf32>
    %cst_7 = arith.constant 0.000000e+00 : f32
    %15 = vector.broadcast %cst_7 : f32 to vector<32x16xf32>
    %16 = arith.maximumf %14, %15 : vector<32x16xf32>
    %c0_8 = arith.constant 0 : index
    %c0_9 = arith.constant 0 : index
    %c0_10 = arith.constant 0 : index
    %17 = vector.load %arg4[%c0_8, %c0_9, %c0_10] : memref<25x16x128xf32, #tpu.memory_space<vmem>>, vector<1x16x128xf32>
    %18 = vector.shape_cast %17 : vector<1x16x128xf32> to vector<16x128xf32>
    %cst_11 = arith.constant dense<0.000000e+00> : vector<32x128xf32>
    %19 = tpu.matmul %16, %18, %cst_11 {dimension_numbers = #tpu.dot_dimension_numbers<[1], [0], [0], [1], [0, 0, 1, 1], [], []>} : vector<32x16xf32>, vector<16x128xf32>, vector<32x128xf32> -> vector<32x128xf32>
    %20 = arith.addf %5, %19 : vector<32x128xf32>
    %21 = vector.extract_strided_slice %3 {offsets = [128, 0], sizes = [32, 16], strides = [1, 1]} : vector<3200x16xf32> to vector<32x16xf32>
    %22 = vector.extract_strided_slice %3 {offsets = [160, 0], sizes = [32, 16], strides = [1, 1]} : vector<3200x16xf32> to vector<32x16xf32>
    %23 = arith.maximumf %21, %22 : vector<32x16xf32>
    %24 = vector.extract_strided_slice %3 {offsets = [192, 0], sizes = [32, 16], strides = [1, 1]} : vector<3200x16xf32> to vector<32x16xf32>
    %25 = vector.extract_strided_slice %3 {offsets = [224, 0], sizes = [32, 16], strides = [1, 1]} : vector<3200x16xf32> to vector<32x16xf32>
    %26 = arith.maximumf %24, %25 : vector<32x16xf32>
    %27 = arith.maximumf %23, %26 : vector<32x16xf32>
    %28 = vector.broadcast %4 : vector<1x16xf32> to vector<32x16xf32>
    %29 = arith.addf %27, %28 : vector<32x16xf32>
    %cst_12 = arith.constant 0.000000e+00 : f32
    %30 = vector.broadcast %cst_12 : f32 to vector<32x16xf32>
    %31 = arith.maximumf %29, %30 : vector<32x16xf32>
    %c1 = arith.constant 1 : index
    %c0_13 = arith.constant 0 : index
    %c0_14 = arith.constant 0 : index
    %32 = vector.load %arg4[%c1, %c0_13, %c0_14] : memref<25x16x128xf32, #tpu.memory_space<vmem>>, vector<1x16x128xf32>
    %33 = vector.shape_cast %32 : vector<1x16x128xf32> to vector<16x128xf32>
    %cst_15 = arith.constant dense<0.000000e+00> : vector<32x128xf32>
    %34 = tpu.matmul %31, %33, %cst_15 {dimension_numbers = #tpu.dot_dimension_numbers<[1], [0], [0], [1], [0, 0, 1, 1], [], []>} : vector<32x16xf32>, vector<16x128xf32>, vector<32x128xf32> -> vector<32x128xf32>
    %35 = arith.addf %20, %34 : vector<32x128xf32>
    %36 = vector.extract_strided_slice %3 {offsets = [256, 0], sizes = [32, 16], strides = [1, 1]} : vector<3200x16xf32> to vector<32x16xf32>
    %37 = vector.extract_strided_slice %3 {offsets = [288, 0], sizes = [32, 16], strides = [1, 1]} : vector<3200x16xf32> to vector<32x16xf32>
    %38 = arith.maximumf %36, %37 : vector<32x16xf32>
    %39 = vector.extract_strided_slice %3 {offsets = [320, 0], sizes = [32, 16], strides = [1, 1]} : vector<3200x16xf32> to vector<32x16xf32>
    %40 = vector.extract_strided_slice %3 {offsets = [352, 0], sizes = [32, 16], strides = [1, 1]} : vector<3200x16xf32> to vector<32x16xf32>
    %41 = arith.maximumf %39, %40 : vector<32x16xf32>
    %42 = arith.maximumf %38, %41 : vector<32x16xf32>
    %43 = vector.broadcast %4 : vector<1x16xf32> to vector<32x16xf32>
    %44 = arith.addf %42, %43 : vector<32x16xf32>
    %cst_16 = arith.constant 0.000000e+00 : f32
    %45 = vector.broadcast %cst_16 : f32 to vector<32x16xf32>
    %46 = arith.maximumf %44, %45 : vector<32x16xf32>
    %c2 = arith.constant 2 : index
    %c0_17 = arith.constant 0 : index
    %c0_18 = arith.constant 0 : index
    %47 = vector.load %arg4[%c2, %c0_17, %c0_18] : memref<25x16x128xf32, #tpu.memory_space<vmem>>, vector<1x16x128xf32>
    %48 = vector.shape_cast %47 : vector<1x16x128xf32> to vector<16x128xf32>
    %cst_19 = arith.constant dense<0.000000e+00> : vector<32x128xf32>
    %49 = tpu.matmul %46, %48, %cst_19 {dimension_numbers = #tpu.dot_dimension_numbers<[1], [0], [0], [1], [0, 0, 1, 1], [], []>} : vector<32x16xf32>, vector<16x128xf32>, vector<32x128xf32> -> vector<32x128xf32>
    %50 = arith.addf %35, %49 : vector<32x128xf32>
    %51 = vector.extract_strided_slice %3 {offsets = [384, 0], sizes = [32, 16], strides = [1, 1]} : vector<3200x16xf32> to vector<32x16xf32>
    %52 = vector.extract_strided_slice %3 {offsets = [416, 0], sizes = [32, 16], strides = [1, 1]} : vector<3200x16xf32> to vector<32x16xf32>
    %53 = arith.maximumf %51, %52 : vector<32x16xf32>
    %54 = vector.extract_strided_slice %3 {offsets = [448, 0], sizes = [32, 16], strides = [1, 1]} : vector<3200x16xf32> to vector<32x16xf32>
    %55 = vector.extract_strided_slice %3 {offsets = [480, 0], sizes = [32, 16], strides = [1, 1]} : vector<3200x16xf32> to vector<32x16xf32>
    %56 = arith.maximumf %54, %55 : vector<32x16xf32>
    %57 = arith.maximumf %53, %56 : vector<32x16xf32>
    %58 = vector.broadcast %4 : vector<1x16xf32> to vector<32x16xf32>
    %59 = arith.addf %57, %58 : vector<32x16xf32>
    %cst_20 = arith.constant 0.000000e+00 : f32
    %60 = vector.broadcast %cst_20 : f32 to vector<32x16xf32>
    %61 = arith.maximumf %59, %60 : vector<32x16xf32>
    %c3 = arith.constant 3 : index
    %c0_21 = arith.constant 0 : index
    %c0_22 = arith.constant 0 : index
    %62 = vector.load %arg4[%c3, %c0_21, %c0_22] : memref<25x16x128xf32, #tpu.memory_space<vmem>>, vector<1x16x128xf32>
    %63 = vector.shape_cast %62 : vector<1x16x128xf32> to vector<16x128xf32>
    %cst_23 = arith.constant dense<0.000000e+00> : vector<32x128xf32>
    %64 = tpu.matmul %61, %63, %cst_23 {dimension_numbers = #tpu.dot_dimension_numbers<[1], [0], [0], [1], [0, 0, 1, 1], [], []>} : vector<32x16xf32>, vector<16x128xf32>, vector<32x128xf32> -> vector<32x128xf32>
    %65 = arith.addf %50, %64 : vector<32x128xf32>
    %66 = vector.extract_strided_slice %3 {offsets = [512, 0], sizes = [32, 16], strides = [1, 1]} : vector<3200x16xf32> to vector<32x16xf32>
    %67 = vector.extract_strided_slice %3 {offsets = [544, 0], sizes = [32, 16], strides = [1, 1]} : vector<3200x16xf32> to vector<32x16xf32>
    %68 = arith.maximumf %66, %67 : vector<32x16xf32>
    %69 = vector.extract_strided_slice %3 {offsets = [576, 0], sizes = [32, 16], strides = [1, 1]} : vector<3200x16xf32> to vector<32x16xf32>
    %70 = vector.extract_strided_slice %3 {offsets = [608, 0], sizes = [32, 16], strides = [1, 1]} : vector<3200x16xf32> to vector<32x16xf32>
    %71 = arith.maximumf %69, %70 : vector<32x16xf32>
    %72 = arith.maximumf %68, %71 : vector<32x16xf32>
    %73 = vector.broadcast %4 : vector<1x16xf32> to vector<32x16xf32>
    %74 = arith.addf %72, %73 : vector<32x16xf32>
    %cst_24 = arith.constant 0.000000e+00 : f32
    %75 = vector.broadcast %cst_24 : f32 to vector<32x16xf32>
    %76 = arith.maximumf %74, %75 : vector<32x16xf32>
    %c4 = arith.constant 4 : index
    %c0_25 = arith.constant 0 : index
    %c0_26 = arith.constant 0 : index
    %77 = vector.load %arg4[%c4, %c0_25, %c0_26] : memref<25x16x128xf32, #tpu.memory_space<vmem>>, vector<1x16x128xf32>
    %78 = vector.shape_cast %77 : vector<1x16x128xf32> to vector<16x128xf32>
    %cst_27 = arith.constant dense<0.000000e+00> : vector<32x128xf32>
    %79 = tpu.matmul %76, %78, %cst_27 {dimension_numbers = #tpu.dot_dimension_numbers<[1], [0], [0], [1], [0, 0, 1, 1], [], []>} : vector<32x16xf32>, vector<16x128xf32>, vector<32x128xf32> -> vector<32x128xf32>
    %80 = arith.addf %65, %79 : vector<32x128xf32>
    %81 = vector.extract_strided_slice %3 {offsets = [640, 0], sizes = [32, 16], strides = [1, 1]} : vector<3200x16xf32> to vector<32x16xf32>
    %82 = vector.extract_strided_slice %3 {offsets = [672, 0], sizes = [32, 16], strides = [1, 1]} : vector<3200x16xf32> to vector<32x16xf32>
    %83 = arith.maximumf %81, %82 : vector<32x16xf32>
    %84 = vector.extract_strided_slice %3 {offsets = [704, 0], sizes = [32, 16], strides = [1, 1]} : vector<3200x16xf32> to vector<32x16xf32>
    %85 = vector.extract_strided_slice %3 {offsets = [736, 0], sizes = [32, 16], strides = [1, 1]} : vector<3200x16xf32> to vector<32x16xf32>
    %86 = arith.maximumf %84, %85 : vector<32x16xf32>
    %87 = arith.maximumf %83, %86 : vector<32x16xf32>
    %88 = vector.broadcast %4 : vector<1x16xf32> to vector<32x16xf32>
    %89 = arith.addf %87, %88 : vector<32x16xf32>
    %cst_28 = arith.constant 0.000000e+00 : f32
    %90 = vector.broadcast %cst_28 : f32 to vector<32x16xf32>
    %91 = arith.maximumf %89, %90 : vector<32x16xf32>
    %c5 = arith.constant 5 : index
    %c0_29 = arith.constant 0 : index
    %c0_30 = arith.constant 0 : index
    %92 = vector.load %arg4[%c5, %c0_29, %c0_30] : memref<25x16x128xf32, #tpu.memory_space<vmem>>, vector<1x16x128xf32>
    %93 = vector.shape_cast %92 : vector<1x16x128xf32> to vector<16x128xf32>
    %cst_31 = arith.constant dense<0.000000e+00> : vector<32x128xf32>
    %94 = tpu.matmul %91, %93, %cst_31 {dimension_numbers = #tpu.dot_dimension_numbers<[1], [0], [0], [1], [0, 0, 1, 1], [], []>} : vector<32x16xf32>, vector<16x128xf32>, vector<32x128xf32> -> vector<32x128xf32>
    %95 = arith.addf %80, %94 : vector<32x128xf32>
    %96 = vector.extract_strided_slice %3 {offsets = [768, 0], sizes = [32, 16], strides = [1, 1]} : vector<3200x16xf32> to vector<32x16xf32>
    %97 = vector.extract_strided_slice %3 {offsets = [800, 0], sizes = [32, 16], strides = [1, 1]} : vector<3200x16xf32> to vector<32x16xf32>
    %98 = arith.maximumf %96, %97 : vector<32x16xf32>
    %99 = vector.extract_strided_slice %3 {offsets = [832, 0], sizes = [32, 16], strides = [1, 1]} : vector<3200x16xf32> to vector<32x16xf32>
    %100 = vector.extract_strided_slice %3 {offsets = [864, 0], sizes = [32, 16], strides = [1, 1]} : vector<3200x16xf32> to vector<32x16xf32>
    %101 = arith.maximumf %99, %100 : vector<32x16xf32>
    %102 = arith.maximumf %98, %101 : vector<32x16xf32>
    %103 = vector.broadcast %4 : vector<1x16xf32> to vector<32x16xf32>
    %104 = arith.addf %102, %103 : vector<32x16xf32>
    %cst_32 = arith.constant 0.000000e+00 : f32
    %105 = vector.broadcast %cst_32 : f32 to vector<32x16xf32>
    %106 = arith.maximumf %104, %105 : vector<32x16xf32>
    %c6 = arith.constant 6 : index
    %c0_33 = arith.constant 0 : index
    %c0_34 = arith.constant 0 : index
    %107 = vector.load %arg4[%c6, %c0_33, %c0_34] : memref<25x16x128xf32, #tpu.memory_space<vmem>>, vector<1x16x128xf32>
    %108 = vector.shape_cast %107 : vector<1x16x128xf32> to vector<16x128xf32>
    %cst_35 = arith.constant dense<0.000000e+00> : vector<32x128xf32>
    %109 = tpu.matmul %106, %108, %cst_35 {dimension_numbers = #tpu.dot_dimension_numbers<[1], [0], [0], [1], [0, 0, 1, 1], [], []>} : vector<32x16xf32>, vector<16x128xf32>, vector<32x128xf32> -> vector<32x128xf32>
    %110 = arith.addf %95, %109 : vector<32x128xf32>
    %111 = vector.extract_strided_slice %3 {offsets = [896, 0], sizes = [32, 16], strides = [1, 1]} : vector<3200x16xf32> to vector<32x16xf32>
    %112 = vector.extract_strided_slice %3 {offsets = [928, 0], sizes = [32, 16], strides = [1, 1]} : vector<3200x16xf32> to vector<32x16xf32>
    %113 = arith.maximumf %111, %112 : vector<32x16xf32>
    %114 = vector.extract_strided_slice %3 {offsets = [960, 0], sizes = [32, 16], strides = [1, 1]} : vector<3200x16xf32> to vector<32x16xf32>
    %115 = vector.extract_strided_slice %3 {offsets = [992, 0], sizes = [32, 16], strides = [1, 1]} : vector<3200x16xf32> to vector<32x16xf32>
    %116 = arith.maximumf %114, %115 : vector<32x16xf32>
    %117 = arith.maximumf %113, %116 : vector<32x16xf32>
    %118 = vector.broadcast %4 : vector<1x16xf32> to vector<32x16xf32>
    %119 = arith.addf %117, %118 : vector<32x16xf32>
    %cst_36 = arith.constant 0.000000e+00 : f32
    %120 = vector.broadcast %cst_36 : f32 to vector<32x16xf32>
    %121 = arith.maximumf %119, %120 : vector<32x16xf32>
    %c7 = arith.constant 7 : index
    %c0_37 = arith.constant 0 : index
    %c0_38 = arith.constant 0 : index
    %122 = vector.load %arg4[%c7, %c0_37, %c0_38] : memref<25x16x128xf32, #tpu.memory_space<vmem>>, vector<1x16x128xf32>
    %123 = vector.shape_cast %122 : vector<1x16x128xf32> to vector<16x128xf32>
    %cst_39 = arith.constant dense<0.000000e+00> : vector<32x128xf32>
    %124 = tpu.matmul %121, %123, %cst_39 {dimension_numbers = #tpu.dot_dimension_numbers<[1], [0], [0], [1], [0, 0, 1, 1], [], []>} : vector<32x16xf32>, vector<16x128xf32>, vector<32x128xf32> -> vector<32x128xf32>
    %125 = arith.addf %110, %124 : vector<32x128xf32>
    %126 = vector.extract_strided_slice %3 {offsets = [1024, 0], sizes = [32, 16], strides = [1, 1]} : vector<3200x16xf32> to vector<32x16xf32>
    %127 = vector.extract_strided_slice %3 {offsets = [1056, 0], sizes = [32, 16], strides = [1, 1]} : vector<3200x16xf32> to vector<32x16xf32>
    %128 = arith.maximumf %126, %127 : vector<32x16xf32>
    %129 = vector.extract_strided_slice %3 {offsets = [1088, 0], sizes = [32, 16], strides = [1, 1]} : vector<3200x16xf32> to vector<32x16xf32>
    %130 = vector.extract_strided_slice %3 {offsets = [1120, 0], sizes = [32, 16], strides = [1, 1]} : vector<3200x16xf32> to vector<32x16xf32>
    %131 = arith.maximumf %129, %130 : vector<32x16xf32>
    %132 = arith.maximumf %128, %131 : vector<32x16xf32>
    %133 = vector.broadcast %4 : vector<1x16xf32> to vector<32x16xf32>
    %134 = arith.addf %132, %133 : vector<32x16xf32>
    %cst_40 = arith.constant 0.000000e+00 : f32
    %135 = vector.broadcast %cst_40 : f32 to vector<32x16xf32>
    %136 = arith.maximumf %134, %135 : vector<32x16xf32>
    %c8 = arith.constant 8 : index
    %c0_41 = arith.constant 0 : index
    %c0_42 = arith.constant 0 : index
    %137 = vector.load %arg4[%c8, %c0_41, %c0_42] : memref<25x16x128xf32, #tpu.memory_space<vmem>>, vector<1x16x128xf32>
    %138 = vector.shape_cast %137 : vector<1x16x128xf32> to vector<16x128xf32>
    %cst_43 = arith.constant dense<0.000000e+00> : vector<32x128xf32>
    %139 = tpu.matmul %136, %138, %cst_43 {dimension_numbers = #tpu.dot_dimension_numbers<[1], [0], [0], [1], [0, 0, 1, 1], [], []>} : vector<32x16xf32>, vector<16x128xf32>, vector<32x128xf32> -> vector<32x128xf32>
    %140 = arith.addf %125, %139 : vector<32x128xf32>
    %141 = vector.extract_strided_slice %3 {offsets = [1152, 0], sizes = [32, 16], strides = [1, 1]} : vector<3200x16xf32> to vector<32x16xf32>
    %142 = vector.extract_strided_slice %3 {offsets = [1184, 0], sizes = [32, 16], strides = [1, 1]} : vector<3200x16xf32> to vector<32x16xf32>
    %143 = arith.maximumf %141, %142 : vector<32x16xf32>
    %144 = vector.extract_strided_slice %3 {offsets = [1216, 0], sizes = [32, 16], strides = [1, 1]} : vector<3200x16xf32> to vector<32x16xf32>
    %145 = vector.extract_strided_slice %3 {offsets = [1248, 0], sizes = [32, 16], strides = [1, 1]} : vector<3200x16xf32> to vector<32x16xf32>
    %146 = arith.maximumf %144, %145 : vector<32x16xf32>
    %147 = arith.maximumf %143, %146 : vector<32x16xf32>
    %148 = vector.broadcast %4 : vector<1x16xf32> to vector<32x16xf32>
    %149 = arith.addf %147, %148 : vector<32x16xf32>
    %cst_44 = arith.constant 0.000000e+00 : f32
    %150 = vector.broadcast %cst_44 : f32 to vector<32x16xf32>
    %151 = arith.maximumf %149, %150 : vector<32x16xf32>
    %c9 = arith.constant 9 : index
    %c0_45 = arith.constant 0 : index
    %c0_46 = arith.constant 0 : index
    %152 = vector.load %arg4[%c9, %c0_45, %c0_46] : memref<25x16x128xf32, #tpu.memory_space<vmem>>, vector<1x16x128xf32>
    %153 = vector.shape_cast %152 : vector<1x16x128xf32> to vector<16x128xf32>
    %cst_47 = arith.constant dense<0.000000e+00> : vector<32x128xf32>
    %154 = tpu.matmul %151, %153, %cst_47 {dimension_numbers = #tpu.dot_dimension_numbers<[1], [0], [0], [1], [0, 0, 1, 1], [], []>} : vector<32x16xf32>, vector<16x128xf32>, vector<32x128xf32> -> vector<32x128xf32>
    %155 = arith.addf %140, %154 : vector<32x128xf32>
    %156 = vector.extract_strided_slice %3 {offsets = [1280, 0], sizes = [32, 16], strides = [1, 1]} : vector<3200x16xf32> to vector<32x16xf32>
    %157 = vector.extract_strided_slice %3 {offsets = [1312, 0], sizes = [32, 16], strides = [1, 1]} : vector<3200x16xf32> to vector<32x16xf32>
    %158 = arith.maximumf %156, %157 : vector<32x16xf32>
    %159 = vector.extract_strided_slice %3 {offsets = [1344, 0], sizes = [32, 16], strides = [1, 1]} : vector<3200x16xf32> to vector<32x16xf32>
    %160 = vector.extract_strided_slice %3 {offsets = [1376, 0], sizes = [32, 16], strides = [1, 1]} : vector<3200x16xf32> to vector<32x16xf32>
    %161 = arith.maximumf %159, %160 : vector<32x16xf32>
    %162 = arith.maximumf %158, %161 : vector<32x16xf32>
    %163 = vector.broadcast %4 : vector<1x16xf32> to vector<32x16xf32>
    %164 = arith.addf %162, %163 : vector<32x16xf32>
    %cst_48 = arith.constant 0.000000e+00 : f32
    %165 = vector.broadcast %cst_48 : f32 to vector<32x16xf32>
    %166 = arith.maximumf %164, %165 : vector<32x16xf32>
    %c10 = arith.constant 10 : index
    %c0_49 = arith.constant 0 : index
    %c0_50 = arith.constant 0 : index
    %167 = vector.load %arg4[%c10, %c0_49, %c0_50] : memref<25x16x128xf32, #tpu.memory_space<vmem>>, vector<1x16x128xf32>
    %168 = vector.shape_cast %167 : vector<1x16x128xf32> to vector<16x128xf32>
    %cst_51 = arith.constant dense<0.000000e+00> : vector<32x128xf32>
    %169 = tpu.matmul %166, %168, %cst_51 {dimension_numbers = #tpu.dot_dimension_numbers<[1], [0], [0], [1], [0, 0, 1, 1], [], []>} : vector<32x16xf32>, vector<16x128xf32>, vector<32x128xf32> -> vector<32x128xf32>
    %170 = arith.addf %155, %169 : vector<32x128xf32>
    %171 = vector.extract_strided_slice %3 {offsets = [1408, 0], sizes = [32, 16], strides = [1, 1]} : vector<3200x16xf32> to vector<32x16xf32>
    %172 = vector.extract_strided_slice %3 {offsets = [1440, 0], sizes = [32, 16], strides = [1, 1]} : vector<3200x16xf32> to vector<32x16xf32>
    %173 = arith.maximumf %171, %172 : vector<32x16xf32>
    %174 = vector.extract_strided_slice %3 {offsets = [1472, 0], sizes = [32, 16], strides = [1, 1]} : vector<3200x16xf32> to vector<32x16xf32>
    %175 = vector.extract_strided_slice %3 {offsets = [1504, 0], sizes = [32, 16], strides = [1, 1]} : vector<3200x16xf32> to vector<32x16xf32>
    %176 = arith.maximumf %174, %175 : vector<32x16xf32>
    %177 = arith.maximumf %173, %176 : vector<32x16xf32>
    %178 = vector.broadcast %4 : vector<1x16xf32> to vector<32x16xf32>
    %179 = arith.addf %177, %178 : vector<32x16xf32>
    %cst_52 = arith.constant 0.000000e+00 : f32
    %180 = vector.broadcast %cst_52 : f32 to vector<32x16xf32>
    %181 = arith.maximumf %179, %180 : vector<32x16xf32>
    %c11 = arith.constant 11 : index
    %c0_53 = arith.constant 0 : index
    %c0_54 = arith.constant 0 : index
    %182 = vector.load %arg4[%c11, %c0_53, %c0_54] : memref<25x16x128xf32, #tpu.memory_space<vmem>>, vector<1x16x128xf32>
    %183 = vector.shape_cast %182 : vector<1x16x128xf32> to vector<16x128xf32>
    %cst_55 = arith.constant dense<0.000000e+00> : vector<32x128xf32>
    %184 = tpu.matmul %181, %183, %cst_55 {dimension_numbers = #tpu.dot_dimension_numbers<[1], [0], [0], [1], [0, 0, 1, 1], [], []>} : vector<32x16xf32>, vector<16x128xf32>, vector<32x128xf32> -> vector<32x128xf32>
    %185 = arith.addf %170, %184 : vector<32x128xf32>
    %186 = vector.extract_strided_slice %3 {offsets = [1536, 0], sizes = [32, 16], strides = [1, 1]} : vector<3200x16xf32> to vector<32x16xf32>
    %187 = vector.extract_strided_slice %3 {offsets = [1568, 0], sizes = [32, 16], strides = [1, 1]} : vector<3200x16xf32> to vector<32x16xf32>
    %188 = arith.maximumf %186, %187 : vector<32x16xf32>
    %189 = vector.extract_strided_slice %3 {offsets = [1600, 0], sizes = [32, 16], strides = [1, 1]} : vector<3200x16xf32> to vector<32x16xf32>
    %190 = vector.extract_strided_slice %3 {offsets = [1632, 0], sizes = [32, 16], strides = [1, 1]} : vector<3200x16xf32> to vector<32x16xf32>
    %191 = arith.maximumf %189, %190 : vector<32x16xf32>
    %192 = arith.maximumf %188, %191 : vector<32x16xf32>
    %193 = vector.broadcast %4 : vector<1x16xf32> to vector<32x16xf32>
    %194 = arith.addf %192, %193 : vector<32x16xf32>
    %cst_56 = arith.constant 0.000000e+00 : f32
    %195 = vector.broadcast %cst_56 : f32 to vector<32x16xf32>
    %196 = arith.maximumf %194, %195 : vector<32x16xf32>
    %c12 = arith.constant 12 : index
    %c0_57 = arith.constant 0 : index
    %c0_58 = arith.constant 0 : index
    %197 = vector.load %arg4[%c12, %c0_57, %c0_58] : memref<25x16x128xf32, #tpu.memory_space<vmem>>, vector<1x16x128xf32>
    %198 = vector.shape_cast %197 : vector<1x16x128xf32> to vector<16x128xf32>
    %cst_59 = arith.constant dense<0.000000e+00> : vector<32x128xf32>
    %199 = tpu.matmul %196, %198, %cst_59 {dimension_numbers = #tpu.dot_dimension_numbers<[1], [0], [0], [1], [0, 0, 1, 1], [], []>} : vector<32x16xf32>, vector<16x128xf32>, vector<32x128xf32> -> vector<32x128xf32>
    %200 = arith.addf %185, %199 : vector<32x128xf32>
    %201 = vector.extract_strided_slice %3 {offsets = [1664, 0], sizes = [32, 16], strides = [1, 1]} : vector<3200x16xf32> to vector<32x16xf32>
    %202 = vector.extract_strided_slice %3 {offsets = [1696, 0], sizes = [32, 16], strides = [1, 1]} : vector<3200x16xf32> to vector<32x16xf32>
    %203 = arith.maximumf %201, %202 : vector<32x16xf32>
    %204 = vector.extract_strided_slice %3 {offsets = [1728, 0], sizes = [32, 16], strides = [1, 1]} : vector<3200x16xf32> to vector<32x16xf32>
    %205 = vector.extract_strided_slice %3 {offsets = [1760, 0], sizes = [32, 16], strides = [1, 1]} : vector<3200x16xf32> to vector<32x16xf32>
    %206 = arith.maximumf %204, %205 : vector<32x16xf32>
    %207 = arith.maximumf %203, %206 : vector<32x16xf32>
    %208 = vector.broadcast %4 : vector<1x16xf32> to vector<32x16xf32>
    %209 = arith.addf %207, %208 : vector<32x16xf32>
    %cst_60 = arith.constant 0.000000e+00 : f32
    %210 = vector.broadcast %cst_60 : f32 to vector<32x16xf32>
    %211 = arith.maximumf %209, %210 : vector<32x16xf32>
    %c13 = arith.constant 13 : index
    %c0_61 = arith.constant 0 : index
    %c0_62 = arith.constant 0 : index
    %212 = vector.load %arg4[%c13, %c0_61, %c0_62] : memref<25x16x128xf32, #tpu.memory_space<vmem>>, vector<1x16x128xf32>
    %213 = vector.shape_cast %212 : vector<1x16x128xf32> to vector<16x128xf32>
    %cst_63 = arith.constant dense<0.000000e+00> : vector<32x128xf32>
    %214 = tpu.matmul %211, %213, %cst_63 {dimension_numbers = #tpu.dot_dimension_numbers<[1], [0], [0], [1], [0, 0, 1, 1], [], []>} : vector<32x16xf32>, vector<16x128xf32>, vector<32x128xf32> -> vector<32x128xf32>
    %215 = arith.addf %200, %214 : vector<32x128xf32>
    %216 = vector.extract_strided_slice %3 {offsets = [1792, 0], sizes = [32, 16], strides = [1, 1]} : vector<3200x16xf32> to vector<32x16xf32>
    %217 = vector.extract_strided_slice %3 {offsets = [1824, 0], sizes = [32, 16], strides = [1, 1]} : vector<3200x16xf32> to vector<32x16xf32>
    %218 = arith.maximumf %216, %217 : vector<32x16xf32>
    %219 = vector.extract_strided_slice %3 {offsets = [1856, 0], sizes = [32, 16], strides = [1, 1]} : vector<3200x16xf32> to vector<32x16xf32>
    %220 = vector.extract_strided_slice %3 {offsets = [1888, 0], sizes = [32, 16], strides = [1, 1]} : vector<3200x16xf32> to vector<32x16xf32>
    %221 = arith.maximumf %219, %220 : vector<32x16xf32>
    %222 = arith.maximumf %218, %221 : vector<32x16xf32>
    %223 = vector.broadcast %4 : vector<1x16xf32> to vector<32x16xf32>
    %224 = arith.addf %222, %223 : vector<32x16xf32>
    %cst_64 = arith.constant 0.000000e+00 : f32
    %225 = vector.broadcast %cst_64 : f32 to vector<32x16xf32>
    %226 = arith.maximumf %224, %225 : vector<32x16xf32>
    %c14 = arith.constant 14 : index
    %c0_65 = arith.constant 0 : index
    %c0_66 = arith.constant 0 : index
    %227 = vector.load %arg4[%c14, %c0_65, %c0_66] : memref<25x16x128xf32, #tpu.memory_space<vmem>>, vector<1x16x128xf32>
    %228 = vector.shape_cast %227 : vector<1x16x128xf32> to vector<16x128xf32>
    %cst_67 = arith.constant dense<0.000000e+00> : vector<32x128xf32>
    %229 = tpu.matmul %226, %228, %cst_67 {dimension_numbers = #tpu.dot_dimension_numbers<[1], [0], [0], [1], [0, 0, 1, 1], [], []>} : vector<32x16xf32>, vector<16x128xf32>, vector<32x128xf32> -> vector<32x128xf32>
    %230 = arith.addf %215, %229 : vector<32x128xf32>
    %231 = vector.extract_strided_slice %3 {offsets = [1920, 0], sizes = [32, 16], strides = [1, 1]} : vector<3200x16xf32> to vector<32x16xf32>
    %232 = vector.extract_strided_slice %3 {offsets = [1952, 0], sizes = [32, 16], strides = [1, 1]} : vector<3200x16xf32> to vector<32x16xf32>
    %233 = arith.maximumf %231, %232 : vector<32x16xf32>
    %234 = vector.extract_strided_slice %3 {offsets = [1984, 0], sizes = [32, 16], strides = [1, 1]} : vector<3200x16xf32> to vector<32x16xf32>
    %235 = vector.extract_strided_slice %3 {offsets = [2016, 0], sizes = [32, 16], strides = [1, 1]} : vector<3200x16xf32> to vector<32x16xf32>
    %236 = arith.maximumf %234, %235 : vector<32x16xf32>
    %237 = arith.maximumf %233, %236 : vector<32x16xf32>
    %238 = vector.broadcast %4 : vector<1x16xf32> to vector<32x16xf32>
    %239 = arith.addf %237, %238 : vector<32x16xf32>
    %cst_68 = arith.constant 0.000000e+00 : f32
    %240 = vector.broadcast %cst_68 : f32 to vector<32x16xf32>
    %241 = arith.maximumf %239, %240 : vector<32x16xf32>
    %c15 = arith.constant 15 : index
    %c0_69 = arith.constant 0 : index
    %c0_70 = arith.constant 0 : index
    %242 = vector.load %arg4[%c15, %c0_69, %c0_70] : memref<25x16x128xf32, #tpu.memory_space<vmem>>, vector<1x16x128xf32>
    %243 = vector.shape_cast %242 : vector<1x16x128xf32> to vector<16x128xf32>
    %cst_71 = arith.constant dense<0.000000e+00> : vector<32x128xf32>
    %244 = tpu.matmul %241, %243, %cst_71 {dimension_numbers = #tpu.dot_dimension_numbers<[1], [0], [0], [1], [0, 0, 1, 1], [], []>} : vector<32x16xf32>, vector<16x128xf32>, vector<32x128xf32> -> vector<32x128xf32>
    %245 = arith.addf %230, %244 : vector<32x128xf32>
    %246 = vector.extract_strided_slice %3 {offsets = [2048, 0], sizes = [32, 16], strides = [1, 1]} : vector<3200x16xf32> to vector<32x16xf32>
    %247 = vector.extract_strided_slice %3 {offsets = [2080, 0], sizes = [32, 16], strides = [1, 1]} : vector<3200x16xf32> to vector<32x16xf32>
    %248 = arith.maximumf %246, %247 : vector<32x16xf32>
    %249 = vector.extract_strided_slice %3 {offsets = [2112, 0], sizes = [32, 16], strides = [1, 1]} : vector<3200x16xf32> to vector<32x16xf32>
    %250 = vector.extract_strided_slice %3 {offsets = [2144, 0], sizes = [32, 16], strides = [1, 1]} : vector<3200x16xf32> to vector<32x16xf32>
    %251 = arith.maximumf %249, %250 : vector<32x16xf32>
    %252 = arith.maximumf %248, %251 : vector<32x16xf32>
    %253 = vector.broadcast %4 : vector<1x16xf32> to vector<32x16xf32>
    %254 = arith.addf %252, %253 : vector<32x16xf32>
    %cst_72 = arith.constant 0.000000e+00 : f32
    %255 = vector.broadcast %cst_72 : f32 to vector<32x16xf32>
    %256 = arith.maximumf %254, %255 : vector<32x16xf32>
    %c16 = arith.constant 16 : index
    %c0_73 = arith.constant 0 : index
    %c0_74 = arith.constant 0 : index
    %257 = vector.load %arg4[%c16, %c0_73, %c0_74] : memref<25x16x128xf32, #tpu.memory_space<vmem>>, vector<1x16x128xf32>
    %258 = vector.shape_cast %257 : vector<1x16x128xf32> to vector<16x128xf32>
    %cst_75 = arith.constant dense<0.000000e+00> : vector<32x128xf32>
    %259 = tpu.matmul %256, %258, %cst_75 {dimension_numbers = #tpu.dot_dimension_numbers<[1], [0], [0], [1], [0, 0, 1, 1], [], []>} : vector<32x16xf32>, vector<16x128xf32>, vector<32x128xf32> -> vector<32x128xf32>
    %260 = arith.addf %245, %259 : vector<32x128xf32>
    %261 = vector.extract_strided_slice %3 {offsets = [2176, 0], sizes = [32, 16], strides = [1, 1]} : vector<3200x16xf32> to vector<32x16xf32>
    %262 = vector.extract_strided_slice %3 {offsets = [2208, 0], sizes = [32, 16], strides = [1, 1]} : vector<3200x16xf32> to vector<32x16xf32>
    %263 = arith.maximumf %261, %262 : vector<32x16xf32>
    %264 = vector.extract_strided_slice %3 {offsets = [2240, 0], sizes = [32, 16], strides = [1, 1]} : vector<3200x16xf32> to vector<32x16xf32>
    %265 = vector.extract_strided_slice %3 {offsets = [2272, 0], sizes = [32, 16], strides = [1, 1]} : vector<3200x16xf32> to vector<32x16xf32>
    %266 = arith.maximumf %264, %265 : vector<32x16xf32>
    %267 = arith.maximumf %263, %266 : vector<32x16xf32>
    %268 = vector.broadcast %4 : vector<1x16xf32> to vector<32x16xf32>
    %269 = arith.addf %267, %268 : vector<32x16xf32>
    %cst_76 = arith.constant 0.000000e+00 : f32
    %270 = vector.broadcast %cst_76 : f32 to vector<32x16xf32>
    %271 = arith.maximumf %269, %270 : vector<32x16xf32>
    %c17 = arith.constant 17 : index
    %c0_77 = arith.constant 0 : index
    %c0_78 = arith.constant 0 : index
    %272 = vector.load %arg4[%c17, %c0_77, %c0_78] : memref<25x16x128xf32, #tpu.memory_space<vmem>>, vector<1x16x128xf32>
    %273 = vector.shape_cast %272 : vector<1x16x128xf32> to vector<16x128xf32>
    %cst_79 = arith.constant dense<0.000000e+00> : vector<32x128xf32>
    %274 = tpu.matmul %271, %273, %cst_79 {dimension_numbers = #tpu.dot_dimension_numbers<[1], [0], [0], [1], [0, 0, 1, 1], [], []>} : vector<32x16xf32>, vector<16x128xf32>, vector<32x128xf32> -> vector<32x128xf32>
    %275 = arith.addf %260, %274 : vector<32x128xf32>
    %276 = vector.extract_strided_slice %3 {offsets = [2304, 0], sizes = [32, 16], strides = [1, 1]} : vector<3200x16xf32> to vector<32x16xf32>
    %277 = vector.extract_strided_slice %3 {offsets = [2336, 0], sizes = [32, 16], strides = [1, 1]} : vector<3200x16xf32> to vector<32x16xf32>
    %278 = arith.maximumf %276, %277 : vector<32x16xf32>
    %279 = vector.extract_strided_slice %3 {offsets = [2368, 0], sizes = [32, 16], strides = [1, 1]} : vector<3200x16xf32> to vector<32x16xf32>
    %280 = vector.extract_strided_slice %3 {offsets = [2400, 0], sizes = [32, 16], strides = [1, 1]} : vector<3200x16xf32> to vector<32x16xf32>
    %281 = arith.maximumf %279, %280 : vector<32x16xf32>
    %282 = arith.maximumf %278, %281 : vector<32x16xf32>
    %283 = vector.broadcast %4 : vector<1x16xf32> to vector<32x16xf32>
    %284 = arith.addf %282, %283 : vector<32x16xf32>
    %cst_80 = arith.constant 0.000000e+00 : f32
    %285 = vector.broadcast %cst_80 : f32 to vector<32x16xf32>
    %286 = arith.maximumf %284, %285 : vector<32x16xf32>
    %c18 = arith.constant 18 : index
    %c0_81 = arith.constant 0 : index
    %c0_82 = arith.constant 0 : index
    %287 = vector.load %arg4[%c18, %c0_81, %c0_82] : memref<25x16x128xf32, #tpu.memory_space<vmem>>, vector<1x16x128xf32>
    %288 = vector.shape_cast %287 : vector<1x16x128xf32> to vector<16x128xf32>
    %cst_83 = arith.constant dense<0.000000e+00> : vector<32x128xf32>
    %289 = tpu.matmul %286, %288, %cst_83 {dimension_numbers = #tpu.dot_dimension_numbers<[1], [0], [0], [1], [0, 0, 1, 1], [], []>} : vector<32x16xf32>, vector<16x128xf32>, vector<32x128xf32> -> vector<32x128xf32>
    %290 = arith.addf %275, %289 : vector<32x128xf32>
    %291 = vector.extract_strided_slice %3 {offsets = [2432, 0], sizes = [32, 16], strides = [1, 1]} : vector<3200x16xf32> to vector<32x16xf32>
    %292 = vector.extract_strided_slice %3 {offsets = [2464, 0], sizes = [32, 16], strides = [1, 1]} : vector<3200x16xf32> to vector<32x16xf32>
    %293 = arith.maximumf %291, %292 : vector<32x16xf32>
    %294 = vector.extract_strided_slice %3 {offsets = [2496, 0], sizes = [32, 16], strides = [1, 1]} : vector<3200x16xf32> to vector<32x16xf32>
    %295 = vector.extract_strided_slice %3 {offsets = [2528, 0], sizes = [32, 16], strides = [1, 1]} : vector<3200x16xf32> to vector<32x16xf32>
    %296 = arith.maximumf %294, %295 : vector<32x16xf32>
    %297 = arith.maximumf %293, %296 : vector<32x16xf32>
    %298 = vector.broadcast %4 : vector<1x16xf32> to vector<32x16xf32>
    %299 = arith.addf %297, %298 : vector<32x16xf32>
    %cst_84 = arith.constant 0.000000e+00 : f32
    %300 = vector.broadcast %cst_84 : f32 to vector<32x16xf32>
    %301 = arith.maximumf %299, %300 : vector<32x16xf32>
    %c19 = arith.constant 19 : index
    %c0_85 = arith.constant 0 : index
    %c0_86 = arith.constant 0 : index
    %302 = vector.load %arg4[%c19, %c0_85, %c0_86] : memref<25x16x128xf32, #tpu.memory_space<vmem>>, vector<1x16x128xf32>
    %303 = vector.shape_cast %302 : vector<1x16x128xf32> to vector<16x128xf32>
    %cst_87 = arith.constant dense<0.000000e+00> : vector<32x128xf32>
    %304 = tpu.matmul %301, %303, %cst_87 {dimension_numbers = #tpu.dot_dimension_numbers<[1], [0], [0], [1], [0, 0, 1, 1], [], []>} : vector<32x16xf32>, vector<16x128xf32>, vector<32x128xf32> -> vector<32x128xf32>
    %305 = arith.addf %290, %304 : vector<32x128xf32>
    %306 = vector.extract_strided_slice %3 {offsets = [2560, 0], sizes = [32, 16], strides = [1, 1]} : vector<3200x16xf32> to vector<32x16xf32>
    %307 = vector.extract_strided_slice %3 {offsets = [2592, 0], sizes = [32, 16], strides = [1, 1]} : vector<3200x16xf32> to vector<32x16xf32>
    %308 = arith.maximumf %306, %307 : vector<32x16xf32>
    %309 = vector.extract_strided_slice %3 {offsets = [2624, 0], sizes = [32, 16], strides = [1, 1]} : vector<3200x16xf32> to vector<32x16xf32>
    %310 = vector.extract_strided_slice %3 {offsets = [2656, 0], sizes = [32, 16], strides = [1, 1]} : vector<3200x16xf32> to vector<32x16xf32>
    %311 = arith.maximumf %309, %310 : vector<32x16xf32>
    %312 = arith.maximumf %308, %311 : vector<32x16xf32>
    %313 = vector.broadcast %4 : vector<1x16xf32> to vector<32x16xf32>
    %314 = arith.addf %312, %313 : vector<32x16xf32>
    %cst_88 = arith.constant 0.000000e+00 : f32
    %315 = vector.broadcast %cst_88 : f32 to vector<32x16xf32>
    %316 = arith.maximumf %314, %315 : vector<32x16xf32>
    %c20 = arith.constant 20 : index
    %c0_89 = arith.constant 0 : index
    %c0_90 = arith.constant 0 : index
    %317 = vector.load %arg4[%c20, %c0_89, %c0_90] : memref<25x16x128xf32, #tpu.memory_space<vmem>>, vector<1x16x128xf32>
    %318 = vector.shape_cast %317 : vector<1x16x128xf32> to vector<16x128xf32>
    %cst_91 = arith.constant dense<0.000000e+00> : vector<32x128xf32>
    %319 = tpu.matmul %316, %318, %cst_91 {dimension_numbers = #tpu.dot_dimension_numbers<[1], [0], [0], [1], [0, 0, 1, 1], [], []>} : vector<32x16xf32>, vector<16x128xf32>, vector<32x128xf32> -> vector<32x128xf32>
    %320 = arith.addf %305, %319 : vector<32x128xf32>
    %321 = vector.extract_strided_slice %3 {offsets = [2688, 0], sizes = [32, 16], strides = [1, 1]} : vector<3200x16xf32> to vector<32x16xf32>
    %322 = vector.extract_strided_slice %3 {offsets = [2720, 0], sizes = [32, 16], strides = [1, 1]} : vector<3200x16xf32> to vector<32x16xf32>
    %323 = arith.maximumf %321, %322 : vector<32x16xf32>
    %324 = vector.extract_strided_slice %3 {offsets = [2752, 0], sizes = [32, 16], strides = [1, 1]} : vector<3200x16xf32> to vector<32x16xf32>
    %325 = vector.extract_strided_slice %3 {offsets = [2784, 0], sizes = [32, 16], strides = [1, 1]} : vector<3200x16xf32> to vector<32x16xf32>
    %326 = arith.maximumf %324, %325 : vector<32x16xf32>
    %327 = arith.maximumf %323, %326 : vector<32x16xf32>
    %328 = vector.broadcast %4 : vector<1x16xf32> to vector<32x16xf32>
    %329 = arith.addf %327, %328 : vector<32x16xf32>
    %cst_92 = arith.constant 0.000000e+00 : f32
    %330 = vector.broadcast %cst_92 : f32 to vector<32x16xf32>
    %331 = arith.maximumf %329, %330 : vector<32x16xf32>
    %c21 = arith.constant 21 : index
    %c0_93 = arith.constant 0 : index
    %c0_94 = arith.constant 0 : index
    %332 = vector.load %arg4[%c21, %c0_93, %c0_94] : memref<25x16x128xf32, #tpu.memory_space<vmem>>, vector<1x16x128xf32>
    %333 = vector.shape_cast %332 : vector<1x16x128xf32> to vector<16x128xf32>
    %cst_95 = arith.constant dense<0.000000e+00> : vector<32x128xf32>
    %334 = tpu.matmul %331, %333, %cst_95 {dimension_numbers = #tpu.dot_dimension_numbers<[1], [0], [0], [1], [0, 0, 1, 1], [], []>} : vector<32x16xf32>, vector<16x128xf32>, vector<32x128xf32> -> vector<32x128xf32>
    %335 = arith.addf %320, %334 : vector<32x128xf32>
    %336 = vector.extract_strided_slice %3 {offsets = [2816, 0], sizes = [32, 16], strides = [1, 1]} : vector<3200x16xf32> to vector<32x16xf32>
    %337 = vector.extract_strided_slice %3 {offsets = [2848, 0], sizes = [32, 16], strides = [1, 1]} : vector<3200x16xf32> to vector<32x16xf32>
    %338 = arith.maximumf %336, %337 : vector<32x16xf32>
    %339 = vector.extract_strided_slice %3 {offsets = [2880, 0], sizes = [32, 16], strides = [1, 1]} : vector<3200x16xf32> to vector<32x16xf32>
    %340 = vector.extract_strided_slice %3 {offsets = [2912, 0], sizes = [32, 16], strides = [1, 1]} : vector<3200x16xf32> to vector<32x16xf32>
    %341 = arith.maximumf %339, %340 : vector<32x16xf32>
    %342 = arith.maximumf %338, %341 : vector<32x16xf32>
    %343 = vector.broadcast %4 : vector<1x16xf32> to vector<32x16xf32>
    %344 = arith.addf %342, %343 : vector<32x16xf32>
    %cst_96 = arith.constant 0.000000e+00 : f32
    %345 = vector.broadcast %cst_96 : f32 to vector<32x16xf32>
    %346 = arith.maximumf %344, %345 : vector<32x16xf32>
    %c22 = arith.constant 22 : index
    %c0_97 = arith.constant 0 : index
    %c0_98 = arith.constant 0 : index
    %347 = vector.load %arg4[%c22, %c0_97, %c0_98] : memref<25x16x128xf32, #tpu.memory_space<vmem>>, vector<1x16x128xf32>
    %348 = vector.shape_cast %347 : vector<1x16x128xf32> to vector<16x128xf32>
    %cst_99 = arith.constant dense<0.000000e+00> : vector<32x128xf32>
    %349 = tpu.matmul %346, %348, %cst_99 {dimension_numbers = #tpu.dot_dimension_numbers<[1], [0], [0], [1], [0, 0, 1, 1], [], []>} : vector<32x16xf32>, vector<16x128xf32>, vector<32x128xf32> -> vector<32x128xf32>
    %350 = arith.addf %335, %349 : vector<32x128xf32>
    %351 = vector.extract_strided_slice %3 {offsets = [2944, 0], sizes = [32, 16], strides = [1, 1]} : vector<3200x16xf32> to vector<32x16xf32>
    %352 = vector.extract_strided_slice %3 {offsets = [2976, 0], sizes = [32, 16], strides = [1, 1]} : vector<3200x16xf32> to vector<32x16xf32>
    %353 = arith.maximumf %351, %352 : vector<32x16xf32>
    %354 = vector.extract_strided_slice %3 {offsets = [3008, 0], sizes = [32, 16], strides = [1, 1]} : vector<3200x16xf32> to vector<32x16xf32>
    %355 = vector.extract_strided_slice %3 {offsets = [3040, 0], sizes = [32, 16], strides = [1, 1]} : vector<3200x16xf32> to vector<32x16xf32>
    %356 = arith.maximumf %354, %355 : vector<32x16xf32>
    %357 = arith.maximumf %353, %356 : vector<32x16xf32>
    %358 = vector.broadcast %4 : vector<1x16xf32> to vector<32x16xf32>
    %359 = arith.addf %357, %358 : vector<32x16xf32>
    %cst_100 = arith.constant 0.000000e+00 : f32
    %360 = vector.broadcast %cst_100 : f32 to vector<32x16xf32>
    %361 = arith.maximumf %359, %360 : vector<32x16xf32>
    %c23 = arith.constant 23 : index
    %c0_101 = arith.constant 0 : index
    %c0_102 = arith.constant 0 : index
    %362 = vector.load %arg4[%c23, %c0_101, %c0_102] : memref<25x16x128xf32, #tpu.memory_space<vmem>>, vector<1x16x128xf32>
    %363 = vector.shape_cast %362 : vector<1x16x128xf32> to vector<16x128xf32>
    %cst_103 = arith.constant dense<0.000000e+00> : vector<32x128xf32>
    %364 = tpu.matmul %361, %363, %cst_103 {dimension_numbers = #tpu.dot_dimension_numbers<[1], [0], [0], [1], [0, 0, 1, 1], [], []>} : vector<32x16xf32>, vector<16x128xf32>, vector<32x128xf32> -> vector<32x128xf32>
    %365 = arith.addf %350, %364 : vector<32x128xf32>
    %366 = vector.extract_strided_slice %3 {offsets = [3072, 0], sizes = [32, 16], strides = [1, 1]} : vector<3200x16xf32> to vector<32x16xf32>
    %367 = vector.extract_strided_slice %3 {offsets = [3104, 0], sizes = [32, 16], strides = [1, 1]} : vector<3200x16xf32> to vector<32x16xf32>
    %368 = arith.maximumf %366, %367 : vector<32x16xf32>
    %369 = vector.extract_strided_slice %3 {offsets = [3136, 0], sizes = [32, 16], strides = [1, 1]} : vector<3200x16xf32> to vector<32x16xf32>
    %370 = vector.extract_strided_slice %3 {offsets = [3168, 0], sizes = [32, 16], strides = [1, 1]} : vector<3200x16xf32> to vector<32x16xf32>
    %371 = arith.maximumf %369, %370 : vector<32x16xf32>
    %372 = arith.maximumf %368, %371 : vector<32x16xf32>
    %373 = vector.broadcast %4 : vector<1x16xf32> to vector<32x16xf32>
    %374 = arith.addf %372, %373 : vector<32x16xf32>
    %cst_104 = arith.constant 0.000000e+00 : f32
    %375 = vector.broadcast %cst_104 : f32 to vector<32x16xf32>
    %376 = arith.maximumf %374, %375 : vector<32x16xf32>
    %c24 = arith.constant 24 : index
    %c0_105 = arith.constant 0 : index
    %c0_106 = arith.constant 0 : index
    %377 = vector.load %arg4[%c24, %c0_105, %c0_106] : memref<25x16x128xf32, #tpu.memory_space<vmem>>, vector<1x16x128xf32>
    %378 = vector.shape_cast %377 : vector<1x16x128xf32> to vector<16x128xf32>
    %cst_107 = arith.constant dense<0.000000e+00> : vector<32x128xf32>
    %379 = tpu.matmul %376, %378, %cst_107 {dimension_numbers = #tpu.dot_dimension_numbers<[1], [0], [0], [1], [0, 0, 1, 1], [], []>} : vector<32x16xf32>, vector<16x128xf32>, vector<32x128xf32> -> vector<32x128xf32>
    %380 = arith.addf %365, %379 : vector<32x128xf32>
    %c0_108 = arith.constant 0 : index
    %c0_109 = arith.constant 0 : index
    %381 = vector.load %arg5[%c0_108, %c0_109] : memref<1x128xf32, #tpu.memory_space<vmem>>, vector<1x128xf32>
    %382 = vector.broadcast %381 : vector<1x128xf32> to vector<32x128xf32>
    %383 = arith.addf %380, %382 : vector<32x128xf32>
    %cst_110 = arith.constant 0.000000e+00 : f32
    %384 = vector.broadcast %cst_110 : f32 to vector<32x128xf32>
    %385 = arith.maximumf %383, %384 : vector<32x128xf32>
    %c0_111 = arith.constant 0 : index
    %c0_112 = arith.constant 0 : index
    %386 = vector.load %arg6[%c0_111, %c0_112] : memref<128x128xf32, #tpu.memory_space<vmem>>, vector<128x128xf32>
    %cst_113 = arith.constant dense<0.000000e+00> : vector<32x128xf32>
    %387 = tpu.matmul %385, %386, %cst_113 {dimension_numbers = #tpu.dot_dimension_numbers<[1], [0], [0], [1], [0, 0, 1, 1], [], []>} : vector<32x128xf32>, vector<128x128xf32>, vector<32x128xf32> -> vector<32x128xf32>
    %c0_114 = arith.constant 0 : index
    %c0_115 = arith.constant 0 : index
    %388 = vector.load %arg7[%c0_114, %c0_115] : memref<1x128xf32, #tpu.memory_space<vmem>>, vector<1x128xf32>
    %389 = vector.broadcast %388 : vector<1x128xf32> to vector<32x128xf32>
    %390 = arith.addf %387, %389 : vector<32x128xf32>
    %cst_116 = arith.constant 0.000000e+00 : f32
    %391 = vector.broadcast %cst_116 : f32 to vector<32x128xf32>
    %392 = arith.maximumf %390, %391 : vector<32x128xf32>
    %c0_117 = arith.constant 0 : index
    %c0_118 = arith.constant 0 : index
    %393 = vector.load %arg8[%c0_117, %c0_118] : memref<128x128xf32, #tpu.memory_space<vmem>>, vector<128x128xf32>
    %cst_119 = arith.constant dense<0.000000e+00> : vector<32x128xf32>
    %394 = tpu.matmul %392, %393, %cst_119 {dimension_numbers = #tpu.dot_dimension_numbers<[1], [0], [0], [1], [0, 0, 1, 1], [], []>} : vector<32x128xf32>, vector<128x128xf32>, vector<32x128xf32> -> vector<32x128xf32>
    %c0_120 = arith.constant 0 : index
    %c0_121 = arith.constant 0 : index
    %395 = vector.load %arg9[%c0_120, %c0_121] : memref<1x128xf32, #tpu.memory_space<vmem>>, vector<1x128xf32>
    %396 = vector.broadcast %395 : vector<1x128xf32> to vector<32x128xf32>
    %397 = arith.addf %394, %396 : vector<32x128xf32>
    %c0_122 = arith.constant 0 : index
    %c0_123 = arith.constant 0 : index
    %398 = vector.load %arg10[%c0_122, %c0_123] : memref<32x128xf32, #tpu.memory_space<vmem>>, vector<32x128xf32>
    tpu.vector_store %arg10[%c0_122, %c0_123], %397 {strides = array<i32>} : memref<32x128xf32, #tpu.memory_space<vmem>>, vector<32x128xf32>,
    return
  }
  func.func @transform_0(%arg0: i32) -> (i32, i32, i32) {
    %c0_i32 = arith.constant 0 : i32
    %c0_i32_0 = arith.constant 0 : i32
    %c0_i32_1 = arith.constant 0 : i32
    return %arg0, %c0_i32, %c0_i32_0 : i32, i32, i32
  }
  func.func @transform_1(%arg0: i32) -> (i32, i32) {
    %c0_i32 = arith.constant 0 : i32
    %c0_i32_0 = arith.constant 0 : i32
    %c0_i32_1 = arith.constant 0 : i32
    return %c0_i32, %c0_i32_0 : i32, i32
  }
  func.func @transform_2(%arg0: i32) -> (i32, i32) {
    %c0_i32 = arith.constant 0 : i32
    %c0_i32_0 = arith.constant 0 : i32
    %c0_i32_1 = arith.constant 0 : i32
    return %c0_i32, %c0_i32_0 : i32, i32
  }
  func.func @transform_3(%arg0: i32) -> (i32, i32, i32) {
    %c0_i32 = arith.constant 0 : i32
    %c0_i32_0 = arith.constant 0 : i32
    %c0_i32_1 = arith.constant 0 : i32
    %c0_i32_2 = arith.constant 0 : i32
    return %c0_i32, %c0_i32_0, %c0_i32_1 : i32, i32, i32
  }
  func.func @transform_4(%arg0: i32) -> (i32, i32) {
    %c0_i32 = arith.constant 0 : i32
    %c0_i32_0 = arith.constant 0 : i32
    %c0_i32_1 = arith.constant 0 : i32
    return %c0_i32, %c0_i32_0 : i32, i32
  }
  func.func @transform_5(%arg0: i32) -> (i32, i32) {
    %c0_i32 = arith.constant 0 : i32
    %c0_i32_0 = arith.constant 0 : i32
    %c0_i32_1 = arith.constant 0 : i32
    return %c0_i32, %c0_i32_0 : i32, i32
  }
  func.func @transform_6(%arg0: i32) -> (i32, i32) {
    %c0_i32 = arith.constant 0 : i32
    %c0_i32_0 = arith.constant 0 : i32
    %c0_i32_1 = arith.constant 0 : i32
    return %c0_i32, %c0_i32_0 : i32, i32
  }
  func.func @transform_7(%arg0: i32) -> (i32, i32) {
    %c0_i32 = arith.constant 0 : i32
    %c0_i32_0 = arith.constant 0 : i32
    %c0_i32_1 = arith.constant 0 : i32
    return %c0_i32, %c0_i32_0 : i32, i32
  }
  func.func @transform_8(%arg0: i32) -> (i32, i32) {
    %c0_i32 = arith.constant 0 : i32
    %c0_i32_0 = arith.constant 0 : i32
    %c0_i32_1 = arith.constant 0 : i32
    return %c0_i32, %c0_i32_0 : i32, i32
  }
  func.func @transform_9(%arg0: i32) -> (i32, i32) {
    %c0_i32 = arith.constant 0 : i32
    %c0_i32_0 = arith.constant 0 : i32
    return %arg0, %c0_i32 : i32, i32
  }
}

</mosaic_0001>

<bundles_post_ra>
// kernel: lenet5_forward.2
= control target key start
LH: loop header
LB: loop body
LE: loop exit
PB: predicated region body
PF: predicated region fallthrough
CT: control target
= control target key end

     0   :  { %vm563_vm0 = vcmask 1043456   ;;  %vm564_vm1 = vcmask 1044480   ;;  %v11145_v1 = vmov 0   ;;  %v8839_v2 = vmov 65535   ;;  %s11139_s0 = inlined_call_operand.vmem [shape: bf16[4,25,6272], index: 0, kind: input, shape index: {}]   ;;  %s11140_s1 = inlined_call_operand.vmem [shape: bf16[8,25], index: 1, kind: input, shape index: {}]   ;;  %s11141_s2 = inlined_call_operand.vmem [shape: f32[8,1], index: 2, kind: input, shape index: {}]   ;;  %s11142_s3 = inlined_call_operand.vmem [shape: bf16[8,6272], index: 3, kind: output, shape index: {}]  }
   0x1   :  { %v8251_v0 = vld [vmem:[%s11139_s0 + $0x18c] ss:$196 sps:$4 sm:$0x1f]   ;;  %746 = vmatprep.mubr.bf16.mxu0 %v11145_v1  ;;  %787 = vmatprep.mubr.bf16.mxu1 %v11145_v1  ;;  %v565_v3 = vsel %vm563_vm0, 4294967295, %v8839_v2  ;;  %v8257_v10 = vld [vmem:[%s11139_s0 + $0x4] ss:$196 sps:$4 sm:$0xff]  }
   0x2   :  { %8250 = vset.pattern.permute.xlu0 %v11145_v1  ;;  %v8868_v4 = vsel %vm564_vm1, %v565_v3, 0  ;;  %v8253_v5 = vld [vmem:[%s11139_s0 + $0x194] ss:$196 sps:$4 sm:$0x1f]   ;;  %v8259_v11 = vld [vmem:[%s11139_s0 + $0xc] ss:$196 sps:$4 sm:$0xff]  }
   0x3   :  { %v571_v6 = vand.u32 %v8251_v0, %v8868_v4  ;;  %v8255_v7 = vld [vmem:[%s11139_s0 + $0x188] ss:$196 sps:$4 sm:$0x1f]   ;;  %v8256_v8 = vld [vmem:[%s11139_s0 + $0x190] ss:$196 sps:$4 sm:$0x1f]   ;;  %v577_v9 = vand.u32 %v8253_v5, %v8868_v4 }
   0x4   :  { %v568_v12 = vand.u32 %v8255_v7, %v8868_v4  ;;  %v574_v13 = vand.u32 %v8256_v8, %v8868_v4  ;;  %v8261_v14 = vld [vmem:[%s11139_s0] ss:$196 sps:$4 sm:$0xff]   ;;  %v8262_v15 = vld [vmem:[%s11139_s0 + $0x8] ss:$196 sps:$4 sm:$0xff]   ;;  %vm559_vm2 = vcmask 203776   ;;  %vm8841_vm3 = vmmov 0  }
   0x5   :  { %726 = vmatprep.subr.bf16.mxu0 %v571_v6  ;;  %767 = vmatprep.subr.bf16.mxu1 %v577_v9  ;;  %v8263_v16 = vld [vmem:[%s11139_s0 + $0x198] ss:$196 sps:$4 sm:$0x1f]   ;;  %v8266_v18 = vld [vmem:[%s11139_s0 + $0x1a0] ss:$196 sps:$4 sm:$0x1f]  }
   0x6   :  { %727 = vmatpush1.bf16.msra.mxu0 %v568_v12  ;;  %768 = vmatpush1.bf16.msra.mxu1 %v574_v13  ;;  %v8265_v17 = vld [vmem:[%s11139_s0 + $0x19c] ss:$196 sps:$4 sm:$0x1f]   ;;  %v8268_v19 = vld [vmem:[%s11139_s0 + $0x1a4] ss:$196 sps:$4 sm:$0x1f]   ;;  %v580_v23 = vand.u32 %v8263_v16, %v8868_v4  ;;  %v586_v24 = vand.u32 %v8266_v18, %v8868_v4 }
   0x7   :  { %728 = vmatprep.subr.bf16.mxu0 %v8257_v10  ;;  %769 = vmatprep.subr.bf16.mxu1 %v8259_v11  ;;  %v583_v20 = vand.u32 %v8265_v17, %v8868_v4  ;;  %v589_v21 = vand.u32 %v8268_v19, %v8868_v4  ;;  %v8912_v22 = vld [vmem:[%s11140_s1] sm:$0xf]  ;;  %v8271_v25 = vld [vmem:[%s11139_s0 + $0x14] ss:$196 sps:$4 sm:$0xff]   ;;  %v8283_v35 = vld [vmem:[%s11139_s0 + $0x24] ss:$196 sps:$4 sm:$0xff]  }
   0x8   :  { %v8274_v26 = vld [vmem:[%s11139_s0 + $0x1c] ss:$196 sps:$4 sm:$0xff]   ;;  %v8269_v27 = vld [vmem:[%s11139_s0 + $0x10] ss:$196 sps:$4 sm:$0xff]   ;;  %v8284_v42 = vld [vmem:[%s11139_s0 + $0x28] ss:$196 sps:$4 sm:$0xff]  }
   0x9   :  { %v8277_v28 = vld [vmem:[%s11139_s0 + $0x1ac] ss:$196 sps:$4 sm:$0x1f]   ;;  %v8280_v30 = vld [vmem:[%s11139_s0 + $0x1b4] ss:$196 sps:$4 sm:$0x1f]  }
   0xa   :  { %729 = vmatpush1.bf16.msra.mxu0 %v8261_v14  ;;  %770 = vmatpush1.bf16.msra.mxu1 %v8262_v15  ;;  %v8275_v29 = vld [vmem:[%s11139_s0 + $0x1a8] ss:$196 sps:$4 sm:$0x1f]   ;;  %v8272_v31 = vld [vmem:[%s11139_s0 + $0x18] ss:$196 sps:$4 sm:$0xff]   ;;  %v595_v33 = vand.u32 %v8277_v28, %v8868_v4  ;;  %v601_v34 = vand.u32 %v8280_v30, %v8868_v4 }
   0xb   :  { %808 = vmatprep.subr.bf16.mxu0 %v583_v20  ;;  %849 = vmatprep.subr.bf16.mxu1 %v589_v21  ;;  %v8278_v32 = vld [vmem:[%s11139_s0 + $0x1b0] ss:$196 sps:$4 sm:$0x1f]   ;;  %v592_v37 = vand.u32 %v8275_v29, %v8868_v4  ;;  %v8289_v39 = vld [vmem:[%s11139_s0 + $0x1bc] ss:$196 sps:$4 sm:$0x1f]  }
   0xc   :  { %v8286_v36 = vld [vmem:[%s11139_s0 + $0x2c] ss:$196 sps:$4 sm:$0xff]   ;;  %v598_v38 = vand.u32 %v8278_v32, %v8868_v4  ;;  %v8292_v40 = vld [vmem:[%s11139_s0 + $0x1c4] ss:$196 sps:$4 sm:$0x1f]   ;;  %v607_v45 = vand.u32 %v8289_v39, %v8868_v4 }
   0xd   :  { %7458 = vmatmul.mubr.msk.bf16.vlgmr.msra.gmra.mxu0 %vm559_vm2, %v8912_v22  ;;  %7459 = vmatmul.mubr.msk.bf16.vlgmr.msra.gmra.mxu1 %vm559_vm2, %v8912_v22  ;;  %v8281_v41 = vld [vmem:[%s11139_s0 + $0x20] ss:$196 sps:$4 sm:$0xff]   ;;  %v8287_v43 = vld [vmem:[%s11139_s0 + $0x1b8] ss:$196 sps:$4 sm:$0x1f]   ;;  %v613_v46 = vand.u32 %v8292_v40, %v8868_v4 }
   0xe   :  { %809 = vmatpush1.bf16.msra.mxu0 %v580_v23  ;;  %850 = vmatpush1.bf16.msra.mxu1 %v586_v24  ;;  %v8290_v44 = vld [vmem:[%s11139_s0 + $0x1c0] ss:$196 sps:$4 sm:$0x1f]   ;;  %v8295_v47 = vld [vmem:[%s11139_s0 + $0x34] ss:$196 sps:$4 sm:$0xff]   ;;  %v604_v48 = vand.u32 %v8287_v43, %v8868_v4 }
   0xf   :  { %810 = vmatprep.subr.bf16.mxu0 %v8271_v25  ;;  %851 = vmatprep.subr.bf16.mxu1 %v8274_v26  ;;  %v610_v49 = vand.u32 %v8290_v44, %v8868_v4  ;;  %v8301_v50 = vld [vmem:[%s11139_s0 + $0x1cc] ss:$196 sps:$4 sm:$0x1f]   ;;  %v8298_v51 = vld [vmem:[%s11139_s0 + $0x3c] ss:$196 sps:$4 sm:$0xff]  }
  0x10   :  { %828 = vmatprep.mubr.bf16.mxu0 %v11145_v1  ;;  %869 = vmatprep.mubr.bf16.mxu1 %v11145_v1  ;;  %v8304_v52 = vld [vmem:[%s11139_s0 + $0x1d4] ss:$196 sps:$4 sm:$0x1f]   ;;  %v8299_v55 = vld [vmem:[%s11139_s0 + $0x1c8] ss:$196 sps:$4 sm:$0x1f]   ;;  %v619_v57 = vand.u32 %v8301_v50, %v8868_v4 }
  0x11   :  { %v8293_v53 = vld [vmem:[%s11139_s0 + $0x30] ss:$196 sps:$4 sm:$0xff]   ;;  %v8296_v54 = vld [vmem:[%s11139_s0 + $0x38] ss:$196 sps:$4 sm:$0xff]   ;;  %v625_v58 = vand.u32 %v8304_v52, %v8868_v4  ;;  %v8307_v59 = vld [vmem:[%s11139_s0 + $0x44] ss:$196 sps:$4 sm:$0xff]   ;;  %v616_v60 = vand.u32 %v8299_v55, %v8868_v4 }
  0x12   :  { %811 = vmatpush1.bf16.msra.mxu0 %v8269_v27  ;;  %852 = vmatpush1.bf16.msra.mxu1 %v8272_v31  ;;  %v8302_v56 = vld [vmem:[%s11139_s0 + $0x1d0] ss:$196 sps:$4 sm:$0x1f]   ;;  %v8313_v63 = vld [vmem:[%s11139_s0 + $0x1dc] ss:$196 sps:$4 sm:$0x1f]  }
  0x13   :  { %890 = vmatprep.subr.bf16.mxu0 %v595_v33  ;;  %931 = vmatprep.subr.bf16.mxu1 %v601_v34  ;;  %v622_v61 = vand.u32 %v8302_v56, %v8868_v4  ;;  %v8310_v62 = vld [vmem:[%s11139_s0 + $0x4c] ss:$196 sps:$4 sm:$0xff]   ;;  %v8316_v0 = vld [vmem:[%s11139_s0 + $0x1e4] ss:$196 sps:$4 sm:$0x1f]   ;;  %v631_v7 = vand.u32 %v8313_v63, %v8868_v4 }
  0x14   :  { %v8305_v2 = vld [vmem:[%s11139_s0 + $0x40] ss:$196 sps:$4 sm:$0xff]   ;;  %v8311_v3 = vld [vmem:[%s11139_s0 + $0x1d8] ss:$196 sps:$4 sm:$0x1f]   ;;  %v637_v8 = vand.u32 %v8316_v0, %v8868_v4 }
  0x15   :  { %7460 = vmatmul.mubr.msk.bf16.vlgmr.msra.gmra.mxu0 %vm559_vm2, %v8912_v22  ;;  %7461 = vmatmul.mubr.msk.bf16.vlgmr.msra.gmra.mxu1 %vm559_vm2, %v8912_v22  ;;  %v8308_v5 = vld [vmem:[%s11139_s0 + $0x48] ss:$196 sps:$4 sm:$0xff]   ;;  %v8314_v6 = vld [vmem:[%s11139_s0 + $0x1e0] ss:$196 sps:$4 sm:$0x1f]   ;;  %v628_v11 = vand.u32 %v8311_v3, %v8868_v4 }
  0x16   :  { %891 = vmatpush1.bf16.msra.mxu0 %v592_v37  ;;  %932 = vmatpush1.bf16.msra.mxu1 %v598_v38  ;;  %v8319_v9 = vld [vmem:[%s11139_s0 + $0x54] ss:$196 sps:$4 sm:$0xff]   ;;  %v8322_v10 = vld [vmem:[%s11139_s0 + $0x5c] ss:$196 sps:$4 sm:$0xff]   ;;  %v634_v12 = vand.u32 %v8314_v6, %v8868_v4  ;;  %v8331_v21 = vld [vmem:[%s11139_s0 + $0x64] ss:$196 sps:$4 sm:$0xff]  }
  0x17   :  { %892 = vmatprep.subr.bf16.mxu0 %v8283_v35  ;;  %933 = vmatprep.subr.bf16.mxu1 %v8286_v36  ;;  %v8325_v13 = vld [vmem:[%s11139_s0 + $0x1ec] ss:$196 sps:$4 sm:$0x1f]   ;;  %v8328_v14 = vld [vmem:[%s11139_s0 + $0x1f4] ss:$196 sps:$4 sm:$0x1f]  }
  0x18   :  { %910 = vmatprep.mubr.bf16.mxu0 %v11145_v1  ;;  %951 = vmatprep.mubr.bf16.mxu1 %v11145_v1  ;;  %v8317_v15 = vld [vmem:[%s11139_s0 + $0x50] ss:$196 sps:$4 sm:$0xff]   ;;  %v8320_v16 = vld [vmem:[%s11139_s0 + $0x58] ss:$196 sps:$4 sm:$0xff]   ;;  %v643_v19 = vand.u32 %v8325_v13, %v8868_v4  ;;  %v649_v20 = vand.u32 %v8328_v14, %v8868_v4  ;;  %v8329_v28 = vld [vmem:[%s11139_s0 + $0x60] ss:$196 sps:$4 sm:$0xff]  }
  0x19   :  { %v8323_v17 = vld [vmem:[%s11139_s0 + $0x1e8] ss:$196 sps:$4 sm:$0x1f]   ;;  %v8326_v18 = vld [vmem:[%s11139_s0 + $0x1f0] ss:$196 sps:$4 sm:$0x1f]  }
  0x1a   :  { %893 = vmatpush1.bf16.msra.mxu0 %v8281_v41  ;;  %934 = vmatpush1.bf16.msra.mxu1 %v8284_v42  ;;  %v640_v23 = vand.u32 %v8323_v17, %v8868_v4  ;;  %v646_v24 = vand.u32 %v8326_v18, %v8868_v4  ;;  %v8334_v25 = vld [vmem:[%s11139_s0 + $0x6c] ss:$196 sps:$4 sm:$0xff]   ;;  %v8337_v26 = vld [vmem:[%s11139_s0 + $0x1fc] ss:$196 sps:$4 sm:$0x1f]  }
  0x1b   :  { %972 = vmatprep.subr.bf16.mxu0 %v607_v45  ;;  %1013 = vmatprep.subr.bf16.mxu1 %v613_v46  ;;  %v8340_v27 = vld [vmem:[%s11139_s0 + $0x204] ss:$196 sps:$4 sm:$0x1f]   ;;  %v8335_v29 = vld [vmem:[%s11139_s0 + $0x1f8] ss:$196 sps:$4 sm:$0x1f]   ;;  %v655_v32 = vand.u32 %v8337_v26, %v8868_v4 }
  0x1c   :  { %v8332_v30 = vld [vmem:[%s11139_s0 + $0x68] ss:$196 sps:$4 sm:$0xff]   ;;  %v8338_v31 = vld [vmem:[%s11139_s0 + $0x200] ss:$196 sps:$4 sm:$0x1f]   ;;  %v661_v33 = vand.u32 %v8340_v27, %v8868_v4  ;;  %v652_v35 = vand.u32 %v8335_v29, %v8868_v4 }
  0x1d   :  { %7462 = vmatmul.mubr.msk.bf16.vlgmr.msra.gmra.mxu0 %vm559_vm2, %v8912_v22  ;;  %7463 = vmatmul.mubr.msk.bf16.vlgmr.msra.gmra.mxu1 %vm559_vm2, %v8912_v22  ;;  %v8343_v34 = vld [vmem:[%s11139_s0 + $0x74] ss:$196 sps:$4 sm:$0xff]   ;;  %v658_v36 = vand.u32 %v8338_v31, %v8868_v4  ;;  %v8346_v37 = vld [vmem:[%s11139_s0 + $0x7c] ss:$196 sps:$4 sm:$0xff]   ;;  %v8355_v46 = vld [vmem:[%s11139_s0 + $0x84] ss:$196 sps:$4 sm:$0xff]  }
  0x1e   :  { %973 = vmatpush1.bf16.msra.mxu0 %v604_v48  ;;  %1014 = vmatpush1.bf16.msra.mxu1 %v610_v49  ;;  %v8349_v38 = vld [vmem:[%s11139_s0 + $0x20c] ss:$196 sps:$4 sm:$0x1f]   ;;  %v8352_v39 = vld [vmem:[%s11139_s0 + $0x214] ss:$196 sps:$4 sm:$0x1f]  }
  0x1f   :  { %974 = vmatprep.subr.bf16.mxu0 %v8295_v47  ;;  %1015 = vmatprep.subr.bf16.mxu1 %v8298_v51  ;;  %v8341_v40 = vld [vmem:[%s11139_s0 + $0x70] ss:$196 sps:$4 sm:$0xff]   ;;  %v8344_v41 = vld [vmem:[%s11139_s0 + $0x78] ss:$196 sps:$4 sm:$0xff]   ;;  %v667_v44 = vand.u32 %v8349_v38, %v8868_v4  ;;  %v673_v45 = vand.u32 %v8352_v39, %v8868_v4  ;;  %v8353_v52 = vld [vmem:[%s11139_s0 + $0x80] ss:$196 sps:$4 sm:$0xff]  }
  0x20   :  { %992 = vmatprep.mubr.bf16.mxu0 %v11145_v1  ;;  %1033 = vmatprep.mubr.bf16.mxu1 %v11145_v1  ;;  %v8347_v42 = vld [vmem:[%s11139_s0 + $0x208] ss:$196 sps:$4 sm:$0x1f]   ;;  %v8350_v43 = vld [vmem:[%s11139_s0 + $0x210] ss:$196 sps:$4 sm:$0x1f]  }
  0x21   :  { %v8358_v47 = vld [vmem:[%s11139_s0 + $0x8c] ss:$196 sps:$4 sm:$0xff]   ;;  %v664_v48 = vand.u32 %v8347_v42, %v8868_v4  ;;  %v670_v49 = vand.u32 %v8350_v43, %v8868_v4  ;;  %v8361_v50 = vld [vmem:[%s11139_s0 + $0x21c] ss:$196 sps:$4 sm:$0x1f]  }
  0x22   :  { %975 = vmatpush1.bf16.msra.mxu0 %v8293_v53  ;;  %1016 = vmatpush1.bf16.msra.mxu1 %v8296_v54  ;;  %v8364_v51 = vld [vmem:[%s11139_s0 + $0x224] ss:$196 sps:$4 sm:$0x1f]   ;;  %v8359_v53 = vld [vmem:[%s11139_s0 + $0x218] ss:$196 sps:$4 sm:$0x1f]   ;;  %v679_v56 = vand.u32 %v8361_v50, %v8868_v4 }
  0x23   :  { %1054 = vmatprep.subr.bf16.mxu0 %v619_v57  ;;  %1095 = vmatprep.subr.bf16.mxu1 %v625_v58  ;;  %v8356_v54 = vld [vmem:[%s11139_s0 + $0x88] ss:$196 sps:$4 sm:$0xff]   ;;  %v8362_v55 = vld [vmem:[%s11139_s0 + $0x220] ss:$196 sps:$4 sm:$0x1f]   ;;  %v685_v57 = vand.u32 %v8364_v51, %v8868_v4 }
  0x24   :  { %v8367_v58 = vld [vmem:[%s11139_s0 + $0x94] ss:$196 sps:$4 sm:$0xff]   ;;  %v8371_v3 = vld [vmem:[%s11139_s0 + $0x228] ss:$196 sps:$4 sm:$0x1f]  }
  0x25   :  { %7464 = vmatmul.mubr.msk.bf16.vlgmr.msra.gmra.mxu0 %vm559_vm2, %v8912_v22  ;;  %7465 = vmatmul.mubr.msk.bf16.vlgmr.msra.gmra.mxu1 %vm559_vm2, %v8912_v22  ;;  %v8376_v63 = vld [vmem:[%s11139_s0 + $0x234] ss:$196 sps:$4 sm:$0x1f]   ;;  %v8388_v13 = vld [vmem:[%s11139_s0 + $0x244] ss:$196 sps:$4 sm:$0x1f]  }
  0x26   :  { %1055 = vmatpush1.bf16.msra.mxu0 %v616_v60  ;;  %1096 = vmatpush1.bf16.msra.mxu1 %v622_v61  ;;  %v676_v60 = vand.u32 %v8359_v53, %v8868_v4  ;;  %v682_v61 = vand.u32 %v8362_v55, %v8868_v4  ;;  %v8365_v0 = vld [vmem:[%s11139_s0 + $0x90] ss:$196 sps:$4 sm:$0xff]   ;;  %v8377_v14 = vld [vmem:[%s11139_s0 + $0xa0] ss:$196 sps:$4 sm:$0xff]  }
  0x27   :  { %1056 = vmatprep.subr.bf16.mxu0 %v8307_v59  ;;  %1097 = vmatprep.subr.bf16.mxu1 %v8310_v62  ;;  %v8370_v59 = vld [vmem:[%s11139_s0 + $0x9c] ss:$196 sps:$4 sm:$0xff]   ;;  %v8373_v62 = vld [vmem:[%s11139_s0 + $0x22c] ss:$196 sps:$4 sm:$0x1f]  }
  0x28   :  { %1074 = vmatprep.mubr.bf16.mxu0 %v11145_v1  ;;  %1115 = vmatprep.mubr.bf16.mxu1 %v11145_v1  ;;  %v691_v6 = vand.u32 %v8373_v62, %v8868_v4  ;;  %v8386_v17 = vld [vmem:[%s11139_s0 + $0x240] ss:$196 sps:$4 sm:$0x1f]   ;;  %v8389_v26 = vld [vmem:[%s11139_s0 + $0xb0] ss:$196 sps:$4 sm:$0xff]  }
  0x29   :  { %v8395_v27 = vld [vmem:[%s11139_s0 + $0x498] ss:$196 sps:$4 sm:$0x1f]   ;;  %v8398_v29 = vld [vmem:[%s11139_s0 + $0x248] ss:$196 sps:$4 sm:$0x1f]  }
  0x2a   :  { %1057 = vmatpush1.bf16.msra.mxu0 %v8305_v2  ;;  %1098 = vmatpush1.bf16.msra.mxu1 %v8308_v5  ;;  %v8368_v2 = vld [vmem:[%s11139_s0 + $0x98] ss:$196 sps:$4 sm:$0xff]   ;;  %v8374_v5 = vld [vmem:[%s11139_s0 + $0x230] ss:$196 sps:$4 sm:$0x1f]  }
  0x2b   :  { %1136 = vmatprep.subr.bf16.mxu0 %v631_v7  ;;  %1177 = vmatprep.subr.bf16.mxu1 %v637_v8  ;;  %v697_v7 = vand.u32 %v8376_v63, %v8868_v4  ;;  %v8379_v8 = vld [vmem:[%s11139_s0 + $0xa4] ss:$196 sps:$4 sm:$0xff]   ;;  %v8401_v31 = vld [vmem:[%s11139_s0 + $0x314] ss:$196 sps:$4 sm:$0xff]   ;;  %v8411_v43 = vld [vmem:[%s11139_s0 + $0x31c] ss:$196 sps:$4 sm:$0xff]  }
  0x2c   :  { %v8402_v38 = vld [vmem:[%s11139_s0 + $0xc0] ss:$196 sps:$4 sm:$0xff]   ;;  %v8415_v50 = vld [vmem:[%s11139_s0 + $0x4b0] ss:$196 sps:$4 sm:$0x1f]  }
  0x2d   :  { %7466 = vmatmul.mubr.msk.bf16.vlgmr.msra.gmra.mxu0 %vm559_vm2, %v8912_v22  ;;  %7467 = vmatmul.mubr.msk.bf16.vlgmr.msra.gmra.mxu1 %vm559_vm2, %v8912_v22  ;;  %v8403_v39 = vld [vmem:[%s11139_s0 + $0x4a0] ss:$196 sps:$4 sm:$0x1f]   ;;  %v8423_v55 = vld [vmem:[%s11139_s0 + $0x32c] ss:$196 sps:$4 sm:$0xff]  }
  0x2e   :  { %1137 = vmatpush1.bf16.msra.mxu0 %v628_v11  ;;  %1178 = vmatpush1.bf16.msra.mxu1 %v634_v12  ;;  %v8385_v11 = vld [vmem:[%s11139_s0 + $0x23c] ss:$196 sps:$4 sm:$0x1f]   ;;  %v8382_v12 = vld [vmem:[%s11139_s0 + $0xac] ss:$196 sps:$4 sm:$0xff]  }
  0x2f   :  { %1138 = vmatprep.subr.bf16.mxu0 %v8319_v9  ;;  %1179 = vmatprep.subr.bf16.mxu1 %v8322_v10  ;;  %v688_v9 = vand.u32 %v8371_v3, %v8868_v4  ;;  %v694_v10 = vand.u32 %v8374_v5, %v8868_v4  ;;  %v703_v18 = vand.u32 %v8385_v11, %v8868_v4  ;;  %v8412_v51 = vld [vmem:[%s11139_s0 + $0x320] ss:$196 sps:$4 sm:$0xff]   ;;  %v8424_v62 = vld [vmem:[%s11139_s0 + $0x330] ss:$196 sps:$4 sm:$0xff]   ;;  %v8433_v11 = vld [vmem:[%s11139_s0 + $0x338] ss:$196 sps:$4 sm:$0xff]  }
  0x30   :  { %1156 = vmatprep.mubr.bf16.mxu0 %v11145_v1  ;;  %1197 = vmatprep.mubr.bf16.mxu1 %v11145_v1  ;;  %v8427_v63 = vld [vmem:[%s11139_s0 + $0x4c0] ss:$196 sps:$4 sm:$0x1f]  }
  0x31   :  { %v8435_v5 = vld [vmem:[%s11139_s0 + $0x33c] ss:$196 sps:$4 sm:$0xff]  }
  0x32   :  { %1139 = vmatpush1.bf16.msra.mxu0 %v8317_v15  ;;  %1180 = vmatpush1.bf16.msra.mxu1 %v8320_v16  ;;  %v8380_v15 = vld [vmem:[%s11139_s0 + $0xa8] ss:$196 sps:$4 sm:$0xff]   ;;  %v8383_v16 = vld [vmem:[%s11139_s0 + $0x238] ss:$196 sps:$4 sm:$0x1f]  }
  0x33   :  { %1218 = vmatprep.subr.bf16.mxu0 %v643_v19  ;;  %1259 = vmatprep.subr.bf16.mxu1 %v649_v20  ;;  %v709_v19 = vand.u32 %v8388_v13, %v8868_v4  ;;  %v700_v20 = vand.u32 %v8383_v16, %v8868_v4  ;;  %v8439_v13 = vld [vmem:[%s11139_s0 + $0x4d0] ss:$196 sps:$4 sm:$0x1f]  }
  0x35   :  { %7468 = vmatmul.mubr.msk.bf16.vlgmr.msra.gmra.mxu0 %vm559_vm2, %v8912_v22  ;;  %7469 = vmatmul.mubr.msk.bf16.vlgmr.msra.gmra.mxu1 %vm559_vm2, %v8912_v22 }
  0x36   :  { %1219 = vmatpush1.bf16.msra.mxu0 %v640_v23  ;;  %1260 = vmatpush1.bf16.msra.mxu1 %v646_v24  ;;  %v8391_v23 = vld [vmem:[%s11139_s0 + $0xb4] ss:$196 sps:$4 sm:$0xff]   ;;  %v8394_v24 = vld [vmem:[%s11139_s0 + $0xbc] ss:$196 sps:$4 sm:$0xff]  }
  0x37   :  { %1220 = vmatprep.subr.bf16.mxu0 %v8331_v21  ;;  %1261 = vmatprep.subr.bf16.mxu1 %v8334_v25  ;;  %v706_v21 = vand.u32 %v8386_v17, %v8868_v4  ;;  %v8397_v25 = vld [vmem:[%s11139_s0 + $0x49c] ss:$196 sps:$4 sm:$0x1f]   ;;  %v2325_v17 = vand.u32 %v8439_v13, %v8868_v4 }
  0x38   :  { %1238 = vmatprep.mubr.bf16.mxu0 %v11145_v1  ;;  %1279 = vmatprep.mubr.bf16.mxu1 %v11145_v1  ;;  %v8499_v13 = vld [vmem:[%s11139_s0 + $0x520] ss:$196 sps:$4 sm:$0x1f]  }
  0x3a   :  { %1221 = vmatpush1.bf16.msra.mxu0 %v8329_v28  ;;  %1262 = vmatpush1.bf16.msra.mxu1 %v8332_v30  ;;  %v8392_v28 = vld [vmem:[%s11139_s0 + $0xb8] ss:$196 sps:$4 sm:$0xff]   ;;  %v2286_v30 = vand.u32 %v8397_v25, %v8868_v4  ;;  %v8451_v25 = vld [vmem:[%s11139_s0 + $0x4e0] ss:$196 sps:$4 sm:$0x1f]  }
  0x3b   :  { %1300 = vmatprep.subr.bf16.mxu0 %v655_v32  ;;  %1341 = vmatprep.subr.bf16.mxu1 %v661_v33  ;;  %v712_v32 = vand.u32 %v8398_v29, %v8868_v4  ;;  %v2283_v33 = vand.u32 %v8395_v27, %v8868_v4  ;;  %v8454_v27 = vld [vmem:[%s11139_s0 + $0x4e8] ss:$196 sps:$4 sm:$0x1f]  }
  0x3d   :  { %7470 = vmatmul.mubr.msk.bf16.vlgmr.msra.gmra.mxu0 %vm559_vm2, %v8912_v22  ;;  %7471 = vmatmul.mubr.msk.bf16.vlgmr.msra.gmra.mxu1 %vm559_vm2, %v8912_v22 }
  0x3e   :  { %1301 = vmatpush1.bf16.msra.mxu0 %v652_v35  ;;  %1342 = vmatpush1.bf16.msra.mxu1 %v658_v36  ;;  %v11143_v35 = vmov 0.0   ;;  %v8408_v36 = vld [vmem:[%s11139_s0 + $0x4ac] ss:$196 sps:$4 sm:$0x1f]  }
  0x3f   :  { %1302 = vmatprep.subr.bf16.mxu0 %v8343_v34  ;;  %1343 = vmatprep.subr.bf16.mxu1 %v8346_v37  ;;  %v8405_v34 = vld [vmem:[%s11139_s0 + $0x4a4] ss:$196 sps:$4 sm:$0x1f]   ;;  %v8399_v37 = vld [vmem:[%s11139_s0 + $0x310] ss:$196 sps:$4 sm:$0xff]   ;;  %v2298_v42 = vand.u32 %v8408_v36, %v8868_v4 }
  0x40   :  { %1320 = vmatprep.mubr.bf16.mxu0 %v11145_v1  ;;  %1361 = vmatprep.mubr.bf16.mxu1 %v11145_v1  ;;  %v8462_v36 = vld [vmem:[%s11139_s0 + $0x364] ss:$196 sps:$4 sm:$0xff]  }
  0x42   :  { %1303 = vmatpush1.bf16.msra.mxu0 %v8341_v40  ;;  %1344 = vmatpush1.bf16.msra.mxu1 %v8344_v41  ;;  %v8406_v40 = vld [vmem:[%s11139_s0 + $0x4a8] ss:$196 sps:$4 sm:$0x1f]   ;;  %v2292_v41 = vand.u32 %v8405_v34, %v8868_v4  ;;  %v8468_v34 = vld [vmem:[%s11139_s0 + $0x4fc] ss:$196 sps:$4 sm:$0x1f]  }
  0x43   :  { %1382 = vmatprep.subr.bf16.mxu0 %v667_v44  ;;  %1423 = vmatprep.subr.bf16.mxu1 %v673_v45  ;;  %v2289_v44 = vand.u32 %v8403_v39, %v8868_v4  ;;  %v2295_v45 = vand.u32 %v8406_v40, %v8868_v4  ;;  %v8463_v39 = vld [vmem:[%s11139_s0 + $0x4f0] ss:$196 sps:$4 sm:$0x1f]   ;;  %v8466_v40 = vld [vmem:[%s11139_s0 + $0x4f8] ss:$196 sps:$4 sm:$0x1f]  }
  0x45   :  { %7472 = vmatmul.mubr.msk.bf16.vlgmr.msra.gmra.mxu0 %vm559_vm2, %v8912_v22  ;;  %7473 = vmatmul.mubr.msk.bf16.vlgmr.msra.gmra.mxu1 %vm559_vm2, %v8912_v22 }
  0x46   :  { %1383 = vmatpush1.bf16.msra.mxu0 %v664_v48  ;;  %1424 = vmatpush1.bf16.msra.mxu1 %v670_v49  ;;  %v8420_v48 = vld [vmem:[%s11139_s0 + $0x4bc] ss:$196 sps:$4 sm:$0x1f]  }
  0x47   :  { %1384 = vmatprep.subr.bf16.mxu0 %v8355_v46  ;;  %1425 = vmatprep.subr.bf16.mxu1 %v8358_v47  ;;  %v8414_v46 = vld [vmem:[%s11139_s0 + $0x324] ss:$196 sps:$4 sm:$0xff]   ;;  %v8417_v47 = vld [vmem:[%s11139_s0 + $0x4b4] ss:$196 sps:$4 sm:$0x1f]  }
  0x48   :  { %1402 = vmatprep.mubr.bf16.mxu0 %v11145_v1  ;;  %1443 = vmatprep.mubr.bf16.mxu1 %v11145_v1  ;;  %v8409_v49 = vld [vmem:[%s11139_s0 + $0x318] ss:$196 sps:$4 sm:$0xff]   ;;  %v2304_v53 = vand.u32 %v8417_v47, %v8868_v4  ;;  %v8477_v47 = vld [vmem:[%s11139_s0 + $0x504] ss:$196 sps:$4 sm:$0x1f]  }
  0x4a   :  { %1385 = vmatpush1.bf16.msra.mxu0 %v8353_v52  ;;  %1426 = vmatpush1.bf16.msra.mxu1 %v8356_v54  ;;  %v8418_v52 = vld [vmem:[%s11139_s0 + $0x4b8] ss:$196 sps:$4 sm:$0x1f]   ;;  %v2310_v54 = vand.u32 %v8420_v48, %v8868_v4  ;;  %v8480_v48 = vld [vmem:[%s11139_s0 + $0x50c] ss:$196 sps:$4 sm:$0x1f]  }
  0x4b   :  { %1464 = vmatprep.subr.bf16.mxu0 %v679_v56  ;;  %1505 = vmatprep.subr.bf16.mxu1 %v685_v57  ;;  %v2301_v56 = vand.u32 %v8415_v50, %v8868_v4  ;;  %v2307_v57 = vand.u32 %v8418_v52, %v8868_v4  ;;  %v8475_v50 = vld [vmem:[%s11139_s0 + $0x500] ss:$196 sps:$4 sm:$0x1f]   ;;  %v8478_v52 = vld [vmem:[%s11139_s0 + $0x508] ss:$196 sps:$4 sm:$0x1f]  }
  0x4d   :  { %7474 = vmatmul.mubr.msk.bf16.vlgmr.msra.gmra.mxu0 %vm559_vm2, %v8912_v22  ;;  %7475 = vmatmul.mubr.msk.bf16.vlgmr.msra.gmra.mxu1 %vm559_vm2, %v8912_v22 }
  0x4e   :  { %1465 = vmatpush1.bf16.msra.mxu0 %v676_v60  ;;  %1506 = vmatpush1.bf16.msra.mxu1 %v682_v61  ;;  %v8432_v60 = vld [vmem:[%s11139_s0 + $0x4cc] ss:$196 sps:$4 sm:$0x1f]  }
  0x4f   :  { %1466 = vmatprep.subr.bf16.mxu0 %v8367_v58  ;;  %1507 = vmatprep.subr.bf16.mxu1 %v8370_v59  ;;  %v8426_v58 = vld [vmem:[%s11139_s0 + $0x334] ss:$196 sps:$4 sm:$0xff]   ;;  %v8429_v59 = vld [vmem:[%s11139_s0 + $0x4c4] ss:$196 sps:$4 sm:$0x1f]   ;;  %v2322_v3 = vand.u32 %v8432_v60, %v8868_v4 }
  0x50   :  { %1484 = vmatprep.mubr.bf16.mxu0 %v11145_v1  ;;  %1525 = vmatprep.mubr.bf16.mxu1 %v11145_v1  ;;  %v8421_v61 = vld [vmem:[%s11139_s0 + $0x328] ss:$196 sps:$4 sm:$0xff]   ;;  %v8492_v60 = vld [vmem:[%s11139_s0 + $0x51c] ss:$196 sps:$4 sm:$0x1f]  }
  0x52   :  { %1467 = vmatpush1.bf16.msra.mxu0 %v8365_v0  ;;  %1508 = vmatpush1.bf16.msra.mxu1 %v8368_v2  ;;  %v8430_v0 = vld [vmem:[%s11139_s0 + $0x4c8] ss:$196 sps:$4 sm:$0x1f]   ;;  %v2316_v2 = vand.u32 %v8429_v59, %v8868_v4  ;;  %v8489_v59 = vld [vmem:[%s11139_s0 + $0x514] ss:$196 sps:$4 sm:$0x1f]  }
  0x53   :  { %1546 = vmatprep.subr.bf16.mxu0 %v691_v6  ;;  %1587 = vmatprep.subr.bf16.mxu1 %v697_v7  ;;  %v8438_v6 = vld [vmem:[%s11139_s0 + $0x344] ss:$196 sps:$4 sm:$0xff]   ;;  %v2313_v7 = vand.u32 %v8427_v63, %v8868_v4  ;;  %v8487_v63 = vld [vmem:[%s11139_s0 + $0x510] ss:$196 sps:$4 sm:$0x1f]  }
  0x55   :  { %7476 = vmatmul.mubr.msk.bf16.vlgmr.msra.gmra.mxu0 %vm559_vm2, %v8912_v22  ;;  %7477 = vmatmul.mubr.msk.bf16.vlgmr.msra.gmra.mxu1 %vm559_vm2, %v8912_v22 }
  0x56   :  { %1547 = vmatpush1.bf16.msra.mxu0 %v688_v9  ;;  %1588 = vmatpush1.bf16.msra.mxu1 %v694_v10  ;;  %v8441_v9 = vld [vmem:[%s11139_s0 + $0x4d4] ss:$196 sps:$4 sm:$0x1f]   ;;  %v8444_v10 = vld [vmem:[%s11139_s0 + $0x4dc] ss:$196 sps:$4 sm:$0x1f]  }
  0x57   :  { %1548 = vmatprep.subr.bf16.mxu0 %v8379_v8  ;;  %1589 = vmatprep.subr.bf16.mxu1 %v8382_v12  ;;  %v2319_v8 = vand.u32 %v8430_v0, %v8868_v4  ;;  %v8436_v12 = vld [vmem:[%s11139_s0 + $0x340] ss:$196 sps:$4 sm:$0xff]   ;;  %v2334_v16 = vand.u32 %v8444_v10, %v8868_v4  ;;  %v8490_v0 = vld [vmem:[%s11139_s0 + $0x518] ss:$196 sps:$4 sm:$0x1f]  }
  0x58   :  { %1566 = vmatprep.mubr.bf16.mxu0 %v11145_v1  ;;  %1607 = vmatprep.mubr.bf16.mxu1 %v11145_v1  ;;  %v8504_v10 = vld [vmem:[%s11139_s0 + $0x52c] ss:$196 sps:$4 sm:$0x1f]  }
  0x5a   :  { %1549 = vmatpush1.bf16.msra.mxu0 %v8377_v14  ;;  %1590 = vmatpush1.bf16.msra.mxu1 %v8380_v15  ;;  %v8442_v14 = vld [vmem:[%s11139_s0 + $0x4d8] ss:$196 sps:$4 sm:$0x1f]   ;;  %v2328_v15 = vand.u32 %v8441_v9, %v8868_v4  ;;  %v8501_v9 = vld [vmem:[%s11139_s0 + $0x524] ss:$196 sps:$4 sm:$0x1f]  }
  0x5b   :  { %1628 = vmatprep.subr.bf16.mxu0 %v703_v18  ;;  %1669 = vmatprep.subr.bf16.mxu1 %v709_v19  ;;  %v2331_v18 = vand.u32 %v8442_v14, %v8868_v4  ;;  %v8450_v19 = vld [vmem:[%s11139_s0 + $0x354] ss:$196 sps:$4 sm:$0xff]   ;;  %v8502_v14 = vld [vmem:[%s11139_s0 + $0x528] ss:$196 sps:$4 sm:$0x1f]  }
  0x5d   :  { %7478 = vmatmul.mubr.msk.bf16.vlgmr.msra.gmra.mxu0 %vm559_vm2, %v8912_v22  ;;  %7479 = vmatmul.mubr.msk.bf16.vlgmr.msra.gmra.mxu1 %vm559_vm2, %v8912_v22 }
  0x5e   :  { %1629 = vmatpush1.bf16.msra.mxu0 %v700_v20  ;;  %1670 = vmatpush1.bf16.msra.mxu1 %v706_v21  ;;  %v8453_v20 = vld [vmem:[%s11139_s0 + $0x4e4] ss:$196 sps:$4 sm:$0x1f]   ;;  %v8456_v21 = vld [vmem:[%s11139_s0 + $0x4ec] ss:$196 sps:$4 sm:$0x1f]  }
  0x5f   :  { %1630 = vmatprep.subr.bf16.mxu0 %v8391_v23  ;;  %1671 = vmatprep.subr.bf16.mxu1 %v8394_v24  ;;  %v8445_v23 = vld [vmem:[%s11139_s0 + $0x348] ss:$196 sps:$4 sm:$0xff]   ;;  %v9440_v24 = vld [vmem:[%s11140_s1] sm:$0xf]  ;;  %v2346_v29 = vand.u32 %v8456_v21, %v8868_v4 }
  0x60   :  { %1648 = vmatprep.mubr.bf16.mxu0 %v11145_v1  ;;  %1689 = vmatprep.mubr.bf16.mxu1 %v11145_v1  ;;  %v8516_v21 = vld [vmem:[%s11139_s0 + $0x53c] ss:$196 sps:$4 sm:$0x1f]  }
  0x62   :  { %1631 = vmatpush1.bf16.msra.mxu0 %v8389_v26  ;;  %1672 = vmatpush1.bf16.msra.mxu1 %v8392_v28  ;;  %v8448_v26 = vld [vmem:[%s11139_s0 + $0x350] ss:$196 sps:$4 sm:$0xff]   ;;  %v2340_v28 = vand.u32 %v8453_v20, %v8868_v4  ;;  %v8510_v20 = vld [vmem:[%s11139_s0 + $0x3a4] ss:$196 sps:$4 sm:$0xff]  }
  0x63   :  { %8214 = vmatprep.subr.bf16.mxu0 %v11143_v35  ;;  %2441 = vmatprep.subr.bf16.mxu1 %v2286_v30  ;;  %v8459_v30 = vld [vmem:[%s11139_s0 + $0x35c] ss:$196 sps:$4 sm:$0xff]  }
  0x65   :  { %7480 = vmatmul.mubr.msk.bf16.vlgmr.msra.gmra.mxu0 %vm559_vm2, %v8912_v22  ;;  %7481 = vmatmul.mubr.msk.bf16.vlgmr.msra.gmra.mxu1 %vm559_vm2, %v8912_v22 }
  0x66   :  { %8215 = vmatpush3.bf16.msra.mxu0 %v712_v32  ;;  %2442 = vmatpush1.bf16.msra.mxu1 %v2283_v33  ;;  %v2337_v32 = vand.u32 %v8451_v25, %v8868_v4  ;;  %v2343_v33 = vand.u32 %v8454_v27, %v8868_v4  ;;  %v8508_v25 = vld [vmem:[%s11139_s0 + $0x3a0] ss:$196 sps:$4 sm:$0xff]   ;;  %v8514_v27 = vld [vmem:[%s11139_s0 + $0x538] ss:$196 sps:$4 sm:$0x1f]  }
  0x67   :  { %8216 = vmatprep.subr.bf16.mxu0 %v11143_v35  ;;  %2443 = vmatprep.subr.bf16.mxu1 %v8401_v31  ;;  %v8465_v31 = vld [vmem:[%s11139_s0 + $0x4f4] ss:$196 sps:$4 sm:$0x1f]  }
  0x68   :  { %8218 = vmatprep.mubr.msk.bf16.mxu0 %vm8841_vm3, %v11143_v35  ;;  %2461 = vmatprep.mubr.bf16.mxu1 %v11145_v1 }
  0x6a   :  { %8217 = vmatpush3.bf16.msra.mxu0 %v8402_v38  ;;  %2444 = vmatpush1.bf16.msra.mxu1 %v8399_v37  ;;  %v8457_v37 = vld [vmem:[%s11139_s0 + $0x358] ss:$196 sps:$4 sm:$0xff]   ;;  %v8460_v38 = vld [vmem:[%s11139_s0 + $0x360] ss:$196 sps:$4 sm:$0xff]  }
  0x6b   :  { %2482 = vmatprep.subr.bf16.mxu0 %v2292_v41  ;;  %2523 = vmatprep.subr.bf16.mxu1 %v2298_v42  ;;  %v2352_v41 = vand.u32 %v8465_v31, %v8868_v4  ;;  %v2358_v42 = vand.u32 %v8468_v34, %v8868_v4  ;;  %v8525_v34 = vld [vmem:[%s11139_s0 + $0x544] ss:$196 sps:$4 sm:$0x1f]  }
  0x6d   :  { %8219 = vmatmul.mubr.msk.bf16.vlgmr.msra.gmra.mxu0 %vm559_vm2, %v8912_v22  ;;  %7681 = vmatmul.mubr.msk.bf16.vlgmr.msra.gmra.mxu1 %vm559_vm2, %v8912_v22 }
  0x6e   :  { %2483 = vmatpush1.bf16.msra.mxu0 %v2289_v44  ;;  %2524 = vmatpush1.bf16.msra.mxu1 %v2295_v45  ;;  %v2349_v44 = vand.u32 %v8463_v39, %v8868_v4  ;;  %v2355_v45 = vand.u32 %v8466_v40, %v8868_v4  ;;  %v8523_v39 = vld [vmem:[%s11139_s0 + $0x540] ss:$196 sps:$4 sm:$0x1f]   ;;  %v8526_v40 = vld [vmem:[%s11139_s0 + $0x548] ss:$196 sps:$4 sm:$0x1f]  }
  0x6f   :  { %2484 = vmatprep.subr.bf16.mxu0 %v8411_v43  ;;  %2525 = vmatprep.subr.bf16.mxu1 %v8414_v46  ;;  %v8471_v43 = vld [vmem:[%s11139_s0 + $0x36c] ss:$196 sps:$4 sm:$0xff]   ;;  %v8474_v46 = vld [vmem:[%s11139_s0 + $0x374] ss:$196 sps:$4 sm:$0xff]  }
  0x70   :  { %2502 = vmatprep.mubr.bf16.mxu0 %v11145_v1  ;;  %2543 = vmatprep.mubr.bf16.mxu1 %v11145_v1 }
  0x72   :  { %2485 = vmatpush1.bf16.msra.mxu0 %v8409_v49  ;;  %2526 = vmatpush1.bf16.msra.mxu1 %v8412_v51  ;;  %v8469_v49 = vld [vmem:[%s11139_s0 + $0x368] ss:$196 sps:$4 sm:$0xff]   ;;  %v8472_v51 = vld [vmem:[%s11139_s0 + $0x370] ss:$196 sps:$4 sm:$0xff]  }
  0x73   :  { %2564 = vmatprep.subr.bf16.mxu0 %v2304_v53  ;;  %2605 = vmatprep.subr.bf16.mxu1 %v2310_v54  ;;  %v2364_v53 = vand.u32 %v8477_v47, %v8868_v4  ;;  %v2370_v54 = vand.u32 %v8480_v48, %v8868_v4  ;;  %v8537_v47 = vld [vmem:[%s11139_s0 + $0x554] ss:$196 sps:$4 sm:$0x1f]  }
  0x74   :  { %v8529_v48 = vld [vmem:[%s11139_s0 + $0x3b8] ss:$196 sps:$4 sm:$0xff]  }
  0x75   :  { %7682 = vmatmul.mubr.msk.bf16.vlgmr.msra.gmra.mxu0 %vm559_vm2, %v8912_v22  ;;  %7683 = vmatmul.mubr.msk.bf16.vlgmr.msra.gmra.mxu1 %vm559_vm2, %v8912_v22 }
  0x76   :  { %2565 = vmatpush1.bf16.msra.mxu0 %v2301_v56  ;;  %2606 = vmatpush1.bf16.msra.mxu1 %v2307_v57  ;;  %v2361_v56 = vand.u32 %v8475_v50, %v8868_v4  ;;  %v2367_v57 = vand.u32 %v8478_v52, %v8868_v4  ;;  %v8535_v50 = vld [vmem:[%s11139_s0 + $0x550] ss:$196 sps:$4 sm:$0x1f]   ;;  %v2424_v52 = vand.u32 %v8537_v47, %v8868_v4 }
  0x77   :  { %2566 = vmatprep.subr.bf16.mxu0 %v8423_v55  ;;  %2607 = vmatprep.subr.bf16.mxu1 %v8426_v58  ;;  %v8483_v55 = vld [vmem:[%s11139_s0 + $0x37c] ss:$196 sps:$4 sm:$0xff]   ;;  %v8486_v58 = vld [vmem:[%s11139_s0 + $0x384] ss:$196 sps:$4 sm:$0xff]  }
  0x78   :  { %2584 = vmatprep.mubr.bf16.mxu0 %v11145_v1  ;;  %2625 = vmatprep.mubr.bf16.mxu1 %v11145_v1 }
  0x7a   :  { %2567 = vmatpush1.bf16.msra.mxu0 %v8421_v61  ;;  %2608 = vmatpush1.bf16.msra.mxu1 %v8424_v62  ;;  %v8481_v61 = vld [vmem:[%s11139_s0 + $0x378] ss:$196 sps:$4 sm:$0xff]   ;;  %v8484_v62 = vld [vmem:[%s11139_s0 + $0x380] ss:$196 sps:$4 sm:$0xff]  }
  0x7b   :  { %2646 = vmatprep.subr.bf16.mxu0 %v2316_v2  ;;  %2687 = vmatprep.subr.bf16.mxu1 %v2322_v3  ;;  %v2376_v2 = vand.u32 %v8489_v59, %v8868_v4  ;;  %v2382_v3 = vand.u32 %v8492_v60, %v8868_v4  ;;  %v8542_v59 = vld [vmem:[%s11139_s0 + $0x3d0] ss:$196 sps:$4 sm:$0xff]   ;;  %v8543_v60 = vld [vmem:[%s11139_s0 + $0x7a8] ss:$196 sps:$4 sm:$0x1f]  }
  0x7d   :  { %7684 = vmatmul.mubr.msk.bf16.vlgmr.msra.gmra.mxu0 %vm559_vm2, %v8912_v22  ;;  %7685 = vmatmul.mubr.msk.bf16.vlgmr.msra.gmra.mxu1 %vm559_vm2, %v8912_v22  ;;  %v8447_v22 = vld [vmem:[%s11139_s0 + $0x34c] ss:$196 sps:$4 sm:$0xff]  }
  0x7e   :  { %2647 = vmatpush1.bf16.msra.mxu0 %v2313_v7  ;;  %2688 = vmatpush1.bf16.msra.mxu1 %v2319_v8  ;;  %v2373_v7 = vand.u32 %v8487_v63, %v8868_v4  ;;  %v2379_v8 = vand.u32 %v8490_v0, %v8868_v4  ;;  %v8551_v0 = vld [vmem:[%s11139_s0 + $0x624] ss:$196 sps:$4 sm:$0xff]  }
  0x7f   :  { %2648 = vmatprep.subr.bf16.mxu0 %v8435_v5  ;;  %2689 = vmatprep.subr.bf16.mxu1 %v8438_v6  ;;  %v8495_v5 = vld [vmem:[%s11139_s0 + $0x38c] ss:$196 sps:$4 sm:$0xff]   ;;  %v8498_v6 = vld [vmem:[%s11139_s0 + $0x394] ss:$196 sps:$4 sm:$0xff]  }
  0x80   :  { %2666 = vmatprep.mubr.bf16.mxu0 %v11145_v1  ;;  %2707 = vmatprep.mubr.bf16.mxu1 %v11145_v1 }
  0x82   :  { %2649 = vmatpush1.bf16.msra.mxu0 %v8433_v11  ;;  %2690 = vmatpush1.bf16.msra.mxu1 %v8436_v12  ;;  %v8493_v11 = vld [vmem:[%s11139_s0 + $0x388] ss:$196 sps:$4 sm:$0xff]   ;;  %v8496_v12 = vld [vmem:[%s11139_s0 + $0x390] ss:$196 sps:$4 sm:$0xff]  }
  0x83   :  { %2728 = vmatprep.subr.bf16.mxu0 %v2328_v15  ;;  %2769 = vmatprep.subr.bf16.mxu1 %v2334_v16  ;;  %v2388_v15 = vand.u32 %v8501_v9, %v8868_v4  ;;  %v2394_v16 = vand.u32 %v8504_v10, %v8868_v4 }
  0x85   :  { %7686 = vmatmul.mubr.msk.bf16.vlgmr.msra.gmra.mxu0 %vm559_vm2, %v9440_v24  ;;  %7687 = vmatmul.mubr.msk.bf16.vlgmr.msra.gmra.mxu1 %vm559_vm2, %v9440_v24 }
  0x86   :  { %2729 = vmatpush1.bf16.msra.mxu0 %v2325_v17  ;;  %2770 = vmatpush1.bf16.msra.mxu1 %v2331_v18  ;;  %v2391_v17 = vand.u32 %v8502_v14, %v8868_v4  ;;  %v8507_v18 = vld [vmem:[%s11139_s0 + $0x39c] ss:$196 sps:$4 sm:$0xff]  }
  0x87   :  { %2730 = vmatprep.subr.bf16.mxu0 %v8447_v22  ;;  %2771 = vmatprep.subr.bf16.mxu1 %v8450_v19  ;;  %v2385_v22 = vand.u32 %v8499_v13, %v8868_v4  ;;  %v8513_v19 = vld [vmem:[%s11139_s0 + $0x534] ss:$196 sps:$4 sm:$0x1f]   ;;  %v8558_v13 = vld [vmem:[%s11139_s0 + $0x7c0] ss:$196 sps:$4 sm:$0x1f]  }
  0x88   :  { %2748 = vmatprep.mubr.bf16.mxu0 %v11145_v1  ;;  %2789 = vmatprep.mubr.bf16.mxu1 %v11145_v1 }
  0x8a   :  { %2731 = vmatpush1.bf16.msra.mxu0 %v8445_v23  ;;  %2772 = vmatpush1.bf16.msra.mxu1 %v8448_v26  ;;  %v8505_v23 = vld [vmem:[%s11139_s0 + $0x398] ss:$196 sps:$4 sm:$0xff]   ;;  %v8511_v26 = vld [vmem:[%s11139_s0 + $0x530] ss:$196 sps:$4 sm:$0x1f]  }
  0x8b   :  { %2810 = vmatprep.subr.bf16.mxu0 %v2340_v28  ;;  %2851 = vmatprep.subr.bf16.mxu1 %v2346_v29  ;;  %v2400_v28 = vand.u32 %v8513_v19, %v8868_v4  ;;  %v2406_v29 = vand.u32 %v8516_v21, %v8868_v4  ;;  %v2397_v31 = vand.u32 %v8511_v26, %v8868_v4  ;;  %v8569_v19 = vld [vmem:[%s11139_s0 + $0x7cc] ss:$196 sps:$4 sm:$0x1f]  }
  0x8c   :  { %v4065_v21 = vand.u32 %v8558_v13, %v8868_v4  ;;  %v8588_v13 = vld [vmem:[%s11139_s0 + $0x658] ss:$196 sps:$4 sm:$0xff]  }
  0x8d   :  { %7688 = vmatmul.mubr.msk.bf16.vlgmr.msra.gmra.mxu0 %vm559_vm2, %v9440_v24  ;;  %7689 = vmatmul.mubr.msk.bf16.vlgmr.msra.gmra.mxu1 %vm559_vm2, %v9440_v24 }
  0x8e   :  { %2811 = vmatpush1.bf16.msra.mxu0 %v2337_v32  ;;  %2852 = vmatpush1.bf16.msra.mxu1 %v2343_v33  ;;  %v2403_v32 = vand.u32 %v8514_v27, %v8868_v4  ;;  %v8522_v33 = vld [vmem:[%s11139_s0 + $0x3b4] ss:$196 sps:$4 sm:$0xff]  }
  0x8f   :  { %2812 = vmatprep.subr.bf16.mxu0 %v8459_v30  ;;  %2853 = vmatprep.subr.bf16.mxu1 %v8462_v36  ;;  %v8519_v30 = vld [vmem:[%s11139_s0 + $0x3ac] ss:$196 sps:$4 sm:$0xff]  }
  0x90   :  { %2830 = vmatprep.mubr.bf16.mxu0 %v11145_v1  ;;  %2871 = vmatprep.mubr.bf16.mxu1 %v11145_v1  ;;  %v8528_v36 = vld [vmem:[%s11139_s0 + $0x54c] ss:$196 sps:$4 sm:$0x1f]  }
  0x92   :  { %2813 = vmatpush1.bf16.msra.mxu0 %v8457_v37  ;;  %2854 = vmatpush1.bf16.msra.mxu1 %v8460_v38  ;;  %v8517_v37 = vld [vmem:[%s11139_s0 + $0x3a8] ss:$196 sps:$4 sm:$0xff]   ;;  %v8520_v38 = vld [vmem:[%s11139_s0 + $0x3b0] ss:$196 sps:$4 sm:$0xff]  }
  0x93   :  { %2892 = vmatprep.subr.bf16.mxu0 %v2352_v41  ;;  %2933 = vmatprep.subr.bf16.mxu1 %v2358_v42  ;;  %v2412_v41 = vand.u32 %v8525_v34, %v8868_v4  ;;  %v2418_v42 = vand.u32 %v8528_v36, %v8868_v4  ;;  %v8570_v34 = vld [vmem:[%s11139_s0 + $0x7d0] ss:$196 sps:$4 sm:$0x1f]  }
  0x95   :  { %7690 = vmatmul.mubr.msk.bf16.vlgmr.msra.gmra.mxu0 %vm559_vm2, %v9440_v24  ;;  %7691 = vmatmul.mubr.msk.bf16.vlgmr.msra.gmra.mxu1 %vm559_vm2, %v9440_v24 }
  0x96   :  { %2893 = vmatpush1.bf16.msra.mxu0 %v2349_v44  ;;  %2934 = vmatpush1.bf16.msra.mxu1 %v2355_v45  ;;  %v2415_v44 = vand.u32 %v8526_v40, %v8868_v4  ;;  %v8531_v45 = vld [vmem:[%s11139_s0 + $0x3bc] ss:$196 sps:$4 sm:$0xff]  }
  0x97   :  { %2894 = vmatprep.subr.bf16.mxu0 %v8471_v43  ;;  %2935 = vmatprep.subr.bf16.mxu1 %v8474_v46  ;;  %v2409_v43 = vand.u32 %v8523_v39, %v8868_v4  ;;  %v8534_v46 = vld [vmem:[%s11139_s0 + $0x3c4] ss:$196 sps:$4 sm:$0xff]  }
  0x98   :  { %2912 = vmatprep.mubr.bf16.mxu0 %v11145_v1  ;;  %2953 = vmatprep.mubr.bf16.mxu1 %v11145_v1 }
  0x9a   :  { %2895 = vmatpush1.bf16.msra.mxu0 %v8469_v49  ;;  %2936 = vmatpush1.bf16.msra.mxu1 %v8472_v51  ;;  %v8532_v49 = vld [vmem:[%s11139_s0 + $0x3c0] ss:$196 sps:$4 sm:$0xff]   ;;  %v8538_v51 = vld [vmem:[%s11139_s0 + $0x558] ss:$196 sps:$4 sm:$0x1f]  }
  0x9b   :  { %2974 = vmatprep.subr.bf16.mxu0 %v2364_v53  ;;  %3015 = vmatprep.subr.bf16.mxu1 %v2370_v54  ;;  %v2421_v53 = vand.u32 %v8535_v50, %v8868_v4  ;;  %v2427_v54 = vand.u32 %v8538_v51, %v8868_v4  ;;  %v8573_v50 = vld [vmem:[%s11139_s0 + $0x640] ss:$196 sps:$4 sm:$0xff]   ;;  %v8576_v51 = vld [vmem:[%s11139_s0 + $0x648] ss:$196 sps:$4 sm:$0xff]  }
  0x9d   :  { %7692 = vmatmul.mubr.msk.bf16.vlgmr.msra.gmra.mxu0 %vm559_vm2, %v9440_v24  ;;  %7693 = vmatmul.mubr.msk.bf16.vlgmr.msra.gmra.mxu1 %vm559_vm2, %v9440_v24 }
  0x9e   :  { %2975 = vmatpush1.bf16.msra.mxu0 %v2361_v56  ;;  %3016 = vmatpush1.bf16.msra.mxu1 %v2367_v57  ;;  %v8541_v56 = vld [vmem:[%s11139_s0 + $0x3cc] ss:$196 sps:$4 sm:$0xff]   ;;  %v8548_v57 = vld [vmem:[%s11139_s0 + $0x7b4] ss:$196 sps:$4 sm:$0x1f]  }
  0x9f   :  { %2976 = vmatprep.subr.bf16.mxu0 %v8483_v55  ;;  %3017 = vmatprep.subr.bf16.mxu1 %v8486_v58  ;;  %v8545_v55 = vld [vmem:[%s11139_s0 + $0x7ac] ss:$196 sps:$4 sm:$0x1f]   ;;  %v4056_v63 = vand.u32 %v8548_v57, %v8868_v4 }
  0xa0   :  { %2994 = vmatprep.mubr.bf16.mxu0 %v11145_v1  ;;  %3035 = vmatprep.mubr.bf16.mxu1 %v11145_v1  ;;  %v8539_v58 = vld [vmem:[%s11139_s0 + $0x3c8] ss:$196 sps:$4 sm:$0xff]  }
  0xa2   :  { %2977 = vmatpush1.bf16.msra.mxu0 %v8481_v61  ;;  %3018 = vmatpush1.bf16.msra.mxu1 %v8484_v62  ;;  %v8546_v61 = vld [vmem:[%s11139_s0 + $0x7b0] ss:$196 sps:$4 sm:$0x1f]   ;;  %v4050_v62 = vand.u32 %v8545_v55, %v8868_v4  ;;  %v8582_v55 = vld [vmem:[%s11139_s0 + $0x7e0] ss:$196 sps:$4 sm:$0x1f]  }
  0xa3   :  { %3056 = vmatprep.subr.bf16.mxu0 %v2376_v2  ;;  %3097 = vmatprep.subr.bf16.mxu1 %v2382_v3  ;;  %v8554_v2 = vld [vmem:[%s11139_s0 + $0x62c] ss:$196 sps:$4 sm:$0xff]   ;;  %v4047_v3 = vand.u32 %v8543_v60, %v8868_v4 }
  0xa5   :  { %7694 = vmatmul.mubr.msk.bf16.vlgmr.msra.gmra.mxu0 %vm559_vm2, %v9440_v24  ;;  %7695 = vmatmul.mubr.msk.bf16.vlgmr.msra.gmra.mxu1 %vm559_vm2, %v9440_v24 }
  0xa6   :  { %3057 = vmatpush1.bf16.msra.mxu0 %v2373_v7  ;;  %3098 = vmatpush1.bf16.msra.mxu1 %v2379_v8  ;;  %v8560_v7 = vld [vmem:[%s11139_s0 + $0x7c4] ss:$196 sps:$4 sm:$0x1f]  }
  0xa7   :  { %3058 = vmatprep.subr.bf16.mxu0 %v8495_v5  ;;  %3099 = vmatprep.subr.bf16.mxu1 %v8498_v6  ;;  %v4053_v5 = vand.u32 %v8546_v61, %v8868_v4  ;;  %v8557_v6 = vld [vmem:[%s11139_s0 + $0x7bc] ss:$196 sps:$4 sm:$0x1f]  }
  0xa8   :  { %3076 = vmatprep.mubr.bf16.mxu0 %v11145_v1  ;;  %3117 = vmatprep.mubr.bf16.mxu1 %v11145_v1  ;;  %v8549_v8 = vld [vmem:[%s11139_s0 + $0x620] ss:$196 sps:$4 sm:$0xff]  }
  0xaa   :  { %3059 = vmatpush1.bf16.msra.mxu0 %v8493_v11  ;;  %3100 = vmatpush1.bf16.msra.mxu1 %v8496_v12  ;;  %v8552_v11 = vld [vmem:[%s11139_s0 + $0x628] ss:$196 sps:$4 sm:$0xff]   ;;  %v8555_v12 = vld [vmem:[%s11139_s0 + $0x7b8] ss:$196 sps:$4 sm:$0x1f]  }
  0xab   :  { %3138 = vmatprep.subr.bf16.mxu0 %v2388_v15  ;;  %3179 = vmatprep.subr.bf16.mxu1 %v2394_v16  ;;  %v4062_v16 = vand.u32 %v8557_v6, %v8868_v4  ;;  %v8590_v6 = vld [vmem:[%s11139_s0 + $0x65c] ss:$196 sps:$4 sm:$0xff]  }
  0xad   :  { %7696 = vmatmul.mubr.msk.bf16.vlgmr.msra.gmra.mxu0 %vm559_vm2, %v9440_v24  ;;  %7697 = vmatmul.mubr.msk.bf16.vlgmr.msra.gmra.mxu1 %vm559_vm2, %v9440_v24 }
  0xae   :  { %3139 = vmatpush1.bf16.msra.mxu0 %v2385_v22  ;;  %3180 = vmatpush1.bf16.msra.mxu1 %v2391_v17  ;;  %v4068_v22 = vand.u32 %v8560_v7, %v8868_v4  ;;  %v8596_v7 = vld [vmem:[%s11139_s0 + $0x7f4] ss:$196 sps:$4 sm:$0x1f]  }
  0xaf   :  { %3140 = vmatprep.subr.bf16.mxu0 %v8507_v18  ;;  %3181 = vmatprep.subr.bf16.mxu1 %v8510_v20  ;;  %v4059_v20 = vand.u32 %v8555_v12, %v8868_v4 }
  0xb0   :  { %3158 = vmatprep.mubr.bf16.mxu0 %v11145_v1  ;;  %3199 = vmatprep.mubr.bf16.mxu1 %v11145_v1 }
  0xb2   :  { %3141 = vmatpush1.bf16.msra.mxu0 %v8505_v23  ;;  %3182 = vmatpush1.bf16.msra.mxu1 %v8508_v25  ;;  %v8563_v23 = vld [vmem:[%s11139_s0 + $0x634] ss:$196 sps:$4 sm:$0xff]  }
  0xb3   :  { %3220 = vmatprep.subr.bf16.mxu0 %v2400_v28  ;;  %3261 = vmatprep.subr.bf16.mxu1 %v2406_v29  ;;  %v8572_v25 = vld [vmem:[%s11139_s0 + $0x7d4] ss:$196 sps:$4 sm:$0x1f]   ;;  %v8566_v28 = vld [vmem:[%s11139_s0 + $0x63c] ss:$196 sps:$4 sm:$0xff]  }
  0xb4   :  { %v8561_v29 = vld [vmem:[%s11139_s0 + $0x630] ss:$196 sps:$4 sm:$0xff]   ;;  %v4080_v39 = vand.u32 %v8572_v25, %v8868_v4  ;;  %v8599_v25 = vld [vmem:[%s11139_s0 + $0x664] ss:$196 sps:$4 sm:$0xff]  }
  0xb5   :  { %7698 = vmatmul.mubr.msk.bf16.vlgmr.msra.gmra.mxu0 %vm559_vm2, %v9440_v24  ;;  %7699 = vmatmul.mubr.msk.bf16.vlgmr.msra.gmra.mxu1 %vm559_vm2, %v9440_v24 }
  0xb6   :  { %3221 = vmatpush1.bf16.msra.mxu0 %v2397_v31  ;;  %3262 = vmatpush1.bf16.msra.mxu1 %v2403_v32  ;;  %v8564_v32 = vld [vmem:[%s11139_s0 + $0x638] ss:$196 sps:$4 sm:$0xff]  }
  0xb7   :  { %3222 = vmatprep.subr.bf16.mxu0 %v8519_v30  ;;  %3263 = vmatprep.subr.bf16.mxu1 %v8522_v33  ;;  %v8567_v33 = vld [vmem:[%s11139_s0 + $0x7c8] ss:$196 sps:$4 sm:$0x1f]  }
  0xb8   :  { %3240 = vmatprep.mubr.bf16.mxu0 %v11145_v1  ;;  %3281 = vmatprep.mubr.bf16.mxu1 %v11145_v1 }
  0xba   :  { %3223 = vmatpush1.bf16.msra.mxu0 %v8517_v37  ;;  %3264 = vmatpush1.bf16.msra.mxu1 %v8520_v38  ;;  %v4074_v38 = vand.u32 %v8569_v19, %v8868_v4 }
  0xbb   :  { %3302 = vmatprep.subr.bf16.mxu0 %v2412_v41  ;;  %3343 = vmatprep.subr.bf16.mxu1 %v2418_v42  ;;  %v8575_v42 = vld [vmem:[%s11139_s0 + $0x644] ss:$196 sps:$4 sm:$0xff]  }
  0xbd   :  { %7700 = vmatmul.mubr.msk.bf16.vlgmr.msra.gmra.mxu0 %vm559_vm2, %v9440_v24  ;;  %7701 = vmatmul.mubr.msk.bf16.vlgmr.msra.gmra.mxu1 %vm559_vm2, %v9440_v24 }
  0xbe   :  { %3303 = vmatpush1.bf16.msra.mxu0 %v2409_v43  ;;  %3344 = vmatpush1.bf16.msra.mxu1 %v2415_v44  ;;  %v8578_v43 = vld [vmem:[%s11139_s0 + $0x64c] ss:$196 sps:$4 sm:$0xff]   ;;  %v4071_v44 = vand.u32 %v8567_v33, %v8868_v4 }
  0xbf   :  { %3304 = vmatprep.subr.bf16.mxu0 %v8531_v45  ;;  %3345 = vmatprep.subr.bf16.mxu1 %v8534_v46  ;;  %v4077_v45 = vand.u32 %v8570_v34, %v8868_v4  ;;  %v8581_v46 = vld [vmem:[%s11139_s0 + $0x7dc] ss:$196 sps:$4 sm:$0x1f]   ;;  %v8608_v34 = vld [vmem:[%s11139_s0 + $0x804] ss:$196 sps:$4 sm:$0x1f]  }
  0xc0   :  { %3322 = vmatprep.mubr.bf16.mxu0 %v11145_v1  ;;  %3363 = vmatprep.mubr.bf16.mxu1 %v11145_v1 }
  0xc2   :  { %3305 = vmatpush1.bf16.msra.mxu0 %v8529_v48  ;;  %3346 = vmatpush1.bf16.msra.mxu1 %v8532_v49  ;;  %v8584_v49 = vld [vmem:[%s11139_s0 + $0x7e4] ss:$196 sps:$4 sm:$0x1f]  }
  0xc3   :  { %3384 = vmatprep.subr.bf16.mxu0 %v2424_v52  ;;  %8222 = vmatprep.subr.bf16.mxu1 %v11143_v35 }
  0xc5   :  { %7702 = vmatmul.mubr.msk.bf16.vlgmr.msra.gmra.mxu0 %vm559_vm2, %v9440_v24  ;;  %7703 = vmatmul.mubr.msk.bf16.vlgmr.msra.gmra.mxu1 %vm559_vm2, %v9440_v24 }
  0xc6   :  { %3385 = vmatpush1.bf16.msra.mxu0 %v2421_v53  ;;  %8223 = vmatpush3.bf16.msra.mxu1 %v2427_v54  ;;  %v8579_v54 = vld [vmem:[%s11139_s0 + $0x7d8] ss:$196 sps:$4 sm:$0x1f]  }
  0xc7   :  { %3386 = vmatprep.subr.bf16.mxu0 %v8541_v56  ;;  %8224 = vmatprep.subr.bf16.mxu1 %v11143_v35 }
  0xc8   :  { %3404 = vmatprep.mubr.bf16.mxu0 %v11145_v1  ;;  %8226 = vmatprep.mubr.msk.bf16.mxu1 %vm8841_vm3, %v11143_v35  ;;  %v8693_v35 = vld [vmem:[%s11139_s0 + $0x934] ss:$196 sps:$4 sm:$0xff]  }
  0xca   :  { %3387 = vmatpush1.bf16.msra.mxu0 %v8539_v58  ;;  %8225 = vmatpush3.bf16.msra.mxu1 %v8542_v59  ;;  %v4086_v58 = vand.u32 %v8581_v46, %v8868_v4  ;;  %v4092_v59 = vand.u32 %v8584_v49, %v8868_v4  ;;  %v4116_v46 = vand.u32 %v8608_v34, %v8868_v4  ;;  %v8611_v49 = vld [vmem:[%s11139_s0 + $0x674] ss:$196 sps:$4 sm:$0xff]   ;;  %v8624_v34 = vld [vmem:[%s11139_s0 + $0x688] ss:$196 sps:$4 sm:$0xff]  }
  0xcb   :  { %4205 = vmatprep.subr.bf16.mxu0 %v4050_v62  ;;  %4246 = vmatprep.subr.bf16.mxu1 %v4056_v63  ;;  %v4083_v62 = vand.u32 %v8579_v54, %v8868_v4  ;;  %v4089_v63 = vand.u32 %v8582_v55, %v8868_v4  ;;  %v8614_v54 = vld [vmem:[%s11139_s0 + $0x67c] ss:$196 sps:$4 sm:$0xff]  }
  0xcd   :  { %v9744_v9 = vpop.f32.mrf.mxu0  ;;  %v9746_v10 = vpop.f32.mrf.mxu1  ;;  %7704 = vmatmul.mubr.msk.bf16.vlgmr.msra.gmra.mxu0 %vm559_vm2, %v9440_v24  ;;  %8227 = vmatmul.mubr.msk.bf16.vlgmr.msra.gmra.mxu1 %vm559_vm2, %v9440_v24 }
  0xce   :  { %4206 = vmatpush1.bf16.msra.mxu0 %v4047_v3  ;;  %4247 = vmatpush1.bf16.msra.mxu1 %v4053_v5 }
  0xcf   :  { %v9761_v14 = vpop.f32.mrf.mxu0  ;;  %v9763_v15 = vpop.f32.mrf.mxu1  ;;  %4207 = vmatprep.subr.bf16.mxu0 %v8551_v0  ;;  %4248 = vmatprep.subr.bf16.mxu1 %v8554_v2  ;;  %v8587_v0 = vld [vmem:[%s11139_s0 + $0x654] ss:$196 sps:$4 sm:$0xff]   ;;  %v8593_v2 = vld [vmem:[%s11139_s0 + $0x7ec] ss:$196 sps:$4 sm:$0x1f]  }
  0xd0   :  { %4225 = vmatprep.mubr.bf16.mxu0 %v11145_v1  ;;  %4266 = vmatprep.mubr.bf16.mxu1 %v11145_v1  ;;  %v4098_v19 = vand.u32 %v8593_v2, %v8868_v4  ;;  %v9964_v2 = vld [vmem:[%s11140_s1] sm:$0xf] }
  0xd1   :  { %v752_v17 = vpop.f32.mrf.mxu0  ;;  %v793_v18 = vpop.f32.mrf.mxu1 }
  0xd2   :  { %4208 = vmatpush1.bf16.msra.mxu0 %v8549_v8  ;;  %4249 = vmatpush1.bf16.msra.mxu1 %v8552_v11  ;;  %v8585_v8 = vld [vmem:[%s11139_s0 + $0x650] ss:$196 sps:$4 sm:$0xff]  }
  0xd3   :  { %v753_v26 = vpop.f32.mrf.mxu0  ;;  %v794_v27 = vpop.f32.mrf.mxu1  ;;  %4287 = vmatprep.subr.bf16.mxu0 %v4062_v16  ;;  %4328 = vmatprep.subr.bf16.mxu1 %v4068_v22  ;;  %v8591_v16 = vld [vmem:[%s11139_s0 + $0x7e8] ss:$196 sps:$4 sm:$0x1f]   ;;  %v8594_v22 = vld [vmem:[%s11139_s0 + $0x7f0] ss:$196 sps:$4 sm:$0x1f]  }
  0xd4   :  { %v4095_v26 = vand.u32 %v8591_v16, %v8868_v4  ;;  %v4101_v27 = vand.u32 %v8594_v22, %v8868_v4 }
  0xd5   :  { %v9786_v30 = vpop.f32.mrf.mxu0  ;;  %v9788_v31 = vpop.f32.mrf.mxu1  ;;  %7904 = vmatmul.mubr.msk.bf16.vlgmr.msra.gmra.mxu0 %vm559_vm2, %v9440_v24  ;;  %7905 = vmatmul.mubr.msk.bf16.vlgmr.msra.gmra.mxu1 %vm559_vm2, %v9440_v24 }
  0xd6   :  { %4288 = vmatpush1.bf16.msra.mxu0 %v4059_v20  ;;  %4329 = vmatpush1.bf16.msra.mxu1 %v4065_v21  ;;  %v4104_v20 = vand.u32 %v8596_v7, %v8868_v4 }
  0xd7   :  { %v9803_v36 = vpop.f32.mrf.mxu0  ;;  %v9805_v37 = vpop.f32.mrf.mxu1  ;;  %4289 = vmatprep.subr.bf16.mxu0 %v8563_v23  ;;  %4330 = vmatprep.subr.bf16.mxu1 %v8566_v28  ;;  %v8602_v28 = vld [vmem:[%s11139_s0 + $0x66c] ss:$196 sps:$4 sm:$0xff]  }
  0xd8   :  { %4307 = vmatprep.mubr.bf16.mxu0 %v11145_v1  ;;  %4348 = vmatprep.mubr.bf16.mxu1 %v11145_v1 }
  0xd9   :  { %v834_v40 = vpop.f32.mrf.mxu0  ;;  %v875_v41 = vpop.f32.mrf.mxu1 }
  0xda   :  { %4290 = vmatpush1.bf16.msra.mxu0 %v8561_v29  ;;  %4331 = vmatpush1.bf16.msra.mxu1 %v8564_v32  ;;  %v8605_v29 = vld [vmem:[%s11139_s0 + $0x7fc] ss:$196 sps:$4 sm:$0x1f]   ;;  %v8600_v41 = vld [vmem:[%s11139_s0 + $0x668] ss:$196 sps:$4 sm:$0xff]  }
  0xdb   :  { %v835_v47 = vpop.f32.mrf.mxu0  ;;  %v876_v48 = vpop.f32.mrf.mxu1  ;;  %4369 = vmatprep.subr.bf16.mxu0 %v4074_v38  ;;  %4410 = vmatprep.subr.bf16.mxu1 %v4080_v39  ;;  %v8597_v38 = vld [vmem:[%s11139_s0 + $0x660] ss:$196 sps:$4 sm:$0xff]  }
  0xdd   :  { %v9831_v52 = vpop.f32.mrf.mxu0  ;;  %v9833_v53 = vpop.f32.mrf.mxu1  ;;  %7906 = vmatmul.mubr.msk.bf16.vlgmr.msra.gmra.mxu0 %vm559_vm2, %v9440_v24  ;;  %7907 = vmatmul.mubr.msk.bf16.vlgmr.msra.gmra.mxu1 %vm559_vm2, %v9440_v24 }
  0xde   :  { %4370 = vmatpush1.bf16.msra.mxu0 %v4071_v44  ;;  %4411 = vmatpush1.bf16.msra.mxu1 %v4077_v45 }
  0xdf   :  { %v9845_v56 = vpop.f32.mrf.mxu0  ;;  %v9847_v57 = vpop.f32.mrf.mxu1  ;;  %4371 = vmatprep.subr.bf16.mxu0 %v8575_v42  ;;  %4412 = vmatprep.subr.bf16.mxu1 %v8578_v43  ;;  %v8603_v42 = vld [vmem:[%s11139_s0 + $0x7f8] ss:$196 sps:$4 sm:$0x1f]   ;;  %v8606_v43 = vld [vmem:[%s11139_s0 + $0x800] ss:$196 sps:$4 sm:$0x1f]  }
  0xe0   :  { %4389 = vmatprep.mubr.bf16.mxu0 %v11145_v1  ;;  %4430 = vmatprep.mubr.bf16.mxu1 %v11145_v1 }
  0xe1   :  { %v916_v60 = vpop.f32.mrf.mxu0  ;;  %v957_v61 = vpop.f32.mrf.mxu1 }
  0xe2   :  { %4372 = vmatpush1.bf16.msra.mxu0 %v8573_v50  ;;  %4413 = vmatpush1.bf16.msra.mxu1 %v8576_v51  ;;  %v4107_v50 = vand.u32 %v8603_v42, %v8868_v4  ;;  %v4113_v51 = vand.u32 %v8606_v43, %v8868_v4  ;;  %v8620_v60 = vld [vmem:[%s11139_s0 + $0x814] ss:$196 sps:$4 sm:$0x1f]  }
  0xe3   :  { %v917_v3 = vpop.f32.mrf.mxu0  ;;  %v958_v5 = vpop.f32.mrf.mxu1  ;;  %4451 = vmatprep.subr.bf16.mxu0 %v4086_v58  ;;  %4492 = vmatprep.subr.bf16.mxu1 %v4092_v59  ;;  %v8617_v59 = vld [vmem:[%s11139_s0 + $0x80c] ss:$196 sps:$4 sm:$0x1f]  }
  0xe4   :  { %v8609_v61 = vld [vmem:[%s11139_s0 + $0x670] ss:$196 sps:$4 sm:$0xff]   ;;  %v8615_v3 = vld [vmem:[%s11139_s0 + $0x808] ss:$196 sps:$4 sm:$0x1f]  }
  0xe5   :  { %v9870_v11 = vpop.f32.mrf.mxu0  ;;  %v9872_v12 = vpop.f32.mrf.mxu1  ;;  %7908 = vmatmul.mubr.msk.bf16.vlgmr.msra.gmra.mxu0 %vm559_vm2, %v9440_v24  ;;  %7909 = vmatmul.mubr.msk.bf16.vlgmr.msra.gmra.mxu1 %vm559_vm2, %v9440_v24  ;;  %v8618_v5 = vld [vmem:[%s11139_s0 + $0x810] ss:$196 sps:$4 sm:$0x1f]  }
  0xe6   :  { %4452 = vmatpush1.bf16.msra.mxu0 %v4083_v62  ;;  %4493 = vmatpush1.bf16.msra.mxu1 %v4089_v63  ;;  %v8612_v62 = vld [vmem:[%s11139_s0 + $0x678] ss:$196 sps:$4 sm:$0xff]  }
  0xe7   :  { %v9887_v17 = vpop.f32.mrf.mxu0  ;;  %v9889_v18 = vpop.f32.mrf.mxu1  ;;  %4453 = vmatprep.subr.bf16.mxu0 %v8587_v0  ;;  %4494 = vmatprep.subr.bf16.mxu1 %v8590_v6 }
  0xe8   :  { %4471 = vmatprep.mubr.bf16.mxu0 %v11145_v1  ;;  %4512 = vmatprep.mubr.bf16.mxu1 %v11145_v1 }
  0xe9   :  { %v998_v21 = vpop.f32.mrf.mxu0  ;;  %v1039_v23 = vpop.f32.mrf.mxu1 }
  0xea   :  { %4454 = vmatpush1.bf16.msra.mxu0 %v8585_v8  ;;  %4495 = vmatpush1.bf16.msra.mxu1 %v8588_v13  ;;  %v4122_v8 = vand.u32 %v8617_v59, %v8868_v4  ;;  %v4128_v13 = vand.u32 %v8620_v60, %v8868_v4  ;;  %v8623_v21 = vld [vmem:[%s11139_s0 + $0x684] ss:$196 sps:$4 sm:$0xff]   ;;  %v8629_v23 = vld [vmem:[%s11139_s0 + $0x81c] ss:$196 sps:$4 sm:$0x1f]  }
  0xeb   :  { %v999_v32 = vpop.f32.mrf.mxu0  ;;  %v1040_v33 = vpop.f32.mrf.mxu1  ;;  %4533 = vmatprep.subr.bf16.mxu0 %v4098_v19  ;;  %4574 = vmatprep.subr.bf16.mxu1 %v4104_v20  ;;  %v4119_v19 = vand.u32 %v8615_v3, %v8868_v4  ;;  %v4125_v20 = vand.u32 %v8618_v5, %v8868_v4  ;;  %v8644_v60 = vld [vmem:[%s11139_s0 + $0x834] ss:$196 sps:$4 sm:$0x1f]  }
  0xec   :  { %v8636_v5 = vld [vmem:[%s11139_s0 + $0x698] ss:$196 sps:$4 sm:$0xff]  }
  0xed   :  { %v9912_v39 = vpop.f32.mrf.mxu0  ;;  %v9914_v40 = vpop.f32.mrf.mxu1  ;;  %7910 = vmatmul.mubr.msk.bf16.vlgmr.msra.gmra.mxu0 %vm559_vm2, %v9440_v24  ;;  %7911 = vmatmul.mubr.msk.bf16.vlgmr.msra.gmra.mxu1 %vm559_vm2, %v9440_v24  ;;  %v4110_v24 = vand.u32 %v8605_v29, %v8868_v4  ;;  %v8621_v29 = vld [vmem:[%s11139_s0 + $0x680] ss:$196 sps:$4 sm:$0xff]  }
  0xee   :  { %4534 = vmatpush1.bf16.msra.mxu0 %v4095_v26  ;;  %4575 = vmatpush1.bf16.msra.mxu1 %v4101_v27  ;;  %v8626_v27 = vld [vmem:[%s11139_s0 + $0x68c] ss:$196 sps:$4 sm:$0xff]  }
  0xef   :  { %v9929_v44 = vpop.f32.mrf.mxu0  ;;  %v9931_v45 = vpop.f32.mrf.mxu1  ;;  %4535 = vmatprep.subr.bf16.mxu0 %v8599_v25  ;;  %4576 = vmatprep.subr.bf16.mxu1 %v8602_v28  ;;  %v8632_v28 = vld [vmem:[%s11139_s0 + $0x824] ss:$196 sps:$4 sm:$0x1f]  }
  0xf0   :  { %4553 = vmatprep.mubr.bf16.mxu0 %v11145_v1  ;;  %4594 = vmatprep.mubr.bf16.mxu1 %v11145_v1 }
  0xf1   :  { %v1080_v47 = vpop.f32.mrf.mxu0  ;;  %v1121_v48 = vpop.f32.mrf.mxu1 }
  0xf2   :  { %4536 = vmatpush1.bf16.msra.mxu0 %v8597_v38  ;;  %4577 = vmatpush1.bf16.msra.mxu1 %v8600_v41  ;;  %v8627_v38 = vld [vmem:[%s11139_s0 + $0x818] ss:$196 sps:$4 sm:$0x1f]   ;;  %v8630_v41 = vld [vmem:[%s11139_s0 + $0x820] ss:$196 sps:$4 sm:$0x1f]  }
  0xf3   :  { %v1081_v55 = vpop.f32.mrf.mxu0  ;;  %v1122_v58 = vpop.f32.mrf.mxu1  ;;  %4615 = vmatprep.subr.bf16.mxu0 %v4110_v24  ;;  %4656 = vmatprep.subr.bf16.mxu1 %v4116_v46  ;;  %v4134_v24 = vand.u32 %v8629_v23, %v8868_v4  ;;  %v4140_v46 = vand.u32 %v8632_v28, %v8868_v4  ;;  %v8647_v28 = vld [vmem:[%s11139_s0 + $0x6a4] ss:$196 sps:$4 sm:$0xff]  }
  0xf4   :  { %v8641_v55 = vld [vmem:[%s11139_s0 + $0x82c] ss:$196 sps:$4 sm:$0x1f]  }
  0xf5   :  { %v9957_v63 = vpop.f32.mrf.mxu0  ;;  %v9959_v0 = vpop.f32.mrf.mxu1  ;;  %7912 = vmatmul.mubr.msk.bf16.vlgmr.msra.gmra.mxu0 %vm559_vm2, %v9964_v2  ;;  %7913 = vmatmul.mubr.msk.bf16.vlgmr.msra.gmra.mxu1 %vm559_vm2, %v9964_v2 }
  0xf6   :  { %4616 = vmatpush1.bf16.msra.mxu0 %v4107_v50  ;;  %4657 = vmatpush1.bf16.msra.mxu1 %v4113_v51  ;;  %v8638_v50 = vld [vmem:[%s11139_s0 + $0x69c] ss:$196 sps:$4 sm:$0xff]   ;;  %v4131_v51 = vand.u32 %v8627_v38, %v8868_v4 }
  0xf7   :  { %v9976_v6 = vpop.f32.mrf.mxu0  ;;  %v9978_v7 = vpop.f32.mrf.mxu1  ;;  %4617 = vmatprep.subr.bf16.mxu0 %v8611_v49  ;;  %4658 = vmatprep.subr.bf16.mxu1 %v8614_v54  ;;  %v8635_v49 = vld [vmem:[%s11139_s0 + $0x694] ss:$196 sps:$4 sm:$0xff]   ;;  %v4137_v54 = vand.u32 %v8630_v41, %v8868_v4  ;;  %v8650_v41 = vld [vmem:[%s11139_s0 + $0x6ac] ss:$196 sps:$4 sm:$0xff]  }
  0xf8   :  { %11147 = vst [vmem:[#allocation2_spill] sm:$0xff] %v9976_v6  ;;  %11148 = vst [vmem:[#allocation3_spill] sm:$0xff] %v9978_v7  ;;  %4635 = vmatprep.mubr.bf16.mxu0 %v11145_v1  ;;  %4676 = vmatprep.mubr.bf16.mxu1 %v11145_v1 }
  0xf9   :  { %v1162_v16 = vpop.f32.mrf.mxu0  ;;  %v1203_v22 = vpop.f32.mrf.mxu1 }
  0xfa   :  { %4618 = vmatpush1.bf16.msra.mxu0 %v8609_v61  ;;  %4659 = vmatpush1.bf16.msra.mxu1 %v8612_v62  ;;  %v8633_v61 = vld [vmem:[%s11139_s0 + $0x690] ss:$196 sps:$4 sm:$0xff]  }
  0xfb   :  { %v1163_v25 = vpop.f32.mrf.mxu0  ;;  %v1204_v26 = vpop.f32.mrf.mxu1  ;;  %4697 = vmatprep.subr.bf16.mxu0 %v4122_v8  ;;  %4738 = vmatprep.subr.bf16.mxu1 %v4128_v13  ;;  %v8639_v8 = vld [vmem:[%s11139_s0 + $0x828] ss:$196 sps:$4 sm:$0x1f]   ;;  %v8642_v13 = vld [vmem:[%s11139_s0 + $0x830] ss:$196 sps:$4 sm:$0x1f]  }
  0xfc   :  { %v4143_v26 = vand.u32 %v8639_v8, %v8868_v4 }
  0xfd   :  { %v10001_v32 = vpop.f32.mrf.mxu0  ;;  %v10003_v33 = vpop.f32.mrf.mxu1  ;;  %7914 = vmatmul.mubr.msk.bf16.vlgmr.msra.gmra.mxu0 %vm559_vm2, %v9964_v2  ;;  %7915 = vmatmul.mubr.msk.bf16.vlgmr.msra.gmra.mxu1 %vm559_vm2, %v9964_v2 }
  0xfe   :  { %11149 = vst [vmem:[#allocation4_spill] sm:$0xff] %v10001_v32  ;;  %11150 = vst [vmem:[#allocation5_spill] sm:$0xff] %v10003_v33  ;;  %4698 = vmatpush1.bf16.msra.mxu0 %v4119_v19  ;;  %4739 = vmatpush1.bf16.msra.mxu1 %v4125_v20  ;;  %v4146_v19 = vand.u32 %v8641_v55, %v8868_v4  ;;  %v4152_v20 = vand.u32 %v8644_v60, %v8868_v4 }
  0xff   :  { %v10018_v42 = vpop.f32.mrf.mxu0  ;;  %v10020_v43 = vpop.f32.mrf.mxu1  ;;  %4699 = vmatprep.subr.bf16.mxu0 %v8623_v21  ;;  %4740 = vmatprep.subr.bf16.mxu1 %v8626_v27  ;;  %v7030_v21 = vld [vmem:[%s11141_s2] sm:$0xff]  ;;  %v4149_v27 = vand.u32 %v8642_v13, %v8868_v4 }
 0x100   :  { %11151 = vst [vmem:[#allocation6_spill] sm:$0xff] %v10018_v42  ;;  %11152 = vst [vmem:[#allocation7_spill] sm:$0xff] %v10020_v43  ;;  %4717 = vmatprep.mubr.bf16.mxu0 %v11145_v1  ;;  %4758 = vmatprep.mubr.bf16.mxu1 %v11145_v1 }
 0x101   :  { %v1244_v47 = vpop.f32.mrf.mxu0  ;;  %v1285_v48 = vpop.f32.mrf.mxu1  ;;  %7033 = vperm.xlu0 %8250, %v7030_v21  }
 0x102   :  { %4700 = vmatpush1.bf16.msra.mxu0 %v8621_v29  ;;  %4741 = vmatpush1.bf16.msra.mxu1 %v8624_v34  ;;  %v8653_v29 = vld [vmem:[%s11139_s0 + $0x83c] ss:$196 sps:$4 sm:$0x1f]  }
 0x103   :  { %v1245_v58 = vpop.f32.mrf.mxu0  ;;  %v1286_v59 = vpop.f32.mrf.mxu1  ;;  %4779 = vmatprep.subr.bf16.mxu0 %v4134_v24  ;;  %4820 = vmatprep.subr.bf16.mxu1 %v4140_v46  ;;  %v8656_v24 = vld [vmem:[%s11139_s0 + $0x844] ss:$196 sps:$4 sm:$0x1f]  }
 0x104   :  { %v8645_v46 = vld [vmem:[%s11139_s0 + $0x6a0] ss:$196 sps:$4 sm:$0xff]   ;;  %v4158_v58 = vand.u32 %v8653_v29, %v8868_v4  ;;  %v4164_v59 = vand.u32 %v8656_v24, %v8868_v4 }
 0x105   :  { %v10043_v62 = vpop.f32.mrf.mxu0  ;;  %v10045_v3 = vpop.f32.mrf.mxu1  ;;  %7916 = vmatmul.mubr.msk.bf16.vlgmr.msra.gmra.mxu0 %vm559_vm2, %v9964_v2  ;;  %7917 = vmatmul.mubr.msk.bf16.vlgmr.msra.gmra.mxu1 %vm559_vm2, %v9964_v2 }
 0x106   :  { %11153 = vst [vmem:[#allocation8_spill] sm:$0xff] %v10043_v62  ;;  %11154 = vst [vmem:[#allocation9_spill] sm:$0xff] %v10045_v3  ;;  %4780 = vmatpush1.bf16.msra.mxu0 %v4131_v51  ;;  %4821 = vmatpush1.bf16.msra.mxu1 %v4137_v54  ;;  %v8654_v51 = vld [vmem:[%s11139_s0 + $0x840] ss:$196 sps:$4 sm:$0x1f]  }
 0x107   :  { %v10060_v16 = vpop.f32.mrf.mxu0  ;;  %v10062_v22 = vpop.f32.mrf.mxu1  ;;  %4781 = vmatprep.subr.bf16.mxu0 %v8635_v49  ;;  %4822 = vmatprep.subr.bf16.mxu1 %v8638_v50  ;;  %v8648_v49 = vld [vmem:[%s11139_s0 + $0x6a8] ss:$196 sps:$4 sm:$0xff]   ;;  %v8651_v50 = vld [vmem:[%s11139_s0 + $0x838] ss:$196 sps:$4 sm:$0x1f]   ;;  %v4161_v13 = vand.u32 %v8654_v51, %v8868_v4 }
 0x108   :  { %11155 = vst [vmem:[#allocation10_spill] sm:$0xff] %v10060_v16  ;;  %11156 = vst [vmem:[#allocation11_spill] sm:$0xff] %v10062_v22  ;;  %4799 = vmatprep.mubr.bf16.mxu0 %v11145_v1  ;;  %4840 = vmatprep.mubr.bf16.mxu1 %v11145_v1  ;;  %v4155_v8 = vand.u32 %v8651_v50, %v8868_v4 }
 0x109   :  { %v1326_v23 = vpop.f32.mrf.mxu0  ;;  %v1367_v25 = vpop.f32.mrf.mxu1 }
 0x10a   :  { %4782 = vmatpush1.bf16.msra.mxu0 %v8633_v61  ;;  %4823 = vmatpush1.bf16.msra.mxu1 %v8636_v5  ;;  %v8659_v5 = vld [vmem:[%s11139_s0 + $0x6b4] ss:$196 sps:$4 sm:$0xff]  }
 0x10b   :  { %v1327_v34 = vpop.f32.mrf.mxu0  ;;  %v1368_v38 = vpop.f32.mrf.mxu1  ;;  %4861 = vmatprep.subr.bf16.mxu0 %v4146_v19  ;;  %4902 = vmatprep.subr.bf16.mxu1 %v4152_v20  ;;  %v8662_v19 = vld [vmem:[%s11139_s0 + $0x6bc] ss:$196 sps:$4 sm:$0xff]   ;;  %v8665_v20 = vld [vmem:[%s11139_s0 + $0x84c] ss:$196 sps:$4 sm:$0x1f]  }
 0x10c   :  { %v8668_v25 = vld [vmem:[%s11139_s0 + $0x854] ss:$196 sps:$4 sm:$0x1f]   ;;  %v8663_v34 = vld [vmem:[%s11139_s0 + $0x848] ss:$196 sps:$4 sm:$0x1f]  }
 0x10d   :  { %v10088_v47 = vpop.f32.mrf.mxu0  ;;  %v10090_v48 = vpop.f32.mrf.mxu1  ;;  %7918 = vmatmul.mubr.msk.bf16.vlgmr.msra.gmra.mxu0 %vm559_vm2, %v9964_v2  ;;  %7919 = vmatmul.mubr.msk.bf16.vlgmr.msra.gmra.mxu1 %vm559_vm2, %v9964_v2  ;;  %v8666_v38 = vld [vmem:[%s11139_s0 + $0x850] ss:$196 sps:$4 sm:$0x1f]  }
 0x10e   :  { %11157 = vst [vmem:[#allocation12_spill] sm:$0xff] %v10088_v47  ;;  %11158 = vst [vmem:[#allocation13_spill] sm:$0xff] %v10090_v48  ;;  %4862 = vmatpush1.bf16.msra.mxu0 %v4143_v26  ;;  %4903 = vmatpush1.bf16.msra.mxu1 %v4149_v27  ;;  %v8657_v26 = vld [vmem:[%s11139_s0 + $0x6b0] ss:$196 sps:$4 sm:$0xff]   ;;  %v8660_v27 = vld [vmem:[%s11139_s0 + $0x6b8] ss:$196 sps:$4 sm:$0xff]  }
 0x10f   :  { %v10105_v54 = vpop.f32.mrf.mxu0  ;;  %v10107_v55 = vpop.f32.mrf.mxu1  ;;  %4863 = vmatprep.subr.bf16.mxu0 %v8647_v28  ;;  %4904 = vmatprep.subr.bf16.mxu1 %v8650_v41 }
 0x110   :  { %11159 = vst [vmem:[#allocation14_spill] sm:$0xff] %v10105_v54  ;;  %11160 = vst [vmem:[#allocation15_spill] sm:$0xff] %v10107_v55  ;;  %4881 = vmatprep.mubr.bf16.mxu0 %v11145_v1  ;;  %4922 = vmatprep.mubr.bf16.mxu1 %v11145_v1 }
 0x111   :  { %v1408_v60 = vpop.f32.mrf.mxu0  ;;  %v1449_v61 = vpop.f32.mrf.mxu1 }
 0x112   :  { %4864 = vmatpush1.bf16.msra.mxu0 %v8645_v46  ;;  %4905 = vmatpush1.bf16.msra.mxu1 %v8648_v49  ;;  %v4170_v46 = vand.u32 %v8665_v20, %v8868_v4  ;;  %v4176_v49 = vand.u32 %v8668_v25, %v8868_v4  ;;  %v8671_v60 = vld [vmem:[%s11139_s0 + $0x6c4] ss:$196 sps:$4 sm:$0xff]   ;;  %v8674_v61 = vld [vmem:[%s11139_s0 + $0x6cc] ss:$196 sps:$4 sm:$0xff]  }
 0x113   :  { %v1409_v21 = vpop.f32.mrf.mxu0  ;;  %v1450_v23 = vpop.f32.mrf.mxu1  ;;  %4943 = vmatprep.subr.bf16.mxu0 %v4158_v58  ;;  %4984 = vmatprep.subr.bf16.mxu1 %v4164_v59  ;;  %v4167_v58 = vand.u32 %v8663_v34, %v8868_v4  ;;  %v4173_v59 = vand.u32 %v8666_v38, %v8868_v4  ;;  %v8672_v25 = vld [vmem:[%s11139_s0 + $0x6c8] ss:$196 sps:$4 sm:$0xff]  }
 0x114   :  { %v8669_v23 = vld [vmem:[%s11139_s0 + $0x6c0] ss:$196 sps:$4 sm:$0xff]  }
 0x115   :  { %v10133_v28 = vpop.f32.mrf.mxu0  ;;  %v10135_v29 = vpop.f32.mrf.mxu1  ;;  %7920 = vmatmul.mubr.msk.bf16.vlgmr.msra.gmra.mxu0 %vm559_vm2, %v9964_v2  ;;  %7921 = vmatmul.mubr.msk.bf16.vlgmr.msra.gmra.mxu1 %vm559_vm2, %v9964_v2 }
 0x116   :  { %11161 = vst [vmem:[#allocation16_spill] sm:$0xff] %v10133_v28  ;;  %11162 = vst [vmem:[#allocation17_spill] sm:$0xff] %v10135_v29  ;;  %4944 = vmatpush1.bf16.msra.mxu0 %v4155_v8  ;;  %4985 = vmatpush1.bf16.msra.mxu1 %v4161_v13  ;;  %v8677_v13 = vld [vmem:[%s11139_s0 + $0x85c] ss:$196 sps:$4 sm:$0x1f]  }
 0x117   :  { %v10147_v41 = vpop.f32.mrf.mxu0  ;;  %v10149_v24 = vpop.f32.mrf.mxu1  ;;  %4945 = vmatprep.subr.bf16.mxu0 %v8659_v5  ;;  %4986 = vmatprep.subr.bf16.mxu1 %v8662_v19  ;;  %v8680_v19 = vld [vmem:[%s11139_s0 + $0x864] ss:$196 sps:$4 sm:$0x1f]  }
 0x118   :  { %11163 = vst [vmem:[#allocation18_spill] sm:$0xff] %v10147_v41  ;;  %11164 = vst [vmem:[#allocation19_spill] sm:$0xff] %v10149_v24  ;;  %4963 = vmatprep.mubr.bf16.mxu0 %v11145_v1  ;;  %5004 = vmatprep.mubr.bf16.mxu1 %v11145_v1 }
 0x119   :  { %v1490_v50 = vpop.f32.mrf.mxu0  ;;  %v1531_v51 = vpop.f32.mrf.mxu1 }
 0x11a   :  { %4946 = vmatpush1.bf16.msra.mxu0 %v8657_v26  ;;  %4987 = vmatpush1.bf16.msra.mxu1 %v8660_v27  ;;  %v8675_v26 = vld [vmem:[%s11139_s0 + $0x858] ss:$196 sps:$4 sm:$0x1f]   ;;  %v8678_v27 = vld [vmem:[%s11139_s0 + $0x860] ss:$196 sps:$4 sm:$0x1f]  }
 0x11b   :  { %v1491_v5 = vpop.f32.mrf.mxu0  ;;  %v1532_v8 = vpop.f32.mrf.mxu1  ;;  %5025 = vmatprep.subr.bf16.mxu0 %v4170_v46  ;;  %5066 = vmatprep.subr.bf16.mxu1 %v4176_v49  ;;  %v4182_v46 = vand.u32 %v8677_v13, %v8868_v4  ;;  %v4188_v49 = vand.u32 %v8680_v19, %v8868_v4  ;;  %v8689_v13 = vld [vmem:[%s11139_s0 + $0xabc] ss:$196 sps:$4 sm:$0x1f]  }
 0x11c   :  { %v8686_v8 = vld [vmem:[%s11139_s0 + $0x6dc] ss:$196 sps:$4 sm:$0xff]  }
 0x11d   :  { %v10169_v20 = vpop.f32.mrf.mxu0  ;;  %v10171_v21 = vpop.f32.mrf.mxu1  ;;  %7922 = vmatmul.mubr.msk.bf16.vlgmr.msra.gmra.mxu0 %vm559_vm2, %v9964_v2  ;;  %7923 = vmatmul.mubr.msk.bf16.vlgmr.msra.gmra.mxu1 %vm559_vm2, %v9964_v2 }
 0x11e   :  { %11165 = vst [vmem:[#allocation20_spill] sm:$0xff] %v10169_v20  ;;  %11166 = vst [vmem:[#allocation21_spill] sm:$0xff] %v10171_v21  ;;  %5026 = vmatpush1.bf16.msra.mxu0 %v4167_v58  ;;  %5067 = vmatpush1.bf16.msra.mxu1 %v4173_v59  ;;  %v4179_v58 = vand.u32 %v8675_v26, %v8868_v4  ;;  %v4185_v59 = vand.u32 %v8678_v27, %v8868_v4  ;;  %v8684_v26 = vld [vmem:[%s11139_s0 + $0x6d8] ss:$196 sps:$4 sm:$0xff]  }
 0x11f   :  { %v10189_v34 = vpop.f32.mrf.mxu0  ;;  %v10191_v38 = vpop.f32.mrf.mxu1  ;;  %5027 = vmatprep.subr.bf16.mxu0 %v8671_v60  ;;  %5068 = vmatprep.subr.bf16.mxu1 %v8674_v61  ;;  %v8683_v60 = vld [vmem:[%s11139_s0 + $0x6d4] ss:$196 sps:$4 sm:$0xff]  }
 0x120   :  { %11167 = vst [vmem:[#allocation22_spill] sm:$0xff] %v10189_v34  ;;  %11168 = vst [vmem:[#allocation23_spill] sm:$0xff] %v10191_v38  ;;  %5045 = vmatprep.mubr.bf16.mxu0 %v11145_v1  ;;  %5086 = vmatprep.mubr.bf16.mxu1 %v11145_v1  ;;  %v8687_v27 = vld [vmem:[%s11139_s0 + $0xab8] ss:$196 sps:$4 sm:$0x1f]  }
 0x121   :  { %v1572_v50 = vpop.f32.mrf.mxu0  ;;  %v1613_v51 = vpop.f32.mrf.mxu1 }
 0x122   :  { %5028 = vmatpush1.bf16.msra.mxu0 %v8669_v23  ;;  %5069 = vmatpush1.bf16.msra.mxu1 %v8672_v25  ;;  %v8681_v25 = vld [vmem:[%s11139_s0 + $0x6d0] ss:$196 sps:$4 sm:$0xff]   ;;  %v5814_v51 = vand.u32 %v8689_v13, %v8868_v4  ;;  %v8697_v13 = vld [vmem:[%s11139_s0 + $0xac4] ss:$196 sps:$4 sm:$0x1f]  }
 0x123   :  { %v1573_v61 = vpop.f32.mrf.mxu0  ;;  %v1614_v5 = vpop.f32.mrf.mxu1  ;;  %5107 = vmatprep.subr.bf16.mxu0 %v4182_v46  ;;  %5148 = vmatprep.subr.bf16.mxu1 %v4188_v49  ;;  %v8690_v46 = vld [vmem:[%s11139_s0 + $0x868] ss:$196 sps:$4 sm:$0x1f]  }
 0x124   :  { %v4191_v61 = vand.u32 %v8690_v46, %v8868_v4  ;;  %v5811_v5 = vand.u32 %v8687_v27, %v8868_v4  ;;  %v8691_v46 = vld [vmem:[%s11139_s0 + $0x930] ss:$196 sps:$4 sm:$0xff]  }
 0x125   :  { %v10208_v19 = vpop.f32.mrf.mxu0  ;;  %v10210_v23 = vpop.f32.mrf.mxu1  ;;  %7924 = vmatmul.mubr.msk.bf16.vlgmr.msra.gmra.mxu0 %vm559_vm2, %v9964_v2  ;;  %7925 = vmatmul.mubr.msk.bf16.vlgmr.msra.gmra.mxu1 %vm559_vm2, %v9964_v2 }
 0x126   :  { %11169 = vst [vmem:[#allocation24_spill] sm:$0xff] %v10208_v19  ;;  %11170 = vst [vmem:[#allocation25_spill] sm:$0xff] %v10210_v23  ;;  %5108 = vmatpush1.bf16.msra.mxu0 %v4179_v58  ;;  %5149 = vmatpush1.bf16.msra.mxu1 %v4185_v59 }
 0x127   :  { %v10228_v49 = vpop.f32.mrf.mxu0  ;;  %v10230_v50 = vpop.f32.mrf.mxu1  ;;  %5109 = vmatprep.subr.bf16.mxu0 %v8683_v60  ;;  %5150 = vmatprep.subr.bf16.mxu1 %v8686_v8 }
 0x128   :  { %11171 = vst [vmem:[#allocation26_spill] sm:$0xff] %v10228_v49  ;;  %11172 = vst [vmem:[#allocation27_spill] sm:$0xff] %v10230_v50  ;;  %5127 = vmatprep.mubr.bf16.mxu0 %v11145_v1  ;;  %5168 = vmatprep.mubr.bf16.mxu1 %v11145_v1  ;;  %v11173_v50 = vmov 0.0   ;;  %v5820_v1 = vand.u32 %v8697_v13, %v8868_v4  ;;  %v8706_v13 = vld [vmem:[%s11139_s0 + $0x944] ss:$196 sps:$4 sm:$0xff]  }
 0x129   :  { %v1654_v58 = vpop.f32.mrf.mxu0  ;;  %v1695_v59 = vpop.f32.mrf.mxu1 }
 0x12a   :  { %5110 = vmatpush1.bf16.msra.mxu0 %v8681_v25  ;;  %5151 = vmatpush1.bf16.msra.mxu1 %v8684_v26  ;;  %v8700_v25 = vld [vmem:[%s11139_s0 + $0xacc] ss:$196 sps:$4 sm:$0x1f]   ;;  %v8695_v58 = vld [vmem:[%s11139_s0 + $0xac0] ss:$196 sps:$4 sm:$0x1f]  }
 0x12b   :  { %v1655_v60 = vpop.f32.mrf.mxu0  ;;  %v1696_v8 = vpop.f32.mrf.mxu1  ;;  %8230 = vmatprep.subr.bf16.mxu0 %v11173_v50  ;;  %5969 = vmatprep.subr.bf16.mxu1 %v5814_v51  ;;  %v8694_v51 = vld [vmem:[%s11139_s0 + $0x6e0] ss:$196 sps:$4 sm:$0xff]   ;;  %v8698_v59 = vld [vmem:[%s11139_s0 + $0xac8] ss:$196 sps:$4 sm:$0x1f]  }
 0x12c   :  { %v5823_v23 = vand.u32 %v8698_v59, %v8868_v4  ;;  %v8710_v59 = vld [vmem:[%s11139_s0 + $0xad8] ss:$196 sps:$4 sm:$0x1f]  }
 0x12d   :  { %v10247_v26 = vpop.f32.mrf.mxu0  ;;  %v10249_v27 = vpop.f32.mrf.mxu1  ;;  %7926 = vmatmul.mubr.msk.bf16.vlgmr.msra.gmra.mxu0 %vm559_vm2, %v9964_v2  ;;  %7927 = vmatmul.mubr.msk.bf16.vlgmr.msra.gmra.mxu1 %vm559_vm2, %v9964_v2  ;;  %v5835_v20 = vand.u32 %v8710_v59, %v8868_v4 }
 0x12e   :  { %11174 = vst [vmem:[#allocation28_spill] sm:$0xff] %v10247_v26  ;;  %8231 = vmatpush3.bf16.msra.mxu0 %v4191_v61  ;;  %5970 = vmatpush1.bf16.msra.mxu1 %v5811_v5  ;;  %v5826_v26 = vand.u32 %v8700_v25, %v8868_v4  ;;  %v11175_v61 = vmov 0  }
 0x12f   :  { %v8220_v60 = vpop.f32.mrf.mxu0  ;;  %v10267_v8 = vpop.f32.mrf.mxu1  ;;  %8232 = vmatprep.subr.bf16.mxu0 %v11173_v50  ;;  %5971 = vmatprep.subr.bf16.mxu1 %v8693_v35  ;;  %v8703_v35 = vld [vmem:[%s11139_s0 + $0x93c] ss:$196 sps:$4 sm:$0xff]  }
 0x130   :  { %8234 = vmatprep.mubr.msk.bf16.mxu0 %vm8841_vm3, %v11173_v50  ;;  %5989 = vmatprep.mubr.bf16.mxu1 %v11175_v61  ;;  %v5817_v60 = vand.u32 %v8695_v58, %v8868_v4 }
 0x131   :  { %v1735_v5 = vpop.f32.mrf.mxu0  ;;  %v2467_v49 = vpop.f32.mrf.mxu1 }
 0x132   :  { %8233 = vmatpush3.bf16.msra.mxu0 %v8694_v51  ;;  %5972 = vmatpush1.bf16.msra.mxu1 %v8691_v46  ;;  %v8709_v49 = vld [vmem:[%s11139_s0 + $0xad4] ss:$196 sps:$4 sm:$0x1f]   ;;  %v8712_v46 = vld [vmem:[%s11139_s0 + $0xadc] ss:$196 sps:$4 sm:$0x1f]  }
 0x133   :  { %v8221_v25 = vpop.f32.mrf.mxu0  ;;  %v2468_v19 = vpop.f32.mrf.mxu1  ;;  %6010 = vmatprep.subr.bf16.mxu0 %v5820_v1  ;;  %6051 = vmatprep.subr.bf16.mxu1 %v5826_v26  ;;  %v8701_v1 = vld [vmem:[%s11139_s0 + $0x938] ss:$196 sps:$4 sm:$0xff]   ;;  %v8707_v26 = vld [vmem:[%s11139_s0 + $0xad0] ss:$196 sps:$4 sm:$0x1f]   ;;  %v5832_v38 = vand.u32 %v8709_v49, %v8868_v4  ;;  %v5838_v34 = vand.u32 %v8712_v46, %v8868_v4 }
 0x134   :  { %v8704_v19 = vld [vmem:[%s11139_s0 + $0x940] ss:$196 sps:$4 sm:$0xff]   ;;  %v5829_v21 = vand.u32 %v8707_v26, %v8868_v4 }
 0x135   :  { %v10289_v51 = vpop.f32.mrf.mxu0  ;;  %v10291_v58 = vpop.f32.mrf.mxu1  ;;  %8235 = vmatmul.mubr.msk.bf16.vlgmr.msra.gmra.mxu0 %vm559_vm2, %v9964_v2  ;;  %8127 = vmatmul.mubr.msk.bf16.vlgmr.msra.gmra.mxu1 %vm559_vm2, %v9964_v2 }
 0x136   :  { %6011 = vmatpush1.bf16.msra.mxu0 %v5817_v60  ;;  %6052 = vmatpush1.bf16.msra.mxu1 %v5823_v23 }
 0x137   :  { %v10309_v5 = vpop.f32.mrf.mxu0  ;;  %v10311_v25 = vpop.f32.mrf.mxu1  ;;  %6012 = vmatprep.subr.bf16.mxu0 %v8703_v35  ;;  %6053 = vmatprep.subr.bf16.mxu1 %v8706_v13  ;;  %v8715_v35 = vld [vmem:[%s11139_s0 + $0x94c] ss:$196 sps:$4 sm:$0xff]   ;;  %v8718_v13 = vld [vmem:[%s11139_s0 + $0x954] ss:$196 sps:$4 sm:$0xff]  }
 0x138   :  { %6030 = vmatprep.mubr.bf16.mxu0 %v11175_v61  ;;  %6071 = vmatprep.mubr.bf16.mxu1 %v11175_v61 }
 0x139   :  { %v2508_v23 = vpop.f32.mrf.mxu0  ;;  %v2549_v60 = vpop.f32.mrf.mxu1 }
 0x13a   :  { %6013 = vmatpush1.bf16.msra.mxu0 %v8701_v1  ;;  %6054 = vmatpush1.bf16.msra.mxu1 %v8704_v19  ;;  %v8721_v1 = vld [vmem:[%s11139_s0 + $0xae4] ss:$196 sps:$4 sm:$0x1f]   ;;  %v8724_v19 = vld [vmem:[%s11139_s0 + $0xaec] ss:$196 sps:$4 sm:$0x1f]  }
 0x13b   :  { %v2509_v49 = vpop.f32.mrf.mxu0  ;;  %v2550_v46 = vpop.f32.mrf.mxu1  ;;  %6092 = vmatprep.subr.bf16.mxu0 %v5832_v38  ;;  %6133 = vmatprep.subr.bf16.mxu1 %v5838_v34  ;;  %v8713_v34 = vld [vmem:[%s11139_s0 + $0x948] ss:$196 sps:$4 sm:$0xff]   ;;  %v8716_v38 = vld [vmem:[%s11139_s0 + $0x950] ss:$196 sps:$4 sm:$0xff]   ;;  %v5844_v24 = vand.u32 %v8721_v1, %v8868_v4  ;;  %v5850_v41 = vand.u32 %v8724_v19, %v8868_v4 }
 0x13c   :  { %v8719_v23 = vld [vmem:[%s11139_s0 + $0xae0] ss:$196 sps:$4 sm:$0x1f]   ;;  %v8722_v60 = vld [vmem:[%s11139_s0 + $0xae8] ss:$196 sps:$4 sm:$0x1f]  }
 0x13d   :  { %v10331_v26 = vpop.f32.mrf.mxu0  ;;  %v10333_v59 = vpop.f32.mrf.mxu1  ;;  %8128 = vmatmul.mubr.msk.bf16.vlgmr.msra.gmra.mxu0 %vm559_vm2, %v9964_v2  ;;  %8129 = vmatmul.mubr.msk.bf16.vlgmr.msra.gmra.mxu1 %vm559_vm2, %v9964_v2  ;;  %v5841_v29 = vand.u32 %v8719_v23, %v8868_v4  ;;  %v5847_v28 = vand.u32 %v8722_v60, %v8868_v4 }
 0x13e   :  { %6093 = vmatpush1.bf16.msra.mxu0 %v5829_v21  ;;  %6134 = vmatpush1.bf16.msra.mxu1 %v5835_v20 }
 0x13f   :  { %v10351_v49 = vpop.f32.mrf.mxu0  ;;  %v10353_v46 = vpop.f32.mrf.mxu1  ;;  %6094 = vmatprep.subr.bf16.mxu0 %v8715_v35  ;;  %6135 = vmatprep.subr.bf16.mxu1 %v8718_v13  ;;  %v8727_v35 = vld [vmem:[%s11139_s0 + $0x95c] ss:$196 sps:$4 sm:$0xff]   ;;  %v8730_v13 = vld [vmem:[%s11139_s0 + $0x964] ss:$196 sps:$4 sm:$0xff]  }
 0x140   :  { %6112 = vmatprep.mubr.bf16.mxu0 %v11175_v61  ;;  %6153 = vmatprep.mubr.bf16.mxu1 %v11175_v61 }
 0x141   :  { %v2590_v20 = vpop.f32.mrf.mxu0  ;;  %v2631_v21 = vpop.f32.mrf.mxu1 }
 0x142   :  { %6095 = vmatpush1.bf16.msra.mxu0 %v8713_v34  ;;  %6136 = vmatpush1.bf16.msra.mxu1 %v8716_v38  ;;  %v8733_v34 = vld [vmem:[%s11139_s0 + $0xaf4] ss:$196 sps:$4 sm:$0x1f]   ;;  %v8736_v38 = vld [vmem:[%s11139_s0 + $0xafc] ss:$196 sps:$4 sm:$0x1f]  }
 0x143   :  { %v2591_v1 = vpop.f32.mrf.mxu0  ;;  %v2632_v19 = vpop.f32.mrf.mxu1  ;;  %6174 = vmatprep.subr.bf16.mxu0 %v5844_v24  ;;  %6215 = vmatprep.subr.bf16.mxu1 %v5850_v41  ;;  %v8725_v41 = vld [vmem:[%s11139_s0 + $0x958] ss:$196 sps:$4 sm:$0xff]   ;;  %v8728_v24 = vld [vmem:[%s11139_s0 + $0x960] ss:$196 sps:$4 sm:$0xff]   ;;  %v5856_v55 = vand.u32 %v8733_v34, %v8868_v4  ;;  %v5862_v54 = vand.u32 %v8736_v38, %v8868_v4 }
 0x144   :  { %v8731_v20 = vld [vmem:[%s11139_s0 + $0xaf0] ss:$196 sps:$4 sm:$0x1f]   ;;  %v8734_v21 = vld [vmem:[%s11139_s0 + $0xaf8] ss:$196 sps:$4 sm:$0x1f]  }
 0x145   :  { %v10373_v23 = vpop.f32.mrf.mxu0  ;;  %v10375_v60 = vpop.f32.mrf.mxu1  ;;  %8130 = vmatmul.mubr.msk.bf16.vlgmr.msra.gmra.mxu0 %vm559_vm2, %v9964_v2  ;;  %8131 = vmatmul.mubr.msk.bf16.vlgmr.msra.gmra.mxu1 %vm559_vm2, %v9964_v2  ;;  %v5853_v48 = vand.u32 %v8731_v20, %v8868_v4  ;;  %v5859_v47 = vand.u32 %v8734_v21, %v8868_v4 }
 0x146   :  { %6175 = vmatpush1.bf16.msra.mxu0 %v5841_v29  ;;  %6216 = vmatpush1.bf16.msra.mxu1 %v5847_v28 }
 0x147   :  { %v10393_v1 = vpop.f32.mrf.mxu0  ;;  %v10395_v19 = vpop.f32.mrf.mxu1  ;;  %6176 = vmatprep.subr.bf16.mxu0 %v8727_v35  ;;  %6217 = vmatprep.subr.bf16.mxu1 %v8730_v13  ;;  %v8739_v35 = vld [vmem:[%s11139_s0 + $0x96c] ss:$196 sps:$4 sm:$0xff]   ;;  %v8742_v13 = vld [vmem:[%s11139_s0 + $0x974] ss:$196 sps:$4 sm:$0xff]  }
 0x148   :  { %6194 = vmatprep.mubr.bf16.mxu0 %v11175_v61  ;;  %6235 = vmatprep.mubr.bf16.mxu1 %v11175_v61 }
 0x149   :  { %v2672_v28 = vpop.f32.mrf.mxu0  ;;  %v2713_v29 = vpop.f32.mrf.mxu1 }
 0x14a   :  { %6177 = vmatpush1.bf16.msra.mxu0 %v8725_v41  ;;  %6218 = vmatpush1.bf16.msra.mxu1 %v8728_v24  ;;  %v8745_v41 = vld [vmem:[%s11139_s0 + $0xb04] ss:$196 sps:$4 sm:$0x1f]   ;;  %v8748_v24 = vld [vmem:[%s11139_s0 + $0xb0c] ss:$196 sps:$4 sm:$0x1f]  }
 0x14b   :  { %v2673_v34 = vpop.f32.mrf.mxu0  ;;  %v2714_v38 = vpop.f32.mrf.mxu1  ;;  %6256 = vmatprep.subr.bf16.mxu0 %v5856_v55  ;;  %6297 = vmatprep.subr.bf16.mxu1 %v5862_v54  ;;  %v8737_v54 = vld [vmem:[%s11139_s0 + $0x968] ss:$196 sps:$4 sm:$0xff]   ;;  %v8740_v55 = vld [vmem:[%s11139_s0 + $0x970] ss:$196 sps:$4 sm:$0xff]   ;;  %v5868_v22 = vand.u32 %v8745_v41, %v8868_v4  ;;  %v5874_v16 = vand.u32 %v8748_v24, %v8868_v4 }
 0x14c   :  { %v8743_v28 = vld [vmem:[%s11139_s0 + $0xb00] ss:$196 sps:$4 sm:$0x1f]   ;;  %v8746_v29 = vld [vmem:[%s11139_s0 + $0xb08] ss:$196 sps:$4 sm:$0x1f]  }
 0x14d   :  { %v10415_v20 = vpop.f32.mrf.mxu0  ;;  %v10417_v21 = vpop.f32.mrf.mxu1  ;;  %8132 = vmatmul.mubr.msk.bf16.vlgmr.msra.gmra.mxu0 %vm559_vm2, %v9964_v2  ;;  %8133 = vmatmul.mubr.msk.bf16.vlgmr.msra.gmra.mxu1 %vm559_vm2, %v9964_v2  ;;  %v5865_v3 = vand.u32 %v8743_v28, %v8868_v4  ;;  %v5871_v62 = vand.u32 %v8746_v29, %v8868_v4 }
 0x14e   :  { %6257 = vmatpush1.bf16.msra.mxu0 %v5853_v48  ;;  %6298 = vmatpush1.bf16.msra.mxu1 %v5859_v47 }
 0x14f   :  { %v10435_v34 = vpop.f32.mrf.mxu0  ;;  %v10437_v38 = vpop.f32.mrf.mxu1  ;;  %6258 = vmatprep.subr.bf16.mxu0 %v8739_v35  ;;  %6299 = vmatprep.subr.bf16.mxu1 %v8742_v13  ;;  %v8751_v35 = vld [vmem:[%s11139_s0 + $0x97c] ss:$196 sps:$4 sm:$0xff]   ;;  %v8754_v13 = vld [vmem:[%s11139_s0 + $0x984] ss:$196 sps:$4 sm:$0xff]  }
 0x150   :  { %6276 = vmatprep.mubr.bf16.mxu0 %v11175_v61  ;;  %6317 = vmatprep.mubr.bf16.mxu1 %v11175_v61 }
 0x151   :  { %v2754_v47 = vpop.f32.mrf.mxu0  ;;  %v2795_v48 = vpop.f32.mrf.mxu1 }
 0x152   :  { %6259 = vmatpush1.bf16.msra.mxu0 %v8737_v54  ;;  %6300 = vmatpush1.bf16.msra.mxu1 %v8740_v55  ;;  %v8757_v54 = vld [vmem:[%s11139_s0 + $0xb14] ss:$196 sps:$4 sm:$0x1f]   ;;  %v8760_v55 = vld [vmem:[%s11139_s0 + $0xb1c] ss:$196 sps:$4 sm:$0x1f]  }
 0x153   :  { %v2755_v41 = vpop.f32.mrf.mxu0  ;;  %v2796_v24 = vpop.f32.mrf.mxu1  ;;  %6338 = vmatprep.subr.bf16.mxu0 %v5868_v22  ;;  %6379 = vmatprep.subr.bf16.mxu1 %v5874_v16  ;;  %v8749_v16 = vld [vmem:[%s11139_s0 + $0x978] ss:$196 sps:$4 sm:$0xff]   ;;  %v8752_v22 = vld [vmem:[%s11139_s0 + $0x980] ss:$196 sps:$4 sm:$0xff]   ;;  %v5880_v43 = vand.u32 %v8757_v54, %v8868_v4  ;;  %v5886_v42 = vand.u32 %v8760_v55, %v8868_v4 }
 0x154   :  { %v8755_v47 = vld [vmem:[%s11139_s0 + $0xb10] ss:$196 sps:$4 sm:$0x1f]   ;;  %v8758_v48 = vld [vmem:[%s11139_s0 + $0xb18] ss:$196 sps:$4 sm:$0x1f]  }
 0x155   :  { %v10457_v28 = vpop.f32.mrf.mxu0  ;;  %v10459_v29 = vpop.f32.mrf.mxu1  ;;  %8134 = vmatmul.mubr.msk.bf16.vlgmr.msra.gmra.mxu0 %vm559_vm2, %v9964_v2  ;;  %8135 = vmatmul.mubr.msk.bf16.vlgmr.msra.gmra.mxu1 %vm559_vm2, %v9964_v2  ;;  %v5877_v33 = vand.u32 %v8755_v47, %v8868_v4  ;;  %v5883_v32 = vand.u32 %v8758_v48, %v8868_v4 }
 0x156   :  { %6339 = vmatpush1.bf16.msra.mxu0 %v5865_v3  ;;  %6380 = vmatpush1.bf16.msra.mxu1 %v5871_v62 }
 0x157   :  { %v10477_v41 = vpop.f32.mrf.mxu0  ;;  %v10479_v24 = vpop.f32.mrf.mxu1  ;;  %6340 = vmatprep.subr.bf16.mxu0 %v8751_v35  ;;  %6381 = vmatprep.subr.bf16.mxu1 %v8754_v13  ;;  %v8763_v35 = vld [vmem:[%s11139_s0 + $0x98c] ss:$196 sps:$4 sm:$0xff]   ;;  %v8766_v13 = vld [vmem:[%s11139_s0 + $0x994] ss:$196 sps:$4 sm:$0xff]  }
 0x158   :  { %6358 = vmatprep.mubr.bf16.mxu0 %v11175_v61  ;;  %6399 = vmatprep.mubr.bf16.mxu1 %v11175_v61 }
 0x159   :  { %v2836_v62 = vpop.f32.mrf.mxu0  ;;  %v2877_v3 = vpop.f32.mrf.mxu1 }
 0x15a   :  { %6341 = vmatpush1.bf16.msra.mxu0 %v8749_v16  ;;  %6382 = vmatpush1.bf16.msra.mxu1 %v8752_v22  ;;  %v8769_v16 = vld [vmem:[%s11139_s0 + $0xb24] ss:$196 sps:$4 sm:$0x1f]   ;;  %v8772_v22 = vld [vmem:[%s11139_s0 + $0xb2c] ss:$196 sps:$4 sm:$0x1f]  }
 0x15b   :  { %v2837_v54 = vpop.f32.mrf.mxu0  ;;  %v2878_v55 = vpop.f32.mrf.mxu1  ;;  %6420 = vmatprep.subr.bf16.mxu0 %v5880_v43  ;;  %6461 = vmatprep.subr.bf16.mxu1 %v5886_v42  ;;  %v8761_v42 = vld [vmem:[%s11139_s0 + $0x988] ss:$196 sps:$4 sm:$0xff]   ;;  %v8764_v43 = vld [vmem:[%s11139_s0 + $0x990] ss:$196 sps:$4 sm:$0xff]   ;;  %v5898_v7 = vand.u32 %v8772_v22, %v8868_v4 }
 0x15c   :  { %v8767_v62 = vld [vmem:[%s11139_s0 + $0xb20] ss:$196 sps:$4 sm:$0x1f]   ;;  %v8770_v3 = vld [vmem:[%s11139_s0 + $0xb28] ss:$196 sps:$4 sm:$0x1f]  }
 0x15d   :  { %v10499_v47 = vpop.f32.mrf.mxu0  ;;  %v10501_v48 = vpop.f32.mrf.mxu1  ;;  %8136 = vmatmul.mubr.msk.bf16.vlgmr.msra.gmra.mxu0 %vm559_vm2, %v9964_v2  ;;  %8137 = vmatmul.mubr.msk.bf16.vlgmr.msra.gmra.mxu1 %vm559_vm2, %v9964_v2  ;;  %v5889_v6 = vand.u32 %v8767_v62, %v8868_v4 }
 0x15e   :  { %11176 = vst [vmem:[#allocation29_spill] sm:$0xff] %v10501_v48  ;;  %6421 = vmatpush1.bf16.msra.mxu0 %v5877_v33  ;;  %6462 = vmatpush1.bf16.msra.mxu1 %v5883_v32  ;;  %v5892_v48 = vand.u32 %v8769_v16, %v8868_v4 }
 0x15f   :  { %v10519_v54 = vpop.f32.mrf.mxu0  ;;  %v10521_v55 = vpop.f32.mrf.mxu1  ;;  %6422 = vmatprep.subr.bf16.mxu0 %v8763_v35  ;;  %6463 = vmatprep.subr.bf16.mxu1 %v8766_v13  ;;  %v8775_v35 = vld [vmem:[%s11139_s0 + $0x99c] ss:$196 sps:$4 sm:$0xff]   ;;  %v8778_v13 = vld [vmem:[%s11139_s0 + $0x9a4] ss:$196 sps:$4 sm:$0xff]  }
 0x160   :  { %11177 = vst [vmem:[#allocation30_spill] sm:$0xff] %v10519_v54  ;;  %11178 = vst [vmem:[#allocation31_spill] sm:$0xff] %v10521_v55  ;;  %6440 = vmatprep.mubr.bf16.mxu0 %v11175_v61  ;;  %6481 = vmatprep.mubr.bf16.mxu1 %v11175_v61  ;;  %v5895_v54 = vand.u32 %v8770_v3, %v8868_v4 }
 0x161   :  { %v2918_v32 = vpop.f32.mrf.mxu0  ;;  %v2959_v33 = vpop.f32.mrf.mxu1 }
 0x162   :  { %6423 = vmatpush1.bf16.msra.mxu0 %v8761_v42  ;;  %6464 = vmatpush1.bf16.msra.mxu1 %v8764_v43  ;;  %v8781_v42 = vld [vmem:[%s11139_s0 + $0xb34] ss:$196 sps:$4 sm:$0x1f]   ;;  %v8784_v43 = vld [vmem:[%s11139_s0 + $0xb3c] ss:$196 sps:$4 sm:$0x1f]  }
 0x163   :  { %v2919_v16 = vpop.f32.mrf.mxu0  ;;  %v2960_v22 = vpop.f32.mrf.mxu1  ;;  %6502 = vmatprep.subr.bf16.mxu0 %v5892_v48  ;;  %6543 = vmatprep.subr.bf16.mxu1 %v5898_v7  ;;  %v8773_v7 = vld [vmem:[%s11139_s0 + $0x998] ss:$196 sps:$4 sm:$0xff]   ;;  %v8776_v48 = vld [vmem:[%s11139_s0 + $0x9a0] ss:$196 sps:$4 sm:$0xff]  }
 0x164   :  { %v8779_v32 = vld [vmem:[%s11139_s0 + $0xb30] ss:$196 sps:$4 sm:$0x1f]   ;;  %v8782_v33 = vld [vmem:[%s11139_s0 + $0xb38] ss:$196 sps:$4 sm:$0x1f]   ;;  %v5904_v22 = vand.u32 %v8781_v42, %v8868_v4 }
 0x165   :  { %v10541_v62 = vpop.f32.mrf.mxu0  ;;  %v10543_v3 = vpop.f32.mrf.mxu1  ;;  %8138 = vmatmul.mubr.msk.bf16.vlgmr.msra.gmra.mxu0 %vm559_vm2, %v9964_v2  ;;  %8139 = vmatmul.mubr.msk.bf16.vlgmr.msra.gmra.mxu1 %vm559_vm2, %v9964_v2  ;;  %v5901_v55 = vand.u32 %v8779_v32, %v8868_v4 }
 0x166   :  { %11179 = vst [vmem:[#allocation32_spill] sm:$0xff] %v10541_v62  ;;  %11180 = vst [vmem:[#allocation33_spill] sm:$0xff] %v10543_v3  ;;  %6503 = vmatpush1.bf16.msra.mxu0 %v5889_v6  ;;  %6544 = vmatpush1.bf16.msra.mxu1 %v5895_v54  ;;  %v5910_v3 = vand.u32 %v8784_v43, %v8868_v4 }
 0x167   :  { %v10561_v16 = vpop.f32.mrf.mxu0  ;;  %v10563_v2 = vpop.f32.mrf.mxu1  ;;  %6504 = vmatprep.subr.bf16.mxu0 %v8775_v35  ;;  %6545 = vmatprep.subr.bf16.mxu1 %v8778_v13  ;;  %v8787_v35 = vld [vmem:[%s11139_s0 + $0x9ac] ss:$196 sps:$4 sm:$0xff]   ;;  %v8790_v13 = vld [vmem:[%s11139_s0 + $0x9b4] ss:$196 sps:$4 sm:$0xff]  }
 0x168   :  { %11181 = vst [vmem:[#allocation34_spill] sm:$0xff] %v10561_v16  ;;  %11182 = vst [vmem:[#allocation35_spill] sm:$0xff] %v10563_v2  ;;  %6522 = vmatprep.mubr.bf16.mxu0 %v11175_v61  ;;  %6563 = vmatprep.mubr.bf16.mxu1 %v11175_v61  ;;  %v5907_v16 = vand.u32 %v8782_v33, %v8868_v4 }
 0x169   :  { %v3000_v6 = vpop.f32.mrf.mxu0  ;;  %v3041_v54 = vpop.f32.mrf.mxu1 }
 0x16a   :  { %6505 = vmatpush1.bf16.msra.mxu0 %v8773_v7  ;;  %6546 = vmatpush1.bf16.msra.mxu1 %v8776_v48  ;;  %v8793_v7 = vld [vmem:[%s11139_s0 + $0xb44] ss:$196 sps:$4 sm:$0x1f]   ;;  %v8796_v48 = vld [vmem:[%s11139_s0 + $0xb4c] ss:$196 sps:$4 sm:$0x1f]  }
 0x16b   :  { %v3001_v42 = vpop.f32.mrf.mxu0  ;;  %v3042_v43 = vpop.f32.mrf.mxu1  ;;  %6584 = vmatprep.subr.bf16.mxu0 %v5904_v22  ;;  %6625 = vmatprep.subr.bf16.mxu1 %v5910_v3  ;;  %v10590_v6 = vld [vmem:[%s11140_s1] sm:$0xf]  ;;  %v8785_v3 = vld [vmem:[%s11139_s0 + $0x9a8] ss:$196 sps:$4 sm:$0xff]   ;;  %v8788_v22 = vld [vmem:[%s11139_s0 + $0x9b0] ss:$196 sps:$4 sm:$0xff]   ;;  %v5916_v2 = vand.u32 %v8793_v7, %v8868_v4 }
 0x16c   :  { %v8791_v54 = vld [vmem:[%s11139_s0 + $0xb40] ss:$196 sps:$4 sm:$0x1f]   ;;  %v8794_v42 = vld [vmem:[%s11139_s0 + $0xb48] ss:$196 sps:$4 sm:$0x1f]  }
 0x16d   :  { %v10583_v32 = vpop.f32.mrf.mxu0  ;;  %v10585_v33 = vpop.f32.mrf.mxu1  ;;  %8140 = vmatmul.mubr.msk.bf16.vlgmr.msra.gmra.mxu0 %vm559_vm2, %v10590_v6  ;;  %8141 = vmatmul.mubr.msk.bf16.vlgmr.msra.gmra.mxu1 %vm559_vm2, %v10590_v6  ;;  %v5913_v62 = vand.u32 %v8791_v54, %v8868_v4 }
 0x16e   :  { %11183 = vst [vmem:[#allocation36_spill] sm:$0xff] %v10583_v32  ;;  %11184 = vst [vmem:[#allocation37_spill] sm:$0xff] %v10585_v33  ;;  %6585 = vmatpush1.bf16.msra.mxu0 %v5901_v55  ;;  %6626 = vmatpush1.bf16.msra.mxu1 %v5907_v16  ;;  %v5922_v32 = vand.u32 %v8796_v48, %v8868_v4 }
 0x16f   :  { %v10608_v43 = vpop.f32.mrf.mxu0  ;;  %v10610_v33 = vpop.f32.mrf.mxu1  ;;  %6586 = vmatprep.subr.bf16.mxu0 %v8787_v35  ;;  %6627 = vmatprep.subr.bf16.mxu1 %v8790_v13  ;;  %v8799_v35 = vld [vmem:[%s11139_s0 + $0x9bc] ss:$196 sps:$4 sm:$0xff]   ;;  %v8802_v13 = vld [vmem:[%s11139_s0 + $0x9c4] ss:$196 sps:$4 sm:$0xff]  }
 0x170   :  { %11185 = vst [vmem:[#allocation38_spill] sm:$0xff] %v10608_v43  ;;  %11186 = vst [vmem:[#allocation39_spill] sm:$0xff] %v10610_v33  ;;  %6604 = vmatprep.mubr.bf16.mxu0 %v11175_v61  ;;  %6645 = vmatprep.mubr.bf16.mxu1 %v11175_v61  ;;  %v5919_v43 = vand.u32 %v8794_v42, %v8868_v4 }
 0x171   :  { %v3082_v55 = vpop.f32.mrf.mxu0  ;;  %v3123_v16 = vpop.f32.mrf.mxu1 }
 0x172   :  { %6587 = vmatpush1.bf16.msra.mxu0 %v8785_v3  ;;  %6628 = vmatpush1.bf16.msra.mxu1 %v8788_v22  ;;  %v8805_v3 = vld [vmem:[%s11139_s0 + $0xb54] ss:$196 sps:$4 sm:$0x1f]   ;;  %v8808_v22 = vld [vmem:[%s11139_s0 + $0xb5c] ss:$196 sps:$4 sm:$0x1f]  }
 0x173   :  { %v3083_v7 = vpop.f32.mrf.mxu0  ;;  %v3124_v48 = vpop.f32.mrf.mxu1  ;;  %6666 = vmatprep.subr.bf16.mxu0 %v5916_v2  ;;  %6707 = vmatprep.subr.bf16.mxu1 %v5922_v32  ;;  %v8797_v2 = vld [vmem:[%s11139_s0 + $0x9b8] ss:$196 sps:$4 sm:$0xff]   ;;  %v8800_v32 = vld [vmem:[%s11139_s0 + $0x9c0] ss:$196 sps:$4 sm:$0xff]   ;;  %v5934_v33 = vand.u32 %v8808_v22, %v8868_v4 }
 0x174   :  { %v8803_v55 = vld [vmem:[%s11139_s0 + $0xb50] ss:$196 sps:$4 sm:$0x1f]   ;;  %v8806_v16 = vld [vmem:[%s11139_s0 + $0xb58] ss:$196 sps:$4 sm:$0x1f]  }
 0x175   :  { %v10630_v54 = vpop.f32.mrf.mxu0  ;;  %v10632_v42 = vpop.f32.mrf.mxu1  ;;  %8142 = vmatmul.mubr.msk.bf16.vlgmr.msra.gmra.mxu0 %vm559_vm2, %v10590_v6  ;;  %8143 = vmatmul.mubr.msk.bf16.vlgmr.msra.gmra.mxu1 %vm559_vm2, %v10590_v6 }
 0x176   :  { %11187 = vst [vmem:[#allocation40_spill] sm:$0xff] %v10630_v54  ;;  %11188 = vst [vmem:[#allocation41_spill] sm:$0xff] %v10632_v42  ;;  %6667 = vmatpush1.bf16.msra.mxu0 %v5913_v62  ;;  %6708 = vmatpush1.bf16.msra.mxu1 %v5919_v43  ;;  %v5928_v42 = vand.u32 %v8805_v3, %v8868_v4  ;;  %v5925_v54 = vand.u32 %v8803_v55, %v8868_v4 }
 0x177   :  { %v10650_v7 = vpop.f32.mrf.mxu0  ;;  %v10652_v48 = vpop.f32.mrf.mxu1  ;;  %6668 = vmatprep.subr.bf16.mxu0 %v8799_v35  ;;  %6709 = vmatprep.subr.bf16.mxu1 %v8802_v13  ;;  %v8811_v35 = vld [vmem:[%s11139_s0 + $0x9cc] ss:$196 sps:$4 sm:$0xff]   ;;  %v8814_v13 = vld [vmem:[%s11139_s0 + $0x9d4] ss:$196 sps:$4 sm:$0xff]  }
 0x178   :  { %11189 = vst [vmem:[#allocation42_spill] sm:$0xff] %v10650_v7  ;;  %11190 = vst [vmem:[#allocation43_spill] sm:$0xff] %v10652_v48  ;;  %6686 = vmatprep.mubr.bf16.mxu0 %v11175_v61  ;;  %6727 = vmatprep.mubr.bf16.mxu1 %v11175_v61  ;;  %v5931_v7 = vand.u32 %v8806_v16, %v8868_v4 }
 0x179   :  { %v3164_v62 = vpop.f32.mrf.mxu0  ;;  %v3205_v43 = vpop.f32.mrf.mxu1 }
 0x17a   :  { %6669 = vmatpush1.bf16.msra.mxu0 %v8797_v2  ;;  %6710 = vmatpush1.bf16.msra.mxu1 %v8800_v32  ;;  %v8817_v2 = vld [vmem:[%s11139_s0 + $0xb64] ss:$196 sps:$4 sm:$0x1f]   ;;  %v8820_v32 = vld [vmem:[%s11139_s0 + $0xb6c] ss:$196 sps:$4 sm:$0x1f]  }
 0x17b   :  { %v3165_v3 = vpop.f32.mrf.mxu0  ;;  %v3206_v22 = vpop.f32.mrf.mxu1  ;;  %6748 = vmatprep.subr.bf16.mxu0 %v5928_v42  ;;  %6789 = vmatprep.subr.bf16.mxu1 %v5934_v33  ;;  %v8809_v33 = vld [vmem:[%s11139_s0 + $0x9c8] ss:$196 sps:$4 sm:$0xff]   ;;  %v8812_v42 = vld [vmem:[%s11139_s0 + $0x9d0] ss:$196 sps:$4 sm:$0xff]   ;;  %v5946_v48 = vand.u32 %v8820_v32, %v8868_v4 }
 0x17c   :  { %v8815_v62 = vld [vmem:[%s11139_s0 + $0xb60] ss:$196 sps:$4 sm:$0x1f]   ;;  %v8818_v43 = vld [vmem:[%s11139_s0 + $0xb68] ss:$196 sps:$4 sm:$0x1f]  }
 0x17d   :  { %v10672_v55 = vpop.f32.mrf.mxu0  ;;  %v10674_v16 = vpop.f32.mrf.mxu1  ;;  %8144 = vmatmul.mubr.msk.bf16.vlgmr.msra.gmra.mxu0 %vm559_vm2, %v10590_v6  ;;  %8145 = vmatmul.mubr.msk.bf16.vlgmr.msra.gmra.mxu1 %vm559_vm2, %v10590_v6  ;;  %v8826_v32 = vld [vmem:[%s11139_s0 + $0x9e4] ss:$196 sps:$4 sm:$0xff]  }
 0x17e   :  { %11191 = vst [vmem:[#allocation44_spill] sm:$0xff] %v10672_v55  ;;  %11192 = vst [vmem:[#allocation45_spill] sm:$0xff] %v10674_v16  ;;  %6749 = vmatpush1.bf16.msra.mxu0 %v5925_v54  ;;  %6790 = vmatpush1.bf16.msra.mxu1 %v5931_v7  ;;  %v5940_v16 = vand.u32 %v8817_v2, %v8868_v4  ;;  %v5937_v55 = vand.u32 %v8815_v62, %v8868_v4 }
 0x17f   :  { %v10692_v3 = vpop.f32.mrf.mxu0  ;;  %v10694_v22 = vpop.f32.mrf.mxu1  ;;  %6750 = vmatprep.subr.bf16.mxu0 %v8811_v35  ;;  %6791 = vmatprep.subr.bf16.mxu1 %v8814_v13  ;;  %v8823_v35 = vld [vmem:[%s11139_s0 + $0x9dc] ss:$196 sps:$4 sm:$0xff]  }
 0x180   :  { %11193 = vst [vmem:[#allocation46_spill] sm:$0xff] %v10692_v3  ;;  %11194 = vst [vmem:[#allocation47_spill] sm:$0xff] %v10694_v22  ;;  %6768 = vmatprep.mubr.bf16.mxu0 %v11175_v61  ;;  %6809 = vmatprep.mubr.bf16.mxu1 %v11175_v61  ;;  %v5943_v3 = vand.u32 %v8818_v43, %v8868_v4  ;;  %v8827_v43 = vld [vmem:[%s11139_s0 + $0xb70] ss:$196 sps:$4 sm:$0x1f]  }
 0x181   :  { %v3246_v54 = vpop.f32.mrf.mxu0  ;;  %v3287_v7 = vpop.f32.mrf.mxu1 }
 0x182   :  { %6751 = vmatpush1.bf16.msra.mxu0 %v8809_v33  ;;  %6792 = vmatpush1.bf16.msra.mxu1 %v8812_v42  ;;  %v8829_v33 = vld [vmem:[%s11139_s0 + $0xb74] ss:$196 sps:$4 sm:$0x1f]  }
 0x183   :  { %v3247_v13 = vpop.f32.mrf.mxu0  ;;  %v3288_v2 = vpop.f32.mrf.mxu1  ;;  %6830 = vmatprep.subr.bf16.mxu0 %v5940_v16  ;;  %6871 = vmatprep.subr.bf16.mxu1 %v5946_v48  ;;  %v8821_v48 = vld [vmem:[%s11139_s0 + $0x9d8] ss:$196 sps:$4 sm:$0xff]   ;;  %v8824_v16 = vld [vmem:[%s11139_s0 + $0x9e0] ss:$196 sps:$4 sm:$0xff]  }
 0x184   :  { %v8830_v54 = vld [vmem:[%s11139_s0 + $0xb78] ss:$196 sps:$4 sm:$0x1f]   ;;  %v5952_v2 = vand.u32 %v8829_v33, %v8868_v4 }
 0x185   :  { %v10711_v42 = vpop.f32.mrf.mxu0  ;;  %v10713_v62 = vpop.f32.mrf.mxu1  ;;  %8146 = vmatmul.mubr.msk.bf16.vlgmr.msra.gmra.mxu0 %vm559_vm2, %v10590_v6  ;;  %8147 = vmatmul.mubr.msk.bf16.vlgmr.msra.gmra.mxu1 %vm559_vm2, %v10590_v6  ;;  %v5955_v22 = vand.u32 %v8830_v54, %v8868_v4 }
 0x186   :  { %11195 = vst [vmem:[#allocation48_spill] sm:$0xff] %v10711_v42  ;;  %11196 = vst [vmem:[#allocation49_spill] sm:$0xff] %v10713_v62  ;;  %6831 = vmatpush1.bf16.msra.mxu0 %v5937_v55  ;;  %6872 = vmatpush1.bf16.msra.mxu1 %v5943_v3  ;;  %v5949_v62 = vand.u32 %v8827_v43, %v8868_v4  ;;  %v8831_v4 = vld [vmem:[%s11139_s0 + $0x9e8] ss:$196 sps:$4 sm:$0xff]  }
 0x187   :  { %v10731_v7 = vpop.f32.mrf.mxu0  ;;  %v10733_v13 = vpop.f32.mrf.mxu1  ;;  %6832 = vmatprep.subr.bf16.mxu0 %v8823_v35  ;;  %6873 = vmatprep.subr.bf16.mxu1 %v8826_v32  ;;  %v8833_v35 = vld [vmem:[%s11139_s0 + $0x9ec] ss:$196 sps:$4 sm:$0xff]  }
 0x188   :  { %11197 = vst [vmem:[#allocation50_spill] sm:$0xff] %v10731_v7  ;;  %6850 = vmatprep.mubr.bf16.mxu0 %v11175_v61  ;;  %6891 = vmatprep.mubr.bf16.mxu1 %v11175_v61 }
 0x189   :  { %v3328_v55 = vpop.f32.mrf.mxu0  ;;  %v3369_v3 = vpop.f32.mrf.mxu1 }
 0x18a   :  { %6833 = vmatpush1.bf16.msra.mxu0 %v8821_v48  ;;  %6874 = vmatpush1.bf16.msra.mxu1 %v8824_v16 }
 0x18b   :  { %v3329_v42 = vpop.f32.mrf.mxu0  ;;  %v3370_v7 = vpop.f32.mrf.mxu1  ;;  %6912 = vmatprep.subr.bf16.mxu0 %v5952_v2  ;;  %8238 = vmatprep.subr.bf16.mxu1 %v11173_v50  ;;  %v3455_v2 = vmax.f32 %v9746_v10, %v10289_v51 }
 0x18c   :  { %v8834_v42 = vld [vmem:[%s11139_s0 + $0x9f0] ss:$196 sps:$4 sm:$0xff]   ;;  %v3453_v7 = vmax.f32 %v9744_v9, %v10249_v27 }
 0x18d   :  { %v10744_v32 = vpop.f32.mrf.mxu0  ;;  %v10746_v33 = vpop.f32.mrf.mxu1  ;;  %8148 = vmatmul.mubr.msk.bf16.vlgmr.msra.gmra.mxu0 %vm559_vm2, %v10590_v6  ;;  %8149 = vmatmul.mubr.msk.bf16.vlgmr.msra.gmra.mxu1 %vm559_vm2, %v10590_v6 }
 0x18e   :  { %6913 = vmatpush1.bf16.msra.mxu0 %v5949_v62  ;;  %8239 = vmatpush3.bf16.msra.mxu1 %v5955_v22 }
 0x18f   :  { %v10758_v48 = vpop.f32.mrf.mxu0  ;;  %v8228_v16 = vpop.f32.mrf.mxu1  ;;  %6914 = vmatprep.subr.bf16.mxu0 %v8833_v35  ;;  %8240 = vmatprep.subr.bf16.mxu1 %v11173_v50 }
 0x190   :  { %6932 = vmatprep.mubr.bf16.mxu0 %v11175_v61  ;;  %8242 = vmatprep.mubr.msk.bf16.mxu1 %vm8841_vm3, %v11173_v50  ;;  %v3454_v50 = vmax.f32 %v9761_v14, %v10267_v8  ;;  %v3456_v61 = vmax.f32 %v9763_v15, %v10309_v5  ;;  %v3457_v14 = vmax.f32 %v9786_v30, %v10291_v58 }
 0x191   :  { %v3410_v22 = vpop.f32.mrf.mxu0  ;;  %v3450_v62 = vpop.f32.mrf.mxu1  ;;  %v3459_v15 = vmax.f32 %v9788_v31, %v10331_v26 }
 0x192   :  { %6915 = vmatpush1.bf16.msra.mxu0 %v8831_v4  ;;  %8241 = vmatpush3.bf16.msra.mxu1 %v8834_v42  ;;  %v3458_v62 = vmax.f32 %v9803_v36, %v10311_v25  ;;  %v3461_v36 = vmax.f32 %v9831_v52, %v10333_v59 }
 0x193   :  { %v3411_v43 = vpop.f32.mrf.mxu0  ;;  %v8229_v54 = vpop.f32.mrf.mxu1 }
 0x194   :  { %v3460_v43 = vmax.f32 %v9805_v37, %v10351_v49  ;;  %v3463_v37 = vmax.f32 %v9833_v53, %v10373_v23 }
 0x195   :  { %v4227_v55 = vpop.f32.mrf.mxu0  ;;  %v4268_v3 = vpop.f32.mrf.mxu1  ;;  %8150 = vmatmul.mubr.msk.bf16.vlgmr.msra.gmra.mxu0 %vm559_vm2, %v10590_v6  ;;  %8243 = vmatmul.mubr.msk.bf16.vlgmr.msra.gmra.mxu1 %vm559_vm2, %v10590_v6 }
 0x196   :  { %v10776_v35 = vmax.f32 %v3453_v7, %v4227_v55  ;;  %v10778_v9 = vmax.f32 %v3455_v2, %v4268_v3 }
 0x197   :  { %v4229_v27 = vpop.f32.mrf.mxu0  ;;  %v4270_v10 = vpop.f32.mrf.mxu1 }
 0x198   :  { %v10780_v51 = vmax.f32 %v3454_v50, %v4229_v27  ;;  %v10782_v4 = vmax.f32 %v3456_v61, %v4270_v10  ;;  %v3462_v61 = vmax.f32 %v9845_v56, %v10353_v46  ;;  %v3464_v27 = vmax.f32 %v9847_v57, %v10393_v1 }
 0x199   :  { %v4231_v42 = vpop.f32.mrf.mxu0  ;;  %v4272_v16 = vpop.f32.mrf.mxu1  ;;  %v3465_v56 = vmax.f32 %v9870_v11, %v10375_v60  ;;  %v3467_v57 = vmax.f32 %v9872_v12, %v10415_v20 }
 0x19b   :  { %v4232_v22 = vpop.f32.mrf.mxu0  ;;  %v4273_v6 = vpop.f32.mrf.mxu1 }
 0x19d   :  { %v4309_v8 = vpop.f32.mrf.mxu0  ;;  %v4350_v5 = vpop.f32.mrf.mxu1 }
 0x19e   :  { %v10792_v54 = vmax.f32 %v3457_v14, %v4309_v8  ;;  %v10794_v7 = vmax.f32 %v3459_v15, %v4350_v5  ;;  %v3466_v15 = vmax.f32 %v9887_v17, %v10395_v19  ;;  %v3468_v8 = vmax.f32 %v9889_v18, %v10435_v34 }
 0x19f   :  { %v4311_v2 = vpop.f32.mrf.mxu0  ;;  %v4352_v55 = vpop.f32.mrf.mxu1  ;;  %v3469_v17 = vmax.f32 %v9912_v39, %v10417_v21  ;;  %v3471_v18 = vmax.f32 %v9914_v40, %v10457_v28 }
 0x1a0   :  { %v10796_v3 = vmax.f32 %v3458_v62, %v4311_v2  ;;  %v10798_v30 = vmax.f32 %v3460_v43, %v4352_v55 }
 0x1a1   :  { %v4313_v58 = vpop.f32.mrf.mxu0  ;;  %v4354_v31 = vpop.f32.mrf.mxu1 }
 0x1a2   :  { %v3470_v31 = vmax.f32 %v9929_v44, %v10437_v38  ;;  %v3473_v44 = vmax.f32 %v9957_v63, %v10459_v29 }
 0x1a3   :  { %v4314_v26 = vpop.f32.mrf.mxu0  ;;  %v4355_v50 = vpop.f32.mrf.mxu1 }
 0x1a4   :  { %v3472_v26 = vmax.f32 %v9931_v45, %v10477_v41  ;;  %v3475_v45 = vmax.f32 %v9959_v0, %v10499_v47 }
 0x1a5   :  { %v4391_v25 = vpop.f32.mrf.mxu0  ;;  %v4432_v49 = vpop.f32.mrf.mxu1 }
 0x1a6   :  { %v10808_v10 = vmax.f32 %v3461_v36, %v4391_v25  ;;  %v10810_v42 = vmax.f32 %v3463_v37, %v4432_v49 }
 0x1a7   :  { %v4393_v16 = vpop.f32.mrf.mxu0  ;;  %v4434_v22 = vpop.f32.mrf.mxu1 }
 0x1a8   :  { %v10812_v6 = vmax.f32 %v3462_v61, %v4393_v16  ;;  %v10814_v52 = vmax.f32 %v3464_v27, %v4434_v22  ;;  %v11198_v27 = vld [vmem:[#allocation2_spill] sm:$0xff] }
 0x1a9   :  { %v4395_v59 = vpop.f32.mrf.mxu0  ;;  %v4436_v53 = vpop.f32.mrf.mxu1  ;;  %v3474_v16 = vmax.f32 %v11198_v27, %v10479_v24  ;;  %v11199_v22 = vld [vmem:[#allocation30_spill] sm:$0xff]  ;;  %v11210_v27 = vld [vmem:[#allocation8_spill] sm:$0xff] }
 0x1aa   :  { %v11200_v59 = vld [vmem:[#allocation3_spill] sm:$0xff] }
 0x1ab   :  { %v4396_v23 = vpop.f32.mrf.mxu0  ;;  %v4437_v14 = vpop.f32.mrf.mxu1  ;;  %v3476_v53 = vmax.f32 %v11200_v59, %v11199_v22  ;;  %v11211_v22 = vld [vmem:[#allocation36_spill] sm:$0xff]  ;;  %v11212_v59 = vld [vmem:[#allocation9_spill] sm:$0xff] }
 0x1ad   :  { %v4473_v46 = vpop.f32.mrf.mxu0  ;;  %v4514_v1 = vpop.f32.mrf.mxu1 }
 0x1ae   :  { %v10824_v5 = vmax.f32 %v3465_v56, %v4473_v46  ;;  %v10826_v62 = vmax.f32 %v3467_v57, %v4514_v1 }
 0x1af   :  { %v4475_v43 = vpop.f32.mrf.mxu0  ;;  %v4516_v2 = vpop.f32.mrf.mxu1 }
 0x1b0   :  { %v10828_v55 = vmax.f32 %v3466_v15, %v4475_v43  ;;  %v10830_v11 = vmax.f32 %v3468_v8, %v4516_v2  ;;  %v11201_v15 = vld [vmem:[#allocation29_spill] sm:$0xff]  ;;  %v11202_v8 = vld [vmem:[#allocation4_spill] sm:$0xff] }
 0x1b1   :  { %v4477_v60 = vpop.f32.mrf.mxu0  ;;  %v4518_v12 = vpop.f32.mrf.mxu1  ;;  %v3477_v24 = vmax.f32 %v11202_v8, %v11201_v15  ;;  %v11203_v43 = vld [vmem:[#allocation32_spill] sm:$0xff]  ;;  %v11204_v2 = vld [vmem:[#allocation5_spill] sm:$0xff]  ;;  %v11216_v15 = vld [vmem:[#allocation11_spill] sm:$0xff] }
 0x1b2   :  { %v3479_v60 = vmax.f32 %v11204_v2, %v11203_v43 }
 0x1b3   :  { %v4478_v20 = vpop.f32.mrf.mxu0  ;;  %v4519_v58 = vpop.f32.mrf.mxu1 }
 0x1b4   :  { %v11205_v58 = vld [vmem:[#allocation31_spill] sm:$0xff] }
 0x1b5   :  { %v4555_v19 = vpop.f32.mrf.mxu0  ;;  %v4596_v34 = vpop.f32.mrf.mxu1 }
 0x1b6   :  { %v10840_v50 = vmax.f32 %v3469_v17, %v4555_v19  ;;  %v10842_v36 = vmax.f32 %v3471_v18, %v4596_v34  ;;  %v11206_v17 = vld [vmem:[#allocation6_spill] sm:$0xff]  ;;  %v11208_v34 = vld [vmem:[#allocation7_spill] sm:$0xff] }
 0x1b7   :  { %v4557_v37 = vpop.f32.mrf.mxu0  ;;  %v4598_v25 = vpop.f32.mrf.mxu1  ;;  %v3478_v18 = vmax.f32 %v11206_v17, %v11205_v58  ;;  %v11207_v19 = vld [vmem:[#allocation34_spill] sm:$0xff] }
 0x1b8   :  { %v10844_v49 = vmax.f32 %v3470_v31, %v4557_v37  ;;  %v10846_v39 = vmax.f32 %v3472_v26, %v4598_v25  ;;  %v3480_v31 = vmax.f32 %v11208_v34, %v11207_v19  ;;  %v11217_v34 = vld [vmem:[#allocation37_spill] sm:$0xff] }
 0x1b9   :  { %v4559_v21 = vpop.f32.mrf.mxu0  ;;  %v4600_v40 = vpop.f32.mrf.mxu1 }
 0x1bb   :  { %v4560_v28 = vpop.f32.mrf.mxu0  ;;  %v4601_v61 = vpop.f32.mrf.mxu1 }
 0x1bd   :  { %v4637_v38 = vpop.f32.mrf.mxu0  ;;  %v4678_v41 = vpop.f32.mrf.mxu1 }
 0x1be   :  { %v10856_v23 = vmax.f32 %v3473_v44, %v4637_v38  ;;  %v10858_v14 = vmax.f32 %v3475_v45, %v4678_v41  ;;  %v11209_v41 = vld [vmem:[#allocation33_spill] sm:$0xff] }
 0x1bf   :  { %v4639_v56 = vpop.f32.mrf.mxu0  ;;  %v4680_v57 = vpop.f32.mrf.mxu1 }
 0x1c0   :  { %v10860_v46 = vmax.f32 %v3474_v16, %v4639_v56  ;;  %v10862_v63 = vmax.f32 %v3476_v53, %v4680_v57  ;;  %v3481_v16 = vmax.f32 %v11210_v27, %v11209_v41  ;;  %v3483_v53 = vmax.f32 %v11212_v59, %v11211_v22  ;;  %v11221_v41 = vld [vmem:[#allocation39_spill] sm:$0xff]  ;;  %v11222_v27 = vld [vmem:[#allocation14_spill] sm:$0xff] }
 0x1c1   :  { %v4641_v29 = vpop.f32.mrf.mxu0  ;;  %v4682_v0 = vpop.f32.mrf.mxu1  ;;  %v11223_v22 = vld [vmem:[#allocation42_spill] sm:$0xff]  ;;  %v11224_v59 = vld [vmem:[#allocation15_spill] sm:$0xff] }
 0x1c2   :  { %v11213_v29 = vld [vmem:[#allocation35_spill] sm:$0xff]  ;;  %v11214_v0 = vld [vmem:[#allocation10_spill] sm:$0xff] }
 0x1c3   :  { %v4642_v47 = vpop.f32.mrf.mxu0  ;;  %v4683_v1 = vpop.f32.mrf.mxu1 }
 0x1c4   :  { %v3482_v47 = vmax.f32 %v11214_v0, %v11213_v29  ;;  %v11215_v1 = vld [vmem:[#allocation38_spill] sm:$0xff] }
 0x1c5   :  { %v4719_v12 = vpop.f32.mrf.mxu0  ;;  %v4760_v20 = vpop.f32.mrf.mxu1  ;;  %v3484_v8 = vmax.f32 %v11216_v15, %v11215_v1 }
 0x1c6   :  { %v10872_v26 = vmax.f32 %v3477_v24, %v4719_v12  ;;  %v10874_v37 = vmax.f32 %v3479_v60, %v4760_v20 }
 0x1c7   :  { %v4721_v25 = vpop.f32.mrf.mxu0  ;;  %v4762_v21 = vpop.f32.mrf.mxu1 }
 0x1c8   :  { %v10876_v40 = vmax.f32 %v3478_v18, %v4721_v25  ;;  %v10878_v28 = vmax.f32 %v3480_v31, %v4762_v21  ;;  %v11218_v31 = vld [vmem:[#allocation12_spill] sm:$0xff] }
 0x1c9   :  { %v4723_v61 = vpop.f32.mrf.mxu0  ;;  %v4764_v44 = vpop.f32.mrf.mxu1  ;;  %v3485_v25 = vmax.f32 %v11218_v31, %v11217_v34  ;;  %v11219_v21 = vld [vmem:[#allocation40_spill] sm:$0xff]  ;;  %v11228_v34 = vld [vmem:[#allocation17_spill] sm:$0xff] }
 0x1ca   :  { %v11220_v61 = vld [vmem:[#allocation13_spill] sm:$0xff] }
 0x1cb   :  { %v4724_v45 = vpop.f32.mrf.mxu0  ;;  %v4765_v38 = vpop.f32.mrf.mxu1  ;;  %v3487_v44 = vmax.f32 %v11220_v61, %v11219_v21  ;;  %v11229_v61 = vld [vmem:[#allocation43_spill] sm:$0xff] }
 0x1cd   :  { %v4801_v56 = vpop.f32.mrf.mxu0  ;;  %v4842_v57 = vpop.f32.mrf.mxu1 }
 0x1ce   :  { %v10888_v24 = vmax.f32 %v3481_v16, %v4801_v56  ;;  %v10890_v43 = vmax.f32 %v3483_v53, %v4842_v57  ;;  %v3486_v16 = vmax.f32 %v11222_v27, %v11221_v41  ;;  %v3488_v53 = vmax.f32 %v11224_v59, %v11223_v22  ;;  %v11232_v41 = vld [vmem:[#allocation19_spill] sm:$0xff] }
 0x1cf   :  { %v4803_v2 = vpop.f32.mrf.mxu0  ;;  %v4844_v60 = vpop.f32.mrf.mxu1 }
 0x1d0   :  { %v10892_v12 = vmax.f32 %v3482_v47, %v4803_v2  ;;  %v10894_v20 = vmax.f32 %v3484_v8, %v4844_v60 }
 0x1d1   :  { %v4805_v58 = vpop.f32.mrf.mxu0  ;;  %v4846_v17 = vpop.f32.mrf.mxu1 }
 0x1d2   :  { %v11225_v58 = vld [vmem:[#allocation41_spill] sm:$0xff]  ;;  %v11226_v17 = vld [vmem:[#allocation16_spill] sm:$0xff] }
 0x1d3   :  { %v4806_v18 = vpop.f32.mrf.mxu0  ;;  %v4847_v19 = vpop.f32.mrf.mxu1 }
 0x1d4   :  { %v3489_v18 = vmax.f32 %v11226_v17, %v11225_v58  ;;  %v11227_v19 = vld [vmem:[#allocation44_spill] sm:$0xff]  ;;  %v11235_v58 = vld [vmem:[#allocation45_spill] sm:$0xff] }
 0x1d5   :  { %v4883_v45 = vpop.f32.mrf.mxu0  ;;  %v4924_v38 = vpop.f32.mrf.mxu1  ;;  %v3491_v31 = vmax.f32 %v11228_v34, %v11227_v19  ;;  %v11236_v17 = vld [vmem:[#allocation20_spill] sm:$0xff] }
 0x1d6   :  { %v10904_v56 = vmax.f32 %v3485_v25, %v4883_v45  ;;  %v10906_v57 = vmax.f32 %v3487_v44, %v4924_v38  ;;  %v11230_v44 = vld [vmem:[#allocation18_spill] sm:$0xff]  ;;  %v3493_v19 = vmax.f32 %v11236_v17, %v11235_v58  ;;  %v11237_v34 = vld [vmem:[#allocation48_spill] sm:$0xff] }
 0x1d7   :  { %v4885_v29 = vpop.f32.mrf.mxu0  ;;  %v4926_v0 = vpop.f32.mrf.mxu1  ;;  %v3490_v45 = vmax.f32 %v11230_v44, %v11229_v61  ;;  %v11231_v38 = vld [vmem:[#allocation46_spill] sm:$0xff]  ;;  %v11238_v61 = vld [vmem:[#allocation21_spill] sm:$0xff] }
 0x1d8   :  { %v10908_v47 = vmax.f32 %v3486_v16, %v4885_v29  ;;  %v10910_v1 = vmax.f32 %v3488_v53, %v4926_v0  ;;  %v3492_v27 = vmax.f32 %v11232_v41, %v11231_v38  ;;  %v3495_v44 = vmax.f32 %v11238_v61, %v11237_v34  ;;  %v11241_v41 = vld [vmem:[#allocation50_spill] sm:$0xff] }
 0x1d9   :  { %v4887_v15 = vpop.f32.mrf.mxu0  ;;  %v4928_v8 = vpop.f32.mrf.mxu1 }
 0x1db   :  { %v4888_v2 = vpop.f32.mrf.mxu0  ;;  %v4929_v60 = vpop.f32.mrf.mxu1 }
 0x1dd   :  { %v4965_v25 = vpop.f32.mrf.mxu0  ;;  %v5006_v21 = vpop.f32.mrf.mxu1 }
 0x1de   :  { %v10920_v16 = vmax.f32 %v3489_v18, %v4965_v25  ;;  %v10922_v22 = vmax.f32 %v3491_v31, %v5006_v21  ;;  %v11239_v31 = vld [vmem:[#allocation47_spill] sm:$0xff]  ;;  %v11240_v21 = vld [vmem:[#allocation22_spill] sm:$0xff] }
 0x1df   :  { %v4967_v59 = vpop.f32.mrf.mxu0  ;;  %v5008_v53 = vpop.f32.mrf.mxu1  ;;  %v3494_v38 = vmax.f32 %v11240_v21, %v11239_v31  ;;  %v11245_v21 = vld [vmem:[#allocation25_spill] sm:$0xff] }
 0x1e0   :  { %11233 = vst [vmem:[#allocation2_spill] sm:$0xff] %v10922_v22  ;;  %v10924_v29 = vmax.f32 %v3490_v45, %v4967_v59  ;;  %v10926_v0 = vmax.f32 %v3492_v27, %v5008_v53  ;;  %v11242_v45 = vld [vmem:[#allocation23_spill] sm:$0xff]  ;;  %v11244_v22 = vld [vmem:[#allocation24_spill] sm:$0xff] }
 0x1e1   :  { %v4969_v15 = vpop.f32.mrf.mxu0  ;;  %v5010_v8 = vpop.f32.mrf.mxu1  ;;  %v3496_v59 = vmax.f32 %v11242_v45, %v11241_v41  ;;  %v3499_v41 = vmax.f32 %v11245_v21, %v10744_v32  ;;  %v11249_v21 = vld [vmem:[#allocation28_spill] sm:$0xff] }
 0x1e2   :  { %11234 = vst [vmem:[#allocation30_spill] sm:$0xff] %v10926_v0  ;;  %v11243_v0 = vld [vmem:[#allocation49_spill] sm:$0xff] }
 0x1e3   :  { %v4970_v2 = vpop.f32.mrf.mxu0  ;;  %v5011_v60 = vpop.f32.mrf.mxu1  ;;  %v3497_v31 = vmax.f32 %v11244_v22, %v11243_v0 }
 0x1e5   :  { %v5047_v18 = vpop.f32.mrf.mxu0  ;;  %v5088_v25 = vpop.f32.mrf.mxu1 }
 0x1e6   :  { %v10936_v27 = vmax.f32 %v3493_v19, %v5047_v18  ;;  %v10938_v53 = vmax.f32 %v3495_v44, %v5088_v25  ;;  %v11246_v44 = vld [vmem:[#allocation26_spill] sm:$0xff] }
 0x1e7   :  { %v5049_v15 = vpop.f32.mrf.mxu0  ;;  %v5090_v8 = vpop.f32.mrf.mxu1  ;;  %v3498_v25 = vmax.f32 %v11246_v44, %v10733_v13  ;;  %v3501_v13 = vmax.f32 %v11249_v21, %v10746_v33 }
 0x1e8   :  { %v10940_v2 = vmax.f32 %v3494_v38, %v5049_v15  ;;  %v10942_v60 = vmax.f32 %v3496_v59, %v5090_v8  ;;  %v11247_v38 = vld [vmem:[#allocation27_spill] sm:$0xff]  ;;  %v10962_v44 = vpop.permute.xlu0 %7033 }
 0x1e9   :  { %v5051_v58 = vpop.f32.mrf.mxu0  ;;  %v5092_v17 = vpop.f32.mrf.mxu1  ;;  %v3500_v45 = vmax.f32 %v11247_v38, %v10758_v48 }
 0x1eb   :  { %v5052_v34 = vpop.f32.mrf.mxu0  ;;  %v5093_v61 = vpop.f32.mrf.mxu1 }
 0x1ed   :  { %v5129_v19 = vpop.f32.mrf.mxu0  ;;  %v5170_v18 = vpop.f32.mrf.mxu1 }
 0x1ee   :  { %v10952_v59 = vmax.f32 %v3497_v31, %v5129_v19  ;;  %v10954_v15 = vmax.f32 %v3499_v41, %v5170_v18 }
 0x1ef   :  { %v5131_v8 = vpop.f32.mrf.mxu0  ;;  %v5172_v58 = vpop.f32.mrf.mxu1 }
 0x1f0   :  { %v10956_v17 = vmax.f32 %v3498_v25, %v5131_v8  ;;  %v10958_v22 = vmax.f32 %v3500_v45, %v5172_v58 }
 0x1f1   :  { %v5133_v0 = vpop.f32.mrf.mxu0  ;;  %v5174_v32 = vpop.f32.mrf.mxu1 }
 0x1f2   :  { %11248 = vst [vmem:[#allocation3_spill] sm:$0xff] %v10958_v22 }
 0x1f3   :  { %v5134_v34 = vpop.f32.mrf.mxu0  ;;  %v5175_v61 = vpop.f32.mrf.mxu1 }
 0x1f5   :  { %v5211_v48 = vpop.f32.mrf.mxu0  ;;  %v5991_v31 = vpop.f32.mrf.mxu1 }
 0x1f6   :  { %v10964_v19 = vmax.f32 %v3501_v13, %v5211_v48  ;;  %v6981_v41 = vmax.f32 %v10776_v35, %v5991_v31 }
 0x1f7   :  { %v8236_v18 = vpop.f32.mrf.mxu0  ;;  %v5993_v25 = vpop.f32.mrf.mxu1 }
 0x1f8   :  { %v6982_v38 = vmax.f32 %v10780_v51, %v5993_v25  ;;  %v7036_v45 = vadd.f32 %v10962_v44, %v6981_v41 }
 0x1f9   :  { %v5214_v8 = vpop.f32.mrf.mxu0  ;;  %v5995_v58 = vpop.f32.mrf.mxu1 }
 0x1fa   :  { %v7037_v0 = vadd.f32 %v10962_v44, %v6982_v38  ;;  %v7085_v34 = vmax.f32 %v7036_v45, 0.0 }
 0x1fb   :  { %v8237_v32 = vpop.f32.mrf.mxu0  ;;  %v5996_v33 = vpop.f32.mrf.mxu1 }
 0x1fc   :  { %v7086_v61 = vmax.f32 %v7037_v0, 0.0 }
 0x1fd   :  { %v6032_v21 = vpop.f32.mrf.mxu0  ;;  %v6073_v22 = vpop.f32.mrf.mxu1 }
 0x1fe   :  { %v8177_v13 = vpack.c.bf16 %v7086_v61, %v7085_v34  ;;  %v6983_v48 = vmax.f32 %v10778_v9, %v6032_v21  ;;  %v6985_v35 = vmax.f32 %v10792_v54, %v6073_v22 }
 0x1ff   :  { %v6034_v31 = vpop.f32.mrf.mxu0  ;;  %v6075_v18 = vpop.f32.mrf.mxu1 }
 0x200   :  { %7331 = vst [vmem:[%s11142_s3] sm:$0xff] %v8177_v13  ;;  %v7038_v51 = vadd.f32 %v10962_v44, %v6983_v48  ;;  %v7040_v41 = vadd.f32 %v10962_v44, %v6985_v35  ;;  %v6984_v25 = vmax.f32 %v10782_v4, %v6034_v31  ;;  %v6986_v38 = vmax.f32 %v10796_v3, %v6075_v18 }
 0x201   :  { %v6036_v45 = vpop.f32.mrf.mxu0  ;;  %v6077_v8 = vpop.f32.mrf.mxu1 }
 0x202   :  { %v7039_v9 = vadd.f32 %v10962_v44, %v6984_v25  ;;  %v7041_v54 = vadd.f32 %v10962_v44, %v6986_v38  ;;  %v7087_v0 = vmax.f32 %v7038_v51, 0.0  ;;  %v7089_v32 = vmax.f32 %v7040_v41, 0.0 }
 0x203   :  { %v6037_v22 = vpop.f32.mrf.mxu0  ;;  %v6078_v58 = vpop.f32.mrf.mxu1 }
 0x204   :  { %v7088_v33 = vmax.f32 %v7039_v9, 0.0  ;;  %v7090_v34 = vmax.f32 %v7041_v54, 0.0 }
 0x205   :  { %v6114_v61 = vpop.f32.mrf.mxu0  ;;  %v6155_v21 = vpop.f32.mrf.mxu1 }
 0x206   :  { %v8178_v13 = vpack.c.bf16 %v7088_v33, %v7087_v0  ;;  %v8179_v48 = vpack.c.bf16 %v7090_v34, %v7089_v32  ;;  %v6987_v4 = vmax.f32 %v10794_v7, %v6114_v61  ;;  %v6989_v3 = vmax.f32 %v10808_v10, %v6155_v21 }
 0x207   :  { %v6116_v35 = vpop.f32.mrf.mxu0  ;;  %v6157_v31 = vpop.f32.mrf.mxu1 }
 0x208   :  { %7332 = vst [vmem:[%s11142_s3 + $0x8] sm:$0xff] %v8178_v13  ;;  %7333 = vst [vmem:[%s11142_s3 + $0x10] sm:$0xff] %v8179_v48  ;;  %v7042_v18 = vadd.f32 %v10962_v44, %v6987_v4  ;;  %v7044_v51 = vadd.f32 %v10962_v44, %v6989_v3  ;;  %v6988_v41 = vmax.f32 %v10798_v30, %v6116_v35 }
 0x209   :  { %v6990_v7 = vmax.f32 %v10812_v6, %v6157_v31  ;;  %v6118_v25 = vpop.f32.mrf.mxu0  ;;  %v6159_v10 = vpop.f32.mrf.mxu1 }
 0x20a   :  { %v7043_v38 = vadd.f32 %v10962_v44, %v6988_v41  ;;  %v7091_v54 = vmax.f32 %v7042_v18, 0.0  ;;  %v7093_v22 = vmax.f32 %v7044_v51, 0.0 }
 0x20b   :  { %v7045_v45 = vadd.f32 %v10962_v44, %v6990_v7  ;;  %v6119_v8 = vpop.f32.mrf.mxu0  ;;  %v6160_v9 = vpop.f32.mrf.mxu1 }
 0x20c   :  { %v7092_v58 = vmax.f32 %v7043_v38, 0.0 }
 0x20d   :  { %v7094_v0 = vmax.f32 %v7045_v45, 0.0  ;;  %v6196_v32 = vpop.f32.mrf.mxu0  ;;  %v6237_v33 = vpop.f32.mrf.mxu1 }
 0x20e   :  { %v8180_v34 = vpack.c.bf16 %v7092_v58, %v7091_v54  ;;  %v6991_v30 = vmax.f32 %v10810_v42, %v6196_v32  ;;  %v6993_v6 = vmax.f32 %v10824_v5, %v6237_v33 }
 0x20f   :  { %v8181_v61 = vpack.c.bf16 %v7094_v0, %v7093_v22  ;;  %v6198_v21 = vpop.f32.mrf.mxu0  ;;  %v6239_v13 = vpop.f32.mrf.mxu1 }
 0x210   :  { %7334 = vst [vmem:[%s11142_s3 + $0x18] sm:$0xff] %v8180_v34  ;;  %v7046_v48 = vadd.f32 %v10962_v44, %v6991_v30  ;;  %v7048_v4 = vadd.f32 %v10962_v44, %v6993_v6  ;;  %v6992_v3 = vmax.f32 %v10814_v52, %v6198_v21  ;;  %v6994_v42 = vmax.f32 %v10828_v55, %v6239_v13 }
 0x211   :  { %7335 = vst [vmem:[%s11142_s3 + $0x20] sm:$0xff] %v8181_v61  ;;  %v6200_v35 = vpop.f32.mrf.mxu0  ;;  %v6241_v5 = vpop.f32.mrf.mxu1 }
 0x212   :  { %v7047_v31 = vadd.f32 %v10962_v44, %v6992_v3  ;;  %v7049_v18 = vadd.f32 %v10962_v44, %v6994_v42  ;;  %v7095_v7 = vmax.f32 %v7046_v48, 0.0  ;;  %v7097_v25 = vmax.f32 %v7048_v4, 0.0 }
 0x213   :  { %v6201_v51 = vpop.f32.mrf.mxu0  ;;  %v6242_v41 = vpop.f32.mrf.mxu1 }
 0x214   :  { %v7096_v10 = vmax.f32 %v7047_v31, 0.0  ;;  %v7098_v38 = vmax.f32 %v7049_v18, 0.0 }
 0x215   :  { %v6278_v45 = vpop.f32.mrf.mxu0  ;;  %v6319_v8 = vpop.f32.mrf.mxu1 }
 0x216   :  { %v8182_v9 = vpack.c.bf16 %v7096_v10, %v7095_v7  ;;  %v8183_v54 = vpack.c.bf16 %v7098_v38, %v7097_v25  ;;  %v6995_v52 = vmax.f32 %v10826_v62, %v6278_v45  ;;  %v6997_v55 = vmax.f32 %v10840_v50, %v6319_v8 }
 0x217   :  { %v6280_v22 = vpop.f32.mrf.mxu0  ;;  %v6321_v58 = vpop.f32.mrf.mxu1 }
 0x218   :  { %7336 = vst [vmem:[%s11142_s3 + $0x28] sm:$0xff] %v8182_v9  ;;  %7337 = vst [vmem:[%s11142_s3 + $0x30] sm:$0xff] %v8183_v54  ;;  %v7050_v0 = vadd.f32 %v10962_v44, %v6995_v52  ;;  %v7052_v32 = vadd.f32 %v10962_v44, %v6997_v55  ;;  %v6996_v33 = vmax.f32 %v10830_v11, %v6280_v22 }
 0x219   :  { %v6998_v62 = vmax.f32 %v10844_v49, %v6321_v58  ;;  %v6282_v34 = vpop.f32.mrf.mxu0  ;;  %v6323_v50 = vpop.f32.mrf.mxu1 }
 0x21a   :  { %v7051_v61 = vadd.f32 %v10962_v44, %v6996_v33  ;;  %v7099_v13 = vmax.f32 %v7050_v0, 0.0  ;;  %v7101_v48 = vmax.f32 %v7052_v32, 0.0 }
 0x21b   :  { %v7053_v30 = vadd.f32 %v10962_v44, %v6998_v62  ;;  %v6283_v6 = vpop.f32.mrf.mxu0  ;;  %v6324_v21 = vpop.f32.mrf.mxu1 }
 0x21c   :  { %v7100_v4 = vmax.f32 %v7051_v61, 0.0 }
 0x21d   :  { %v7102_v3 = vmax.f32 %v7053_v30, 0.0  ;;  %v6360_v42 = vpop.f32.mrf.mxu0  ;;  %v6401_v35 = vpop.f32.mrf.mxu1 }
 0x21e   :  { %v8184_v5 = vpack.c.bf16 %v7100_v4, %v7099_v13  ;;  %v6999_v11 = vmax.f32 %v10842_v36, %v6360_v42  ;;  %v7001_v49 = vmax.f32 %v10856_v23, %v6401_v35 }
 0x21f   :  { %v8185_v31 = vpack.c.bf16 %v7102_v3, %v7101_v48  ;;  %v6362_v18 = vpop.f32.mrf.mxu0  ;;  %v6403_v51 = vpop.f32.mrf.mxu1 }
 0x220   :  { %7338 = vst [vmem:[%s11142_s3 + $0x38] sm:$0xff] %v8184_v5  ;;  %v7054_v41 = vadd.f32 %v10962_v44, %v6999_v11  ;;  %v7056_v7 = vadd.f32 %v10962_v44, %v7001_v49  ;;  %v7000_v25 = vmax.f32 %v10846_v39, %v6362_v18  ;;  %v7002_v36 = vmax.f32 %v10860_v46, %v6403_v51 }
 0x221   :  { %7339 = vst [vmem:[%s11142_s3 + $0x40] sm:$0xff] %v8185_v31  ;;  %v6364_v10 = vpop.f32.mrf.mxu0  ;;  %v6405_v23 = vpop.f32.mrf.mxu1 }
 0x222   :  { %v7055_v38 = vadd.f32 %v10962_v44, %v7000_v25  ;;  %v7057_v45 = vadd.f32 %v10962_v44, %v7002_v36  ;;  %v7103_v54 = vmax.f32 %v7054_v41, 0.0  ;;  %v7105_v52 = vmax.f32 %v7056_v7, 0.0 }
 0x223   :  { %v6365_v8 = vpop.f32.mrf.mxu0  ;;  %v6406_v9 = vpop.f32.mrf.mxu1 }
 0x224   :  { %v7104_v55 = vmax.f32 %v7055_v38, 0.0  ;;  %v7106_v22 = vmax.f32 %v7057_v45, 0.0 }
 0x225   :  { %v6442_v58 = vpop.f32.mrf.mxu0  ;;  %v6483_v0 = vpop.f32.mrf.mxu1 }
 0x226   :  { %v8186_v32 = vpack.c.bf16 %v7104_v55, %v7103_v54  ;;  %v8187_v33 = vpack.c.bf16 %v7106_v22, %v7105_v52  ;;  %v7003_v39 = vmax.f32 %v10858_v14, %v6442_v58  ;;  %v7005_v46 = vmax.f32 %v10872_v26, %v6483_v0 }
 0x227   :  { %v6444_v62 = vpop.f32.mrf.mxu0  ;;  %v6485_v34 = vpop.f32.mrf.mxu1 }
 0x228   :  { %7340 = vst [vmem:[%s11142_s3 + $0x48] sm:$0xff] %v8186_v32  ;;  %7341 = vst [vmem:[%s11142_s3 + $0x50] sm:$0xff] %v8187_v33  ;;  %v7058_v50 = vadd.f32 %v10962_v44, %v7003_v39  ;;  %v7060_v61 = vadd.f32 %v10962_v44, %v7005_v46  ;;  %v7004_v30 = vmax.f32 %v10862_v63, %v6444_v62 }
 0x229   :  { %v7006_v14 = vmax.f32 %v10876_v40, %v6485_v34  ;;  %v6446_v6 = vpop.f32.mrf.mxu0  ;;  %v6487_v26 = vpop.f32.mrf.mxu1 }
 0x22a   :  { %v7059_v21 = vadd.f32 %v10962_v44, %v7004_v30  ;;  %v7107_v3 = vmax.f32 %v7058_v50, 0.0  ;;  %v7109_v42 = vmax.f32 %v7060_v61, 0.0 }
 0x22b   :  { %v7061_v13 = vadd.f32 %v10962_v44, %v7006_v14  ;;  %v6447_v48 = vpop.f32.mrf.mxu0  ;;  %v6488_v4 = vpop.f32.mrf.mxu1 }
 0x22c   :  { %v7108_v35 = vmax.f32 %v7059_v21, 0.0 }
 0x22d   :  { %v7110_v5 = vmax.f32 %v7061_v13, 0.0  ;;  %v6524_v31 = vpop.f32.mrf.mxu0  ;;  %v6565_v11 = vpop.f32.mrf.mxu1 }
 0x22e   :  { %v8188_v49 = vpack.c.bf16 %v7108_v35, %v7107_v3  ;;  %v7007_v63 = vmax.f32 %v10874_v37, %v6524_v31  ;;  %v7009_v40 = vmax.f32 %v10888_v24, %v6565_v11 }
 0x22f   :  { %v8189_v18 = vpack.c.bf16 %v7110_v5, %v7109_v42  ;;  %v6526_v51 = vpop.f32.mrf.mxu0  ;;  %v6567_v41 = vpop.f32.mrf.mxu1 }
 0x230   :  { %7342 = vst [vmem:[%s11142_s3 + $0x58] sm:$0xff] %v8188_v49  ;;  %v7062_v7 = vadd.f32 %v10962_v44, %v7007_v63  ;;  %v7064_v25 = vadd.f32 %v10962_v44, %v7009_v40  ;;  %v7008_v36 = vmax.f32 %v10878_v28, %v6526_v51  ;;  %v7010_v37 = vmax.f32 %v10892_v12, %v6567_v41 }
 0x231   :  { %7343 = vst [vmem:[%s11142_s3 + $0x60] sm:$0xff] %v8189_v18  ;;  %v6528_v10 = vpop.f32.mrf.mxu0  ;;  %v6569_v24 = vpop.f32.mrf.mxu1 }
 0x232   :  { %v7063_v23 = vadd.f32 %v10962_v44, %v7008_v36  ;;  %v7065_v38 = vadd.f32 %v10962_v44, %v7010_v37  ;;  %v7111_v9 = vmax.f32 %v7062_v7, 0.0  ;;  %v7113_v54 = vmax.f32 %v7064_v25, 0.0 }
 0x233   :  { %v6529_v45 = vpop.f32.mrf.mxu0  ;;  %v6570_v8 = vpop.f32.mrf.mxu1 }
 0x234   :  { %v7112_v52 = vmax.f32 %v7063_v23, 0.0  ;;  %v7114_v55 = vmax.f32 %v7065_v38, 0.0  ;;  %v11250_v8 = vld [vmem:[#allocation2_spill] sm:$0xff] }
 0x235   :  { %v6606_v22 = vpop.f32.mrf.mxu0  ;;  %v6647_v58 = vpop.f32.mrf.mxu1 }
 0x236   :  { %v8190_v0 = vpack.c.bf16 %v7112_v52, %v7111_v9  ;;  %v8191_v32 = vpack.c.bf16 %v7114_v55, %v7113_v54  ;;  %v7011_v28 = vmax.f32 %v10890_v43, %v6606_v22  ;;  %v7013_v12 = vmax.f32 %v10904_v56, %v6647_v58  ;;  %v11251_v22 = vld [vmem:[#allocation30_spill] sm:$0xff] }
 0x237   :  { %v6608_v33 = vpop.f32.mrf.mxu0  ;;  %v6649_v39 = vpop.f32.mrf.mxu1 }
 0x238   :  { %7344 = vst [vmem:[%s11142_s3 + $0x68] sm:$0xff] %v8190_v0  ;;  %7345 = vst [vmem:[%s11142_s3 + $0x70] sm:$0xff] %v8191_v32  ;;  %v7066_v46 = vadd.f32 %v10962_v44, %v7011_v28  ;;  %v7068_v62 = vadd.f32 %v10962_v44, %v7013_v12  ;;  %v7012_v34 = vmax.f32 %v10894_v20, %v6608_v33 }
 0x239   :  { %v7014_v43 = vmax.f32 %v10908_v47, %v6649_v39  ;;  %v6610_v50 = vpop.f32.mrf.mxu0  ;;  %v6651_v56 = vpop.f32.mrf.mxu1 }
 0x23a   :  { %v7067_v61 = vadd.f32 %v10962_v44, %v7012_v34  ;;  %v7115_v26 = vmax.f32 %v7066_v46, 0.0  ;;  %v7117_v21 = vmax.f32 %v7068_v62, 0.0 }
 0x23b   :  { %v7069_v30 = vadd.f32 %v10962_v44, %v7014_v43  ;;  %v6611_v14 = vpop.f32.mrf.mxu0  ;;  %v6652_v6 = vpop.f32.mrf.mxu1 }
 0x23c   :  { %v7116_v13 = vmax.f32 %v7067_v61, 0.0 }
 0x23d   :  { %v7118_v48 = vmax.f32 %v7069_v30, 0.0  ;;  %v6688_v4 = vpop.f32.mrf.mxu0  ;;  %v6729_v3 = vpop.f32.mrf.mxu1 }
 0x23e   :  { %v8192_v42 = vpack.c.bf16 %v7116_v13, %v7115_v26  ;;  %v7015_v20 = vmax.f32 %v10906_v57, %v6688_v4  ;;  %v7017_v47 = vmax.f32 %v10920_v16, %v6729_v3 }
 0x23f   :  { %v8193_v35 = vpack.c.bf16 %v7118_v48, %v7117_v21  ;;  %v6690_v5 = vpop.f32.mrf.mxu0  ;;  %v6731_v31 = vpop.f32.mrf.mxu1 }
 0x240   :  { %7346 = vst [vmem:[%s11142_s3 + $0x78] sm:$0xff] %v8192_v42  ;;  %v7070_v11 = vadd.f32 %v10962_v44, %v7015_v20  ;;  %v7072_v49 = vadd.f32 %v10962_v44, %v7017_v47  ;;  %v7016_v18 = vmax.f32 %v10910_v1, %v6690_v5  ;;  %v7018_v57 = vmax.f32 %v10924_v29, %v6731_v31 }
 0x241   :  { %7347 = vst [vmem:[%s11142_s3 + $0x80] sm:$0xff] %v8193_v35  ;;  %v6692_v63 = vpop.f32.mrf.mxu0  ;;  %v6733_v16 = vpop.f32.mrf.mxu1 }
 0x242   :  { %v7071_v40 = vadd.f32 %v10962_v44, %v7016_v18  ;;  %v7073_v51 = vadd.f32 %v10962_v44, %v7018_v57  ;;  %v7119_v25 = vmax.f32 %v7070_v11, 0.0  ;;  %v7121_v36 = vmax.f32 %v7072_v49, 0.0 }
 0x243   :  { %v6693_v41 = vpop.f32.mrf.mxu0  ;;  %v6734_v7 = vpop.f32.mrf.mxu1 }
 0x244   :  { %v7120_v37 = vmax.f32 %v7071_v40, 0.0  ;;  %v7122_v10 = vmax.f32 %v7073_v51, 0.0  ;;  %v11252_v7 = vld [vmem:[#allocation3_spill] sm:$0xff] }
 0x245   :  { %v6770_v24 = vpop.f32.mrf.mxu0  ;;  %v6811_v23 = vpop.f32.mrf.mxu1 }
 0x246   :  { %v8194_v38 = vpack.c.bf16 %v7120_v37, %v7119_v25  ;;  %v8195_v45 = vpack.c.bf16 %v7122_v10, %v7121_v36  ;;  %v7019_v1 = vmax.f32 %v11250_v8, %v6770_v24  ;;  %v7021_v29 = vmax.f32 %v10936_v27, %v6811_v23 }
 0x247   :  { %v6772_v9 = vpop.f32.mrf.mxu0  ;;  %v6813_v54 = vpop.f32.mrf.mxu1 }
 0x248   :  { %7348 = vst [vmem:[%s11142_s3 + $0x88] sm:$0xff] %v8194_v38  ;;  %7349 = vst [vmem:[%s11142_s3 + $0x90] sm:$0xff] %v8195_v45  ;;  %v7074_v52 = vadd.f32 %v10962_v44, %v7019_v1  ;;  %v7076_v55 = vadd.f32 %v10962_v44, %v7021_v29  ;;  %v7020_v58 = vmax.f32 %v11251_v22, %v6772_v9 }
 0x249   :  { %v7022_v0 = vmax.f32 %v10940_v2, %v6813_v54  ;;  %v6774_v32 = vpop.f32.mrf.mxu0  ;;  %v6815_v27 = vpop.f32.mrf.mxu1 }
 0x24a   :  { %v7075_v28 = vadd.f32 %v10962_v44, %v7020_v58  ;;  %v7123_v46 = vmax.f32 %v7074_v52, 0.0  ;;  %v7125_v62 = vmax.f32 %v7076_v55, 0.0 }
 0x24b   :  { %v7077_v12 = vadd.f32 %v10962_v44, %v7022_v0  ;;  %v6775_v33 = vpop.f32.mrf.mxu0  ;;  %v6816_v39 = vpop.f32.mrf.mxu1 }
 0x24c   :  { %v7124_v34 = vmax.f32 %v7075_v28, 0.0 }
 0x24d   :  { %v7126_v43 = vmax.f32 %v7077_v12, 0.0  ;;  %v6852_v50 = vpop.f32.mrf.mxu0  ;;  %v6893_v56 = vpop.f32.mrf.mxu1 }
 0x24e   :  { %v8196_v61 = vpack.c.bf16 %v7124_v34, %v7123_v46  ;;  %v7023_v14 = vmax.f32 %v10938_v53, %v6852_v50  ;;  %v7025_v2 = vmax.f32 %v10952_v59, %v6893_v56 }
 0x24f   :  { %v8197_v30 = vpack.c.bf16 %v7126_v43, %v7125_v62  ;;  %v6854_v6 = vpop.f32.mrf.mxu0  ;;  %v6895_v26 = vpop.f32.mrf.mxu1 }
 0x250   :  { %7350 = vst [vmem:[%s11142_s3 + $0x98] sm:$0xff] %v8196_v61  ;;  %v7078_v21 = vadd.f32 %v10962_v44, %v7023_v14  ;;  %v7080_v13 = vadd.f32 %v10962_v44, %v7025_v2  ;;  %v7024_v48 = vmax.f32 %v10942_v60, %v6854_v6  ;;  %v7026_v53 = vmax.f32 %v10956_v17, %v6895_v26 }
 0x251   :  { %7351 = vst [vmem:[%s11142_s3 + $0xa0] sm:$0xff] %v8197_v30  ;;  %v6856_v4 = vpop.f32.mrf.mxu0  ;;  %v6897_v59 = vpop.f32.mrf.mxu1 }
 0x252   :  { %v7079_v3 = vadd.f32 %v10962_v44, %v7024_v48  ;;  %v7081_v42 = vadd.f32 %v10962_v44, %v7026_v53  ;;  %v7127_v47 = vmax.f32 %v7078_v21, 0.0  ;;  %v7129_v5 = vmax.f32 %v7080_v13, 0.0 }
 0x253   :  { %v6857_v35 = vpop.f32.mrf.mxu0  ;;  %v6898_v20 = vpop.f32.mrf.mxu1 }
 0x254   :  { %v7128_v31 = vmax.f32 %v7079_v3, 0.0  ;;  %v7130_v11 = vmax.f32 %v7081_v42, 0.0 }
 0x255   :  { %v6934_v49 = vpop.f32.mrf.mxu0  ;;  %v6975_v18 = vpop.f32.mrf.mxu1 }
 0x256   :  { %v8198_v57 = vpack.c.bf16 %v7128_v31, %v7127_v47  ;;  %v8199_v63 = vpack.c.bf16 %v7130_v11, %v7129_v5  ;;  %v7027_v60 = vmax.f32 %v10954_v15, %v6934_v49  ;;  %v7029_v17 = vmax.f32 %v10964_v19, %v6975_v18 }
 0x257   :  { %v6936_v16 = vpop.f32.mrf.mxu0  ;;  %v8244_v40 = vpop.f32.mrf.mxu1 }
 0x258   :  { %7352 = vst [vmem:[%s11142_s3 + $0xa8] sm:$0xff] %v8198_v57  ;;  %7353 = vst [vmem:[%s11142_s3 + $0xb0] sm:$0xff] %v8199_v63  ;;  %v7082_v51 = vadd.f32 %v10962_v44, %v7027_v60  ;;  %v7084_v41 = vadd.f32 %v10962_v44, %v7029_v17  ;;  %v7028_v25 = vmax.f32 %v11252_v7, %v6936_v16 }
 0x259   :  { %v6938_v36 = vpop.f32.mrf.mxu0  ;;  %v6978_v15 = vpop.f32.mrf.mxu1 }
 0x25a   :  { %v7133_v37 = vmax.f32 %v7084_v41, 0.0  ;;  %v7083_v19 = vadd.f32 %v10962_v44, %v7028_v25  ;;  %v7131_v23 = vmax.f32 %v7082_v51, 0.0 }
 0x25b   :  { %v6939_v10 = vpop.f32.mrf.mxu0  ;;  %v8245_v24 = vpop.f32.mrf.mxu1 }
 0x25c   :  { %v8201_v38 = vpack.c.bf16 %v7133_v37, %v7133_v37  ;;  %v7132_v45 = vmax.f32 %v7083_v19, 0.0 }
 0x25e   :  { %7355 = vst [vmem:[%s11142_s3 + $0xc0] sm:$0xf] %v8201_v38  ;;  %v8200_v8 = vpack.c.bf16 %v7132_v45, %v7131_v23 }
 0x260   :  { %7354 = vst [vmem:[%s11142_s3 + $0xb8] sm:$0xff] %v8200_v8 }

// kernel: lenet5_forward.3
= control target key start
LH: loop header
LB: loop body
LE: loop exit
PB: predicated region body
PF: predicated region fallthrough
CT: control target
= control target key end

     0   :  { %v9800_v0 = vmov 0   ;;  %vm2309_vm0 = vcmask 179200   ;;  %vm2910_vm1 = vcmask 1042432   ;;  %vm4599_vm2 = vcmask 130048   ;;  %s12833_s1 = inlined_call_operand.vmem [shape: bf16[150,16], index: 1, kind: input, shape index: {}]   ;;  %s12834_s0 = inlined_call_operand.vmem [shape: bf16[1,3200,150], index: 0, kind: input, shape index: {}]   ;;  %s12835_s3 = inlined_call_operand.vmem [shape: f32[25,16,128], index: 3, kind: input, shape index: {}]   ;;  %s12836_s2 = inlined_call_operand.vmem [shape: f32[1,16], index: 2, kind: input, shape index: {}]   ;;  %s12837_s5 = inlined_call_operand.vmem [shape: f32[128,128], index: 5, kind: input, shape index: {}]   ;;  %s12838_s7 = inlined_call_operand.vmem [shape: f32[128,128], index: 7, kind: input, shape index: {}]   ;;  %s12839_s4 = inlined_call_operand.vmem [shape: f32[1,128], index: 4, kind: input, shape index: {}]   ;;  %s12840_s6 = inlined_call_operand.vmem [shape: f32[1,128], index: 6, kind: input, shape index: {}]   ;;  %s12841_s8 = inlined_call_operand.vmem [shape: f32[1,128], index: 8, kind: input, shape index: {}]   ;;  %s12842_s9 = inlined_call_operand.vmem [shape: f32[32,128], index: 9, kind: output, shape index: {}]  }
   0x1   :  { %2914 = vmatprep.subr.bf16.mxu0 %v9800_v0  ;;  %9167 = vmatprep.subr.bf16.mxu1 %v9800_v0  ;;  %v9188_v1 = vld [vmem:[%s12833_s1 + $0x38] sm:$0xff]   ;;  %v9189_v2 = vld [vmem:[%s12833_s1 + $0x30] sm:$0xff]   ;;  %v9190_v3 = vld [vmem:[%s12833_s1 + $0x28] sm:$0xff]  }
   0x2   :  { %2915 = vmatpush1.bf16.msra.mxu0 %v9188_v1  ;;  %9177 = vmatpush1.bf16.msra.mxu1 %v9188_v1  ;;  %v9191_v4 = vld [vmem:[%s12833_s1 + $0x20] sm:$0xff]   ;;  %v9203_v6 = vld [vmem:[%s12834_s0 + $0x754] ss:$8 sps:$4 sm:$0xff]   ;;  %v9194_v9 = vld [vmem:[%s12833_s1 + $0x8] sm:$0xff]  }
   0x3   :  { %2916 = vmatprep.subr.bf16.mxu0 %v9800_v0  ;;  %9168 = vmatprep.subr.bf16.mxu1 %v9800_v0  ;;  %v9200_v5 = vld [vmem:[%s12834_s0 + $0x4] ss:$8 sps:$4 sm:$0xff]   ;;  %v9192_v7 = vld [vmem:[%s12833_s1 + $0x18] sm:$0xff]   ;;  %v9193_v8 = vld [vmem:[%s12833_s1 + $0x10] sm:$0xff]  }
   0x4   :  { %8299 = vmatprep.mubr.msk.bf16.mxu0 %vm2309_vm0, %v9200_v5  ;;  %8416 = vmatprep.mubr.msk.bf16.mxu1 %vm2309_vm0, %v9203_v6  ;;  %v9195_v10 = vld [vmem:[%s12833_s1] sm:$0xff]   ;;  %v9196_v11 = vld [vmem:[%s12833_s1 + $0x48] ss:$0 sps:$4 sm:$0x77]   ;;  %v9201_v15 = vld [vmem:[%s12834_s0 + $0x750] ss:$8 sps:$4 sm:$0xff]  }
   0x5   :  { %v2912_v12 = vsel %vm2910_vm1, %v9196_v11, 0  ;;  %v9197_v13 = vld [vmem:[%s12833_s1 + $0x40] sm:$0xff]   ;;  %v9204_v16 = vld [vmem:[%s12834_s0 + $0x14] ss:$8 sps:$4 sm:$0xff]   ;;  %v9208_v18 = vld [vmem:[%s12834_s0 + $0x10] ss:$8 sps:$4 sm:$0xff]  }
   0x6   :  { %2917 = vmatpush1.bf16.msra.mxu0 %v9189_v2  ;;  %9178 = vmatpush1.bf16.msra.mxu1 %v9189_v2  ;;  %v9198_v14 = vld [vmem:[%s12834_s0] ss:$8 sps:$4 sm:$0xff]   ;;  %v9206_v17 = vld [vmem:[%s12834_s0 + $0x764] ss:$8 sps:$4 sm:$0xff]   ;;  %v9212_v21 = vld [vmem:[%s12834_s0 + $0x774] ss:$8 sps:$4 sm:$0xff]  }
   0x7   :  { %2918 = vmatprep.subr.bf16.mxu0 %v9800_v0  ;;  %9169 = vmatprep.subr.bf16.mxu1 %v9800_v0  ;;  %v9209_v19 = vld [vmem:[%s12834_s0 + $0x760] ss:$8 sps:$4 sm:$0xff]   ;;  %v9210_v20 = vld [vmem:[%s12834_s0 + $0x24] ss:$8 sps:$4 sm:$0xff]   ;;  %v9215_v23 = vld [vmem:[%s12834_s0 + $0x770] ss:$8 sps:$4 sm:$0xff]  }
   0x8   :  { %v9214_v22 = vld [vmem:[%s12834_s0 + $0x20] ss:$8 sps:$4 sm:$0xff]   ;;  %v9216_v24 = vld [vmem:[%s12834_s0 + $0x34] ss:$8 sps:$4 sm:$0xff]   ;;  %v9218_v25 = vld [vmem:[%s12834_s0 + $0x784] ss:$8 sps:$4 sm:$0xff]  }
   0x9   :  { %v9220_v26 = vld [vmem:[%s12834_s0 + $0x30] ss:$8 sps:$4 sm:$0xff]   ;;  %v9221_v27 = vld [vmem:[%s12834_s0 + $0x780] ss:$8 sps:$4 sm:$0xff]   ;;  %v9222_v28 = vld [vmem:[%s12834_s0 + $0x44] ss:$8 sps:$4 sm:$0xff]  }
   0xa   :  { %2919 = vmatpush1.bf16.msra.mxu0 %v9190_v3  ;;  %9179 = vmatpush1.bf16.msra.mxu1 %v9190_v3  ;;  %v9224_v29 = vld [vmem:[%s12834_s0 + $0x794] ss:$8 sps:$4 sm:$0xff]   ;;  %v9226_v30 = vld [vmem:[%s12834_s0 + $0x40] ss:$8 sps:$4 sm:$0xff]   ;;  %v9227_v31 = vld [vmem:[%s12834_s0 + $0x790] ss:$8 sps:$4 sm:$0xff]  }
   0xb   :  { %2920 = vmatprep.subr.bf16.mxu0 %v9800_v0  ;;  %9170 = vmatprep.subr.bf16.mxu1 %v9800_v0  ;;  %v9228_v32 = vld [vmem:[%s12834_s0 + $0x54] ss:$8 sps:$4 sm:$0xff]   ;;  %v9230_v33 = vld [vmem:[%s12834_s0 + $0x7a4] ss:$8 sps:$4 sm:$0xff]   ;;  %v9232_v34 = vld [vmem:[%s12834_s0 + $0x50] ss:$8 sps:$4 sm:$0xff]  }
   0xc   :  { %v9233_v35 = vld [vmem:[%s12834_s0 + $0x7a0] ss:$8 sps:$4 sm:$0xff]   ;;  %v9234_v36 = vld [vmem:[%s12834_s0 + $0x64] ss:$8 sps:$4 sm:$0xff]   ;;  %v9236_v37 = vld [vmem:[%s12834_s0 + $0x7b4] ss:$8 sps:$4 sm:$0xff]  }
   0xd   :  { %v9238_v38 = vld [vmem:[%s12834_s0 + $0x60] ss:$8 sps:$4 sm:$0xff]   ;;  %v9239_v39 = vld [vmem:[%s12834_s0 + $0x7b0] ss:$8 sps:$4 sm:$0xff]   ;;  %v9240_v40 = vld [vmem:[%s12834_s0 + $0x74] ss:$8 sps:$4 sm:$0xff]  }
   0xe   :  { %2921 = vmatpush1.bf16.msra.mxu0 %v9191_v4  ;;  %9180 = vmatpush1.bf16.msra.mxu1 %v9191_v4  ;;  %v9242_v41 = vld [vmem:[%s12834_s0 + $0x7c4] ss:$8 sps:$4 sm:$0xff]   ;;  %v9244_v42 = vld [vmem:[%s12834_s0 + $0x70] ss:$8 sps:$4 sm:$0xff]   ;;  %v9245_v43 = vld [vmem:[%s12834_s0 + $0x7c0] ss:$8 sps:$4 sm:$0xff]  }
   0xf   :  { %2922 = vmatprep.subr.bf16.mxu0 %v9800_v0  ;;  %9171 = vmatprep.subr.bf16.mxu1 %v9800_v0  ;;  %v9246_v44 = vld [vmem:[%s12834_s0 + $0x84] ss:$8 sps:$4 sm:$0xff]   ;;  %v9248_v45 = vld [vmem:[%s12834_s0 + $0x7d4] ss:$8 sps:$4 sm:$0xff]   ;;  %v9250_v46 = vld [vmem:[%s12834_s0 + $0x80] ss:$8 sps:$4 sm:$0xff]  }
  0x10   :  { %v9251_v47 = vld [vmem:[%s12834_s0 + $0x7d0] ss:$8 sps:$4 sm:$0xff]   ;;  %v9252_v48 = vld [vmem:[%s12834_s0 + $0x94] ss:$8 sps:$4 sm:$0xff]   ;;  %v9254_v49 = vld [vmem:[%s12834_s0 + $0x7e4] ss:$8 sps:$4 sm:$0xff]  }
  0x11   :  { %v9256_v50 = vld [vmem:[%s12834_s0 + $0x90] ss:$8 sps:$4 sm:$0xff]   ;;  %v9257_v51 = vld [vmem:[%s12834_s0 + $0x7e0] ss:$8 sps:$4 sm:$0xff]   ;;  %v9258_v52 = vld [vmem:[%s12834_s0 + $0xa4] ss:$8 sps:$4 sm:$0xff]  }
  0x12   :  { %2923 = vmatpush1.bf16.msra.mxu0 %v9192_v7  ;;  %9181 = vmatpush1.bf16.msra.mxu1 %v9192_v7  ;;  %v9260_v53 = vld [vmem:[%s12834_s0 + $0x7f4] ss:$8 sps:$4 sm:$0xff]   ;;  %v9262_v54 = vld [vmem:[%s12834_s0 + $0xa0] ss:$8 sps:$4 sm:$0xff]   ;;  %v9263_v55 = vld [vmem:[%s12834_s0 + $0x7f0] ss:$8 sps:$4 sm:$0xff]  }
  0x13   :  { %2924 = vmatprep.subr.bf16.mxu0 %v9800_v0  ;;  %9172 = vmatprep.subr.bf16.mxu1 %v9800_v0  ;;  %v9264_v56 = vld [vmem:[%s12834_s0 + $0xb4] ss:$8 sps:$4 sm:$0xff]   ;;  %v9266_v57 = vld [vmem:[%s12834_s0 + $0x804] ss:$8 sps:$4 sm:$0xff]   ;;  %v9268_v58 = vld [vmem:[%s12834_s0 + $0xb0] ss:$8 sps:$4 sm:$0xff]  }
  0x14   :  { %v9269_v59 = vld [vmem:[%s12834_s0 + $0x800] ss:$8 sps:$4 sm:$0xff]   ;;  %v9270_v60 = vld [vmem:[%s12834_s0 + $0xc4] ss:$8 sps:$4 sm:$0xff]   ;;  %v9272_v61 = vld [vmem:[%s12834_s0 + $0x814] ss:$8 sps:$4 sm:$0xff]  }
  0x15   :  { %v9274_v62 = vld [vmem:[%s12834_s0 + $0xc0] ss:$8 sps:$4 sm:$0xff]   ;;  %v9275_v63 = vld [vmem:[%s12834_s0 + $0x810] ss:$8 sps:$4 sm:$0xff]   ;;  %v9278_v1 = vld [vmem:[%s12834_s0 + $0x824] ss:$8 sps:$4 sm:$0xff]  }
  0x16   :  { %2925 = vmatpush1.bf16.msra.mxu0 %v9193_v8  ;;  %9182 = vmatpush1.bf16.msra.mxu1 %v9193_v8  ;;  %v9280_v2 = vld [vmem:[%s12834_s0 + $0xd0] ss:$8 sps:$4 sm:$0xff]   ;;  %v9281_v3 = vld [vmem:[%s12834_s0 + $0x820] ss:$8 sps:$4 sm:$0xff]   ;;  %v9282_v4 = vld [vmem:[%s12834_s0 + $0xe4] ss:$8 sps:$4 sm:$0xff]  }
  0x17   :  { %2926 = vmatprep.subr.bf16.mxu0 %v9800_v0  ;;  %9173 = vmatprep.subr.bf16.mxu1 %v9800_v0  ;;  %v9284_v5 = vld [vmem:[%s12834_s0 + $0x834] ss:$8 sps:$4 sm:$0xff]   ;;  %v9286_v6 = vld [vmem:[%s12834_s0 + $0xe0] ss:$8 sps:$4 sm:$0xff]   ;;  %v9287_v7 = vld [vmem:[%s12834_s0 + $0x830] ss:$8 sps:$4 sm:$0xff]  }
  0x18   :  { %v9288_v8 = vld [vmem:[%s12834_s0 + $0xf4] ss:$8 sps:$4 sm:$0xff]   ;;  %v9293_v11 = vld [vmem:[%s12834_s0 + $0x840] ss:$8 sps:$4 sm:$0xff]  }
  0x1a   :  { %2927 = vmatpush1.bf16.msra.mxu0 %v9194_v9  ;;  %9183 = vmatpush1.bf16.msra.mxu1 %v9194_v9  ;;  %v9290_v9 = vld [vmem:[%s12834_s0 + $0x844] ss:$8 sps:$4 sm:$0xff]  }
  0x1b   :  { %2928 = vmatprep.subr.bf16.mxu0 %v9800_v0  ;;  %9174 = vmatprep.subr.bf16.mxu1 %v9800_v0 }
  0x1e   :  { %2929 = vmatpush1.bf16.msra.mxu0 %v9195_v10  ;;  %9184 = vmatpush1.bf16.msra.mxu1 %v9195_v10  ;;  %v9292_v10 = vld [vmem:[%s12834_s0 + $0xf0] ss:$8 sps:$4 sm:$0xff]  }
  0x1f   :  { %2942 = vmatprep.subr.bf16.mxu0 %v9800_v0  ;;  %9175 = vmatprep.subr.bf16.mxu1 %v9800_v0 }
  0x22   :  { %2943 = vmatpush2.bf16.msra.mxu0 %v2912_v12  ;;  %9185 = vmatpush2.bf16.msra.mxu1 %v2912_v12  ;;  %v9294_v12 = vld [vmem:[%s12834_s0 + $0x104] ss:$8 sps:$4 sm:$0xff]  }
  0x23   :  { %2944 = vmatprep.subr.bf16.mxu0 %v9800_v0  ;;  %9176 = vmatprep.subr.bf16.mxu1 %v9800_v0  ;;  %v9276_v0 = vld [vmem:[%s12834_s0 + $0xd4] ss:$8 sps:$4 sm:$0xff]  }
  0x26   :  { %2945 = vmatpush2.bf16.msra.mxu0 %v9197_v13  ;;  %9186 = vmatpush2.bf16.msra.mxu1 %v9197_v13  ;;  %v9296_v13 = vld [vmem:[%s12834_s0 + $0x854] ss:$8 sps:$4 sm:$0xff]  }
  0x29   :  { %2947 = vmatmul.mubr.bf16.vlgmr.msra.gmra.mxu0 %v9198_v14  ;;  %3883 = vmatmul.mubr.bf16.vlgmr.msra.gmra.mxu1 %v9201_v15  ;;  %v9298_v14 = vld [vmem:[%s12834_s0 + $0x100] ss:$8 sps:$4 sm:$0xff]   ;;  %v9299_v15 = vld [vmem:[%s12834_s0 + $0x850] ss:$8 sps:$4 sm:$0xff]  }
  0x2a   :  { %8300 = vmatprep.mubr.msk.bf16.mxu0 %vm2309_vm0, %v9204_v16  ;;  %8417 = vmatprep.mubr.msk.bf16.mxu1 %vm2309_vm0, %v9206_v17  ;;  %v9300_v16 = vld [vmem:[%s12834_s0 + $0x114] ss:$8 sps:$4 sm:$0xff]   ;;  %v9302_v17 = vld [vmem:[%s12834_s0 + $0x864] ss:$8 sps:$4 sm:$0xff]  }
  0x31   :  { %2955 = vmatmul.mubr.bf16.gmra.mxu0 %v9208_v18  ;;  %3891 = vmatmul.mubr.bf16.gmra.mxu1 %v9209_v19  ;;  %v9304_v18 = vld [vmem:[%s12834_s0 + $0x110] ss:$8 sps:$4 sm:$0xff]   ;;  %v9305_v19 = vld [vmem:[%s12834_s0 + $0x860] ss:$8 sps:$4 sm:$0xff]  }
  0x32   :  { %8301 = vmatprep.mubr.msk.bf16.mxu0 %vm2309_vm0, %v9210_v20  ;;  %8418 = vmatprep.mubr.msk.bf16.mxu1 %vm2309_vm0, %v9212_v21  ;;  %v9306_v20 = vld [vmem:[%s12834_s0 + $0x124] ss:$8 sps:$4 sm:$0xff]   ;;  %v9308_v21 = vld [vmem:[%s12834_s0 + $0x874] ss:$8 sps:$4 sm:$0xff]  }
  0x39   :  { %2963 = vmatmul.mubr.bf16.gmra.mxu0 %v9214_v22  ;;  %3899 = vmatmul.mubr.bf16.gmra.mxu1 %v9215_v23  ;;  %v9310_v22 = vld [vmem:[%s12834_s0 + $0x120] ss:$8 sps:$4 sm:$0xff]   ;;  %v9311_v23 = vld [vmem:[%s12834_s0 + $0x870] ss:$8 sps:$4 sm:$0xff]  }
  0x3a   :  { %8302 = vmatprep.mubr.msk.bf16.mxu0 %vm2309_vm0, %v9216_v24  ;;  %8419 = vmatprep.mubr.msk.bf16.mxu1 %vm2309_vm0, %v9218_v25  ;;  %v9312_v24 = vld [vmem:[%s12834_s0 + $0x134] ss:$8 sps:$4 sm:$0xff]   ;;  %v9314_v25 = vld [vmem:[%s12834_s0 + $0x884] ss:$8 sps:$4 sm:$0xff]  }
  0x41   :  { %2971 = vmatmul.mubr.bf16.gmra.mxu0 %v9220_v26  ;;  %3907 = vmatmul.mubr.bf16.gmra.mxu1 %v9221_v27  ;;  %v9316_v26 = vld [vmem:[%s12834_s0 + $0x130] ss:$8 sps:$4 sm:$0xff]   ;;  %v9317_v27 = vld [vmem:[%s12834_s0 + $0x880] ss:$8 sps:$4 sm:$0xff]  }
  0x42   :  { %8303 = vmatprep.mubr.msk.bf16.mxu0 %vm2309_vm0, %v9222_v28  ;;  %8420 = vmatprep.mubr.msk.bf16.mxu1 %vm2309_vm0, %v9224_v29  ;;  %v9318_v28 = vld [vmem:[%s12834_s0 + $0x144] ss:$8 sps:$4 sm:$0xff]   ;;  %v9320_v29 = vld [vmem:[%s12834_s0 + $0x894] ss:$8 sps:$4 sm:$0xff]  }
  0x49   :  { %2979 = vmatmul.mubr.bf16.gmra.mxu0 %v9226_v30  ;;  %3915 = vmatmul.mubr.bf16.gmra.mxu1 %v9227_v31  ;;  %v9322_v30 = vld [vmem:[%s12834_s0 + $0x140] ss:$8 sps:$4 sm:$0xff]   ;;  %v9323_v31 = vld [vmem:[%s12834_s0 + $0x890] ss:$8 sps:$4 sm:$0xff]  }
  0x4a   :  { %8304 = vmatprep.mubr.msk.bf16.mxu0 %vm2309_vm0, %v9228_v32  ;;  %8421 = vmatprep.mubr.msk.bf16.mxu1 %vm2309_vm0, %v9230_v33  ;;  %v9324_v32 = vld [vmem:[%s12834_s0 + $0x154] ss:$8 sps:$4 sm:$0xff]   ;;  %v9326_v33 = vld [vmem:[%s12834_s0 + $0x8a4] ss:$8 sps:$4 sm:$0xff]  }
  0x51   :  { %2987 = vmatmul.mubr.bf16.gmra.mxu0 %v9232_v34  ;;  %3923 = vmatmul.mubr.bf16.gmra.mxu1 %v9233_v35  ;;  %v9328_v34 = vld [vmem:[%s12834_s0 + $0x150] ss:$8 sps:$4 sm:$0xff]   ;;  %v9329_v35 = vld [vmem:[%s12834_s0 + $0x8a0] ss:$8 sps:$4 sm:$0xff]  }
  0x52   :  { %8305 = vmatprep.mubr.msk.bf16.mxu0 %vm2309_vm0, %v9234_v36  ;;  %8422 = vmatprep.mubr.msk.bf16.mxu1 %vm2309_vm0, %v9236_v37  ;;  %v9330_v36 = vld [vmem:[%s12834_s0 + $0x164] ss:$8 sps:$4 sm:$0xff]   ;;  %v9332_v37 = vld [vmem:[%s12834_s0 + $0x8b4] ss:$8 sps:$4 sm:$0xff]  }
  0x59   :  { %2995 = vmatmul.mubr.bf16.gmra.mxu0 %v9238_v38  ;;  %3931 = vmatmul.mubr.bf16.gmra.mxu1 %v9239_v39  ;;  %v9334_v38 = vld [vmem:[%s12834_s0 + $0x160] ss:$8 sps:$4 sm:$0xff]   ;;  %v9335_v39 = vld [vmem:[%s12834_s0 + $0x8b0] ss:$8 sps:$4 sm:$0xff]  }
  0x5a   :  { %8306 = vmatprep.mubr.msk.bf16.mxu0 %vm2309_vm0, %v9240_v40  ;;  %8423 = vmatprep.mubr.msk.bf16.mxu1 %vm2309_vm0, %v9242_v41  ;;  %v9336_v40 = vld [vmem:[%s12834_s0 + $0x174] ss:$8 sps:$4 sm:$0xff]   ;;  %v9338_v41 = vld [vmem:[%s12834_s0 + $0x8c4] ss:$8 sps:$4 sm:$0xff]  }
  0x61   :  { %3003 = vmatmul.mubr.bf16.gmra.mxu0 %v9244_v42  ;;  %3939 = vmatmul.mubr.bf16.gmra.mxu1 %v9245_v43  ;;  %v9340_v42 = vld [vmem:[%s12834_s0 + $0x170] ss:$8 sps:$4 sm:$0xff]   ;;  %v9341_v43 = vld [vmem:[%s12834_s0 + $0x8c0] ss:$8 sps:$4 sm:$0xff]  }
  0x62   :  { %8307 = vmatprep.mubr.msk.bf16.mxu0 %vm2309_vm0, %v9246_v44  ;;  %8424 = vmatprep.mubr.msk.bf16.mxu1 %vm2309_vm0, %v9248_v45  ;;  %v9342_v44 = vld [vmem:[%s12834_s0 + $0x184] ss:$8 sps:$4 sm:$0xff]   ;;  %v9344_v45 = vld [vmem:[%s12834_s0 + $0x8d4] ss:$8 sps:$4 sm:$0xff]  }
  0x69   :  { %3011 = vmatmul.mubr.bf16.gmra.mxu0 %v9250_v46  ;;  %3947 = vmatmul.mubr.bf16.gmra.mxu1 %v9251_v47  ;;  %v9346_v46 = vld [vmem:[%s12834_s0 + $0x180] ss:$8 sps:$4 sm:$0xff]   ;;  %v9347_v47 = vld [vmem:[%s12834_s0 + $0x8d0] ss:$8 sps:$4 sm:$0xff]  }
  0x6a   :  { %8308 = vmatprep.mubr.msk.bf16.mxu0 %vm2309_vm0, %v9252_v48  ;;  %8425 = vmatprep.mubr.msk.bf16.mxu1 %vm2309_vm0, %v9254_v49  ;;  %v9348_v48 = vld [vmem:[%s12834_s0 + $0x194] ss:$8 sps:$4 sm:$0xff]   ;;  %v9350_v49 = vld [vmem:[%s12834_s0 + $0x8e4] ss:$8 sps:$4 sm:$0xff]  }
  0x71   :  { %3019 = vmatmul.mubr.bf16.gmra.mxu0 %v9256_v50  ;;  %3955 = vmatmul.mubr.bf16.gmra.mxu1 %v9257_v51 }
  0x72   :  { %8309 = vmatprep.mubr.msk.bf16.mxu0 %vm2309_vm0, %v9258_v52  ;;  %8426 = vmatprep.mubr.msk.bf16.mxu1 %vm2309_vm0, %v9260_v53 }
  0x79   :  { %3027 = vmatmul.mubr.bf16.gmra.mxu0 %v9262_v54  ;;  %3963 = vmatmul.mubr.bf16.gmra.mxu1 %v9263_v55 }
  0x7a   :  { %8310 = vmatprep.mubr.msk.bf16.mxu0 %vm2309_vm0, %v9264_v56  ;;  %8427 = vmatprep.mubr.msk.bf16.mxu1 %vm2309_vm0, %v9266_v57  ;;  %v9352_v56 = vld [vmem:[%s12834_s0 + $0x190] ss:$8 sps:$4 sm:$0xff]   ;;  %v9353_v57 = vld [vmem:[%s12834_s0 + $0x8e0] ss:$8 sps:$4 sm:$0xff]  }
  0x81   :  { %3035 = vmatmul.mubr.bf16.gmra.mxu0 %v9268_v58  ;;  %3971 = vmatmul.mubr.bf16.gmra.mxu1 %v9269_v59  ;;  %v9354_v58 = vld [vmem:[%s12834_s0 + $0x1a4] ss:$8 sps:$4 sm:$0xff]   ;;  %v9356_v59 = vld [vmem:[%s12834_s0 + $0x8f4] ss:$8 sps:$4 sm:$0xff]  }
  0x82   :  { %8311 = vmatprep.mubr.msk.bf16.mxu0 %vm2309_vm0, %v9270_v60  ;;  %8428 = vmatprep.mubr.msk.bf16.mxu1 %vm2309_vm0, %v9272_v61 }
  0x89   :  { %3043 = vmatmul.mubr.bf16.gmra.mxu0 %v9274_v62  ;;  %3979 = vmatmul.mubr.bf16.gmra.mxu1 %v9275_v63 }
  0x8a   :  { %8312 = vmatprep.mubr.msk.bf16.mxu0 %vm2309_vm0, %v9276_v0  ;;  %8429 = vmatprep.mubr.msk.bf16.mxu1 %vm2309_vm0, %v9278_v1 }
  0x91   :  { %3051 = vmatmul.mubr.bf16.gmra.mxu0 %v9280_v2  ;;  %3987 = vmatmul.mubr.bf16.gmra.mxu1 %v9281_v3 }
  0x92   :  { %8313 = vmatprep.mubr.msk.bf16.mxu0 %vm2309_vm0, %v9282_v4  ;;  %8430 = vmatprep.mubr.msk.bf16.mxu1 %vm2309_vm0, %v9284_v5  ;;  %v9358_v4 = vld [vmem:[%s12834_s0 + $0x1a0] ss:$8 sps:$4 sm:$0xff]   ;;  %v9359_v5 = vld [vmem:[%s12834_s0 + $0x8f0] ss:$8 sps:$4 sm:$0xff]  }
  0x99   :  { %3059 = vmatmul.mubr.bf16.gmra.mxu0 %v9286_v6  ;;  %3995 = vmatmul.mubr.bf16.gmra.mxu1 %v9287_v7  ;;  %v9360_v6 = vld [vmem:[%s12834_s0 + $0x1b4] ss:$8 sps:$4 sm:$0xff]   ;;  %v9362_v7 = vld [vmem:[%s12834_s0 + $0x904] ss:$8 sps:$4 sm:$0xff]  }
  0x9a   :  { %8314 = vmatprep.mubr.msk.bf16.mxu0 %vm2309_vm0, %v9288_v8  ;;  %8431 = vmatprep.mubr.msk.bf16.mxu1 %vm2309_vm0, %v9290_v9 }
  0xa1   :  { %3067 = vmatmul.mubr.bf16.gmra.mxu0 %v9292_v10  ;;  %4003 = vmatmul.mubr.bf16.gmra.mxu1 %v9293_v11 }
  0xa2   :  { %8315 = vmatprep.mubr.msk.bf16.mxu0 %vm2309_vm0, %v9294_v12  ;;  %8432 = vmatprep.mubr.msk.bf16.mxu1 %vm2309_vm0, %v9296_v13 }
  0xa9   :  { %3075 = vmatmul.mubr.bf16.gmra.mxu0 %v9298_v14  ;;  %4011 = vmatmul.mubr.bf16.gmra.mxu1 %v9299_v15 }
  0xaa   :  { %8316 = vmatprep.mubr.msk.bf16.mxu0 %vm2309_vm0, %v9300_v16  ;;  %8433 = vmatprep.mubr.msk.bf16.mxu1 %vm2309_vm0, %v9302_v17 }
  0xb1   :  { %3083 = vmatmul.mubr.bf16.gmra.mxu0 %v9304_v18  ;;  %4019 = vmatmul.mubr.bf16.gmra.mxu1 %v9305_v19  ;;  %v9364_v18 = vld [vmem:[%s12834_s0 + $0x1b0] ss:$8 sps:$4 sm:$0xff]   ;;  %v9365_v19 = vld [vmem:[%s12834_s0 + $0x900] ss:$8 sps:$4 sm:$0xff]  }
  0xb2   :  { %8317 = vmatprep.mubr.msk.bf16.mxu0 %vm2309_vm0, %v9306_v20  ;;  %8434 = vmatprep.mubr.msk.bf16.mxu1 %vm2309_vm0, %v9308_v21 }
  0xb9   :  { %3091 = vmatmul.mubr.bf16.gmra.mxu0 %v9310_v22  ;;  %4027 = vmatmul.mubr.bf16.gmra.mxu1 %v9311_v23  ;;  %v9366_v22 = vld [vmem:[%s12834_s0 + $0x1c4] ss:$8 sps:$4 sm:$0xff]   ;;  %v9368_v23 = vld [vmem:[%s12834_s0 + $0x914] ss:$8 sps:$4 sm:$0xff]  }
  0xba   :  { %8318 = vmatprep.mubr.msk.bf16.mxu0 %vm2309_vm0, %v9312_v24  ;;  %8435 = vmatprep.mubr.msk.bf16.mxu1 %vm2309_vm0, %v9314_v25 }
  0xc1   :  { %3099 = vmatmul.mubr.bf16.gmra.mxu0 %v9316_v26  ;;  %4035 = vmatmul.mubr.bf16.gmra.mxu1 %v9317_v27 }
  0xc2   :  { %8319 = vmatprep.mubr.msk.bf16.mxu0 %vm2309_vm0, %v9318_v28  ;;  %8436 = vmatprep.mubr.msk.bf16.mxu1 %vm2309_vm0, %v9320_v29 }
  0xc9   :  { %3107 = vmatmul.mubr.bf16.gmra.mxu0 %v9322_v30  ;;  %4043 = vmatmul.mubr.bf16.gmra.mxu1 %v9323_v31 }
  0xca   :  { %8320 = vmatprep.mubr.msk.bf16.mxu0 %vm2309_vm0, %v9324_v32  ;;  %8437 = vmatprep.mubr.msk.bf16.mxu1 %vm2309_vm0, %v9326_v33  ;;  %v9370_v33 = vld [vmem:[%s12834_s0 + $0x1c0] ss:$8 sps:$4 sm:$0xff]  }
  0xd1   :  { %3115 = vmatmul.mubr.bf16.gmra.mxu0 %v9328_v34  ;;  %4051 = vmatmul.mubr.bf16.gmra.mxu1 %v9329_v35  ;;  %v9371_v34 = vld [vmem:[%s12834_s0 + $0x910] ss:$8 sps:$4 sm:$0xff]  }
  0xd2   :  { %8321 = vmatprep.mubr.msk.bf16.mxu0 %vm2309_vm0, %v9330_v36  ;;  %8438 = vmatprep.mubr.msk.bf16.mxu1 %vm2309_vm0, %v9332_v37  ;;  %v9372_v36 = vld [vmem:[%s12834_s0 + $0x1d4] ss:$8 sps:$4 sm:$0xff]   ;;  %v9374_v37 = vld [vmem:[%s12834_s0 + $0x924] ss:$8 sps:$4 sm:$0xff]  }
  0xd9   :  { %3123 = vmatmul.mubr.bf16.gmra.mxu0 %v9334_v38  ;;  %4059 = vmatmul.mubr.bf16.gmra.mxu1 %v9335_v39 }
  0xda   :  { %8322 = vmatprep.mubr.msk.bf16.mxu0 %vm2309_vm0, %v9336_v40  ;;  %8439 = vmatprep.mubr.msk.bf16.mxu1 %vm2309_vm0, %v9338_v41 }
  0xe1   :  { %3131 = vmatmul.mubr.bf16.gmra.mxu0 %v9340_v42  ;;  %4067 = vmatmul.mubr.bf16.gmra.mxu1 %v9341_v43 }
  0xe2   :  { %8323 = vmatprep.mubr.msk.bf16.mxu0 %vm2309_vm0, %v9342_v44  ;;  %8440 = vmatprep.mubr.msk.bf16.mxu1 %vm2309_vm0, %v9344_v45 }
  0xe9   :  { %v10237_v50 = vpop.f32.mrf.mxu0  ;;  %3139 = vmatmul.mubr.bf16.gmra.mxu0 %v9346_v46  ;;  %v10239_v51 = vpop.f32.mrf.mxu1  ;;  %4075 = vmatmul.mubr.bf16.gmra.mxu1 %v9347_v47  ;;  %v9376_v46 = vld [vmem:[%s12834_s0 + $0x1d0] ss:$8 sps:$4 sm:$0xff]   ;;  %v9377_v47 = vld [vmem:[%s12834_s0 + $0x920] ss:$8 sps:$4 sm:$0xff]  }
  0xea   :  { %8324 = vmatprep.mubr.msk.bf16.mxu0 %vm2309_vm0, %v9348_v48  ;;  %8441 = vmatprep.mubr.msk.bf16.mxu1 %vm2309_vm0, %v9350_v49  ;;  %v9378_v48 = vld [vmem:[%s12834_s0 + $0x1e4] ss:$8 sps:$4 sm:$0xff]   ;;  %v9380_v49 = vld [vmem:[%s12834_s0 + $0x934] ss:$8 sps:$4 sm:$0xff]  }
  0xeb   :  { %v2950_v52 = vpop.f32.mrf.mxu0  ;;  %v3886_v53 = vpop.f32.mrf.mxu1 }
  0xec   :  { %v8501_v52 = vld [vmem:[%s12835_s3 + $0x18] sm:$0xff] }
  0xed   :  { %v10243_v54 = vpop.f32.mrf.mxu0  ;;  %v10245_v55 = vpop.f32.mrf.mxu1  ;;  %8841 = vmatprep.subr.mxu1 %v8501_v52 }
  0xee   :  { %8842 = vmatpush3.msra.mxu1 %v8501_v52  ;;  %v9396_v52 = vld [vmem:[%s12834_s0 + $0x214] ss:$8 sps:$4 sm:$0xff]  }
  0xef   :  { %v2953_v60 = vpop.f32.mrf.mxu0  ;;  %v3889_v61 = vpop.f32.mrf.mxu1 }
  0xf1   :  { %v10259_v62 = vpop.f32.mrf.mxu0  ;;  %3147 = vmatmul.mubr.bf16.gmra.mxu0 %v9352_v56  ;;  %v10261_v63 = vpop.f32.mrf.mxu1  ;;  %4083 = vmatmul.mubr.bf16.gmra.mxu1 %v9353_v57 }
  0xf2   :  { %8325 = vmatprep.mubr.msk.bf16.mxu0 %vm2309_vm0, %v9354_v58  ;;  %8442 = vmatprep.mubr.msk.bf16.mxu1 %vm2309_vm0, %v9356_v59 }
  0xf3   :  { %v2958_v0 = vpop.f32.mrf.mxu0  ;;  %v3894_v1 = vpop.f32.mrf.mxu1 }
  0xf5   :  { %v10265_v2 = vpop.f32.mrf.mxu0  ;;  %v10267_v3 = vpop.f32.mrf.mxu1 }
  0xf7   :  { %v2961_v8 = vpop.f32.mrf.mxu0  ;;  %v3897_v9 = vpop.f32.mrf.mxu1 }
  0xf8   :  { %v9386_v8 = vld [vmem:[%s12834_s0 + $0x944] ss:$8 sps:$4 sm:$0xff]  }
  0xf9   :  { %v10281_v10 = vpop.f32.mrf.mxu0  ;;  %3155 = vmatmul.mubr.bf16.gmra.mxu0 %v9358_v4  ;;  %v10283_v11 = vpop.f32.mrf.mxu1  ;;  %4091 = vmatmul.mubr.bf16.gmra.mxu1 %v9359_v5  ;;  %v9382_v4 = vld [vmem:[%s12834_s0 + $0x1e0] ss:$8 sps:$4 sm:$0xff]   ;;  %v9383_v5 = vld [vmem:[%s12834_s0 + $0x930] ss:$8 sps:$4 sm:$0xff]  }
  0xfa   :  { %v4548_v12 = vmax.f32 %v10237_v50, %v10281_v10  ;;  %8326 = vmatprep.mubr.msk.bf16.mxu0 %vm2309_vm0, %v9360_v6  ;;  %8443 = vmatprep.mubr.msk.bf16.mxu1 %vm2309_vm0, %v9362_v7  ;;  %v9384_v7 = vld [vmem:[%s12834_s0 + $0x1f4] ss:$8 sps:$4 sm:$0xff]   ;;  %v9390_v50 = vld [vmem:[%s12834_s0 + $0x204] ss:$8 sps:$4 sm:$0xff]  }
  0xfb   :  { %v2966_v14 = vpop.f32.mrf.mxu0  ;;  %v3902_v15 = vpop.f32.mrf.mxu1  ;;  %v9392_v10 = vld [vmem:[%s12834_s0 + $0x954] ss:$8 sps:$4 sm:$0xff]  }
  0xfd   :  { %v10291_v16 = vpop.f32.mrf.mxu0  ;;  %v10293_v17 = vpop.f32.mrf.mxu1 }
  0xfe   :  { %v4549_v20 = vmax.f32 %v10243_v54, %v10291_v16  ;;  %v9394_v16 = vld [vmem:[%s12834_s0 + $0x200] ss:$8 sps:$4 sm:$0xff]  }
  0xff   :  { %v2969_v24 = vpop.f32.mrf.mxu0  ;;  %v3905_v25 = vpop.f32.mrf.mxu1 }
 0x101   :  { %v10311_v26 = vpop.f32.mrf.mxu0  ;;  %3163 = vmatmul.mubr.bf16.gmra.mxu0 %v9364_v18  ;;  %v10313_v27 = vpop.f32.mrf.mxu1  ;;  %4099 = vmatmul.mubr.bf16.gmra.mxu1 %v9365_v19 }
 0x102   :  { %v4550_v28 = vmax.f32 %v10259_v62, %v10311_v26  ;;  %8327 = vmatprep.mubr.msk.bf16.mxu0 %vm2309_vm0, %v9366_v22  ;;  %8444 = vmatprep.mubr.msk.bf16.mxu1 %vm2309_vm0, %v9368_v23  ;;  %v9398_v62 = vld [vmem:[%s12834_s0 + $0x964] ss:$8 sps:$4 sm:$0xff]  }
 0x103   :  { %v2974_v29 = vpop.f32.mrf.mxu0  ;;  %v3910_v30 = vpop.f32.mrf.mxu1 }
 0x105   :  { %v10319_v31 = vpop.f32.mrf.mxu0  ;;  %v10321_v32 = vpop.f32.mrf.mxu1 }
 0x106   :  { %v4551_v35 = vmax.f32 %v10265_v2, %v10319_v31  ;;  %v9400_v2 = vld [vmem:[%s12834_s0 + $0x210] ss:$8 sps:$4 sm:$0xff]   ;;  %v9401_v31 = vld [vmem:[%s12834_s0 + $0x960] ss:$8 sps:$4 sm:$0xff]  }
 0x107   :  { %v2977_v38 = vpop.f32.mrf.mxu0  ;;  %v3913_v39 = vpop.f32.mrf.mxu1 }
 0x109   :  { %v2980_v40 = vpop.f32.mrf.mxu0  ;;  %3171 = vmatmul.mubr.bf16.gmra.mxu0 %v9370_v33  ;;  %v10337_v41 = vpop.f32.mrf.mxu1  ;;  %4107 = vmatmul.mubr.bf16.gmra.mxu1 %v9371_v34  ;;  %v9388_v33 = vld [vmem:[%s12834_s0 + $0x1f0] ss:$8 sps:$4 sm:$0xff]   ;;  %v9389_v34 = vld [vmem:[%s12834_s0 + $0x940] ss:$8 sps:$4 sm:$0xff]  }
 0x10a   :  { %8328 = vmatprep.mubr.msk.bf16.mxu0 %vm2309_vm0, %v9372_v36  ;;  %8445 = vmatprep.mubr.msk.bf16.mxu1 %vm2309_vm0, %v9374_v37 }
 0x10b   :  { %v2982_v42 = vpop.f32.mrf.mxu0  ;;  %v3918_v43 = vpop.f32.mrf.mxu1 }
 0x10d   :  { %v2983_v44 = vpop.f32.mrf.mxu0  ;;  %v10341_v45 = vpop.f32.mrf.mxu1 }
 0x10f   :  { %v2985_v53 = vpop.f32.mrf.mxu0  ;;  %v3921_v56 = vpop.f32.mrf.mxu1 }
 0x111   :  { %v2988_v57 = vpop.f32.mrf.mxu0  ;;  %3179 = vmatmul.mubr.bf16.gmra.mxu0 %v9376_v46  ;;  %v10358_v58 = vpop.f32.mrf.mxu1  ;;  %4115 = vmatmul.mubr.bf16.gmra.mxu1 %v9377_v47 }
 0x112   :  { %v6406_v59 = vmax.f32 %v10313_v27, %v10358_v58  ;;  %8329 = vmatprep.mubr.msk.bf16.mxu0 %vm2309_vm0, %v9378_v48  ;;  %8446 = vmatprep.mubr.msk.bf16.mxu1 %vm2309_vm0, %v9380_v49  ;;  %v9410_v27 = vld [vmem:[%s12834_s0 + $0x984] ss:$8 sps:$4 sm:$0xff]  }
 0x113   :  { %v2990_v60 = vpop.f32.mrf.mxu0  ;;  %v3926_v61 = vpop.f32.mrf.mxu1 }
 0x115   :  { %v2991_v0 = vpop.f32.mrf.mxu0  ;;  %v10364_v1 = vpop.f32.mrf.mxu1 }
 0x116   :  { %v6407_v6 = vmax.f32 %v10321_v32, %v10364_v1 }
 0x117   :  { %v2993_v9 = vpop.f32.mrf.mxu0  ;;  %v3929_v14 = vpop.f32.mrf.mxu1 }
 0x119   :  { %v2996_v15 = vpop.f32.mrf.mxu0  ;;  %3187 = vmatmul.mubr.bf16.gmra.mxu0 %v9382_v4  ;;  %v10380_v18 = vpop.f32.mrf.mxu1  ;;  %4123 = vmatmul.mubr.bf16.gmra.mxu1 %v9383_v5  ;;  %v9404_v5 = vld [vmem:[%s12834_s0 + $0x974] ss:$8 sps:$4 sm:$0xff]  }
 0x11a   :  { %v4552_v19 = vmax.f32 %v2980_v40, %v2996_v15  ;;  %v6408_v22 = vmax.f32 %v10337_v41, %v10380_v18  ;;  %8330 = vmatprep.mubr.msk.bf16.mxu0 %vm2309_vm0, %v9384_v7  ;;  %8447 = vmatprep.mubr.msk.bf16.mxu1 %vm2309_vm0, %v9386_v8  ;;  %v9414_v41 = vld [vmem:[%s12834_s0 + $0x244] ss:$8 sps:$4 sm:$0xff]   ;;  %v9416_v18 = vld [vmem:[%s12834_s0 + $0x994] ss:$8 sps:$4 sm:$0xff]  }
 0x11b   :  { %v2998_v23 = vpop.f32.mrf.mxu0  ;;  %v3934_v24 = vpop.f32.mrf.mxu1 }
 0x11c   :  { %v10389_v25 = vmax.f32 %v4548_v12, %v4552_v19 }
 0x11d   :  { %v2999_v29 = vpop.f32.mrf.mxu0  ;;  %v10391_v30 = vpop.f32.mrf.mxu1 }
 0x11e   :  { %v4553_v36 = vmax.f32 %v2983_v44, %v2999_v29  ;;  %v6409_v37 = vmax.f32 %v10341_v45, %v10391_v30  ;;  %v9418_v30 = vld [vmem:[%s12834_s0 + $0x240] ss:$8 sps:$4 sm:$0xff]  }
 0x11f   :  { %v3001_v12 = vpop.f32.mrf.mxu0  ;;  %v3937_v38 = vpop.f32.mrf.mxu1 }
 0x120   :  { %v10410_v39 = vmax.f32 %v4549_v20, %v4553_v36  ;;  %v9395_v20 = vld [vmem:[%s12834_s0 + $0x950] ss:$8 sps:$4 sm:$0xff]  }
 0x121   :  { %v3004_v40 = vpop.f32.mrf.mxu0  ;;  %3195 = vmatmul.mubr.bf16.gmra.mxu0 %v9388_v33  ;;  %v3940_v42 = vpop.f32.mrf.mxu1  ;;  %4131 = vmatmul.mubr.bf16.gmra.mxu1 %v9389_v34  ;;  %v9406_v34 = vld [vmem:[%s12834_s0 + $0x220] ss:$8 sps:$4 sm:$0xff]   ;;  %v9407_v36 = vld [vmem:[%s12834_s0 + $0x970] ss:$8 sps:$4 sm:$0xff]  }
 0x122   :  { %v4554_v43 = vmax.f32 %v2988_v57, %v3004_v40  ;;  %8331 = vmatprep.mubr.msk.bf16.mxu0 %vm2309_vm0, %v9390_v50  ;;  %8448 = vmatprep.mubr.msk.bf16.mxu1 %vm2309_vm0, %v9392_v10  ;;  %v9408_v10 = vld [vmem:[%s12834_s0 + $0x234] ss:$8 sps:$4 sm:$0xff]  }
 0x123   :  { %v3006_v44 = vpop.f32.mrf.mxu0  ;;  %v3942_v46 = vpop.f32.mrf.mxu1 }
 0x124   :  { %v10417_v47 = vmax.f32 %v4550_v28, %v4554_v43 }
 0x125   :  { %v3007_v48 = vpop.f32.mrf.mxu0  ;;  %v3943_v54 = vpop.f32.mrf.mxu1 }
 0x126   :  { %v4555_v49 = vmax.f32 %v2991_v0, %v3007_v48  ;;  %v9412_v48 = vld [vmem:[%s12834_s0 + $0x230] ss:$8 sps:$4 sm:$0xff]  }
 0x127   :  { %v3009_v26 = vpop.f32.mrf.mxu0  ;;  %v3945_v28 = vpop.f32.mrf.mxu1 }
 0x128   :  { %v10434_v53 = vmax.f32 %v4551_v35, %v4555_v49  ;;  %v9402_v35 = vld [vmem:[%s12834_s0 + $0x224] ss:$8 sps:$4 sm:$0xff]  }
 0x129   :  { %v10436_v56 = vpop.f32.mrf.mxu0  ;;  %3203 = vmatmul.mubr.bf16.gmra.mxu0 %v9394_v16  ;;  %v3948_v57 = vpop.f32.mrf.mxu1  ;;  %4139 = vmatmul.mubr.bf16.gmra.mxu1 %v9395_v20 }
 0x12a   :  { %8332 = vmatprep.mubr.msk.bf16.mxu0 %vm2309_vm0, %v9396_v52  ;;  %8449 = vmatprep.mubr.msk.bf16.mxu1 %vm2309_vm0, %v9398_v62 }
 0x12b   :  { %v3014_v60 = vpop.f32.mrf.mxu0  ;;  %v3950_v61 = vpop.f32.mrf.mxu1 }
 0x12d   :  { %v10440_v0 = vpop.f32.mrf.mxu0  ;;  %v3951_v4 = vpop.f32.mrf.mxu1 }
 0x12f   :  { %v3017_v7 = vpop.f32.mrf.mxu0  ;;  %v3953_v8 = vpop.f32.mrf.mxu1 }
 0x131   :  { %v10454_v9 = vpop.f32.mrf.mxu0  ;;  %3211 = vmatmul.mubr.bf16.gmra.mxu0 %v9400_v2  ;;  %v3956_v14 = vpop.f32.mrf.mxu1  ;;  %4147 = vmatmul.mubr.bf16.gmra.mxu1 %v9401_v31  ;;  %v9420_v2 = vld [vmem:[%s12834_s0 + $0x254] ss:$8 sps:$4 sm:$0xff]   ;;  %v9422_v31 = vld [vmem:[%s12834_s0 + $0x9a4] ss:$8 sps:$4 sm:$0xff]  }
 0x132   :  { %v6410_v15 = vmax.f32 %v3940_v42, %v3956_v14  ;;  %8333 = vmatprep.mubr.msk.bf16.mxu0 %vm2309_vm0, %v9402_v35  ;;  %8450 = vmatprep.mubr.msk.bf16.mxu1 %vm2309_vm0, %v9404_v5 }
 0x133   :  { %v3022_v19 = vpop.f32.mrf.mxu0  ;;  %v3958_v23 = vpop.f32.mrf.mxu1 }
 0x134   :  { %v10461_v24 = vmax.f32 %v6406_v59, %v6410_v15 }
 0x135   :  { %v10463_v29 = vpop.f32.mrf.mxu0  ;;  %v3959_v33 = vpop.f32.mrf.mxu1 }
 0x136   :  { %v6411_v50 = vmax.f32 %v3943_v54, %v3959_v33  ;;  %v9413_v54 = vld [vmem:[%s12834_s0 + $0x980] ss:$8 sps:$4 sm:$0xff]   ;;  %v9424_v33 = vld [vmem:[%s12834_s0 + $0x250] ss:$8 sps:$4 sm:$0xff]  }
 0x137   :  { %v3025_v58 = vpop.f32.mrf.mxu0  ;;  %v3961_v59 = vpop.f32.mrf.mxu1 }
 0x138   :  { %v10480_v12 = vmax.f32 %v6407_v6, %v6411_v50  ;;  %v9428_v50 = vld [vmem:[%s12834_s0 + $0x9b4] ss:$8 sps:$4 sm:$0xff]  }
 0x139   :  { %v10482_v38 = vpop.f32.mrf.mxu0  ;;  %3219 = vmatmul.mubr.bf16.gmra.mxu0 %v9406_v34  ;;  %v3964_v40 = vpop.f32.mrf.mxu1  ;;  %4155 = vmatmul.mubr.bf16.gmra.mxu1 %v9407_v36  ;;  %v9425_v34 = vld [vmem:[%s12834_s0 + $0x9a0] ss:$8 sps:$4 sm:$0xff]   ;;  %v9426_v36 = vld [vmem:[%s12834_s0 + $0x264] ss:$8 sps:$4 sm:$0xff]  }
 0x13a   :  { %12843 = vst [vmem:[#allocation2_spill] sm:$0xff] %v10480_v12  ;;  %v4576_v42 = vmax.f32 %v10436_v56, %v10482_v38  ;;  %v6412_v43 = vmax.f32 %v3948_v57, %v3964_v40  ;;  %8334 = vmatprep.mubr.msk.bf16.mxu0 %vm2309_vm0, %v9408_v10  ;;  %8451 = vmatprep.mubr.msk.bf16.mxu1 %vm2309_vm0, %v9410_v27  ;;  %v9438_v56 = vld [vmem:[%s12834_s0 + $0x284] ss:$8 sps:$4 sm:$0xff]   ;;  %v9440_v38 = vld [vmem:[%s12834_s0 + $0x9d4] ss:$8 sps:$4 sm:$0xff]  }
 0x13b   :  { %v3030_v44 = vpop.f32.mrf.mxu0  ;;  %v3966_v46 = vpop.f32.mrf.mxu1 }
 0x13c   :  { %v10491_v32 = vmax.f32 %v6408_v22, %v6412_v43 }
 0x13d   :  { %v10493_v1 = vpop.f32.mrf.mxu0  ;;  %v3967_v6 = vpop.f32.mrf.mxu1 }
 0x13e   :  { %12844 = vst [vmem:[#allocation3_spill] sm:$0xff] %v10491_v32  ;;  %v4577_v16 = vmax.f32 %v10440_v0, %v10493_v1  ;;  %v6413_v20 = vmax.f32 %v3951_v4, %v3967_v6  ;;  %v9442_v1 = vld [vmem:[%s12834_s0 + $0x280] ss:$8 sps:$4 sm:$0xff]  }
 0x13f   :  { %v3033_v22 = vpop.f32.mrf.mxu0  ;;  %v3969_v49 = vpop.f32.mrf.mxu1 }
 0x140   :  { %v10512_v52 = vmax.f32 %v6409_v37, %v6413_v20  ;;  %v9419_v37 = vld [vmem:[%s12834_s0 + $0x990] ss:$8 sps:$4 sm:$0xff]  }
 0x141   :  { %v10514_v62 = vpop.f32.mrf.mxu0  ;;  %3227 = vmatmul.mubr.bf16.gmra.mxu0 %v9412_v48  ;;  %v10516_v26 = vpop.f32.mrf.mxu1  ;;  %4163 = vmatmul.mubr.bf16.gmra.mxu1 %v9413_v54  ;;  %v9430_v48 = vld [vmem:[%s12834_s0 + $0x260] ss:$8 sps:$4 sm:$0xff]   ;;  %v9431_v54 = vld [vmem:[%s12834_s0 + $0x9b0] ss:$8 sps:$4 sm:$0xff]  }
 0x142   :  { %12845 = vst [vmem:[#allocation4_spill] sm:$0xff] %v10512_v52  ;;  %v4578_v28 = vmax.f32 %v10454_v9, %v10514_v62  ;;  %8335 = vmatprep.mubr.msk.bf16.mxu0 %vm2309_vm0, %v9414_v41  ;;  %8452 = vmatprep.mubr.msk.bf16.mxu1 %vm2309_vm0, %v9416_v18  ;;  %v9432_v41 = vld [vmem:[%s12834_s0 + $0x274] ss:$8 sps:$4 sm:$0xff]   ;;  %v9434_v18 = vld [vmem:[%s12834_s0 + $0x9c4] ss:$8 sps:$4 sm:$0xff]  }
 0x143   :  { %v3038_v57 = vpop.f32.mrf.mxu0  ;;  %v3974_v60 = vpop.f32.mrf.mxu1  ;;  %v9446_v9 = vld [vmem:[%s12834_s0 + $0x9e4] ss:$8 sps:$4 sm:$0xff]  }
 0x145   :  { %v10522_v61 = vpop.f32.mrf.mxu0  ;;  %v10524_v45 = vpop.f32.mrf.mxu1 }
 0x146   :  { %v4579_v4 = vmax.f32 %v10463_v29, %v10522_v61  ;;  %v9448_v29 = vld [vmem:[%s12834_s0 + $0x290] ss:$8 sps:$4 sm:$0xff]   ;;  %v9449_v61 = vld [vmem:[%s12834_s0 + $0x9e0] ss:$8 sps:$4 sm:$0xff]  }
 0x147   :  { %v3041_v35 = vpop.f32.mrf.mxu0  ;;  %v3977_v5 = vpop.f32.mrf.mxu1 }
 0x149   :  { %v3044_v7 = vpop.f32.mrf.mxu0  ;;  %3235 = vmatmul.mubr.bf16.gmra.mxu0 %v9418_v30  ;;  %v10540_v8 = vpop.f32.mrf.mxu1  ;;  %4171 = vmatmul.mubr.bf16.gmra.mxu1 %v9419_v37 }
 0x14a   :  { %8336 = vmatprep.mubr.msk.bf16.mxu0 %vm2309_vm0, %v9420_v2  ;;  %8453 = vmatprep.mubr.msk.bf16.mxu1 %vm2309_vm0, %v9422_v31 }
 0x14b   :  { %v3046_v14 = vpop.f32.mrf.mxu0  ;;  %v3982_v15 = vpop.f32.mrf.mxu1 }
 0x14c   :  { %v9437_v15 = vld [vmem:[%s12834_s0 + $0x9c0] ss:$8 sps:$4 sm:$0xff]  }
 0x14d   :  { %v3047_v19 = vpop.f32.mrf.mxu0  ;;  %v10544_v23 = vpop.f32.mrf.mxu1 }
 0x14f   :  { %v3049_v10 = vpop.f32.mrf.mxu0  ;;  %v3985_v27 = vpop.f32.mrf.mxu1 }
 0x151   :  { %v3052_v58 = vpop.f32.mrf.mxu0  ;;  %3243 = vmatmul.mubr.bf16.gmra.mxu0 %v9424_v33  ;;  %v10558_v59 = vpop.f32.mrf.mxu1  ;;  %4179 = vmatmul.mubr.bf16.gmra.mxu1 %v9425_v34 }
 0x152   :  { %v6530_v40 = vmax.f32 %v10516_v26, %v10558_v59  ;;  %8337 = vmatprep.mubr.msk.bf16.mxu0 %vm2309_vm0, %v9426_v36  ;;  %8454 = vmatprep.mubr.msk.bf16.mxu1 %vm2309_vm0, %v9428_v50  ;;  %v9458_v26 = vld [vmem:[%s12834_s0 + $0xa04] ss:$8 sps:$4 sm:$0xff]  }
 0x153   :  { %v3054_v43 = vpop.f32.mrf.mxu0  ;;  %v3990_v44 = vpop.f32.mrf.mxu1 }
 0x155   :  { %v3055_v46 = vpop.f32.mrf.mxu0  ;;  %v10564_v6 = vpop.f32.mrf.mxu1 }
 0x156   :  { %v6531_v20 = vmax.f32 %v10524_v45, %v10564_v6 }
 0x157   :  { %v3057_v22 = vpop.f32.mrf.mxu0  ;;  %v3993_v49 = vpop.f32.mrf.mxu1 }
 0x159   :  { %v3060_v57 = vpop.f32.mrf.mxu0  ;;  %3251 = vmatmul.mubr.bf16.gmra.mxu0 %v9430_v48  ;;  %v10580_v60 = vpop.f32.mrf.mxu1  ;;  %4187 = vmatmul.mubr.bf16.gmra.mxu1 %v9431_v54 }
 0x15a   :  { %v4580_v30 = vmax.f32 %v3044_v7, %v3060_v57  ;;  %v6532_v37 = vmax.f32 %v10540_v8, %v10580_v60  ;;  %8338 = vmatprep.mubr.msk.bf16.mxu0 %vm2309_vm0, %v9432_v41  ;;  %8455 = vmatprep.mubr.msk.bf16.mxu1 %vm2309_vm0, %v9434_v18  ;;  %v9436_v7 = vld [vmem:[%s12834_s0 + $0x270] ss:$8 sps:$4 sm:$0xff]   ;;  %v9444_v41 = vld [vmem:[%s12834_s0 + $0x294] ss:$8 sps:$4 sm:$0xff]   ;;  %v9462_v8 = vld [vmem:[%s12834_s0 + $0x2c4] ss:$8 sps:$4 sm:$0xff]  }
 0x15b   :  { %v3062_v2 = vpop.f32.mrf.mxu0  ;;  %v3998_v31 = vpop.f32.mrf.mxu1  ;;  %v9464_v60 = vld [vmem:[%s12834_s0 + $0xa14] ss:$8 sps:$4 sm:$0xff]  }
 0x15c   :  { %v10589_v35 = vmax.f32 %v4576_v42, %v4580_v30  ;;  %v9452_v31 = vld [vmem:[%s12834_s0 + $0x9f4] ss:$8 sps:$4 sm:$0xff]  }
 0x15d   :  { %v3063_v5 = vpop.f32.mrf.mxu0  ;;  %v10591_v14 = vpop.f32.mrf.mxu1 }
 0x15e   :  { %v4581_v33 = vmax.f32 %v3047_v19, %v3063_v5  ;;  %v6533_v34 = vmax.f32 %v10544_v23, %v10591_v14  ;;  %v9466_v14 = vld [vmem:[%s12834_s0 + $0x2c0] ss:$8 sps:$4 sm:$0xff]  }
 0x15f   :  { %v3065_v42 = vpop.f32.mrf.mxu0  ;;  %v4001_v36 = vpop.f32.mrf.mxu1 }
 0x160   :  { %v10610_v50 = vmax.f32 %v4577_v16, %v4581_v33  ;;  %v9443_v16 = vld [vmem:[%s12834_s0 + $0x9d0] ss:$8 sps:$4 sm:$0xff]  }
 0x161   :  { %v3068_v10 = vpop.f32.mrf.mxu0  ;;  %3259 = vmatmul.mubr.bf16.gmra.mxu0 %v9436_v7  ;;  %v4004_v19 = vpop.f32.mrf.mxu1  ;;  %4195 = vmatmul.mubr.bf16.gmra.mxu1 %v9437_v15 }
 0x162   :  { %v4582_v27 = vmax.f32 %v3052_v58, %v3068_v10  ;;  %8339 = vmatprep.mubr.msk.bf16.mxu0 %vm2309_vm0, %v9438_v56  ;;  %8456 = vmatprep.mubr.msk.bf16.mxu1 %vm2309_vm0, %v9440_v38 }
 0x163   :  { %v3070_v43 = vpop.f32.mrf.mxu0  ;;  %v4006_v44 = vpop.f32.mrf.mxu1 }
 0x164   :  { %v10617_v48 = vmax.f32 %v4578_v28, %v4582_v27  ;;  %v9454_v43 = vld [vmem:[%s12834_s0 + $0x2a0] ss:$8 sps:$4 sm:$0xff]  }
 0x165   :  { %v3071_v54 = vpop.f32.mrf.mxu0  ;;  %v4007_v0 = vpop.f32.mrf.mxu1 }
 0x166   :  { %v4583_v58 = vmax.f32 %v3055_v46, %v3071_v54  ;;  %v9456_v54 = vld [vmem:[%s12834_s0 + $0x2b4] ss:$8 sps:$4 sm:$0xff]  }
 0x167   :  { %v3073_v62 = vpop.f32.mrf.mxu0  ;;  %v4009_v28 = vpop.f32.mrf.mxu1 }
 0x168   :  { %v10634_v18 = vmax.f32 %v4579_v4, %v4583_v58  ;;  %v9450_v4 = vld [vmem:[%s12834_s0 + $0x2a4] ss:$8 sps:$4 sm:$0xff]   ;;  %v9460_v28 = vld [vmem:[%s12834_s0 + $0x2b0] ss:$8 sps:$4 sm:$0xff]  }
 0x169   :  { %v10636_v22 = vpop.f32.mrf.mxu0  ;;  %3267 = vmatmul.mubr.bf16.gmra.mxu0 %v9442_v1  ;;  %v4012_v49 = vpop.f32.mrf.mxu1  ;;  %4203 = vmatmul.mubr.bf16.gmra.mxu1 %v9443_v16 }
 0x16a   :  { %8340 = vmatprep.mubr.msk.bf16.mxu0 %vm2309_vm0, %v9444_v41  ;;  %8457 = vmatprep.mubr.msk.bf16.mxu1 %vm2309_vm0, %v9446_v9 }
 0x16b   :  { %v3078_v46 = vpop.f32.mrf.mxu0  ;;  %v4014_v57 = vpop.f32.mrf.mxu1 }
 0x16d   :  { %v10640_v30 = vpop.f32.mrf.mxu0  ;;  %v4015_v2 = vpop.f32.mrf.mxu1 }
 0x16f   :  { %v3081_v5 = vpop.f32.mrf.mxu0  ;;  %v4017_v7 = vpop.f32.mrf.mxu1 }
 0x171   :  { %v10654_v15 = vpop.f32.mrf.mxu0  ;;  %3275 = vmatmul.mubr.bf16.gmra.mxu0 %v9448_v29  ;;  %v4020_v33 = vpop.f32.mrf.mxu1  ;;  %4211 = vmatmul.mubr.bf16.gmra.mxu1 %v9449_v61 }
 0x172   :  { %v6534_v56 = vmax.f32 %v4004_v19, %v4020_v33  ;;  %8341 = vmatprep.mubr.msk.bf16.mxu0 %vm2309_vm0, %v9450_v4  ;;  %8458 = vmatprep.mubr.msk.bf16.mxu1 %vm2309_vm0, %v9452_v31  ;;  %v9455_v19 = vld [vmem:[%s12834_s0 + $0x9f0] ss:$8 sps:$4 sm:$0xff]  }
 0x173   :  { %v3086_v38 = vpop.f32.mrf.mxu0  ;;  %v4022_v42 = vpop.f32.mrf.mxu1 }
 0x174   :  { %v10661_v36 = vmax.f32 %v6530_v40, %v6534_v56  ;;  %v9468_v38 = vld [vmem:[%s12834_s0 + $0x2d4] ss:$8 sps:$4 sm:$0xff]   ;;  %v9470_v42 = vld [vmem:[%s12834_s0 + $0xa24] ss:$8 sps:$4 sm:$0xff]  }
 0x175   :  { %v10663_v10 = vpop.f32.mrf.mxu0  ;;  %v4023_v27 = vpop.f32.mrf.mxu1 }
 0x176   :  { %12846 = vst [vmem:[#allocation5_spill] sm:$0xff] %v10661_v36  ;;  %v6535_v44 = vmax.f32 %v4007_v0, %v4023_v27 }
 0x177   :  { %v3089_v59 = vpop.f32.mrf.mxu0  ;;  %v4025_v40 = vpop.f32.mrf.mxu1 }
 0x178   :  { %v10680_v1 = vmax.f32 %v6531_v20, %v6535_v44 }
 0x179   :  { %v10682_v16 = vpop.f32.mrf.mxu0  ;;  %3283 = vmatmul.mubr.bf16.gmra.mxu0 %v9454_v43  ;;  %v4028_v58 = vpop.f32.mrf.mxu1  ;;  %4219 = vmatmul.mubr.bf16.gmra.mxu1 %v9455_v19 }
 0x17a   :  { %12847 = vst [vmem:[#allocation6_spill] sm:$0xff] %v10680_v1  ;;  %v4794_v0 = vmax.f32 %v10636_v22, %v10682_v16  ;;  %v6536_v41 = vmax.f32 %v4012_v49, %v4028_v58  ;;  %8342 = vmatprep.mubr.msk.bf16.mxu0 %vm2309_vm0, %v9456_v54  ;;  %8459 = vmatprep.mubr.msk.bf16.mxu1 %vm2309_vm0, %v9458_v26  ;;  %v9461_v49 = vld [vmem:[%s12834_s0 + $0xa00] ss:$8 sps:$4 sm:$0xff]   ;;  %v9472_v58 = vld [vmem:[%s12834_s0 + $0x2d0] ss:$8 sps:$4 sm:$0xff]  }
 0x17b   :  { %v3094_v9 = vpop.f32.mrf.mxu0  ;;  %v4030_v62 = vpop.f32.mrf.mxu1  ;;  %v9486_v22 = vld [vmem:[%s12834_s0 + $0x304] ss:$8 sps:$4 sm:$0xff]   ;;  %v9488_v16 = vld [vmem:[%s12834_s0 + $0xa54] ss:$8 sps:$4 sm:$0xff]  }
 0x17c   :  { %v10691_v45 = vmax.f32 %v6532_v37, %v6536_v41  ;;  %v9473_v41 = vld [vmem:[%s12834_s0 + $0xa20] ss:$8 sps:$4 sm:$0xff]   ;;  %v9474_v9 = vld [vmem:[%s12834_s0 + $0x2e4] ss:$8 sps:$4 sm:$0xff]   ;;  %v9476_v62 = vld [vmem:[%s12834_s0 + $0xa34] ss:$8 sps:$4 sm:$0xff]  }
 0x17d   :  { %v10693_v6 = vpop.f32.mrf.mxu0  ;;  %v4031_v20 = vpop.f32.mrf.mxu1 }
 0x17e   :  { %12848 = vst [vmem:[#allocation7_spill] sm:$0xff] %v10691_v45  ;;  %v4795_v46 = vmax.f32 %v10640_v30, %v10693_v6  ;;  %v6537_v57 = vmax.f32 %v4015_v2, %v4031_v20  ;;  %v9490_v6 = vld [vmem:[%s12834_s0 + $0x300] ss:$8 sps:$4 sm:$0xff]  }
 0x17f   :  { %v3097_v37 = vpop.f32.mrf.mxu0  ;;  %v4033_v29 = vpop.f32.mrf.mxu1 }
 0x180   :  { %v10712_v61 = vmax.f32 %v6533_v34, %v6537_v57  ;;  %v9467_v34 = vld [vmem:[%s12834_s0 + $0xa10] ss:$8 sps:$4 sm:$0xff]  }
 0x181   :  { %v10714_v4 = vpop.f32.mrf.mxu0  ;;  %3291 = vmatmul.mubr.bf16.gmra.mxu0 %v9460_v28  ;;  %v10716_v31 = vpop.f32.mrf.mxu1  ;;  %4227 = vmatmul.mubr.bf16.gmra.mxu1 %v9461_v49 }
 0x182   :  { %12849 = vst [vmem:[#allocation8_spill] sm:$0xff] %v10712_v61  ;;  %v4796_v2 = vmax.f32 %v10654_v15, %v10714_v4  ;;  %8343 = vmatprep.mubr.msk.bf16.mxu0 %vm2309_vm0, %v9462_v8  ;;  %8460 = vmatprep.mubr.msk.bf16.mxu1 %vm2309_vm0, %v9464_v60  ;;  %v9494_v15 = vld [vmem:[%s12834_s0 + $0xa64] ss:$8 sps:$4 sm:$0xff]  }
 0x183   :  { %v3102_v5 = vpop.f32.mrf.mxu0  ;;  %v4038_v7 = vpop.f32.mrf.mxu1 }
 0x184   :  { %v9478_v7 = vld [vmem:[%s12834_s0 + $0x2e0] ss:$8 sps:$4 sm:$0xff]  }
 0x185   :  { %v10722_v33 = vpop.f32.mrf.mxu0  ;;  %v10724_v23 = vpop.f32.mrf.mxu1 }
 0x186   :  { %v4797_v56 = vmax.f32 %v10663_v10, %v10722_v33  ;;  %v9496_v10 = vld [vmem:[%s12834_s0 + $0x310] ss:$8 sps:$4 sm:$0xff]   ;;  %v9497_v33 = vld [vmem:[%s12834_s0 + $0xa60] ss:$8 sps:$4 sm:$0xff]  }
 0x187   :  { %v3105_v27 = vpop.f32.mrf.mxu0  ;;  %v4041_v43 = vpop.f32.mrf.mxu1 }
 0x189   :  { %v3108_v19 = vpop.f32.mrf.mxu0  ;;  %3299 = vmatmul.mubr.bf16.gmra.mxu0 %v9466_v14  ;;  %v10740_v44 = vpop.f32.mrf.mxu1  ;;  %4235 = vmatmul.mubr.bf16.gmra.mxu1 %v9467_v34  ;;  %v9479_v14 = vld [vmem:[%s12834_s0 + $0xa30] ss:$8 sps:$4 sm:$0xff]  }
 0x18a   :  { %8344 = vmatprep.mubr.msk.bf16.mxu0 %vm2309_vm0, %v9468_v38  ;;  %8461 = vmatprep.mubr.msk.bf16.mxu1 %vm2309_vm0, %v9470_v42  ;;  %v9480_v38 = vld [vmem:[%s12834_s0 + $0x2f4] ss:$8 sps:$4 sm:$0xff]   ;;  %v9482_v42 = vld [vmem:[%s12834_s0 + $0xa44] ss:$8 sps:$4 sm:$0xff]  }
 0x18b   :  { %v3110_v54 = vpop.f32.mrf.mxu0  ;;  %v4046_v26 = vpop.f32.mrf.mxu1 }
 0x18d   :  { %v3111_v59 = vpop.f32.mrf.mxu0  ;;  %v10744_v40 = vpop.f32.mrf.mxu1 }
 0x18f   :  { %v3113_v20 = vpop.f32.mrf.mxu0  ;;  %v4049_v28 = vpop.f32.mrf.mxu1 }
 0x191   :  { %v3116_v49 = vpop.f32.mrf.mxu0  ;;  %3307 = vmatmul.mubr.bf16.gmra.mxu0 %v9472_v58  ;;  %v10758_v57 = vpop.f32.mrf.mxu1  ;;  %4243 = vmatmul.mubr.bf16.gmra.mxu1 %v9473_v41 }
 0x192   :  { %v6654_v8 = vmax.f32 %v10716_v31, %v10758_v57  ;;  %8345 = vmatprep.mubr.msk.bf16.mxu0 %vm2309_vm0, %v9474_v9  ;;  %8462 = vmatprep.mubr.msk.bf16.mxu1 %vm2309_vm0, %v9476_v62  ;;  %v9506_v31 = vld [vmem:[%s12834_s0 + $0xa84] ss:$8 sps:$4 sm:$0xff]  }
 0x193   :  { %v3118_v60 = vpop.f32.mrf.mxu0  ;;  %v4054_v37 = vpop.f32.mrf.mxu1 }
 0x194   :  { %v9485_v37 = vld [vmem:[%s12834_s0 + $0xa40] ss:$8 sps:$4 sm:$0xff]  }
 0x195   :  { %v3119_v29 = vpop.f32.mrf.mxu0  ;;  %v10764_v5 = vpop.f32.mrf.mxu1 }
 0x196   :  { %v6655_v34 = vmax.f32 %v10724_v23, %v10764_v5 }
 0x197   :  { %v3121_v27 = vpop.f32.mrf.mxu0  ;;  %v4057_v43 = vpop.f32.mrf.mxu1 }
 0x199   :  { %v3124_v54 = vpop.f32.mrf.mxu0  ;;  %3315 = vmatmul.mubr.bf16.gmra.mxu0 %v9478_v7  ;;  %v10780_v26 = vpop.f32.mrf.mxu1  ;;  %4251 = vmatmul.mubr.bf16.gmra.mxu1 %v9479_v14 }
 0x19a   :  { %v4798_v58 = vmax.f32 %v3108_v19, %v3124_v54  ;;  %v6656_v41 = vmax.f32 %v10740_v44, %v10780_v26  ;;  %8346 = vmatprep.mubr.msk.bf16.mxu0 %vm2309_vm0, %v9480_v38  ;;  %8463 = vmatprep.mubr.msk.bf16.mxu1 %vm2309_vm0, %v9482_v42  ;;  %v9484_v19 = vld [vmem:[%s12834_s0 + $0x2f0] ss:$8 sps:$4 sm:$0xff]   ;;  %v9510_v44 = vld [vmem:[%s12834_s0 + $0x344] ss:$8 sps:$4 sm:$0xff]   ;;  %v9512_v26 = vld [vmem:[%s12834_s0 + $0xa94] ss:$8 sps:$4 sm:$0xff]  }
 0x19b   :  { %v3126_v9 = vpop.f32.mrf.mxu0  ;;  %v4062_v62 = vpop.f32.mrf.mxu1 }
 0x19c   :  { %v10789_v20 = vmax.f32 %v4794_v0, %v4798_v58 }
 0x19d   :  { %v3127_v28 = vpop.f32.mrf.mxu0  ;;  %v10791_v60 = vpop.f32.mrf.mxu1 }
 0x19e   :  { %v4799_v7 = vmax.f32 %v3111_v59, %v3127_v28  ;;  %v6657_v14 = vmax.f32 %v10744_v40, %v10791_v60  ;;  %v9492_v28 = vld [vmem:[%s12834_s0 + $0x314] ss:$8 sps:$4 sm:$0xff]   ;;  %v9514_v60 = vld [vmem:[%s12834_s0 + $0x340] ss:$8 sps:$4 sm:$0xff]  }
 0x19f   :  { %v3129_v0 = vpop.f32.mrf.mxu0  ;;  %v4065_v38 = vpop.f32.mrf.mxu1 }
 0x1a0   :  { %v10810_v42 = vmax.f32 %v4795_v46, %v4799_v7  ;;  %v9491_v46 = vld [vmem:[%s12834_s0 + $0xa50] ss:$8 sps:$4 sm:$0xff]   ;;  %v9500_v38 = vld [vmem:[%s12834_s0 + $0xa74] ss:$8 sps:$4 sm:$0xff]  }
 0x1a1   :  { %v3132_v27 = vpop.f32.mrf.mxu0  ;;  %3323 = vmatmul.mubr.bf16.gmra.mxu0 %v9484_v19  ;;  %v4068_v59 = vpop.f32.mrf.mxu1  ;;  %4259 = vmatmul.mubr.bf16.gmra.mxu1 %v9485_v37 }
 0x1a2   :  { %v4800_v43 = vmax.f32 %v3116_v49, %v3132_v27  ;;  %8347 = vmatprep.mubr.msk.bf16.mxu0 %vm2309_vm0, %v9486_v22  ;;  %8464 = vmatprep.mubr.msk.bf16.mxu1 %vm2309_vm0, %v9488_v16 }
 0x1a3   :  { %v3134_v54 = vpop.f32.mrf.mxu0  ;;  %v4070_v58 = vpop.f32.mrf.mxu1 }
 0x1a4   :  { %v10817_v9 = vmax.f32 %v4796_v2, %v4800_v43 }
 0x1a5   :  { %v3135_v62 = vpop.f32.mrf.mxu0  ;;  %v4071_v30 = vpop.f32.mrf.mxu1 }
 0x1a6   :  { %v4801_v49 = vmax.f32 %v3119_v29, %v3135_v62 }
 0x1a7   :  { %v3137_v4 = vpop.f32.mrf.mxu0  ;;  %v4073_v2 = vpop.f32.mrf.mxu1 }
 0x1a8   :  { %v10834_v19 = vmax.f32 %v4797_v56, %v4801_v49  ;;  %v9498_v56 = vld [vmem:[%s12834_s0 + $0x324] ss:$8 sps:$4 sm:$0xff]   ;;  %v9502_v4 = vld [vmem:[%s12834_s0 + $0x320] ss:$8 sps:$4 sm:$0xff]  }
 0x1a9   :  { %v10836_v37 = vpop.f32.mrf.mxu0  ;;  %3331 = vmatmul.mubr.bf16.gmra.mxu0 %v9490_v6  ;;  %v4076_v7 = vpop.f32.mrf.mxu1  ;;  %4267 = vmatmul.mubr.bf16.gmra.mxu1 %v9491_v46 }
 0x1aa   :  { %8348 = vmatprep.mubr.msk.bf16.mxu0 %vm2309_vm0, %v9492_v28  ;;  %8465 = vmatprep.mubr.msk.bf16.mxu1 %vm2309_vm0, %v9494_v15 }
 0x1ab   :  { %v3142_v29 = vpop.f32.mrf.mxu0  ;;  %v4078_v22 = vpop.f32.mrf.mxu1 }
 0x1ac   :  { %v9504_v29 = vld [vmem:[%s12834_s0 + $0x334] ss:$8 sps:$4 sm:$0xff]  }
 0x1ad   :  { %v10840_v16 = vpop.f32.mrf.mxu0  ;;  %v4079_v0 = vpop.f32.mrf.mxu1 }
 0x1af   :  { %v3145_v27 = vpop.f32.mrf.mxu0  ;;  %v4081_v43 = vpop.f32.mrf.mxu1 }
 0x1b0   :  { %v9508_v43 = vld [vmem:[%s12834_s0 + $0x330] ss:$8 sps:$4 sm:$0xff]  }
 0x1b1   :  { %v10854_v54 = vpop.f32.mrf.mxu0  ;;  %3339 = vmatmul.mubr.bf16.gmra.mxu0 %v9496_v10  ;;  %v4084_v58 = vpop.f32.mrf.mxu1  ;;  %4275 = vmatmul.mubr.bf16.gmra.mxu1 %v9497_v33 }
 0x1b2   :  { %v6658_v62 = vmax.f32 %v4068_v59, %v4084_v58  ;;  %8349 = vmatprep.mubr.msk.bf16.mxu0 %vm2309_vm0, %v9498_v56  ;;  %8466 = vmatprep.mubr.msk.bf16.mxu1 %vm2309_vm0, %v9500_v38  ;;  %v9503_v59 = vld [vmem:[%s12834_s0 + $0xa70] ss:$8 sps:$4 sm:$0xff]  }
 0x1b3   :  { %v3150_v6 = vpop.f32.mrf.mxu0  ;;  %v4086_v46 = vpop.f32.mrf.mxu1 }
 0x1b4   :  { %v10861_v49 = vmax.f32 %v6654_v8, %v6658_v62 }
 0x1b5   :  { %v10863_v28 = vpop.f32.mrf.mxu0  ;;  %v4087_v15 = vpop.f32.mrf.mxu1 }
 0x1b6   :  { %12850 = vst [vmem:[#allocation9_spill] sm:$0xff] %v10861_v49  ;;  %v6659_v2 = vmax.f32 %v4071_v30, %v4087_v15 }
 0x1b7   :  { %v3153_v57 = vpop.f32.mrf.mxu0  ;;  %v4089_v8 = vpop.f32.mrf.mxu1 }
 0x1b8   :  { %v10880_v22 = vmax.f32 %v6655_v34, %v6659_v2  ;;  %v9516_v57 = vld [vmem:[%s12834_s0 + $0x354] ss:$8 sps:$4 sm:$0xff]   ;;  %v9518_v8 = vld [vmem:[%s12834_s0 + $0xaa4] ss:$8 sps:$4 sm:$0xff]  }
 0x1b9   :  { %v10882_v10 = vpop.f32.mrf.mxu0  ;;  %3347 = vmatmul.mubr.bf16.gmra.mxu0 %v9502_v4  ;;  %v4092_v33 = vpop.f32.mrf.mxu1  ;;  %4283 = vmatmul.mubr.bf16.gmra.mxu1 %v9503_v59 }
 0x1ba   :  { %12851 = vst [vmem:[#allocation10_spill] sm:$0xff] %v10880_v22  ;;  %v4918_v30 = vmax.f32 %v10836_v37, %v10882_v10  ;;  %v6660_v56 = vmax.f32 %v4076_v7, %v4092_v33  ;;  %8350 = vmatprep.mubr.msk.bf16.mxu0 %vm2309_vm0, %v9504_v29  ;;  %8467 = vmatprep.mubr.msk.bf16.mxu1 %vm2309_vm0, %v9506_v31  ;;  %v9509_v7 = vld [vmem:[%s12834_s0 + $0xa80] ss:$8 sps:$4 sm:$0xff]   ;;  %v9536_v37 = vld [vmem:[%s12834_s0 + $0xad4] ss:$8 sps:$4 sm:$0xff]  }
 0x1bb   :  { %v3158_v38 = vpop.f32.mrf.mxu0  ;;  %v4094_v27 = vpop.f32.mrf.mxu1 }
 0x1bc   :  { %v10891_v23 = vmax.f32 %v6656_v41, %v6660_v56 }
 0x1bd   :  { %v10893_v5 = vpop.f32.mrf.mxu0  ;;  %v4095_v34 = vpop.f32.mrf.mxu1 }
 0x1be   :  { %12852 = vst [vmem:[#allocation11_spill] sm:$0xff] %v10891_v23  ;;  %v4919_v58 = vmax.f32 %v10840_v16, %v10893_v5  ;;  %v6661_v62 = vmax.f32 %v4079_v0, %v4095_v34  ;;  %v9538_v5 = vld [vmem:[%s12834_s0 + $0x380] ss:$8 sps:$4 sm:$0xff]  }
 0x1bf   :  { %v3161_v41 = vpop.f32.mrf.mxu0  ;;  %v4097_v6 = vpop.f32.mrf.mxu1 }
 0x1c0   :  { %v10912_v46 = vmax.f32 %v6657_v14, %v6661_v62  ;;  %v9515_v14 = vld [vmem:[%s12834_s0 + $0xa90] ss:$8 sps:$4 sm:$0xff]   ;;  %v9522_v41 = vld [vmem:[%s12834_s0 + $0x364] ss:$8 sps:$4 sm:$0xff]   ;;  %v9524_v6 = vld [vmem:[%s12834_s0 + $0xab4] ss:$8 sps:$4 sm:$0xff]  }
 0x1c1   :  { %v10914_v15 = vpop.f32.mrf.mxu0  ;;  %3355 = vmatmul.mubr.bf16.gmra.mxu0 %v9508_v43  ;;  %v10916_v4 = vpop.f32.mrf.mxu1  ;;  %4291 = vmatmul.mubr.bf16.gmra.mxu1 %v9509_v7 }
 0x1c2   :  { %12853 = vst [vmem:[#allocation12_spill] sm:$0xff] %v10912_v46  ;;  %v4920_v0 = vmax.f32 %v10854_v54, %v10914_v15  ;;  %8351 = vmatprep.mubr.msk.bf16.mxu0 %vm2309_vm0, %v9510_v44  ;;  %8468 = vmatprep.mubr.msk.bf16.mxu1 %vm2309_vm0, %v9512_v26  ;;  %v9520_v44 = vld [vmem:[%s12834_s0 + $0x350] ss:$8 sps:$4 sm:$0xff]   ;;  %v9521_v26 = vld [vmem:[%s12834_s0 + $0xaa0] ss:$8 sps:$4 sm:$0xff]  }
 0x1c3   :  { %v3166_v59 = vpop.f32.mrf.mxu0  ;;  %v4102_v2 = vpop.f32.mrf.mxu1  ;;  %v9542_v54 = vld [vmem:[%s12834_s0 + $0xae4] ss:$8 sps:$4 sm:$0xff]  }
 0x1c5   :  { %v10922_v29 = vpop.f32.mrf.mxu0  ;;  %v10924_v40 = vpop.f32.mrf.mxu1 }
 0x1c6   :  { %v4921_v31 = vmax.f32 %v10863_v28, %v10922_v29  ;;  %v9544_v28 = vld [vmem:[%s12834_s0 + $0x390] ss:$8 sps:$4 sm:$0xff]   ;;  %v9545_v29 = vld [vmem:[%s12834_s0 + $0xae0] ss:$8 sps:$4 sm:$0xff]  }
 0x1c7   :  { %v3169_v33 = vpop.f32.mrf.mxu0  ;;  %v4105_v56 = vpop.f32.mrf.mxu1 }
 0x1c9   :  { %v3172_v38 = vpop.f32.mrf.mxu0  ;;  %3363 = vmatmul.mubr.bf16.gmra.mxu0 %v9514_v60  ;;  %v10940_v27 = vpop.f32.mrf.mxu1  ;;  %4299 = vmatmul.mubr.bf16.gmra.mxu1 %v9515_v14 }
 0x1ca   :  { %8352 = vmatprep.mubr.msk.bf16.mxu0 %vm2309_vm0, %v9516_v57  ;;  %8469 = vmatprep.mubr.msk.bf16.mxu1 %vm2309_vm0, %v9518_v8 }
 0x1cb   :  { %v3174_v34 = vpop.f32.mrf.mxu0  ;;  %v4110_v43 = vpop.f32.mrf.mxu1 }
 0x1cc   :  { %v9526_v43 = vld [vmem:[%s12834_s0 + $0x360] ss:$8 sps:$4 sm:$0xff]  }
 0x1cd   :  { %v3175_v7 = vpop.f32.mrf.mxu0  ;;  %v10944_v62 = vpop.f32.mrf.mxu1 }
 0x1cf   :  { %v3177_v59 = vpop.f32.mrf.mxu0  ;;  %v4113_v2 = vpop.f32.mrf.mxu1 }
 0x1d1   :  { %v3180_v60 = vpop.f32.mrf.mxu0  ;;  %3371 = vmatmul.mubr.bf16.gmra.mxu0 %v9520_v44  ;;  %v10958_v14 = vpop.f32.mrf.mxu1  ;;  %4307 = vmatmul.mubr.bf16.gmra.mxu1 %v9521_v26  ;;  %v9527_v44 = vld [vmem:[%s12834_s0 + $0xab0] ss:$8 sps:$4 sm:$0xff]  }
 0x1d2   :  { %8353 = vmatprep.mubr.msk.bf16.mxu0 %vm2309_vm0, %v9522_v41  ;;  %8470 = vmatprep.mubr.msk.bf16.mxu1 %vm2309_vm0, %v9524_v6  ;;  %v9528_v41 = vld [vmem:[%s12834_s0 + $0x374] ss:$8 sps:$4 sm:$0xff]   ;;  %v9530_v6 = vld [vmem:[%s12834_s0 + $0xac4] ss:$8 sps:$4 sm:$0xff]  }
 0x1d3   :  { %v3182_v8 = vpop.f32.mrf.mxu0  ;;  %v4118_v33 = vpop.f32.mrf.mxu1 }
 0x1d5   :  { %v3183_v56 = vpop.f32.mrf.mxu0  ;;  %v10964_v34 = vpop.f32.mrf.mxu1 }
 0x1d7   :  { %v3185_v59 = vpop.f32.mrf.mxu0  ;;  %v4121_v2 = vpop.f32.mrf.mxu1 }
 0x1d9   :  { %v3188_v8 = vpop.f32.mrf.mxu0  ;;  %3379 = vmatmul.mubr.bf16.gmra.mxu0 %v9526_v43  ;;  %v10980_v33 = vpop.f32.mrf.mxu1  ;;  %4315 = vmatmul.mubr.bf16.gmra.mxu1 %v9527_v44  ;;  %v9533_v44 = vld [vmem:[%s12834_s0 + $0xac0] ss:$8 sps:$4 sm:$0xff]  }
 0x1da   :  { %v4922_v21 = vmax.f32 %v3172_v38, %v3188_v8  ;;  %v6780_v13 = vmax.f32 %v10940_v27, %v10980_v33  ;;  %8354 = vmatprep.mubr.msk.bf16.mxu0 %vm2309_vm0, %v9528_v41  ;;  %8471 = vmatprep.mubr.msk.bf16.mxu1 %vm2309_vm0, %v9530_v6  ;;  %v9532_v38 = vld [vmem:[%s12834_s0 + $0x370] ss:$8 sps:$4 sm:$0xff]   ;;  %v9560_v27 = vld [vmem:[%s12834_s0 + $0xb14] ss:$8 sps:$4 sm:$0xff]  }
 0x1db   :  { %v3190_v26 = vpop.f32.mrf.mxu0  ;;  %v4126_v57 = vpop.f32.mrf.mxu1 }
 0x1dc   :  { %v10989_v59 = vmax.f32 %v4918_v30, %v4922_v21  ;;  %v9534_v21 = vld [vmem:[%s12834_s0 + $0x384] ss:$8 sps:$4 sm:$0xff]  }
 0x1dd   :  { %v3191_v2 = vpop.f32.mrf.mxu0  ;;  %v10991_v43 = vpop.f32.mrf.mxu1 }
 0x1de   :  { %v4923_v41 = vmax.f32 %v3175_v7, %v3191_v2 }
 0x1df   :  { %v3193_v10 = vpop.f32.mrf.mxu0  ;;  %v4129_v30 = vpop.f32.mrf.mxu1 }
 0x1e0   :  { %v11010_v26 = vmax.f32 %v4919_v58, %v4923_v41  ;;  %v9539_v58 = vld [vmem:[%s12834_s0 + $0xad0] ss:$8 sps:$4 sm:$0xff]  }
 0x1e1   :  { %v3196_v6 = vpop.f32.mrf.mxu0  ;;  %3387 = vmatmul.mubr.bf16.gmra.mxu0 %v9532_v38  ;;  %v4132_v7 = vpop.f32.mrf.mxu1  ;;  %4323 = vmatmul.mubr.bf16.gmra.mxu1 %v9533_v44  ;;  %v9540_v38 = vld [vmem:[%s12834_s0 + $0x394] ss:$8 sps:$4 sm:$0xff]  }
 0x1e2   :  { %v4924_v8 = vmax.f32 %v3180_v60, %v3196_v6  ;;  %8355 = vmatprep.mubr.msk.bf16.mxu0 %vm2309_vm0, %v9534_v21  ;;  %8472 = vmatprep.mubr.msk.bf16.mxu1 %vm2309_vm0, %v9536_v37 }
 0x1e3   :  { %v3198_v2 = vpop.f32.mrf.mxu0  ;;  %v4134_v57 = vpop.f32.mrf.mxu1 }
 0x1e4   :  { %v11017_v10 = vmax.f32 %v4920_v0, %v4924_v8  ;;  %v9548_v8 = vld [vmem:[%s12834_s0 + $0xaf4] ss:$8 sps:$4 sm:$0xff]  }
 0x1e5   :  { %v3199_v30 = vpop.f32.mrf.mxu0  ;;  %v4135_v16 = vpop.f32.mrf.mxu1 }
 0x1e6   :  { %v4925_v60 = vmax.f32 %v3183_v56, %v3199_v30 }
 0x1e7   :  { %v3201_v15 = vpop.f32.mrf.mxu0  ;;  %v4137_v0 = vpop.f32.mrf.mxu1 }
 0x1e8   :  { %v11034_v44 = vmax.f32 %v4921_v31, %v4925_v60  ;;  %v9546_v31 = vld [vmem:[%s12834_s0 + $0x3a4] ss:$8 sps:$4 sm:$0xff]   ;;  %v12854_v15 = vmax.f32 %v10916_v4, %v10958_v14 }
 0x1e9   :  { %v11036_v41 = vpop.f32.mrf.mxu0  ;;  %3395 = vmatmul.mubr.bf16.gmra.mxu0 %v9538_v5  ;;  %v4140_v57 = vpop.f32.mrf.mxu1  ;;  %4331 = vmatmul.mubr.bf16.gmra.mxu1 %v9539_v58  ;;  %v9554_v4 = vld [vmem:[%s12834_s0 + $0xb04] ss:$8 sps:$4 sm:$0xff]  }
 0x1ea   :  { %8356 = vmatprep.mubr.msk.bf16.mxu0 %vm2309_vm0, %v9540_v38  ;;  %8473 = vmatprep.mubr.msk.bf16.mxu1 %vm2309_vm0, %v9542_v54 }
 0x1eb   :  { %v3206_v56 = vpop.f32.mrf.mxu0  ;;  %v4142_v21 = vpop.f32.mrf.mxu1 }
 0x1ed   :  { %v11040_v37 = vpop.f32.mrf.mxu0  ;;  %v4143_v6 = vpop.f32.mrf.mxu1 }
 0x1ef   :  { %v3209_v2 = vpop.f32.mrf.mxu0  ;;  %v4145_v30 = vpop.f32.mrf.mxu1 }
 0x1f0   :  { %v12856_v2 = vmax.f32 %v10924_v40, %v10964_v34 }
 0x1f1   :  { %v11054_v5 = vpop.f32.mrf.mxu0  ;;  %3403 = vmatmul.mubr.bf16.gmra.mxu0 %v9544_v28  ;;  %v4148_v58 = vpop.f32.mrf.mxu1  ;;  %4339 = vmatmul.mubr.bf16.gmra.mxu1 %v9545_v29  ;;  %v9550_v28 = vld [vmem:[%s12834_s0 + $0x3a0] ss:$8 sps:$4 sm:$0xff]  }
 0x1f2   :  { %v6782_v60 = vmax.f32 %v4132_v7, %v4148_v58  ;;  %8357 = vmatprep.mubr.msk.bf16.mxu0 %vm2309_vm0, %v9546_v31  ;;  %8474 = vmatprep.mubr.msk.bf16.mxu1 %vm2309_vm0, %v9548_v8  ;;  %v9551_v7 = vld [vmem:[%s12834_s0 + $0xaf0] ss:$8 sps:$4 sm:$0xff]   ;;  %v9552_v31 = vld [vmem:[%s12834_s0 + $0x3b4] ss:$8 sps:$4 sm:$0xff]  }
 0x1f3   :  { %v3214_v38 = vpop.f32.mrf.mxu0  ;;  %v4150_v54 = vpop.f32.mrf.mxu1 }
 0x1f4   :  { %v11061_v0 = vmax.f32 %v12854_v15, %v6782_v60 }
 0x1f5   :  { %v11063_v56 = vpop.f32.mrf.mxu0  ;;  %v4151_v21 = vpop.f32.mrf.mxu1 }
 0x1f6   :  { %12855 = vst [vmem:[#allocation13_spill] sm:$0xff] %v11061_v0  ;;  %v6783_v29 = vmax.f32 %v4135_v16, %v4151_v21 }
 0x1f7   :  { %v3217_v14 = vpop.f32.mrf.mxu0  ;;  %v4153_v8 = vpop.f32.mrf.mxu1 }
 0x1f8   :  { %v11080_v30 = vmax.f32 %v12856_v2, %v6783_v29 }
 0x1f9   :  { %v11082_v58 = vpop.f32.mrf.mxu0  ;;  %3411 = vmatmul.mubr.bf16.gmra.mxu0 %v9550_v28  ;;  %v4156_v60 = vpop.f32.mrf.mxu1  ;;  %4347 = vmatmul.mubr.bf16.gmra.mxu1 %v9551_v7  ;;  %v9556_v28 = vld [vmem:[%s12834_s0 + $0x3b0] ss:$8 sps:$4 sm:$0xff]  }
 0x1fa   :  { %12857 = vst [vmem:[#allocation14_spill] sm:$0xff] %v11080_v30  ;;  %v6784_v38 = vmax.f32 %v4140_v57, %v4156_v60  ;;  %8358 = vmatprep.mubr.msk.bf16.mxu0 %vm2309_vm0, %v9552_v31  ;;  %8475 = vmatprep.mubr.msk.bf16.mxu1 %vm2309_vm0, %v9554_v4  ;;  %v9557_v57 = vld [vmem:[%s12834_s0 + $0xb00] ss:$8 sps:$4 sm:$0xff]   ;;  %v12859_v4 = vmax.f32 %v10944_v62, %v10991_v43 }
 0x1fb   :  { %v3222_v54 = vpop.f32.mrf.mxu0  ;;  %v4158_v15 = vpop.f32.mrf.mxu1  ;;  %v9562_v43 = vld [vmem:[%s12834_s0 + $0x3c0] ss:$8 sps:$4 sm:$0xff]   ;;  %v12861_v46 = vmax.f32 %v11036_v41, %v11082_v58  ;;  %v9584_v41 = vld [vmem:[%s12834_s0 + $0xb54] ss:$8 sps:$4 sm:$0xff]  }
 0x1fc   :  { %v11091_v40 = vmax.f32 %v6780_v13, %v6784_v38  ;;  %v9558_v13 = vld [vmem:[%s12834_s0 + $0x3c4] ss:$8 sps:$4 sm:$0xff]   ;;  %v9563_v15 = vld [vmem:[%s12834_s0 + $0xb10] ss:$8 sps:$4 sm:$0xff]  }
 0x1fd   :  { %v11093_v34 = vpop.f32.mrf.mxu0  ;;  %v4159_v21 = vpop.f32.mrf.mxu1 }
 0x1fe   :  { %12858 = vst [vmem:[#allocation15_spill] sm:$0xff] %v11091_v40  ;;  %v6785_v29 = vmax.f32 %v4143_v6, %v4159_v21  ;;  %v9568_v21 = vld [vmem:[%s12834_s0 + $0x3d0] ss:$8 sps:$4 sm:$0xff]  }
 0x1ff   :  { %v3225_v33 = vpop.f32.mrf.mxu0  ;;  %v4161_v31 = vpop.f32.mrf.mxu1 }
 0x200   :  { %v11112_v14 = vmax.f32 %v12859_v4, %v6785_v29 }
 0x201   :  { %v11114_v8 = vpop.f32.mrf.mxu0  ;;  %3419 = vmatmul.mubr.bf16.gmra.mxu0 %v9556_v28  ;;  %v11116_v2 = vpop.f32.mrf.mxu1  ;;  %4355 = vmatmul.mubr.bf16.gmra.mxu1 %v9557_v57  ;;  %v9564_v28 = vld [vmem:[%s12834_s0 + $0x3d4] ss:$8 sps:$4 sm:$0xff]   ;;  %v9566_v57 = vld [vmem:[%s12834_s0 + $0xb24] ss:$8 sps:$4 sm:$0xff]  }
 0x202   :  { %12860 = vst [vmem:[#allocation16_spill] sm:$0xff] %v11112_v14  ;;  %8359 = vmatprep.mubr.msk.bf16.mxu0 %vm2309_vm0, %v9558_v13  ;;  %8476 = vmatprep.mubr.msk.bf16.mxu1 %vm2309_vm0, %v9560_v27 }
 0x203   :  { %v3230_v60 = vpop.f32.mrf.mxu0  ;;  %v4166_v38 = vpop.f32.mrf.mxu1 }
 0x205   :  { %v11122_v54 = vpop.f32.mrf.mxu0  ;;  %v11124_v62 = vpop.f32.mrf.mxu1 }
 0x207   :  { %v3233_v29 = vpop.f32.mrf.mxu0  ;;  %v4169_v13 = vpop.f32.mrf.mxu1 }
 0x209   :  { %v3236_v27 = vpop.f32.mrf.mxu0  ;;  %3427 = vmatmul.mubr.bf16.gmra.mxu0 %v9562_v43  ;;  %v11140_v33 = vpop.f32.mrf.mxu1  ;;  %4363 = vmatmul.mubr.bf16.gmra.mxu1 %v9563_v15  ;;  %v9569_v43 = vld [vmem:[%s12834_s0 + $0xb20] ss:$8 sps:$4 sm:$0xff]   ;;  %v9570_v15 = vld [vmem:[%s12834_s0 + $0x3e4] ss:$8 sps:$4 sm:$0xff]  }
 0x20a   :  { %8360 = vmatprep.mubr.msk.bf16.mxu0 %vm2309_vm0, %v9564_v28  ;;  %8477 = vmatprep.mubr.msk.bf16.mxu1 %vm2309_vm0, %v9566_v57  ;;  %v9572_v28 = vld [vmem:[%s12834_s0 + $0xb34] ss:$8 sps:$4 sm:$0xff]  }
 0x20b   :  { %v3238_v31 = vpop.f32.mrf.mxu0  ;;  %v4174_v4 = vpop.f32.mrf.mxu1 }
 0x20d   :  { %v3239_v60 = vpop.f32.mrf.mxu0  ;;  %v11144_v38 = vpop.f32.mrf.mxu1 }
 0x20f   :  { %v3241_v57 = vpop.f32.mrf.mxu0  ;;  %v4177_v29 = vpop.f32.mrf.mxu1 }
 0x210   :  { %v9574_v57 = vld [vmem:[%s12834_s0 + $0x3e0] ss:$8 sps:$4 sm:$0xff]  }
 0x211   :  { %v3244_v13 = vpop.f32.mrf.mxu0  ;;  %3435 = vmatmul.mubr.bf16.gmra.mxu0 %v9568_v21  ;;  %v11158_v31 = vpop.f32.mrf.mxu1  ;;  %4371 = vmatmul.mubr.bf16.gmra.mxu1 %v9569_v43  ;;  %v9575_v21 = vld [vmem:[%s12834_s0 + $0xb30] ss:$8 sps:$4 sm:$0xff]  }
 0x212   :  { %8361 = vmatprep.mubr.msk.bf16.mxu0 %vm2309_vm0, %v9570_v15  ;;  %8478 = vmatprep.mubr.msk.bf16.mxu1 %vm2309_vm0, %v9572_v28  ;;  %v9576_v15 = vld [vmem:[%s12834_s0 + $0x3f4] ss:$8 sps:$4 sm:$0xff]  }
 0x213   :  { %v3246_v6 = vpop.f32.mrf.mxu0  ;;  %v4182_v7 = vpop.f32.mrf.mxu1 }
 0x214   :  { %v9578_v7 = vld [vmem:[%s12834_s0 + $0xb44] ss:$8 sps:$4 sm:$0xff]  }
 0x215   :  { %v3247_v16 = vpop.f32.mrf.mxu0  ;;  %v11164_v14 = vpop.f32.mrf.mxu1 }
 0x217   :  { %v3249_v6 = vpop.f32.mrf.mxu0  ;;  %v4185_v28 = vpop.f32.mrf.mxu1 }
 0x219   :  { %v3252_v29 = vpop.f32.mrf.mxu0  ;;  %3443 = vmatmul.mubr.bf16.gmra.mxu0 %v9574_v57  ;;  %v11180_v4 = vpop.f32.mrf.mxu1  ;;  %4379 = vmatmul.mubr.bf16.gmra.mxu1 %v9575_v21  ;;  %v9581_v21 = vld [vmem:[%s12834_s0 + $0xb40] ss:$8 sps:$4 sm:$0xff]  }
 0x21a   :  { %v5046_v40 = vmax.f32 %v3236_v27, %v3252_v29  ;;  %8362 = vmatprep.mubr.msk.bf16.mxu0 %vm2309_vm0, %v9576_v15  ;;  %8479 = vmatprep.mubr.msk.bf16.mxu1 %vm2309_vm0, %v9578_v7  ;;  %v9580_v27 = vld [vmem:[%s12834_s0 + $0x3f0] ss:$8 sps:$4 sm:$0xff]  }
 0x21b   :  { %v3254_v43 = vpop.f32.mrf.mxu0  ;;  %v4190_v0 = vpop.f32.mrf.mxu1 }
 0x21c   :  { %v11189_v6 = vmax.f32 %v12861_v46, %v5046_v40  ;;  %v9582_v46 = vld [vmem:[%s12834_s0 + $0x404] ss:$8 sps:$4 sm:$0xff]   ;;  %v12862_v43 = vmax.f32 %v11040_v37, %v11093_v34  ;;  %v9586_v34 = vld [vmem:[%s12834_s0 + $0x400] ss:$8 sps:$4 sm:$0xff]  }
 0x21d   :  { %v3255_v28 = vpop.f32.mrf.mxu0  ;;  %v11191_v57 = vpop.f32.mrf.mxu1 }
 0x21e   :  { %v5047_v15 = vmax.f32 %v3239_v60, %v3255_v28 }
 0x21f   :  { %v3257_v58 = vpop.f32.mrf.mxu0  ;;  %v4193_v40 = vpop.f32.mrf.mxu1 }
 0x220   :  { %v11210_v7 = vmax.f32 %v12862_v43, %v5047_v15  ;;  %v12863_v58 = vmax.f32 %v11054_v5, %v11114_v8  ;;  %v9590_v5 = vld [vmem:[%s12834_s0 + $0xb64] ss:$8 sps:$4 sm:$0xff]   ;;  %v12864_v15 = vmax.f32 %v11063_v56, %v11122_v54  ;;  %v9592_v56 = vld [vmem:[%s12834_s0 + $0x410] ss:$8 sps:$4 sm:$0xff]   ;;  %v9593_v54 = vld [vmem:[%s12834_s0 + $0xb60] ss:$8 sps:$4 sm:$0xff]  }
 0x221   :  { %v3260_v29 = vpop.f32.mrf.mxu0  ;;  %3451 = vmatmul.mubr.bf16.gmra.mxu0 %v9580_v27  ;;  %v4196_v60 = vpop.f32.mrf.mxu1  ;;  %4387 = vmatmul.mubr.bf16.gmra.mxu1 %v9581_v21 }
 0x222   :  { %v5048_v28 = vmax.f32 %v3244_v13, %v3260_v29  ;;  %8363 = vmatprep.mubr.msk.bf16.mxu0 %vm2309_vm0, %v9582_v46  ;;  %8480 = vmatprep.mubr.msk.bf16.mxu1 %vm2309_vm0, %v9584_v41  ;;  %v9587_v13 = vld [vmem:[%s12834_s0 + $0xb50] ss:$8 sps:$4 sm:$0xff]  }
 0x223   :  { %v3262_v0 = vpop.f32.mrf.mxu0  ;;  %v4198_v30 = vpop.f32.mrf.mxu1 }
 0x224   :  { %v11217_v40 = vmax.f32 %v12863_v58, %v5048_v28  ;;  %v9588_v30 = vld [vmem:[%s12834_s0 + $0x414] ss:$8 sps:$4 sm:$0xff]   ;;  %v9594_v28 = vld [vmem:[%s12834_s0 + $0x424] ss:$8 sps:$4 sm:$0xff]  }
 0x225   :  { %v3263_v23 = vpop.f32.mrf.mxu0  ;;  %v4199_v37 = vpop.f32.mrf.mxu1  ;;  %v9596_v58 = vld [vmem:[%s12834_s0 + $0xb74] ss:$8 sps:$4 sm:$0xff]  }
 0x226   :  { %v5049_v27 = vmax.f32 %v3247_v16, %v3263_v23 }
 0x227   :  { %v3265_v8 = vpop.f32.mrf.mxu0  ;;  %v4201_v21 = vpop.f32.mrf.mxu1 }
 0x228   :  { %v11234_v0 = vmax.f32 %v12864_v15, %v5049_v27  ;;  %v12865_v15 = vmax.f32 %v11116_v2, %v11158_v31  ;;  %v9602_v2 = vld [vmem:[%s12834_s0 + $0xb84] ss:$8 sps:$4 sm:$0xff]  }
 0x229   :  { %v11236_v46 = vpop.f32.mrf.mxu0  ;;  %3459 = vmatmul.mubr.bf16.gmra.mxu0 %v9586_v34  ;;  %v4204_v41 = vpop.f32.mrf.mxu1  ;;  %4395 = vmatmul.mubr.bf16.gmra.mxu1 %v9587_v13 }
 0x22a   :  { %8364 = vmatprep.mubr.msk.bf16.mxu0 %vm2309_vm0, %v9588_v30  ;;  %8481 = vmatprep.mubr.msk.bf16.mxu1 %vm2309_vm0, %v9590_v5 }
 0x22b   :  { %v3270_v23 = vpop.f32.mrf.mxu0  ;;  %v4206_v16 = vpop.f32.mrf.mxu1 }
 0x22d   :  { %v11240_v43 = vpop.f32.mrf.mxu0  ;;  %v4207_v29 = vpop.f32.mrf.mxu1 }
 0x22f   :  { %v3273_v34 = vpop.f32.mrf.mxu0  ;;  %v4209_v13 = vpop.f32.mrf.mxu1 }
 0x230   :  { %v12867_v13 = vmax.f32 %v11124_v62, %v11164_v14  ;;  %v12869_v14 = vmax.f32 %v11140_v33, %v11180_v4  ;;  %v9606_v33 = vld [vmem:[%s12834_s0 + $0x444] ss:$8 sps:$4 sm:$0xff]   ;;  %v9608_v4 = vld [vmem:[%s12834_s0 + $0xb94] ss:$8 sps:$4 sm:$0xff]  }
 0x231   :  { %v11254_v27 = vpop.f32.mrf.mxu0  ;;  %3467 = vmatmul.mubr.bf16.gmra.mxu0 %v9592_v56  ;;  %v4212_v30 = vpop.f32.mrf.mxu1  ;;  %4403 = vmatmul.mubr.bf16.gmra.mxu1 %v9593_v54  ;;  %v9598_v56 = vld [vmem:[%s12834_s0 + $0x420] ss:$8 sps:$4 sm:$0xff]  }
 0x232   :  { %v6906_v5 = vmax.f32 %v4196_v60, %v4212_v30  ;;  %8365 = vmatprep.mubr.msk.bf16.mxu0 %vm2309_vm0, %v9594_v28  ;;  %8482 = vmatprep.mubr.msk.bf16.mxu1 %vm2309_vm0, %v9596_v58  ;;  %v9599_v60 = vld [vmem:[%s12834_s0 + $0xb70] ss:$8 sps:$4 sm:$0xff]   ;;  %v9600_v28 = vld [vmem:[%s12834_s0 + $0x434] ss:$8 sps:$4 sm:$0xff]  }
 0x233   :  { %v3278_v8 = vpop.f32.mrf.mxu0  ;;  %v4214_v21 = vpop.f32.mrf.mxu1 }
 0x234   :  { %v11261_v23 = vmax.f32 %v12865_v15, %v6906_v5 }
 0x235   :  { %v11263_v16 = vpop.f32.mrf.mxu0  ;;  %v4215_v34 = vpop.f32.mrf.mxu1 }
 0x236   :  { %12866 = vst [vmem:[#allocation17_spill] sm:$0xff] %v11261_v23  ;;  %v6907_v54 = vmax.f32 %v4199_v37, %v4215_v34  ;;  %v9616_v37 = vld [vmem:[%s12834_s0 + $0x450] ss:$8 sps:$4 sm:$0xff]  }
 0x237   :  { %v3281_v31 = vpop.f32.mrf.mxu0  ;;  %v4217_v58 = vpop.f32.mrf.mxu1 }
 0x238   :  { %v11280_v30 = vmax.f32 %v12867_v13, %v6907_v54  ;;  %v8500_v31 = vld [vmem:[%s12835_s3 + $0x10] sm:$0xff] }
 0x239   :  { %v11282_v5 = vpop.f32.mrf.mxu0  ;;  %3475 = vmatmul.mubr.bf16.gmra.mxu0 %v9598_v56  ;;  %v4220_v8 = vpop.f32.mrf.mxu1  ;;  %4411 = vmatmul.mubr.bf16.gmra.mxu1 %v9599_v60  ;;  %v9604_v60 = vld [vmem:[%s12834_s0 + $0x430] ss:$8 sps:$4 sm:$0xff]  }
 0x23a   :  { %12868 = vst [vmem:[#allocation18_spill] sm:$0xff] %v11280_v30  ;;  %v6908_v21 = vmax.f32 %v4204_v41, %v4220_v8  ;;  %8366 = vmatprep.mubr.msk.bf16.mxu0 %vm2309_vm0, %v9600_v28  ;;  %8483 = vmatprep.mubr.msk.bf16.mxu1 %vm2309_vm0, %v9602_v2  ;;  %v9605_v41 = vld [vmem:[%s12834_s0 + $0xb80] ss:$8 sps:$4 sm:$0xff]   ;;  %v12871_v8 = vmax.f32 %v11144_v38, %v11191_v57 }
 0x23b   :  { %v3286_v15 = vpop.f32.mrf.mxu0  ;;  %v4222_v34 = vpop.f32.mrf.mxu1  ;;  %8843 = vmatprep.subr.mxu1 %v8500_v31  ;;  %v11328_v38 = vld [vmem:[%s12835_s3 + $0x8] sm:$0xff]  ;;  %v12873_v45 = vmax.f32 %v11236_v46, %v11282_v5 }
 0x23c   :  { %v11291_v62 = vmax.f32 %v12869_v14, %v6908_v21  ;;  %8844 = vmatpush3.msra.mxu1 %v8500_v31  ;;  %v9614_v31 = vld [vmem:[%s12834_s0 + $0xba4] ss:$8 sps:$4 sm:$0xff]  }
 0x23d   :  { %v11293_v54 = vpop.f32.mrf.mxu0  ;;  %v4223_v56 = vpop.f32.mrf.mxu1  ;;  %8851 = vmatprep.subr.mxu1 %v11328_v38 }
 0x23e   :  { %12870 = vst [vmem:[#allocation19_spill] sm:$0xff] %v11291_v62  ;;  %v6909_v2 = vmax.f32 %v4207_v29, %v4223_v56 }
 0x23f   :  { %v3289_v58 = vpop.f32.mrf.mxu0  ;;  %v4225_v13 = vpop.f32.mrf.mxu1 }
 0x240   :  { %v11315_v21 = vmax.f32 %v12871_v8, %v6909_v2  ;;  %v9611_v2 = vld [vmem:[%s12834_s0 + $0xb90] ss:$8 sps:$4 sm:$0xff]  }
 0x241   :  { %v11317_v29 = vpop.f32.mrf.mxu0  ;;  %3483 = vmatmul.mubr.bf16.gmra.mxu0 %v9604_v60  ;;  %v11319_v15 = vpop.f32.mrf.mxu1  ;;  %4419 = vmatmul.mubr.bf16.gmra.mxu1 %v9605_v41  ;;  %v9610_v41 = vld [vmem:[%s12834_s0 + $0x440] ss:$8 sps:$4 sm:$0xff]  }
 0x242   :  { %12872 = vst [vmem:[#allocation20_spill] sm:$0xff] %v11315_v21  ;;  %8367 = vmatprep.mubr.msk.bf16.mxu0 %vm2309_vm0, %v9606_v33  ;;  %8484 = vmatprep.mubr.msk.bf16.mxu1 %vm2309_vm0, %v9608_v4  ;;  %v9612_v4 = vld [vmem:[%s12834_s0 + $0x454] ss:$8 sps:$4 sm:$0xff]  }
 0x243   :  { %v3294_v14 = vpop.f32.mrf.mxu0  ;;  %v4230_v56 = vpop.f32.mrf.mxu1 }
 0x245   :  { %v11330_v57 = vpop.f32.mrf.mxu0  ;;  %v11332_v60 = vpop.f32.mrf.mxu1 }
 0x247   :  { %v3297_v58 = vpop.f32.mrf.mxu0  ;;  %v4233_v13 = vpop.f32.mrf.mxu1 }
 0x249   :  { %v3300_v8 = vpop.f32.mrf.mxu0  ;;  %3491 = vmatmul.mubr.bf16.gmra.mxu0 %v9610_v41  ;;  %v11349_v14 = vpop.f32.mrf.mxu1  ;;  %4427 = vmatmul.mubr.bf16.gmra.mxu1 %v9611_v2  ;;  %v9617_v41 = vld [vmem:[%s12834_s0 + $0xba0] ss:$8 sps:$4 sm:$0xff]   ;;  %v9618_v2 = vld [vmem:[%s12834_s0 + $0x464] ss:$8 sps:$4 sm:$0xff]  }
 0x24a   :  { %8368 = vmatprep.mubr.msk.bf16.mxu0 %vm2309_vm0, %v9612_v4  ;;  %8485 = vmatprep.mubr.msk.bf16.mxu1 %vm2309_vm0, %v9614_v31  ;;  %v9620_v4 = vld [vmem:[%s12834_s0 + $0xbb4] ss:$8 sps:$4 sm:$0xff]  }
 0x24b   :  { %v3302_v56 = vpop.f32.mrf.mxu0  ;;  %v4238_v33 = vpop.f32.mrf.mxu1 }
 0x24d   :  { %v3303_v34 = vpop.f32.mrf.mxu0  ;;  %v11353_v28 = vpop.f32.mrf.mxu1 }
 0x24f   :  { %v3305_v33 = vpop.f32.mrf.mxu0  ;;  %v4241_v31 = vpop.f32.mrf.mxu1 }
 0x250   :  { %v9622_v33 = vld [vmem:[%s12834_s0 + $0x460] ss:$8 sps:$4 sm:$0xff]  }
 0x251   :  { %v3308_v58 = vpop.f32.mrf.mxu0  ;;  %3499 = vmatmul.mubr.bf16.gmra.mxu0 %v9616_v37  ;;  %v11367_v13 = vpop.f32.mrf.mxu1  ;;  %4435 = vmatmul.mubr.bf16.gmra.mxu1 %v9617_v41  ;;  %v9623_v37 = vld [vmem:[%s12834_s0 + $0xbb0] ss:$8 sps:$4 sm:$0xff]  }
 0x252   :  { %8369 = vmatprep.mubr.msk.bf16.mxu0 %vm2309_vm0, %v9618_v2  ;;  %8486 = vmatprep.mubr.msk.bf16.mxu1 %vm2309_vm0, %v9620_v4  ;;  %v9624_v2 = vld [vmem:[%s12834_s0 + $0x474] ss:$8 sps:$4 sm:$0xff]  }
 0x253   :  { %v3310_v21 = vpop.f32.mrf.mxu0  ;;  %v4246_v62 = vpop.f32.mrf.mxu1 }
 0x254   :  { %v9626_v62 = vld [vmem:[%s12834_s0 + $0xbc4] ss:$8 sps:$4 sm:$0xff]  }
 0x255   :  { %v3311_v30 = vpop.f32.mrf.mxu0  ;;  %v11373_v23 = vpop.f32.mrf.mxu1 }
 0x257   :  { %v3313_v21 = vpop.f32.mrf.mxu0  ;;  %v4249_v4 = vpop.f32.mrf.mxu1 }
 0x259   :  { %v3316_v31 = vpop.f32.mrf.mxu0  ;;  %3507 = vmatmul.mubr.bf16.gmra.mxu0 %v9622_v33  ;;  %v11389_v56 = vpop.f32.mrf.mxu1  ;;  %4443 = vmatmul.mubr.bf16.gmra.mxu1 %v9623_v37  ;;  %v9629_v37 = vld [vmem:[%s12834_s0 + $0xbc0] ss:$8 sps:$4 sm:$0xff]  }
 0x25a   :  { %v5170_v22 = vmax.f32 %v3300_v8, %v3316_v31  ;;  %8370 = vmatprep.mubr.msk.bf16.mxu0 %vm2309_vm0, %v9624_v2  ;;  %8487 = vmatprep.mubr.msk.bf16.mxu1 %vm2309_vm0, %v9626_v62  ;;  %v9628_v8 = vld [vmem:[%s12834_s0 + $0x470] ss:$8 sps:$4 sm:$0xff]  }
 0x25b   :  { %v3318_v41 = vpop.f32.mrf.mxu0  ;;  %v4254_v61 = vpop.f32.mrf.mxu1 }
 0x25c   :  { %v11398_v21 = vmax.f32 %v12873_v45, %v5170_v22  ;;  %v9630_v45 = vld [vmem:[%s12834_s0 + $0x484] ss:$8 sps:$4 sm:$0xff]   ;;  %v9632_v22 = vld [vmem:[%s12834_s0 + $0xbd4] ss:$8 sps:$4 sm:$0xff]   ;;  %v12874_v41 = vmax.f32 %v11240_v43, %v11293_v54  ;;  %v9634_v54 = vld [vmem:[%s12834_s0 + $0x480] ss:$8 sps:$4 sm:$0xff]  }
 0x25d   :  { %v3319_v4 = vpop.f32.mrf.mxu0  ;;  %v11400_v33 = vpop.f32.mrf.mxu1 }
 0x25e   :  { %v5171_v2 = vmax.f32 %v3303_v34, %v3319_v4 }
 0x25f   :  { %v3321_v46 = vpop.f32.mrf.mxu0  ;;  %v4257_v5 = vpop.f32.mrf.mxu1 }
 0x260   :  { %v11419_v62 = vmax.f32 %v12874_v41, %v5171_v2  ;;  %v12875_v46 = vmax.f32 %v11254_v27, %v11317_v29  ;;  %v9638_v27 = vld [vmem:[%s12834_s0 + $0xbe4] ss:$8 sps:$4 sm:$0xff]   ;;  %v12876_v2 = vmax.f32 %v11263_v16, %v11330_v57  ;;  %v9640_v16 = vld [vmem:[%s12834_s0 + $0x490] ss:$8 sps:$4 sm:$0xff]   ;;  %v9641_v57 = vld [vmem:[%s12834_s0 + $0xbe0] ss:$8 sps:$4 sm:$0xff]  }
 0x261   :  { %v3324_v31 = vpop.f32.mrf.mxu0  ;;  %3515 = vmatmul.mubr.bf16.gmra.mxu0 %v9628_v8  ;;  %v4260_v34 = vpop.f32.mrf.mxu1  ;;  %4451 = vmatmul.mubr.bf16.gmra.mxu1 %v9629_v37 }
 0x262   :  { %v5172_v4 = vmax.f32 %v3308_v58, %v3324_v31  ;;  %8371 = vmatprep.mubr.msk.bf16.mxu0 %vm2309_vm0, %v9630_v45  ;;  %8488 = vmatprep.mubr.msk.bf16.mxu1 %vm2309_vm0, %v9632_v22  ;;  %v9635_v58 = vld [vmem:[%s12834_s0 + $0xbd0] ss:$8 sps:$4 sm:$0xff]  }
 0x263   :  { %v3326_v61 = vpop.f32.mrf.mxu0  ;;  %v4262_v49 = vpop.f32.mrf.mxu1 }
 0x264   :  { %v11426_v5 = vmax.f32 %v12875_v46, %v5172_v4  ;;  %v9636_v49 = vld [vmem:[%s12834_s0 + $0x494] ss:$8 sps:$4 sm:$0xff]   ;;  %v9642_v4 = vld [vmem:[%s12834_s0 + $0x4a4] ss:$8 sps:$4 sm:$0xff]  }
 0x265   :  { %v3327_v1 = vpop.f32.mrf.mxu0  ;;  %v4263_v43 = vpop.f32.mrf.mxu1  ;;  %v9644_v46 = vld [vmem:[%s12834_s0 + $0xbf4] ss:$8 sps:$4 sm:$0xff]  }
 0x266   :  { %v5173_v8 = vmax.f32 %v3311_v30, %v3327_v1 }
 0x267   :  { %v3329_v29 = vpop.f32.mrf.mxu0  ;;  %v4265_v37 = vpop.f32.mrf.mxu1 }
 0x268   :  { %v11443_v61 = vmax.f32 %v12876_v2, %v5173_v8  ;;  %v12877_v2 = vmax.f32 %v11319_v15, %v11367_v13  ;;  %v9650_v15 = vld [vmem:[%s12834_s0 + $0xc04] ss:$8 sps:$4 sm:$0xff]  }
 0x269   :  { %v11445_v45 = vpop.f32.mrf.mxu0  ;;  %3523 = vmatmul.mubr.bf16.gmra.mxu0 %v9634_v54  ;;  %v4268_v22 = vpop.f32.mrf.mxu1  ;;  %4459 = vmatmul.mubr.bf16.gmra.mxu1 %v9635_v58 }
 0x26a   :  { %8372 = vmatprep.mubr.msk.bf16.mxu0 %vm2309_vm0, %v9636_v49  ;;  %8489 = vmatprep.mubr.msk.bf16.mxu1 %vm2309_vm0, %v9638_v27 }
 0x26b   :  { %v3334_v1 = vpop.f32.mrf.mxu0  ;;  %v4270_v30 = vpop.f32.mrf.mxu1 }
 0x26d   :  { %v11449_v41 = vpop.f32.mrf.mxu0  ;;  %v4271_v31 = vpop.f32.mrf.mxu1 }
 0x26f   :  { %v3337_v54 = vpop.f32.mrf.mxu0  ;;  %v4273_v58 = vpop.f32.mrf.mxu1 }
 0x270   :  { %v12879_v58 = vmax.f32 %v11332_v60, %v11373_v23  ;;  %v12881_v23 = vmax.f32 %v11349_v14, %v11389_v56  ;;  %v9654_v14 = vld [vmem:[%s12834_s0 + $0x4c4] ss:$8 sps:$4 sm:$0xff]   ;;  %v9656_v56 = vld [vmem:[%s12834_s0 + $0xc14] ss:$8 sps:$4 sm:$0xff]  }
 0x271   :  { %v11463_v8 = vpop.f32.mrf.mxu0  ;;  %3531 = vmatmul.mubr.bf16.gmra.mxu0 %v9640_v16  ;;  %v4276_v49 = vpop.f32.mrf.mxu1  ;;  %4467 = vmatmul.mubr.bf16.gmra.mxu1 %v9641_v57  ;;  %v9646_v16 = vld [vmem:[%s12834_s0 + $0x4a0] ss:$8 sps:$4 sm:$0xff]  }
 0x272   :  { %v7030_v27 = vmax.f32 %v4260_v34, %v4276_v49  ;;  %8373 = vmatprep.mubr.msk.bf16.mxu0 %vm2309_vm0, %v9642_v4  ;;  %8490 = vmatprep.mubr.msk.bf16.mxu1 %vm2309_vm0, %v9644_v46  ;;  %v9647_v34 = vld [vmem:[%s12834_s0 + $0xbf0] ss:$8 sps:$4 sm:$0xff]   ;;  %v9648_v4 = vld [vmem:[%s12834_s0 + $0x4b4] ss:$8 sps:$4 sm:$0xff]  }
 0x273   :  { %v3342_v29 = vpop.f32.mrf.mxu0  ;;  %v4278_v37 = vpop.f32.mrf.mxu1 }
 0x274   :  { %v11470_v1 = vmax.f32 %v12877_v2, %v7030_v27 }
 0x275   :  { %v11472_v30 = vpop.f32.mrf.mxu0  ;;  %v4279_v54 = vpop.f32.mrf.mxu1 }
 0x276   :  { %12878 = vst [vmem:[#allocation21_spill] sm:$0xff] %v11470_v1  ;;  %v7031_v57 = vmax.f32 %v4263_v43, %v4279_v54 }
 0x277   :  { %v3345_v13 = vpop.f32.mrf.mxu0  ;;  %v4281_v46 = vpop.f32.mrf.mxu1 }
 0x278   :  { %v11489_v49 = vmax.f32 %v12879_v58, %v7031_v57  ;;  %v12883_v58 = vmax.f32 %v11353_v28, %v11400_v33  ;;  %v9658_v33 = vld [vmem:[%s12834_s0 + $0x4c0] ss:$8 sps:$4 sm:$0xff]  }
 0x279   :  { %v11491_v27 = vpop.f32.mrf.mxu0  ;;  %3539 = vmatmul.mubr.bf16.gmra.mxu0 %v9646_v16  ;;  %v4284_v29 = vpop.f32.mrf.mxu1  ;;  %4475 = vmatmul.mubr.bf16.gmra.mxu1 %v9647_v34  ;;  %v9652_v34 = vld [vmem:[%s12834_s0 + $0x4b0] ss:$8 sps:$4 sm:$0xff]  }
 0x27a   :  { %12880 = vst [vmem:[#allocation22_spill] sm:$0xff] %v11489_v49  ;;  %v7032_v37 = vmax.f32 %v4268_v22, %v4284_v29  ;;  %8374 = vmatprep.mubr.msk.bf16.mxu0 %vm2309_vm0, %v9648_v4  ;;  %8491 = vmatprep.mubr.msk.bf16.mxu1 %vm2309_vm0, %v9650_v15  ;;  %v9653_v22 = vld [vmem:[%s12834_s0 + $0xc00] ss:$8 sps:$4 sm:$0xff]   ;;  %v9664_v4 = vld [vmem:[%s12834_s0 + $0x4d0] ss:$8 sps:$4 sm:$0xff]   ;;  %v12885_v32 = vmax.f32 %v11445_v45, %v11491_v27 }
 0x27b   :  { %v3350_v2 = vpop.f32.mrf.mxu0  ;;  %v4286_v54 = vpop.f32.mrf.mxu1  ;;  %v9680_v45 = vld [vmem:[%s12834_s0 + $0xc54] ss:$8 sps:$4 sm:$0xff]  }
 0x27c   :  { %v11500_v60 = vmax.f32 %v12881_v23, %v7032_v37 }
 0x27d   :  { %v11502_v57 = vpop.f32.mrf.mxu0  ;;  %v4287_v16 = vpop.f32.mrf.mxu1 }
 0x27e   :  { %12882 = vst [vmem:[#allocation23_spill] sm:$0xff] %v11500_v60  ;;  %v7033_v15 = vmax.f32 %v4271_v31, %v4287_v16 }
 0x27f   :  { %v3353_v13 = vpop.f32.mrf.mxu0  ;;  %v4289_v46 = vpop.f32.mrf.mxu1 }
 0x280   :  { %v11521_v29 = vmax.f32 %v12883_v58, %v7033_v15  ;;  %v9660_v15 = vld [vmem:[%s12834_s0 + $0x4d4] ss:$8 sps:$4 sm:$0xff]  }
 0x281   :  { %v11523_v37 = vpop.f32.mrf.mxu0  ;;  %3547 = vmatmul.mubr.bf16.gmra.mxu0 %v9652_v34  ;;  %v11525_v2 = vpop.f32.mrf.mxu1  ;;  %4483 = vmatmul.mubr.bf16.gmra.mxu1 %v9653_v22  ;;  %v9659_v34 = vld [vmem:[%s12834_s0 + $0xc10] ss:$8 sps:$4 sm:$0xff]  }
 0x282   :  { %12884 = vst [vmem:[#allocation24_spill] sm:$0xff] %v11521_v29  ;;  %8375 = vmatprep.mubr.msk.bf16.mxu0 %vm2309_vm0, %v9654_v14  ;;  %8492 = vmatprep.mubr.msk.bf16.mxu1 %vm2309_vm0, %v9656_v56  ;;  %v9662_v14 = vld [vmem:[%s12834_s0 + $0xc24] ss:$8 sps:$4 sm:$0xff]  }
 0x283   :  { %v3358_v54 = vpop.f32.mrf.mxu0  ;;  %v4294_v23 = vpop.f32.mrf.mxu1 }
 0x285   :  { %v11531_v16 = vpop.f32.mrf.mxu0  ;;  %v11533_v28 = vpop.f32.mrf.mxu1 }
 0x287   :  { %v3361_v56 = vpop.f32.mrf.mxu0  ;;  %v4297_v13 = vpop.f32.mrf.mxu1 }
 0x289   :  { %v3364_v46 = vpop.f32.mrf.mxu0  ;;  %3555 = vmatmul.mubr.bf16.gmra.mxu0 %v9658_v33  ;;  %v11549_v58 = vpop.f32.mrf.mxu1  ;;  %4491 = vmatmul.mubr.bf16.gmra.mxu1 %v9659_v34  ;;  %v9665_v33 = vld [vmem:[%s12834_s0 + $0xc20] ss:$8 sps:$4 sm:$0xff]   ;;  %v9666_v34 = vld [vmem:[%s12834_s0 + $0x4e4] ss:$8 sps:$4 sm:$0xff]  }
 0x28a   :  { %8376 = vmatprep.mubr.msk.bf16.mxu0 %vm2309_vm0, %v9660_v15  ;;  %8493 = vmatprep.mubr.msk.bf16.mxu1 %vm2309_vm0, %v9662_v14  ;;  %v9668_v15 = vld [vmem:[%s12834_s0 + $0xc34] ss:$8 sps:$4 sm:$0xff]  }
 0x28b   :  { %v3366_v54 = vpop.f32.mrf.mxu0  ;;  %v4302_v23 = vpop.f32.mrf.mxu1 }
 0x28d   :  { %v3367_v22 = vpop.f32.mrf.mxu0  ;;  %v11553_v31 = vpop.f32.mrf.mxu1 }
 0x28f   :  { %v3369_v14 = vpop.f32.mrf.mxu0  ;;  %v4305_v56 = vpop.f32.mrf.mxu1 }
 0x290   :  { %v9670_v14 = vld [vmem:[%s12834_s0 + $0x4e0] ss:$8 sps:$4 sm:$0xff]  }
 0x291   :  { %v3372_v13 = vpop.f32.mrf.mxu0  ;;  %3563 = vmatmul.mubr.bf16.gmra.mxu0 %v9664_v4  ;;  %v11567_v54 = vpop.f32.mrf.mxu1  ;;  %4499 = vmatmul.mubr.bf16.gmra.mxu1 %v9665_v33  ;;  %v9671_v4 = vld [vmem:[%s12834_s0 + $0xc30] ss:$8 sps:$4 sm:$0xff]  }
 0x292   :  { %8377 = vmatprep.mubr.msk.bf16.mxu0 %vm2309_vm0, %v9666_v34  ;;  %8494 = vmatprep.mubr.msk.bf16.mxu1 %vm2309_vm0, %v9668_v15  ;;  %v9672_v34 = vld [vmem:[%s12834_s0 + $0x4f4] ss:$8 sps:$4 sm:$0xff]  }
 0x293   :  { %v3374_v43 = vpop.f32.mrf.mxu0  ;;  %v4310_v29 = vpop.f32.mrf.mxu1 }
 0x294   :  { %v9674_v43 = vld [vmem:[%s12834_s0 + $0xc44] ss:$8 sps:$4 sm:$0xff]  }
 0x295   :  { %v3375_v60 = vpop.f32.mrf.mxu0  ;;  %v11573_v49 = vpop.f32.mrf.mxu1 }
 0x297   :  { %v3377_v29 = vpop.f32.mrf.mxu0  ;;  %v4313_v15 = vpop.f32.mrf.mxu1 }
 0x299   :  { %v3380_v56 = vpop.f32.mrf.mxu0  ;;  %3571 = vmatmul.mubr.bf16.gmra.mxu0 %v9670_v14  ;;  %v11589_v23 = vpop.f32.mrf.mxu1  ;;  %4507 = vmatmul.mubr.bf16.gmra.mxu1 %v9671_v4  ;;  %v9677_v4 = vld [vmem:[%s12834_s0 + $0xc40] ss:$8 sps:$4 sm:$0xff]  }
 0x29a   :  { %v5294_v1 = vmax.f32 %v3364_v46, %v3380_v56  ;;  %8378 = vmatprep.mubr.msk.bf16.mxu0 %vm2309_vm0, %v9672_v34  ;;  %8495 = vmatprep.mubr.msk.bf16.mxu1 %vm2309_vm0, %v9674_v43  ;;  %v9676_v46 = vld [vmem:[%s12834_s0 + $0x4f0] ss:$8 sps:$4 sm:$0xff]  }
 0x29b   :  { %v3382_v33 = vpop.f32.mrf.mxu0  ;;  %v4318_v52 = vpop.f32.mrf.mxu1 }
 0x29c   :  { %v11598_v29 = vmax.f32 %v12885_v32, %v5294_v1  ;;  %v9678_v32 = vld [vmem:[%s12834_s0 + $0x504] ss:$8 sps:$4 sm:$0xff]   ;;  %v12886_v33 = vmax.f32 %v11449_v41, %v11502_v57  ;;  %v9682_v57 = vld [vmem:[%s12834_s0 + $0x500] ss:$8 sps:$4 sm:$0xff]  }
 0x29d   :  { %v3383_v15 = vpop.f32.mrf.mxu0  ;;  %v11600_v14 = vpop.f32.mrf.mxu1 }
 0x29e   :  { %v5295_v34 = vmax.f32 %v3367_v22, %v3383_v15 }
 0x29f   :  { %v3385_v1 = vpop.f32.mrf.mxu0  ;;  %v4321_v27 = vpop.f32.mrf.mxu1 }
 0x2a0   :  { %v11619_v43 = vmax.f32 %v12886_v33, %v5295_v34  ;;  %v12887_v1 = vmax.f32 %v11463_v8, %v11523_v37  ;;  %v9686_v8 = vld [vmem:[%s12834_s0 + $0xc64] ss:$8 sps:$4 sm:$0xff]   ;;  %v12888_v34 = vmax.f32 %v11472_v30, %v11531_v16  ;;  %v9688_v30 = vld [vmem:[%s12834_s0 + $0x510] ss:$8 sps:$4 sm:$0xff]   ;;  %v9689_v16 = vld [vmem:[%s12834_s0 + $0xc60] ss:$8 sps:$4 sm:$0xff]  }
 0x2a1   :  { %v3388_v56 = vpop.f32.mrf.mxu0  ;;  %3579 = vmatmul.mubr.bf16.gmra.mxu0 %v9676_v46  ;;  %v4324_v22 = vpop.f32.mrf.mxu1  ;;  %4515 = vmatmul.mubr.bf16.gmra.mxu1 %v9677_v4 }
 0x2a2   :  { %v5296_v15 = vmax.f32 %v3372_v13, %v3388_v56  ;;  %8379 = vmatprep.mubr.msk.bf16.mxu0 %vm2309_vm0, %v9678_v32  ;;  %8496 = vmatprep.mubr.msk.bf16.mxu1 %vm2309_vm0, %v9680_v45  ;;  %v9683_v13 = vld [vmem:[%s12834_s0 + $0xc50] ss:$8 sps:$4 sm:$0xff]  }
 0x2a3   :  { %v3390_v52 = vpop.f32.mrf.mxu0  ;;  %v4326_v36 = vpop.f32.mrf.mxu1 }
 0x2a4   :  { %v11626_v27 = vmax.f32 %v12887_v1, %v5296_v15  ;;  %v9684_v36 = vld [vmem:[%s12834_s0 + $0x514] ss:$8 sps:$4 sm:$0xff]   ;;  %v9690_v15 = vld [vmem:[%s12834_s0 + $0x524] ss:$8 sps:$4 sm:$0xff]  }
 0x2a5   :  { %v3391_v12 = vpop.f32.mrf.mxu0  ;;  %v4327_v41 = vpop.f32.mrf.mxu1  ;;  %v9692_v1 = vld [vmem:[%s12834_s0 + $0xc74] ss:$8 sps:$4 sm:$0xff]  }
 0x2a6   :  { %v5297_v46 = vmax.f32 %v3375_v60, %v3391_v12 }
 0x2a7   :  { %v3393_v37 = vpop.f32.mrf.mxu0  ;;  %v4329_v4 = vpop.f32.mrf.mxu1 }
 0x2a8   :  { %v11643_v52 = vmax.f32 %v12888_v34, %v5297_v46  ;;  %v11670_v37 = vld [vmem:[%s12836_s2] ss:$0 sm:$0xff] }
 0x2a9   :  { %v11645_v32 = vpop.f32.mrf.mxu0  ;;  %3587 = vmatmul.mubr.bf16.gmra.mxu0 %v9682_v57  ;;  %v4332_v45 = vpop.f32.mrf.mxu1  ;;  %4523 = vmatmul.mubr.bf16.gmra.mxu1 %v9683_v13 }
 0x2aa   :  { %8380 = vmatprep.mubr.msk.bf16.mxu0 %vm2309_vm0, %v9684_v36  ;;  %8497 = vmatprep.mubr.msk.bf16.mxu1 %vm2309_vm0, %v9686_v8 }
 0x2ab   :  { %v3398_v12 = vpop.f32.mrf.mxu0  ;;  %v4334_v60 = vpop.f32.mrf.mxu1 }
 0x2ac   :  { %v4588_v12 = vadd.f32 %v11670_v37, %v10589_v35  ;;  %v12889_v60 = vmax.f32 %v11525_v2, %v11567_v54  ;;  %v9696_v35 = vld [vmem:[%s12834_s0 + $0x534] ss:$8 sps:$4 sm:$0xff]  }
 0x2ad   :  { %v11649_v33 = vpop.f32.mrf.mxu0  ;;  %v4335_v56 = vpop.f32.mrf.mxu1 }
 0x2ae   :  { %v4592_v54 = vmax.f32 %v4588_v12, 0.0 }
 0x2af   :  { %v3401_v57 = vpop.f32.mrf.mxu0  ;;  %v4337_v13 = vpop.f32.mrf.mxu1 }
 0x2b1   :  { %v11663_v46 = vpop.f32.mrf.mxu0  ;;  %3595 = vmatmul.mubr.bf16.gmra.mxu0 %v9688_v30  ;;  %v4340_v36 = vpop.f32.mrf.mxu1  ;;  %4531 = vmatmul.mubr.bf16.gmra.mxu1 %v9689_v16 }
 0x2b2   :  { %v7154_v8 = vmax.f32 %v4324_v22, %v4340_v36  ;;  %8381 = vmatprep.mubr.msk.bf16.mxu0 %vm2309_vm0, %v9690_v15  ;;  %8498 = vmatprep.mubr.msk.bf16.mxu1 %vm2309_vm0, %v9692_v1  ;;  %v9694_v15 = vld [vmem:[%s12834_s0 + $0x520] ss:$8 sps:$4 sm:$0xff]   ;;  %v9695_v1 = vld [vmem:[%s12834_s0 + $0xc70] ss:$8 sps:$4 sm:$0xff]   ;;  %v12890_v36 = vmax.f32 %v11533_v28, %v11573_v49  ;;  %v4590_v49 = vadd.f32 %v11670_v37, %v10617_v48  ;;  %v9699_v48 = vld [vmem:[%s12834_s0 + $0x544] ss:$8 sps:$4 sm:$0xff]  }
 0x2b3   :  { %v3406_v4 = vpop.f32.mrf.mxu0  ;;  %v4342_v34 = vpop.f32.mrf.mxu1  ;;  %v12891_v28 = vmax.f32 %v11549_v58, %v11589_v23  ;;  %v4566_v58 = vadd.f32 %v11670_v37, %v10389_v25  ;;  %v8511_v25 = vld [vmem:[%s12835_s3 + $0x28] sm:$0xff] }
 0x2b4   :  { %v11677_v30 = vmax.f32 %v12889_v60, %v7154_v8  ;;  %v4594_v23 = vmax.f32 %v4590_v49, 0.0  ;;  %v4568_v49 = vadd.f32 %v11670_v37, %v10417_v47 }
 0x2b5   :  { %v11679_v22 = vpop.f32.mrf.mxu0  ;;  %v4343_v16 = vpop.f32.mrf.mxu1 }
 0x2b6   :  { %v7155_v57 = vmax.f32 %v4327_v41, %v4343_v16  ;;  %v4589_v41 = vadd.f32 %v11670_v37, %v10610_v50  ;;  %v4591_v50 = vadd.f32 %v11670_v37, %v10634_v18 }
 0x2b7   :  { %v3409_v13 = vpop.f32.mrf.mxu0  ;;  %v4345_v2 = vpop.f32.mrf.mxu1 }
 0x2b8   :  { %v11693_v8 = vmax.f32 %v12890_v36, %v7155_v57  ;;  %v4593_v13 = vmax.f32 %v4589_v41, 0.0  ;;  %v12892_v36 = vmax.f32 %v11553_v31, %v11600_v14  ;;  %v4567_v31 = vadd.f32 %v11670_v37, %v10410_v39  ;;  %v9701_v39 = vld [vmem:[%s12834_s0 + $0x540] ss:$8 sps:$4 sm:$0xff]  }
 0x2b9   :  { %v11695_v4 = vpop.f32.mrf.mxu0  ;;  %3603 = vmatmul.mubr.bf16.gmra.mxu0 %v9694_v15  ;;  %v4348_v34 = vpop.f32.mrf.mxu1  ;;  %4539 = vmatmul.mubr.bf16.gmra.mxu1 %v9695_v1  ;;  %v9698_v1 = vld [vmem:[%s12834_s0 + $0x530] ss:$8 sps:$4 sm:$0xff]   ;;  %v4595_v14 = vmax.f32 %v4591_v50, 0.0  ;;  %v4572_v50 = vmax.f32 %v4568_v49, 0.0 }
 0x2ba   :  { %v7156_v60 = vmax.f32 %v4332_v45, %v4348_v34  ;;  %8845 = vmatprep.mubr.msk.f32.mxu1 %vm4599_vm2, %v4592_v54  ;;  %8382 = vmatprep.mubr.msk.bf16.mxu0 %vm2309_vm0, %v9696_v35 }
 0x2bb   :  { %v3414_v16 = vpop.f32.mrf.mxu0  ;;  %v4350_v12 = vpop.f32.mrf.mxu1 }
 0x2bc   :  { %v11706_v57 = vmax.f32 %v12891_v28, %v7156_v60  ;;  %v4570_v12 = vmax.f32 %v4566_v58, 0.0 }
 0x2bd   :  { %v11708_v15 = vpop.f32.mrf.mxu0  ;;  %v4351_v45 = vpop.f32.mrf.mxu1 }
 0x2be   :  { %v7157_v35 = vmax.f32 %v4335_v56, %v4351_v45  ;;  %v4574_v56 = vld [vmem:[%s12835_s3] sm:$0xff]  ;;  %v4571_v45 = vmax.f32 %v4567_v31, 0.0 }
 0x2bf   :  { %v3417_v2 = vpop.f32.mrf.mxu0  ;;  %v4353_v54 = vpop.f32.mrf.mxu1 }
 0x2c0   :  { %v11723_v34 = vmax.f32 %v12892_v36, %v7157_v35  ;;  %v4806_v2 = vadd.f32 %v11670_v37, %v10789_v20  ;;  %v8510_v54 = vld [vmem:[%s12835_s3 + $0x20] sm:$0xff]  ;;  %v4807_v20 = vadd.f32 %v11670_v37, %v10810_v42  ;;  %v9704_v42 = vld [vmem:[%s12834_s0 + $0x550] ss:$8 sps:$4 sm:$0xff]  }
 0x2c1   :  { %v11728_v18 = vpop.f32.mrf.mxu0  ;;  %3611 = vmatmul.mubr.bf16.gmra.mxu0 %v9698_v1  ;;  %v11730_v60 = vpop.f32.mrf.mxu1  ;;  %8846 = vmatmul.mubr.msk.f32.vlgmr.msra.gmra.mxu1 %vm4599_vm2, %v4593_v13  ;;  %v4569_v1 = vadd.f32 %v11670_v37, %v10434_v53  ;;  %v9702_v13 = vld [vmem:[%s12834_s0 + $0x554] ss:$8 sps:$4 sm:$0xff]  }
 0x2c2   :  { %8848 = vmatprep.mubr.msk.f32.mxu1 %vm4599_vm2, %v4594_v23  ;;  %8852 = vmatpush3.msra.mxu1 %v11328_v38  ;;  %v8517_v53 = vld [vmem:[%s12835_s3 + $0x38] sm:$0xff]  ;;  %v4810_v31 = vmax.f32 %v4806_v2, 0.0  ;;  %v4931_v2 = vadd.f32 %v11670_v37, %v11010_v26  ;;  %v9707_v26 = vld [vmem:[%s12834_s0 + $0x560] ss:$8 sps:$4 sm:$0xff]  }
 0x2c3   :  { %v3422_v41 = vpop.f32.mrf.mxu0  ;;  %v4358_v16 = vpop.f32.mrf.mxu1  ;;  %8853 = vmatprep.subr.mxu1 %v4574_v56  ;;  %8383 = vmatprep.mubr.msk.bf16.mxu0 %vm2309_vm0, %v9699_v48  ;;  %v4573_v23 = vmax.f32 %v4569_v1, 0.0  ;;  %v4930_v1 = vadd.f32 %v11670_v37, %v10989_v59  ;;  %v8523_v59 = vld [vmem:[%s12835_s3 + $0x48] sm:$0xff] }
 0x2c4   :  { %8854 = vmatpush3.msra.mxu1 %v4574_v56  ;;  %v4811_v16 = vmax.f32 %v4807_v20, 0.0 }
 0x2c5   :  { %v11743_v28 = vpop.f32.mrf.mxu0  ;;  %v11745_v38 = vpop.f32.mrf.mxu1  ;;  %8849 = vmatmul.mubr.msk.f32.gmra.mxu1 %vm4599_vm2, %v4595_v14  ;;  %8861 = vmatprep.subr.mxu1 %v8511_v25  ;;  %v4808_v14 = vadd.f32 %v11670_v37, %v10817_v9  ;;  %v4934_v20 = vmax.f32 %v4930_v1, 0.0 }
 0x2c6   :  { %8855 = vmatprep.mubr.msk.f32.mxu1 %vm4599_vm2, %v4570_v12  ;;  %v4809_v12 = vadd.f32 %v11670_v37, %v10834_v19 }
 0x2c7   :  { %v3425_v35 = vpop.f32.mrf.mxu0  ;;  %v4361_v47 = vpop.f32.mrf.mxu1 }
 0x2c8   :  { %v8516_v35 = vld [vmem:[%s12835_s3 + $0x30] sm:$0xff] }
 0x2c9   :  { %v11762_v48 = vpop.f32.mrf.mxu0  ;;  %3619 = vmatmul.mubr.bf16.gmra.mxu0 %v9701_v39  ;;  %v11764_v58 = vpop.f32.mrf.mxu1  ;;  %8856 = vmatmul.mubr.msk.f32.vlgmr.msra.gmra.mxu1 %vm4599_vm2, %v4571_v45  ;;  %v9705_v39 = vld [vmem:[%s12834_s0 + $0x564] ss:$8 sps:$4 sm:$0xff]   ;;  %v4812_v45 = vmax.f32 %v4808_v14, 0.0  ;;  %v4935_v14 = vmax.f32 %v4931_v2, 0.0 }
 0x2ca   :  { %8858 = vmatprep.mubr.msk.f32.mxu1 %vm4599_vm2, %v4572_v50  ;;  %8862 = vmatpush3.msra.mxu1 %v8511_v25  ;;  %v4813_v50 = vmax.f32 %v4809_v12, 0.0  ;;  %v9708_v12 = vld [vmem:[%s12834_s0 + $0x574] ss:$8 sps:$4 sm:$0xff]  }
 0x2cb   :  { %v3430_v36 = vpop.f32.mrf.mxu0  ;;  %v4366_v56 = vpop.f32.mrf.mxu1  ;;  %8863 = vmatprep.subr.mxu1 %v8510_v54  ;;  %8384 = vmatprep.mubr.msk.bf16.mxu0 %vm2309_vm0, %v9702_v13 }
 0x2cc   :  { %8864 = vmatpush3.msra.mxu1 %v8510_v54  ;;  %v4932_v36 = vadd.f32 %v11670_v37, %v11017_v10  ;;  %v4933_v10 = vadd.f32 %v11670_v37, %v11034_v44 }
 0x2cd   :  { %v11776_v41 = vpop.f32.mrf.mxu0  ;;  %v11778_v25 = vpop.f32.mrf.mxu1  ;;  %8859 = vmatmul.mubr.msk.f32.gmra.mxu1 %vm4599_vm2, %v4573_v23  ;;  %8871 = vmatprep.subr.mxu1 %v8517_v53 }
 0x2ce   :  { %8865 = vmatprep.mubr.msk.f32.mxu1 %vm4599_vm2, %v4810_v31 }
 0x2cf   :  { %v3433_v49 = vpop.f32.mrf.mxu0  ;;  %v4369_v9 = vpop.f32.mrf.mxu1 }
 0x2d0   :  { %v4936_v49 = vmax.f32 %v4932_v36, 0.0  ;;  %v5054_v9 = vadd.f32 %v11670_v37, %v11189_v6  ;;  %v8529_v6 = vld [vmem:[%s12835_s3 + $0x58] sm:$0xff] }
 0x2d1   :  { %v11795_v47 = vpop.f32.mrf.mxu0  ;;  %3627 = vmatmul.mubr.bf16.gmra.mxu0 %v9704_v42  ;;  %v11797_v13 = vpop.f32.mrf.mxu1  ;;  %8866 = vmatmul.mubr.msk.f32.vlgmr.msra.gmra.mxu1 %vm4599_vm2, %v4811_v16 }
 0x2d2   :  { %v7274_v19 = vmax.f32 %v11730_v60, %v11797_v13  ;;  %8868 = vmatprep.mubr.msk.f32.mxu1 %vm4599_vm2, %v4812_v45  ;;  %8872 = vmatpush3.msra.mxu1 %v8517_v53  ;;  %v9720_v60 = vld [vmem:[%s12834_s0 + $0x5b4] ss:$8 sps:$4 sm:$0xff]  }
 0x2d3   :  { %v3438_v54 = vpop.f32.mrf.mxu0  ;;  %v4374_v23 = vpop.f32.mrf.mxu1  ;;  %8873 = vmatprep.subr.mxu1 %v8516_v35  ;;  %8385 = vmatprep.mubr.msk.bf16.mxu0 %vm2309_vm0, %v9705_v39  ;;  %v8522_v39 = vld [vmem:[%s12835_s3 + $0x40] sm:$0xff] }
 0x2d4   :  { %8874 = vmatpush3.msra.mxu1 %v8516_v35  ;;  %v4937_v35 = vmax.f32 %v4933_v10, 0.0  ;;  %v5058_v23 = vmax.f32 %v5054_v9, 0.0  ;;  %v8528_v9 = vld [vmem:[%s12835_s3 + $0x50] sm:$0xff] }
 0x2d5   :  { %v11811_v56 = vpop.f32.mrf.mxu0  ;;  %v11813_v53 = vpop.f32.mrf.mxu1  ;;  %8869 = vmatmul.mubr.msk.f32.gmra.mxu1 %vm4599_vm2, %v4813_v50  ;;  %8881 = vmatprep.subr.mxu1 %v8523_v59  ;;  %v5055_v50 = vadd.f32 %v11670_v37, %v11210_v7  ;;  %v9710_v7 = vld [vmem:[%s12834_s0 + $0x570] ss:$8 sps:$4 sm:$0xff]  }
 0x2d6   :  { %v7275_v31 = vmax.f32 %v11745_v38, %v11813_v53  ;;  %8875 = vmatprep.mubr.msk.f32.mxu1 %vm4599_vm2, %v4934_v20  ;;  %v5056_v20 = vadd.f32 %v11670_v37, %v11217_v40  ;;  %v5057_v40 = vadd.f32 %v11670_v37, %v11234_v0  ;;  %v8535_v0 = vld [vmem:[%s12835_s3 + $0x68] sm:$0xff] }
 0x2d7   :  { %v3441_v42 = vpop.f32.mrf.mxu0  ;;  %v4377_v16 = vpop.f32.mrf.mxu1 }
 0x2d8   :  { %v9711_v16 = vld [vmem:[%s12834_s0 + $0x584] ss:$8 sps:$4 sm:$0xff]  }
 0x2d9   :  { %v11832_v45 = vpop.f32.mrf.mxu0  ;;  %3635 = vmatmul.mubr.bf16.gmra.mxu0 %v9707_v26  ;;  %v11834_v1 = vpop.f32.mrf.mxu1  ;;  %8876 = vmatmul.mubr.msk.f32.vlgmr.msra.gmra.mxu1 %vm4599_vm2, %v4935_v14  ;;  %v5059_v14 = vmax.f32 %v5055_v50, 0.0  ;;  %v5061_v50 = vmax.f32 %v5057_v40, 0.0  ;;  %v5181_v40 = vadd.f32 %v11670_v37, %v11443_v61 }
 0x2da   :  { %v7276_v44 = vmax.f32 %v11764_v58, %v11834_v1  ;;  %8878 = vmatprep.mubr.msk.f32.mxu1 %vm4599_vm2, %v4936_v49  ;;  %8882 = vmatpush3.msra.mxu1 %v8523_v59  ;;  %v5178_v49 = vadd.f32 %v11670_v37, %v11398_v21  ;;  %v5179_v21 = vadd.f32 %v11670_v37, %v11419_v62  ;;  %v9713_v62 = vld [vmem:[%s12834_s0 + $0x580] ss:$8 sps:$4 sm:$0xff]   ;;  %v9723_v58 = vld [vmem:[%s12834_s0 + $0x5c4] ss:$8 sps:$4 sm:$0xff]  }
 0x2db   :  { %v3446_v2 = vpop.f32.mrf.mxu0  ;;  %v4382_v54 = vpop.f32.mrf.mxu1  ;;  %8883 = vmatprep.subr.mxu1 %v8522_v39  ;;  %8386 = vmatprep.mubr.msk.bf16.mxu0 %vm2309_vm0, %v9708_v12  ;;  %v5060_v12 = vmax.f32 %v5056_v20, 0.0  ;;  %v5180_v20 = vadd.f32 %v11670_v37, %v11426_v5 }
 0x2dc   :  { %8884 = vmatpush3.msra.mxu1 %v8522_v39 }
 0x2dd   :  { %v11848_v36 = vpop.f32.mrf.mxu0  ;;  %v11850_v59 = vpop.f32.mrf.mxu1  ;;  %8879 = vmatmul.mubr.msk.f32.gmra.mxu1 %vm4599_vm2, %v4937_v35  ;;  %8891 = vmatprep.subr.mxu1 %v8529_v6 }
 0x2de   :  { %v7277_v26 = vmax.f32 %v11778_v25, %v11850_v59  ;;  %8885 = vmatprep.mubr.msk.f32.mxu1 %vm4599_vm2, %v5058_v23  ;;  %v5182_v23 = vmax.f32 %v5178_v49, 0.0  ;;  %v5418_v49 = vmax.f32 %v11762_v48, %v11832_v45  ;;  %v5185_v48 = vmax.f32 %v5181_v40, 0.0  ;;  %v9726_v25 = vld [vmem:[%s12834_s0 + $0x5d4] ss:$8 sps:$4 sm:$0xff]  }
 0x2df   :  { %v3449_v10 = vpop.f32.mrf.mxu0  ;;  %v4385_v42 = vpop.f32.mrf.mxu1  ;;  %v5303_v45 = vadd.f32 %v11670_v37, %v11619_v43  ;;  %v5415_v43 = vmax.f32 %v11649_v33, %v11708_v15  ;;  %v5305_v33 = vadd.f32 %v11670_v37, %v11643_v52  ;;  %v5417_v52 = vmax.f32 %v11679_v22, %v11743_v28 }
 0x2e0   :  { %v9714_v42 = vld [vmem:[%s12834_s0 + $0x594] ss:$8 sps:$4 sm:$0xff]  }
 0x2e1   :  { %v11869_v39 = vpop.f32.mrf.mxu0  ;;  %3643 = vmatmul.mubr.bf16.gmra.mxu0 %v9710_v7  ;;  %v11871_v35 = vpop.f32.mrf.mxu1  ;;  %8886 = vmatmul.mubr.msk.f32.vlgmr.msra.gmra.mxu1 %vm4599_vm2, %v5059_v14  ;;  %v5183_v14 = vmax.f32 %v5179_v21, 0.0  ;;  %v5414_v21 = vmax.f32 %v11645_v32, %v11695_v4  ;;  %v5304_v4 = vadd.f32 %v11670_v37, %v11626_v27  ;;  %v5416_v27 = vmax.f32 %v11663_v46, %v11728_v18  ;;  %v8540_v18 = vld [vmem:[%s12835_s3 + $0x70] sm:$0xff] }
 0x2e2   :  { %8888 = vmatprep.mubr.msk.f32.mxu1 %vm4599_vm2, %v5060_v12  ;;  %8892 = vmatpush3.msra.mxu1 %v8529_v6  ;;  %v5302_v12 = vadd.f32 %v11670_v37, %v11598_v29  ;;  %v8541_v29 = vld [vmem:[%s12835_s3 + $0x78] sm:$0xff] }
 0x2e3   :  { %v3454_v2 = vpop.f32.mrf.mxu0  ;;  %v4390_v54 = vpop.f32.mrf.mxu1  ;;  %8893 = vmatprep.subr.mxu1 %v8528_v9  ;;  %8387 = vmatprep.mubr.msk.bf16.mxu0 %vm2309_vm0, %v9711_v16  ;;  %v5184_v16 = vmax.f32 %v5180_v20, 0.0  ;;  %v5420_v20 = vmax.f32 %v11795_v47, %v11869_v39  ;;  %v5307_v47 = vmax.f32 %v5303_v45, 0.0 }
 0x2e4   :  { %8894 = vmatpush3.msra.mxu1 %v8528_v9  ;;  %v8534_v9 = vld [vmem:[%s12835_s3 + $0x60] sm:$0xff]  ;;  %v5419_v2 = vmax.f32 %v11776_v41, %v11848_v36  ;;  %v5306_v32 = vmax.f32 %v5302_v12, 0.0  ;;  %v9716_v36 = vld [vmem:[%s12834_s0 + $0x590] ss:$8 sps:$4 sm:$0xff]   ;;  %v8547_v12 = vld [vmem:[%s12835_s3 + $0x88] sm:$0xff] }
 0x2e5   :  { %v11883_v7 = vpop.f32.mrf.mxu0  ;;  %v11885_v6 = vpop.f32.mrf.mxu1  ;;  %8889 = vmatmul.mubr.msk.f32.gmra.mxu1 %vm4599_vm2, %v5061_v50  ;;  %8901 = vmatprep.subr.mxu1 %v8535_v0  ;;  %v5424_v46 = vmax.f32 %v5416_v27, %v5420_v20 }
 0x2e6   :  { %8895 = vmatprep.mubr.msk.f32.mxu1 %vm4599_vm2, %v5182_v23  ;;  %v5423_v15 = vmax.f32 %v5415_v43, %v5419_v2  ;;  %v5421_v39 = vmax.f32 %v11811_v56, %v11883_v7 }
 0x2e7   :  { %v3457_v10 = vpop.f32.mrf.mxu0  ;;  %v4393_v5 = vpop.f32.mrf.mxu1  ;;  %v5428_v45 = vadd.f32 %v11670_v37, %v5424_v46 }
 0x2e8   :  { %v9717_v10 = vld [vmem:[%s12834_s0 + $0x5a4] ss:$8 sps:$4 sm:$0xff]   ;;  %v5308_v5 = vmax.f32 %v5304_v4, 0.0 }
 0x2e9   :  { %v11904_v50 = vpop.f32.mrf.mxu0  ;;  %3651 = vmatmul.mubr.bf16.gmra.mxu0 %v9713_v62  ;;  %v11906_v61 = vpop.f32.mrf.mxu1  ;;  %8896 = vmatmul.mubr.msk.f32.vlgmr.msra.gmra.mxu1 %vm4599_vm2, %v5183_v14 }
 0x2ea   :  { %8898 = vmatprep.mubr.msk.f32.mxu1 %vm4599_vm2, %v5184_v16  ;;  %8902 = vmatpush3.msra.mxu1 %v8535_v0  ;;  %v5422_v0 = vmax.f32 %v5414_v21, %v5418_v49  ;;  %v5309_v49 = vmax.f32 %v5305_v33, 0.0  ;;  %v5425_v21 = vmax.f32 %v5417_v52, %v5421_v39  ;;  %v12000_v33 = vld [vmem:[%s12835_s3 + $0x98] sm:$0xff]  ;;  %v9725_v52 = vld [vmem:[%s12834_s0 + $0x5c0] ss:$8 sps:$4 sm:$0xff]  }
 0x2eb   :  { %v3462_v54 = vpop.f32.mrf.mxu0  ;;  %v4398_v23 = vpop.f32.mrf.mxu1  ;;  %8903 = vmatprep.subr.mxu1 %v8534_v9  ;;  %8388 = vmatprep.mubr.msk.bf16.mxu0 %vm2309_vm0, %v9714_v42  ;;  %v9722_v39 = vld [vmem:[%s12834_s0 + $0x5b0] ss:$8 sps:$4 sm:$0xff]  }
 0x2ec   :  { %8904 = vmatpush3.msra.mxu1 %v8534_v9  ;;  %v5426_v42 = vadd.f32 %v11670_v37, %v5422_v0  ;;  %v5427_v9 = vadd.f32 %v11670_v37, %v5423_v15  ;;  %v9719_v54 = vld [vmem:[%s12834_s0 + $0x5a0] ss:$8 sps:$4 sm:$0xff]   ;;  %v5432_v0 = vmax.f32 %v5428_v45, 0.0 }
 0x2ed   :  { %v11926_v62 = vpop.f32.mrf.mxu0  ;;  %v11928_v41 = vpop.f32.mrf.mxu1  ;;  %8899 = vmatmul.mubr.msk.f32.gmra.mxu1 %vm4599_vm2, %v5185_v48  ;;  %8911 = vmatprep.subr.mxu1 %v8541_v29 }
 0x2ee   :  { %8905 = vmatprep.mubr.msk.f32.mxu1 %vm4599_vm2, %v5306_v32  ;;  %v5430_v48 = vmax.f32 %v5426_v42, 0.0  ;;  %v5431_v13 = vmax.f32 %v5427_v9, 0.0 }
 0x2ef   :  { %v3465_v14 = vpop.f32.mrf.mxu0  ;;  %v4401_v40 = vpop.f32.mrf.mxu1 }
 0x2f1   :  { %v11950_v16 = vpop.f32.mrf.mxu0  ;;  %3659 = vmatmul.mubr.bf16.gmra.mxu0 %v9716_v36  ;;  %v4404_v56 = vpop.f32.mrf.mxu1  ;;  %8906 = vmatmul.mubr.msk.f32.vlgmr.msra.gmra.mxu1 %vm4599_vm2, %v5307_v47  ;;  %v8546_v36 = vld [vmem:[%s12835_s3 + $0x80] sm:$0xff] }
 0x2f2   :  { %v7278_v7 = vmax.f32 %v11871_v35, %v4404_v56  ;;  %8908 = vmatprep.mubr.msk.f32.mxu1 %vm4599_vm2, %v5308_v5  ;;  %8912 = vmatpush3.msra.mxu1 %v8541_v29 }
 0x2f3   :  { %v3470_v22 = vpop.f32.mrf.mxu0  ;;  %v4406_v28 = vpop.f32.mrf.mxu1  ;;  %8913 = vmatprep.subr.mxu1 %v8540_v18  ;;  %8389 = vmatprep.mubr.msk.bf16.mxu0 %vm2309_vm0, %v9717_v10 }
 0x2f4   :  { %v11964_v35 = vmax.f32 %v7274_v19, %v7278_v7  ;;  %8914 = vmatpush3.msra.mxu1 %v8540_v18  ;;  %v5429_v19 = vadd.f32 %v11670_v37, %v5425_v21  ;;  %v9728_v22 = vld [vmem:[%s12834_s0 + $0x5d0] ss:$8 sps:$4 sm:$0xff]   ;;  %v9729_v28 = vld [vmem:[%s12834_s0 + $0x5e4] ss:$8 sps:$4 sm:$0xff]  }
 0x2f5   :  { %v11966_v29 = vpop.f32.mrf.mxu0  ;;  %v4407_v2 = vpop.f32.mrf.mxu1  ;;  %8909 = vmatmul.mubr.msk.f32.gmra.mxu1 %vm4599_vm2, %v5309_v49  ;;  %8921 = vmatprep.subr.mxu1 %v8547_v12 }
 0x2f6   :  { %v7279_v23 = vmax.f32 %v11885_v6, %v4407_v2  ;;  %8915 = vmatprep.mubr.msk.f32.mxu1 %vm4599_vm2, %v5430_v48  ;;  %v5433_v47 = vmax.f32 %v5429_v19, 0.0 }
 0x2f7   :  { %v3473_v32 = vpop.f32.mrf.mxu0  ;;  %v4409_v4 = vpop.f32.mrf.mxu1 }
 0x2f8   :  { %v11981_v20 = vmax.f32 %v7275_v31, %v7279_v23  ;;  %v9731_v4 = vld [vmem:[%s12834_s0 + $0x5e0] ss:$8 sps:$4 sm:$0xff]  }
 0x2f9   :  { %v11983_v43 = vpop.f32.mrf.mxu0  ;;  %3667 = vmatmul.mubr.bf16.gmra.mxu0 %v9719_v54  ;;  %v4412_v6 = vpop.f32.mrf.mxu1  ;;  %8916 = vmatmul.mubr.msk.f32.vlgmr.msra.gmra.mxu1 %vm4599_vm2, %v5431_v13 }
 0x2fa   :  { %v7280_v27 = vmax.f32 %v11906_v61, %v4412_v6  ;;  %8918 = vmatprep.mubr.msk.f32.mxu1 %vm4599_vm2, %v5432_v0  ;;  %8390 = vmatprep.mubr.msk.bf16.mxu0 %vm2309_vm0, %v9720_v60  ;;  %v9732_v6 = vld [vmem:[%s12834_s0 + $0x5f4] ss:$8 sps:$4 sm:$0xff]  }
 0x2fb   :  { %v3478_v38 = vpop.f32.mrf.mxu0  ;;  %v4414_v53 = vpop.f32.mrf.mxu1  ;;  %8922 = vmatpush3.msra.mxu1 %v8547_v12 }
 0x2fc   :  { %v11995_v31 = vmax.f32 %v7276_v44, %v7280_v27  ;;  %8923 = vmatprep.subr.mxu1 %v8546_v36  ;;  %v5538_v53 = vmax.f32 %v11904_v50, %v11983_v43 }
 0x2fd   :  { %v12002_v61 = vpop.f32.mrf.mxu0  ;;  %v4415_v15 = vpop.f32.mrf.mxu1  ;;  %8919 = vmatmul.mubr.msk.f32.gmra.mxu1 %vm4599_vm2, %v5433_v47 }
 0x2fe   :  { %v7281_v14 = vmax.f32 %v11928_v41, %v4415_v15  ;;  %8924 = vmatpush3.msra.mxu1 %v8546_v36 }
 0x2ff   :  { %v3481_v1 = vpop.f32.mrf.mxu0  ;;  %v4417_v44 = vpop.f32.mrf.mxu1  ;;  %8931 = vmatprep.subr.mxu1 %v12000_v33 }
 0x300   :  { %v12016_v40 = vmax.f32 %v7277_v26, %v7281_v14 }
 0x301   :  { %v12018_v10 = vpop.f32.mrf.mxu0  ;;  %3675 = vmatmul.mubr.bf16.gmra.mxu0 %v9722_v39  ;;  %v12020_v5 = vpop.f32.mrf.mxu1 }
 0x302   :  { %8391 = vmatprep.mubr.msk.bf16.mxu0 %vm2309_vm0, %v9723_v58 }
 0x303   :  { %v3486_v41 = vpop.f32.mrf.mxu0  ;;  %v4422_v42 = vpop.f32.mrf.mxu1 }
 0x304   :  { %v9734_v42 = vld [vmem:[%s12834_s0 + $0x5f0] ss:$8 sps:$4 sm:$0xff]  }
 0x305   :  { %v12023_v46 = vpop.f32.mrf.mxu0  ;;  %v12025_v18 = vpop.f32.mrf.mxu1 }
 0x307   :  { %v3489_v59 = vpop.f32.mrf.mxu0  ;;  %v4425_v26 = vpop.f32.mrf.mxu1 }
 0x308   :  { %v9735_v59 = vld [vmem:[%s12834_s0 + $0x604] ss:$8 sps:$4 sm:$0xff]  }
 0x309   :  { %v3492_v56 = vpop.f32.mrf.mxu0  ;;  %3683 = vmatmul.mubr.bf16.gmra.mxu0 %v9725_v52  ;;  %v12033_v7 = vpop.f32.mrf.mxu1  ;;  %v5539_v52 = vmax.f32 %v11926_v62, %v12002_v61  ;;  %v5540_v62 = vmax.f32 %v11950_v16, %v12018_v10  ;;  %v8552_v16 = vld [vmem:[%s12835_s3 + $0x90] sm:$0xff]  ;;  %v5541_v10 = vmax.f32 %v11966_v29, %v12023_v46  ;;  %v12101_v29 = vld [vmem:[%s12835_s3 + $0xa8] sm:$0xff] }
 0x30a   :  { %8392 = vmatprep.mubr.msk.bf16.mxu0 %vm2309_vm0, %v9726_v25 }
 0x30b   :  { %v3494_v12 = vpop.f32.mrf.mxu0  ;;  %v4430_v49 = vpop.f32.mrf.mxu1 }
 0x30d   :  { %v3495_v9 = vpop.f32.mrf.mxu0  ;;  %v12036_v21 = vpop.f32.mrf.mxu1 }
 0x30f   :  { %v3497_v48 = vpop.f32.mrf.mxu0  ;;  %v4433_v45 = vpop.f32.mrf.mxu1 }
 0x311   :  { %v3500_v2 = vpop.f32.mrf.mxu0  ;;  %3691 = vmatmul.mubr.bf16.gmra.mxu0 %v9728_v22  ;;  %v12044_v54 = vpop.f32.mrf.mxu1 }
 0x312   :  { %v7398_v23 = vmax.f32 %v12020_v5, %v12044_v54  ;;  %8393 = vmatprep.mubr.msk.bf16.mxu0 %vm2309_vm0, %v9729_v28 }
 0x313   :  { %v3502_v60 = vpop.f32.mrf.mxu0  ;;  %v4438_v13 = vpop.f32.mrf.mxu1 }
 0x315   :  { %v3503_v19 = vpop.f32.mrf.mxu0  ;;  %v12049_v32 = vpop.f32.mrf.mxu1 }
 0x316   :  { %v7399_v0 = vmax.f32 %v12025_v18, %v12049_v32  ;;  %v9746_v18 = vld [vmem:[%s12834_s0 + $0x630] ss:$8 sps:$4 sm:$0xff]  }
 0x317   :  { %v3505_v36 = vpop.f32.mrf.mxu0  ;;  %v4441_v27 = vpop.f32.mrf.mxu1 }
 0x318   :  { %v9737_v36 = vld [vmem:[%s12834_s0 + $0x600] ss:$8 sps:$4 sm:$0xff]  }
 0x319   :  { %v3508_v47 = vpop.f32.mrf.mxu0  ;;  %3699 = vmatmul.mubr.bf16.gmra.mxu0 %v9731_v4  ;;  %v12059_v38 = vpop.f32.mrf.mxu1 }
 0x31a   :  { %v5542_v15 = vmax.f32 %v3492_v56, %v3508_v47  ;;  %v7400_v39 = vmax.f32 %v12033_v7, %v12059_v38  ;;  %8394 = vmatprep.mubr.msk.bf16.mxu0 %vm2309_vm0, %v9732_v6  ;;  %v9738_v47 = vld [vmem:[%s12834_s0 + $0x614] ss:$8 sps:$4 sm:$0xff]  }
 0x31b   :  { %v3510_v14 = vpop.f32.mrf.mxu0  ;;  %v4446_v58 = vpop.f32.mrf.mxu1 }
 0x31c   :  { %v5546_v1 = vmax.f32 %v5538_v53, %v5542_v15 }
 0x31d   :  { %v3511_v44 = vpop.f32.mrf.mxu0  ;;  %v12066_v41 = vpop.f32.mrf.mxu1 }
 0x31e   :  { %v5550_v50 = vadd.f32 %v11670_v37, %v5546_v1  ;;  %v5543_v43 = vmax.f32 %v3495_v9, %v3511_v44  ;;  %v7401_v25 = vmax.f32 %v12036_v21, %v12066_v41  ;;  %v9750_v21 = vld [vmem:[%s12834_s0 + $0x654] ss:$8 sps:$4 sm:$0xff]  }
 0x31f   :  { %v3513_v26 = vpop.f32.mrf.mxu0  ;;  %v4449_v56 = vpop.f32.mrf.mxu1 }
 0x320   :  { %v5554_v12 = vmax.f32 %v5550_v50, 0.0  ;;  %v5547_v49 = vmax.f32 %v5539_v52, %v5543_v43  ;;  %v9740_v43 = vld [vmem:[%s12834_s0 + $0x610] ss:$8 sps:$4 sm:$0xff]  }
 0x321   :  { %v3516_v22 = vpop.f32.mrf.mxu0  ;;  %3707 = vmatmul.mubr.bf16.gmra.mxu0 %v9734_v42  ;;  %v4452_v28 = vpop.f32.mrf.mxu1 }
 0x322   :  { %v5551_v61 = vadd.f32 %v11670_v37, %v5547_v49  ;;  %v5544_v9 = vmax.f32 %v3500_v2, %v3516_v22  ;;  %8925 = vmatprep.mubr.msk.f32.mxu1 %vm4599_vm2, %v5554_v12  ;;  %8395 = vmatprep.mubr.msk.bf16.mxu0 %vm2309_vm0, %v9735_v59  ;;  %v9741_v59 = vld [vmem:[%s12834_s0 + $0x624] ss:$8 sps:$4 sm:$0xff]  }
 0x323   :  { %v3518_v48 = vpop.f32.mrf.mxu0  ;;  %v4454_v45 = vpop.f32.mrf.mxu1 }
 0x324   :  { %v5555_v60 = vmax.f32 %v5551_v61, 0.0  ;;  %v5548_v13 = vmax.f32 %v5540_v62, %v5544_v9 }
 0x325   :  { %v3519_v4 = vpop.f32.mrf.mxu0  ;;  %v4455_v6 = vpop.f32.mrf.mxu1 }
 0x326   :  { %v5552_v2 = vadd.f32 %v11670_v37, %v5548_v13  ;;  %v5545_v27 = vmax.f32 %v3503_v19, %v3519_v4  ;;  %8926 = vmatmul.mubr.msk.f32.vlgmr.msra.gmra.mxu1 %vm4599_vm2, %v5555_v60  ;;  %v9743_v60 = vld [vmem:[%s12834_s0 + $0x620] ss:$8 sps:$4 sm:$0xff]  }
 0x327   :  { %v3521_v53 = vpop.f32.mrf.mxu0  ;;  %v4457_v15 = vpop.f32.mrf.mxu1  ;;  %8932 = vmatpush3.msra.mxu1 %v12000_v33 }
 0x328   :  { %v5556_v14 = vmax.f32 %v5552_v2, 0.0  ;;  %v5549_v58 = vmax.f32 %v5541_v10, %v5545_v27  ;;  %8933 = vmatprep.subr.mxu1 %v8552_v16 }
 0x329   :  { %v12103_v46 = vpop.f32.mrf.mxu0  ;;  %3715 = vmatmul.mubr.bf16.gmra.mxu0 %v9737_v36  ;;  %v4460_v19 = vpop.f32.mrf.mxu1  ;;  %8934 = vmatpush3.msra.mxu1 %v8552_v16 }
 0x32a   :  { %v5553_v1 = vadd.f32 %v11670_v37, %v5549_v58  ;;  %8928 = vmatprep.mubr.msk.f32.mxu1 %vm4599_vm2, %v5556_v14  ;;  %8396 = vmatprep.mubr.msk.bf16.mxu0 %vm2309_vm0, %v9738_v47 }
 0x32b   :  { %v3526_v33 = vpop.f32.mrf.mxu0  ;;  %v4462_v44 = vpop.f32.mrf.mxu1  ;;  %8941 = vmatprep.subr.mxu1 %v12101_v29 }
 0x32c   :  { %v5557_v42 = vmax.f32 %v5553_v1, 0.0  ;;  %v9749_v33 = vld [vmem:[%s12834_s0 + $0x640] ss:$8 sps:$4 sm:$0xff]  }
 0x32d   :  { %v12109_v52 = vpop.f32.mrf.mxu0  ;;  %v4463_v50 = vpop.f32.mrf.mxu1 }
 0x32e   :  { %8929 = vmatmul.mubr.msk.f32.gmra.mxu1 %vm4599_vm2, %v5557_v42 }
 0x32f   :  { %v3529_v26 = vpop.f32.mrf.mxu0  ;;  %v4465_v56 = vpop.f32.mrf.mxu1 }
 0x330   :  { %v9752_v56 = vld [vmem:[%s12834_s0 + $0x650] ss:$8 sps:$4 sm:$0xff]  }
 0x331   :  { %v12118_v12 = vpop.f32.mrf.mxu0  ;;  %3723 = vmatmul.mubr.bf16.gmra.mxu0 %v9740_v43  ;;  %v4468_v49 = vpop.f32.mrf.mxu1 }
 0x332   :  { %v7402_v22 = vmax.f32 %v4452_v28, %v4468_v49  ;;  %8397 = vmatprep.mubr.msk.bf16.mxu0 %vm2309_vm0, %v9741_v59  ;;  %v9744_v28 = vld [vmem:[%s12834_s0 + $0x634] ss:$8 sps:$4 sm:$0xff]   ;;  %v9753_v49 = vld [vmem:[%s12834_s0 + $0x664] ss:$8 sps:$4 sm:$0xff]  }
 0x333   :  { %v3534_v62 = vpop.f32.mrf.mxu0  ;;  %v4470_v61 = vpop.f32.mrf.mxu1 }
 0x334   :  { %v12124_v9 = vmax.f32 %v7398_v23, %v7402_v22 }
 0x335   :  { %v12126_v48 = vpop.f32.mrf.mxu0  ;;  %v4471_v45 = vpop.f32.mrf.mxu1 }
 0x336   :  { %v7403_v13 = vmax.f32 %v4455_v6, %v4471_v45 }
 0x337   :  { %v3537_v4 = vpop.f32.mrf.mxu0  ;;  %v4473_v36 = vpop.f32.mrf.mxu1 }
 0x338   :  { %v12137_v5 = vmax.f32 %v7399_v0, %v7403_v13  ;;  %v9747_v0 = vld [vmem:[%s12834_s0 + $0x644] ss:$8 sps:$4 sm:$0xff]  }
 0x339   :  { %v12139_v54 = vpop.f32.mrf.mxu0  ;;  %3731 = vmatmul.mubr.bf16.gmra.mxu0 %v9743_v60  ;;  %v4476_v23 = vpop.f32.mrf.mxu1 }
 0x33a   :  { %v7404_v16 = vmax.f32 %v4460_v19, %v4476_v23  ;;  %8398 = vmatprep.mubr.msk.bf16.mxu0 %vm2309_vm0, %v9744_v28  ;;  %v9755_v23 = vld [vmem:[%s12834_s0 + $0x660] ss:$8 sps:$4 sm:$0xff]  }
 0x33b   :  { %v3542_v10 = vpop.f32.mrf.mxu0  ;;  %v4478_v6 = vpop.f32.mrf.mxu1 }
 0x33c   :  { %v12145_v2 = vmax.f32 %v7400_v39, %v7404_v16  ;;  %v9756_v10 = vld [vmem:[%s12834_s0 + $0x674] ss:$8 sps:$4 sm:$0xff]  }
 0x33d   :  { %v12147_v27 = vpop.f32.mrf.mxu0  ;;  %v4479_v47 = vpop.f32.mrf.mxu1 }
 0x33e   :  { %v7405_v32 = vmax.f32 %v4463_v50, %v4479_v47 }
 0x33f   :  { %v3545_v53 = vpop.f32.mrf.mxu0  ;;  %v4481_v15 = vpop.f32.mrf.mxu1 }
 0x340   :  { %v12158_v7 = vmax.f32 %v7401_v25, %v7405_v32 }
 0x341   :  { %v12160_v38 = vpop.f32.mrf.mxu0  ;;  %3739 = vmatmul.mubr.bf16.gmra.mxu0 %v9746_v18  ;;  %v12162_v39 = vpop.f32.mrf.mxu1 }
 0x342   :  { %8399 = vmatprep.mubr.msk.bf16.mxu0 %vm2309_vm0, %v9747_v0  ;;  %v5662_v0 = vmax.f32 %v12103_v46, %v12139_v54 }
 0x343   :  { %v3550_v14 = vpop.f32.mrf.mxu0  ;;  %v4486_v58 = vpop.f32.mrf.mxu1 }
 0x345   :  { %v12165_v19 = vpop.f32.mrf.mxu0  ;;  %v12167_v1 = vpop.f32.mrf.mxu1 }
 0x347   :  { %v3553_v41 = vpop.f32.mrf.mxu0  ;;  %v4489_v25 = vpop.f32.mrf.mxu1 }
 0x348   :  { %v9758_v25 = vld [vmem:[%s12834_s0 + $0x670] ss:$8 sps:$4 sm:$0xff]  }
 0x349   :  { %v3556_v44 = vpop.f32.mrf.mxu0  ;;  %3747 = vmatmul.mubr.bf16.gmra.mxu0 %v9749_v33  ;;  %v12175_v42 = vpop.f32.mrf.mxu1 }
 0x34a   :  { %8400 = vmatprep.mubr.msk.bf16.mxu0 %vm2309_vm0, %v9750_v21 }
 0x34b   :  { %v3558_v50 = vpop.f32.mrf.mxu0  ;;  %v4494_v43 = vpop.f32.mrf.mxu1 }
 0x34c   :  { %v5663_v50 = vmax.f32 %v12109_v52, %v12147_v27  ;;  %v9759_v43 = vld [vmem:[%s12834_s0 + $0x684] ss:$8 sps:$4 sm:$0xff]   ;;  %v5664_v52 = vmax.f32 %v12118_v12, %v12160_v38  ;;  %v5665_v38 = vmax.f32 %v12126_v48, %v12165_v19  ;;  %v12243_v48 = vld [vmem:[%s12835_s3 + $0xb8] sm:$0xff] }
 0x34d   :  { %v3559_v59 = vpop.f32.mrf.mxu0  ;;  %v12178_v26 = vpop.f32.mrf.mxu1  ;;  %v8558_v12 = vld [vmem:[%s12835_s3 + $0xa0] sm:$0xff] }
 0x34f   :  { %v3561_v22 = vpop.f32.mrf.mxu0  ;;  %v4497_v62 = vpop.f32.mrf.mxu1 }
 0x351   :  { %v3564_v61 = vpop.f32.mrf.mxu0  ;;  %3755 = vmatmul.mubr.bf16.gmra.mxu0 %v9752_v56  ;;  %v12186_v45 = vpop.f32.mrf.mxu1 }
 0x352   :  { %v7522_v60 = vmax.f32 %v12162_v39, %v12186_v45  ;;  %8401 = vmatprep.mubr.msk.bf16.mxu0 %vm2309_vm0, %v9753_v49 }
 0x353   :  { %v3566_v13 = vpop.f32.mrf.mxu0  ;;  %v4502_v28 = vpop.f32.mrf.mxu1 }
 0x355   :  { %v3567_v4 = vpop.f32.mrf.mxu0  ;;  %v12191_v36 = vpop.f32.mrf.mxu1 }
 0x356   :  { %v7523_v16 = vmax.f32 %v12167_v1, %v12191_v36  ;;  %v9770_v1 = vld [vmem:[%s12834_s0 + $0x6b0] ss:$8 sps:$4 sm:$0xff]  }
 0x357   :  { %v3569_v6 = vpop.f32.mrf.mxu0  ;;  %v4505_v47 = vpop.f32.mrf.mxu1 }
 0x359   :  { %v3572_v18 = vpop.f32.mrf.mxu0  ;;  %3763 = vmatmul.mubr.bf16.gmra.mxu0 %v9755_v23  ;;  %v12201_v32 = vpop.f32.mrf.mxu1 }
 0x35a   :  { %v5666_v53 = vmax.f32 %v3556_v44, %v3572_v18  ;;  %v7524_v15 = vmax.f32 %v12175_v42, %v12201_v32  ;;  %8402 = vmatprep.mubr.msk.bf16.mxu0 %vm2309_vm0, %v9756_v10 }
 0x35b   :  { %v3574_v14 = vpop.f32.mrf.mxu0  ;;  %v4510_v58 = vpop.f32.mrf.mxu1 }
 0x35c   :  { %v5670_v33 = vmax.f32 %v5662_v0, %v5666_v53  ;;  %v9761_v53 = vld [vmem:[%s12834_s0 + $0x680] ss:$8 sps:$4 sm:$0xff]   ;;  %v9762_v58 = vld [vmem:[%s12834_s0 + $0x694] ss:$8 sps:$4 sm:$0xff]  }
 0x35d   :  { %v3575_v21 = vpop.f32.mrf.mxu0  ;;  %v12208_v41 = vpop.f32.mrf.mxu1 }
 0x35e   :  { %v5674_v46 = vadd.f32 %v11670_v37, %v5670_v33  ;;  %v5667_v54 = vmax.f32 %v3559_v59, %v3575_v21  ;;  %v7525_v44 = vmax.f32 %v12178_v26, %v12208_v41  ;;  %v9774_v26 = vld [vmem:[%s12834_s0 + $0x6d4] ss:$8 sps:$4 sm:$0xff]  }
 0x35f   :  { %v3577_v56 = vpop.f32.mrf.mxu0  ;;  %v4513_v49 = vpop.f32.mrf.mxu1 }
 0x360   :  { %v5678_v22 = vmax.f32 %v5674_v46, 0.0  ;;  %v5671_v62 = vmax.f32 %v5663_v50, %v5667_v54 }
 0x361   :  { %v3580_v13 = vpop.f32.mrf.mxu0  ;;  %3771 = vmatmul.mubr.bf16.gmra.mxu0 %v9758_v25  ;;  %v4516_v28 = vpop.f32.mrf.mxu1 }
 0x362   :  { %v5675_v27 = vadd.f32 %v11670_v37, %v5671_v62  ;;  %v5668_v59 = vmax.f32 %v3564_v61, %v3580_v13  ;;  %8935 = vmatprep.mubr.msk.f32.mxu1 %vm4599_vm2, %v5678_v22  ;;  %8403 = vmatprep.mubr.msk.bf16.mxu0 %vm2309_vm0, %v9759_v43  ;;  %v9764_v22 = vld [vmem:[%s12834_s0 + $0x690] ss:$8 sps:$4 sm:$0xff]   ;;  %v9765_v62 = vld [vmem:[%s12834_s0 + $0x6a4] ss:$8 sps:$4 sm:$0xff]  }
 0x363   :  { %v3582_v23 = vpop.f32.mrf.mxu0  ;;  %v4518_v10 = vpop.f32.mrf.mxu1 }
 0x364   :  { %v5679_v6 = vmax.f32 %v5675_v27, 0.0  ;;  %v5672_v47 = vmax.f32 %v5664_v52, %v5668_v59 }
 0x365   :  { %v3583_v18 = vpop.f32.mrf.mxu0  ;;  %v4519_v0 = vpop.f32.mrf.mxu1 }
 0x366   :  { %v5676_v61 = vadd.f32 %v11670_v37, %v5672_v47  ;;  %v5669_v14 = vmax.f32 %v3567_v4, %v3583_v18  ;;  %8936 = vmatmul.mubr.msk.f32.vlgmr.msra.gmra.mxu1 %vm4599_vm2, %v5679_v6  ;;  %v12250_v4 = vld [vmem:[%s12836_s2] ss:$0 sm:$0xff] }
 0x367   :  { %v3585_v33 = vpop.f32.mrf.mxu0  ;;  %v4521_v21 = vpop.f32.mrf.mxu1  ;;  %8942 = vmatpush3.msra.mxu1 %v12101_v29 }
 0x368   :  { %v5680_v25 = vmax.f32 %v5676_v61, 0.0  ;;  %v5673_v50 = vmax.f32 %v5665_v38, %v5669_v14  ;;  %8943 = vmatprep.subr.mxu1 %v8558_v12 }
 0x369   :  { %v12245_v37 = vpop.f32.mrf.mxu0  ;;  %3779 = vmatmul.mubr.bf16.gmra.mxu0 %v9761_v53  ;;  %v4524_v19 = vpop.f32.mrf.mxu1  ;;  %8944 = vmatpush3.msra.mxu1 %v8558_v12  ;;  %v9767_v12 = vld [vmem:[%s12834_s0 + $0x6a0] ss:$8 sps:$4 sm:$0xff]  }
 0x36a   :  { %v5677_v29 = vadd.f32 %v12250_v4, %v5673_v50  ;;  %8938 = vmatprep.mubr.msk.f32.mxu1 %vm4599_vm2, %v5680_v25  ;;  %8404 = vmatprep.mubr.msk.bf16.mxu0 %vm2309_vm0, %v9762_v58 }
 0x36b   :  { %v3590_v46 = vpop.f32.mrf.mxu0  ;;  %v4526_v54 = vpop.f32.mrf.mxu1  ;;  %8951 = vmatprep.subr.mxu1 %v12243_v48 }
 0x36c   :  { %v5681_v43 = vmax.f32 %v5677_v29, 0.0 }
 0x36d   :  { %v12256_v56 = vpop.f32.mrf.mxu0  ;;  %v4527_v49 = vpop.f32.mrf.mxu1 }
 0x36e   :  { %8939 = vmatmul.mubr.msk.f32.gmra.mxu1 %vm4599_vm2, %v5681_v43 }
 0x36f   :  { %v3593_v13 = vpop.f32.mrf.mxu0  ;;  %v4529_v52 = vpop.f32.mrf.mxu1 }
 0x371   :  { %v12265_v27 = vpop.f32.mrf.mxu0  ;;  %3787 = vmatmul.mubr.bf16.gmra.mxu0 %v9764_v22  ;;  %v4532_v59 = vpop.f32.mrf.mxu1  ;;  %v9773_v22 = vld [vmem:[%s12834_s0 + $0x6c0] ss:$8 sps:$4 sm:$0xff]  }
 0x372   :  { %v7526_v23 = vmax.f32 %v4516_v28, %v4532_v59  ;;  %8405 = vmatprep.mubr.msk.bf16.mxu0 %vm2309_vm0, %v9765_v62  ;;  %v9768_v28 = vld [vmem:[%s12834_s0 + $0x6b4] ss:$8 sps:$4 sm:$0xff]  }
 0x373   :  { %v3598_v10 = vpop.f32.mrf.mxu0  ;;  %v4534_v6 = vpop.f32.mrf.mxu1 }
 0x374   :  { %v12271_v47 = vmax.f32 %v7522_v60, %v7526_v23 }
 0x375   :  { %v12273_v18 = vpop.f32.mrf.mxu0  ;;  %v4535_v53 = vpop.f32.mrf.mxu1 }
 0x376   :  { %v7527_v38 = vmax.f32 %v4519_v0, %v4535_v53 }
 0x377   :  { %v3601_v61 = vpop.f32.mrf.mxu0  ;;  %v4537_v14 = vpop.f32.mrf.mxu1 }
 0x378   :  { %v12284_v39 = vmax.f32 %v7523_v16, %v7527_v38  ;;  %v9771_v16 = vld [vmem:[%s12834_s0 + $0x6c4] ss:$8 sps:$4 sm:$0xff]  }
 0x379   :  { %v12286_v45 = vpop.f32.mrf.mxu0  ;;  %3795 = vmatmul.mubr.bf16.gmra.mxu0 %v9767_v12  ;;  %v4540_v60 = vpop.f32.mrf.mxu1  ;;  %v9776_v12 = vld [vmem:[%s12834_s0 + $0x6d0] ss:$8 sps:$4 sm:$0xff]  }
 0x37a   :  { %v7528_v58 = vmax.f32 %v4524_v19, %v4540_v60  ;;  %8406 = vmatprep.mubr.msk.bf16.mxu0 %vm2309_vm0, %v9768_v28  ;;  %v9777_v28 = vld [vmem:[%s12834_s0 + $0x6e4] ss:$8 sps:$4 sm:$0xff]  }
 0x37b   :  { %v3606_v33 = vpop.f32.mrf.mxu0  ;;  %v4542_v0 = vpop.f32.mrf.mxu1 }
 0x37c   :  { %v12292_v21 = vmax.f32 %v7524_v15, %v7528_v58 }
 0x37d   :  { %v12294_v25 = vpop.f32.mrf.mxu0  ;;  %v4543_v50 = vpop.f32.mrf.mxu1 }
 0x37e   :  { %v7529_v36 = vmax.f32 %v4527_v49, %v4543_v50 }
 0x37f   :  { %v3609_v19 = vpop.f32.mrf.mxu0  ;;  %v4545_v29 = vpop.f32.mrf.mxu1 }
 0x380   :  { %v12305_v42 = vmax.f32 %v7525_v44, %v7529_v36  ;;  %v9779_v29 = vld [vmem:[%s12834_s0 + $0x6e0] ss:$8 sps:$4 sm:$0xff]  }
 0x381   :  { %v12307_v32 = vpop.f32.mrf.mxu0  ;;  %3803 = vmatmul.mubr.bf16.gmra.mxu0 %v9770_v1  ;;  %v8847_v15 = vpop.f32.mrf.mxu1 }
 0x382   :  { %8407 = vmatprep.mubr.msk.bf16.mxu0 %vm2309_vm0, %v9771_v16 }
 0x383   :  { %v3614_v46 = vpop.f32.mrf.mxu0  ;;  %v4678_v54 = vpop.f32.mrf.mxu1 }
 0x384   :  { %v9780_v46 = vld [vmem:[%s12834_s0 + $0x6f4] ss:$8 sps:$4 sm:$0xff]  }
 0x385   :  { %v12310_v43 = vpop.f32.mrf.mxu0  ;;  %v8850_v49 = vpop.f32.mrf.mxu1 }
 0x387   :  { %v3617_v41 = vpop.f32.mrf.mxu0  ;;  %v4688_v44 = vpop.f32.mrf.mxu1 }
 0x389   :  { %v3620_v62 = vpop.f32.mrf.mxu0  ;;  %3811 = vmatmul.mubr.bf16.gmra.mxu0 %v9773_v22  ;;  %v8857_v13 = vpop.f32.mrf.mxu1 }
 0x38a   :  { %v4781_v52 = vadd.f32 %v8857_v13, %v8847_v15  ;;  %8408 = vmatprep.mubr.msk.bf16.mxu0 %vm2309_vm0, %v9774_v26 }
 0x38b   :  { %v3622_v59 = vpop.f32.mrf.mxu0  ;;  %v4775_v23 = vpop.f32.mrf.mxu1 }
 0x38c   :  { %v4776_v10 = vadd.f32 %v4775_v23, %v4678_v54 }
 0x38d   :  { %v3623_v6 = vpop.f32.mrf.mxu0  ;;  %v8860_v53 = vpop.f32.mrf.mxu1 }
 0x38e   :  { %v4791_v38 = vadd.f32 %v8860_v53, %v8850_v49 }
 0x38f   :  { %v3625_v61 = vpop.f32.mrf.mxu0  ;;  %v4785_v14 = vpop.f32.mrf.mxu1 }
 0x390   :  { %v4786_v60 = vadd.f32 %v4785_v14, %v4688_v44  ;;  %v5786_v44 = vmax.f32 %v12245_v37, %v12286_v45  ;;  %v5787_v61 = vmax.f32 %v12256_v56, %v12294_v25 }
 0x391   :  { %v3628_v58 = vpop.f32.mrf.mxu0  ;;  %3819 = vmatmul.mubr.bf16.gmra.mxu0 %v9776_v12  ;;  %v8867_v33 = vpop.f32.mrf.mxu1 }
 0x392   :  { %v4915_v0 = vadd.f32 %v8867_v33, %v4781_v52  ;;  %8409 = vmatprep.mubr.msk.bf16.mxu0 %vm2309_vm0, %v9777_v28  ;;  %v9782_v28 = vld [vmem:[%s12834_s0 + $0x6f0] ss:$8 sps:$4 sm:$0xff]  }
 0x393   :  { %v3630_v50 = vpop.f32.mrf.mxu0  ;;  %v4895_v1 = vpop.f32.mrf.mxu1 }
 0x394   :  { %v4914_v36 = vadd.f32 %v4895_v1, %v4776_v10 }
 0x395   :  { %v3631_v16 = vpop.f32.mrf.mxu0  ;;  %v8870_v19 = vpop.f32.mrf.mxu1 }
 0x396   :  { %v4917_v15 = vadd.f32 %v8870_v19, %v4791_v38 }
 0x397   :  { %v3633_v54 = vpop.f32.mrf.mxu0  ;;  %v4905_v49 = vpop.f32.mrf.mxu1 }
 0x398   :  { %v4916_v22 = vadd.f32 %v4905_v49, %v4786_v60 }
 0x399   :  { %v3636_v26 = vpop.f32.mrf.mxu0  ;;  %3827 = vmatmul.mubr.bf16.gmra.mxu0 %v9779_v29  ;;  %v8877_v41 = vpop.f32.mrf.mxu1 }
 0x39a   :  { %v5790_v13 = vmax.f32 %v3620_v62, %v3636_v26  ;;  %v5039_v52 = vadd.f32 %v8877_v41, %v4915_v0  ;;  %8410 = vmatprep.mubr.msk.bf16.mxu0 %vm2309_vm0, %v9780_v46  ;;  %v9783_v62 = vld [vmem:[%s12834_s0 + $0x704] ss:$8 sps:$4 sm:$0xff]  }
 0x39b   :  { %v3638_v59 = vpop.f32.mrf.mxu0  ;;  %v5019_v23 = vpop.f32.mrf.mxu1 }
 0x39c   :  { %v5794_v10 = vmax.f32 %v5786_v44, %v5790_v13  ;;  %v5038_v53 = vadd.f32 %v5019_v23, %v4914_v36  ;;  %v5788_v36 = vmax.f32 %v12265_v27, %v12307_v32  ;;  %v9785_v27 = vld [vmem:[%s12834_s0 + $0x700] ss:$8 sps:$4 sm:$0xff]   ;;  %v8564_v32 = vld [vmem:[%s12835_s3 + $0xb0] sm:$0xff] }
 0x39d   :  { %v3639_v12 = vpop.f32.mrf.mxu0  ;;  %v8880_v38 = vpop.f32.mrf.mxu1  ;;  %v9786_v59 = vld [vmem:[%s12834_s0 + $0x714] ss:$8 sps:$4 sm:$0xff]  }
 0x39e   :  { %v5798_v14 = vadd.f32 %v12250_v4, %v5794_v10  ;;  %v5791_v37 = vmax.f32 %v3623_v6, %v3639_v12  ;;  %v5041_v45 = vadd.f32 %v8880_v38, %v4917_v15 }
 0x39f   :  { %v3641_v60 = vpop.f32.mrf.mxu0  ;;  %v5029_v33 = vpop.f32.mrf.mxu1 }
 0x3a0   :  { %v5802_v0 = vmax.f32 %v5798_v14, 0.0  ;;  %v5795_v50 = vmax.f32 %v5787_v61, %v5791_v37  ;;  %v5040_v1 = vadd.f32 %v5029_v33, %v4916_v22  ;;  %v9788_v33 = vld [vmem:[%s12834_s0 + $0x710] ss:$8 sps:$4 sm:$0xff]  }
 0x3a1   :  { %v3644_v19 = vpop.f32.mrf.mxu0  ;;  %3835 = vmatmul.mubr.bf16.gmra.mxu0 %v9782_v28  ;;  %v8887_v29 = vpop.f32.mrf.mxu1 }
 0x3a2   :  { %v5799_v56 = vadd.f32 %v12250_v4, %v5795_v50  ;;  %v5792_v25 = vmax.f32 %v3628_v58, %v3644_v19  ;;  %v5163_v6 = vadd.f32 %v8887_v29, %v5039_v52  ;;  %8945 = vmatprep.mubr.msk.f32.mxu1 %vm4599_vm2, %v5802_v0  ;;  %8411 = vmatprep.mubr.msk.bf16.mxu0 %vm2309_vm0, %v9783_v62  ;;  %v9789_v50 = vld [vmem:[%s12834_s0 + $0x724] ss:$8 sps:$4 sm:$0xff]  }
 0x3a3   :  { %v3646_v15 = vpop.f32.mrf.mxu0  ;;  %v5143_v46 = vpop.f32.mrf.mxu1  ;;  %v5789_v58 = vmax.f32 %v12273_v18, %v12310_v43  ;;  %v12366_v18 = vld [vmem:[%s12835_s3 + $0xc8] sm:$0xff] }
 0x3a4   :  { %v5803_v54 = vmax.f32 %v5799_v56, 0.0  ;;  %v5796_v49 = vmax.f32 %v5788_v36, %v5792_v25  ;;  %v5162_v26 = vadd.f32 %v5143_v46, %v5038_v53 }
 0x3a5   :  { %v3647_v22 = vpop.f32.mrf.mxu0  ;;  %v8890_v41 = vpop.f32.mrf.mxu1 }
 0x3a6   :  { %v5800_v44 = vadd.f32 %v12250_v4, %v5796_v49  ;;  %v5793_v13 = vmax.f32 %v3631_v16, %v3647_v22  ;;  %v5165_v52 = vadd.f32 %v8890_v41, %v5041_v45  ;;  %8946 = vmatmul.mubr.msk.f32.vlgmr.msra.gmra.mxu1 %vm4599_vm2, %v5803_v54  ;;  %v9792_v41 = vld [vmem:[%s12834_s0 + $0x734] ss:$8 sps:$4 sm:$0xff]  }
 0x3a7   :  { %v3649_v23 = vpop.f32.mrf.mxu0  ;;  %v5153_v10 = vpop.f32.mrf.mxu1  ;;  %8952 = vmatpush3.msra.mxu1 %v12243_v48 }
 0x3a8   :  { %v5804_v53 = vmax.f32 %v5800_v44, 0.0  ;;  %v5797_v12 = vmax.f32 %v5789_v58, %v5793_v13  ;;  %v5164_v38 = vadd.f32 %v5153_v10, %v5040_v1  ;;  %8953 = vmatprep.subr.mxu1 %v8564_v32 }
 0x3a9   :  { %v12368_v43 = vpop.f32.mrf.mxu0  ;;  %3843 = vmatmul.mubr.bf16.gmra.mxu0 %v9785_v27  ;;  %v8897_v16 = vpop.f32.mrf.mxu1  ;;  %8954 = vmatpush3.msra.mxu1 %v8564_v32 }
 0x3aa   :  { %v5801_v28 = vadd.f32 %v12250_v4, %v5797_v12  ;;  %v5287_v61 = vadd.f32 %v8897_v16, %v5163_v6  ;;  %8948 = vmatprep.mubr.msk.f32.mxu1 %vm4599_vm2, %v5804_v53  ;;  %8412 = vmatprep.mubr.msk.bf16.mxu0 %vm2309_vm0, %v9786_v59 }
 0x3ab   :  { %v3654_v48 = vpop.f32.mrf.mxu0  ;;  %v5267_v14 = vpop.f32.mrf.mxu1  ;;  %8961 = vmatprep.subr.mxu1 %v12366_v18 }
 0x3ac   :  { %v5805_v37 = vmax.f32 %v5801_v28, 0.0  ;;  %v5286_v45 = vadd.f32 %v5267_v14, %v5162_v26  ;;  %v9791_v26 = vld [vmem:[%s12834_s0 + $0x720] ss:$8 sps:$4 sm:$0xff]   ;;  %v9795_v28 = vld [vmem:[%s12834_s0 + $0x744] ss:$8 sps:$4 sm:$0xff]  }
 0x3ad   :  { %v12374_v62 = vpop.f32.mrf.mxu0  ;;  %v8900_v60 = vpop.f32.mrf.mxu1 }
 0x3ae   :  { %v5289_v0 = vadd.f32 %v8900_v60, %v5165_v52  ;;  %8949 = vmatmul.mubr.msk.f32.gmra.mxu1 %vm4599_vm2, %v5805_v37 }
 0x3af   :  { %v3657_v1 = vpop.f32.mrf.mxu0  ;;  %v5277_v36 = vpop.f32.mrf.mxu1 }
 0x3b0   :  { %v5288_v19 = vadd.f32 %v5277_v36, %v5164_v38  ;;  %v9794_v38 = vld [vmem:[%s12834_s0 + $0x730] ss:$8 sps:$4 sm:$0xff]  }
 0x3b1   :  { %v12383_v29 = vpop.f32.mrf.mxu0  ;;  %3851 = vmatmul.mubr.bf16.gmra.mxu0 %v9788_v33  ;;  %v8907_v56 = vpop.f32.mrf.mxu1  ;;  %v9797_v33 = vld [vmem:[%s12834_s0 + $0x740] ss:$8 sps:$4 sm:$0xff]  }
 0x3b2   :  { %v5411_v25 = vadd.f32 %v8907_v56, %v5287_v61  ;;  %8413 = vmatprep.mubr.msk.bf16.mxu0 %vm2309_vm0, %v9789_v50 }
 0x3b3   :  { %v3662_v6 = vpop.f32.mrf.mxu0  ;;  %v5391_v15 = vpop.f32.mrf.mxu1 }
 0x3b4   :  { %v5410_v46 = vadd.f32 %v5391_v15, %v5286_v45 }
 0x3b5   :  { %v12386_v54 = vpop.f32.mrf.mxu0  ;;  %v8910_v49 = vpop.f32.mrf.mxu1 }
 0x3b6   :  { %v5413_v22 = vadd.f32 %v8910_v49, %v5289_v0 }
 0x3b7   :  { %v3665_v27 = vpop.f32.mrf.mxu0  ;;  %v5401_v32 = vpop.f32.mrf.mxu1 }
 0x3b8   :  { %v5412_v58 = vadd.f32 %v5401_v32, %v5288_v19 }
 0x3b9   :  { %v3668_v44 = vpop.f32.mrf.mxu0  ;;  %3859 = vmatmul.mubr.bf16.gmra.mxu0 %v9791_v26  ;;  %v8917_v13 = vpop.f32.mrf.mxu1 }
 0x3ba   :  { %v5535_v52 = vadd.f32 %v8917_v13, %v5411_v25  ;;  %8414 = vmatprep.mubr.msk.bf16.mxu0 %vm2309_vm0, %v9792_v41  ;;  %v5910_v49 = vmax.f32 %v12368_v43, %v3668_v44 }
 0x3bb   :  { %v3670_v59 = vpop.f32.mrf.mxu0  ;;  %v5515_v23 = vpop.f32.mrf.mxu1 }
 0x3bc   :  { %v5534_v10 = vadd.f32 %v5515_v23, %v5410_v46 }
 0x3bd   :  { %v3671_v53 = vpop.f32.mrf.mxu0  ;;  %v8920_v12 = vpop.f32.mrf.mxu1 }
 0x3be   :  { %v12398_v16 = vadd.f32 %v8920_v12, %v5413_v22  ;;  %v5911_v32 = vmax.f32 %v12374_v62, %v3671_v53  ;;  %v8570_v62 = vld [vmem:[%s12835_s3 + $0xc0] sm:$0xff] }
 0x3bf   :  { %v3673_v61 = vpop.f32.mrf.mxu0  ;;  %v5525_v48 = vpop.f32.mrf.mxu1 }
 0x3c0   :  { %v12403_v14 = vadd.f32 %v5525_v48, %v5412_v58 }
 0x3c1   :  { %v3676_v37 = vpop.f32.mrf.mxu0  ;;  %3867 = vmatmul.mubr.bf16.gmra.mxu0 %v9794_v38 }
 0x3c2   :  { %8415 = vmatprep.mubr.msk.bf16.mxu0 %vm2309_vm0, %v9795_v28  ;;  %v5912_v28 = vmax.f32 %v12383_v29, %v3676_v37 }
 0x3c3   :  { %v3678_v45 = vpop.f32.mrf.mxu0 }
 0x3c5   :  { %v3679_v60 = vpop.f32.mrf.mxu0 }
 0x3c6   :  { %v5913_v53 = vmax.f32 %v12386_v54, %v3679_v60 }
 0x3c7   :  { %v3681_v0 = vpop.f32.mrf.mxu0 }
 0x3c9   :  { %v3684_v50 = vpop.f32.mrf.mxu0  ;;  %3875 = vmatmul.mubr.bf16.gmra.mxu0 %v9797_v33 }
 0x3cb   :  { %v3686_v1 = vpop.f32.mrf.mxu0 }
 0x3cd   :  { %v3687_v36 = vpop.f32.mrf.mxu0 }
 0x3cf   :  { %v3689_v19 = vpop.f32.mrf.mxu0 }
 0x3d1   :  { %v3692_v56 = vpop.f32.mrf.mxu0 }
 0x3d3   :  { %v3694_v25 = vpop.f32.mrf.mxu0 }
 0x3d5   :  { %v3695_v6 = vpop.f32.mrf.mxu0 }
 0x3d7   :  { %v3697_v15 = vpop.f32.mrf.mxu0 }
 0x3d9   :  { %v3700_v46 = vpop.f32.mrf.mxu0 }
 0x3da   :  { %v5914_v26 = vmax.f32 %v3684_v50, %v3700_v46 }
 0x3db   :  { %v3702_v22 = vpop.f32.mrf.mxu0 }
 0x3dc   :  { %v5918_v41 = vmax.f32 %v5910_v49, %v5914_v26 }
 0x3dd   :  { %v3703_v27 = vpop.f32.mrf.mxu0 }
 0x3de   :  { %v5922_v58 = vadd.f32 %v12250_v4, %v5918_v41  ;;  %v5915_v13 = vmax.f32 %v3687_v36, %v3703_v27  ;;  %v12427_v36 = vld [vmem:[%s12835_s3 + $0xd8] sm:$0xff] }
 0x3df   :  { %v3705_v59 = vpop.f32.mrf.mxu0 }
 0x3e0   :  { %v5926_v23 = vmax.f32 %v5922_v58, 0.0  ;;  %v5919_v12 = vmax.f32 %v5911_v32, %v5915_v13 }
 0x3e1   :  { %v3708_v38 = vpop.f32.mrf.mxu0 }
 0x3e2   :  { %v5923_v61 = vadd.f32 %v12250_v4, %v5919_v12  ;;  %v5916_v48 = vmax.f32 %v3692_v56, %v3708_v38  ;;  %8955 = vmatprep.mubr.msk.f32.mxu1 %vm4599_vm2, %v5926_v23 }
 0x3e3   :  { %v3710_v43 = vpop.f32.mrf.mxu0 }
 0x3e4   :  { %v5927_v44 = vmax.f32 %v5923_v61, 0.0  ;;  %v5920_v45 = vmax.f32 %v5912_v28, %v5916_v48 }
 0x3e5   :  { %v3711_v33 = vpop.f32.mrf.mxu0 }
 0x3e6   :  { %v5924_v0 = vadd.f32 %v12250_v4, %v5920_v45  ;;  %v5917_v50 = vmax.f32 %v3695_v6, %v3711_v33  ;;  %v8927_v1 = vpop.f32.mrf.mxu1  ;;  %8956 = vmatmul.mubr.msk.f32.vlgmr.msra.gmra.mxu1 %vm4599_vm2, %v5927_v44 }
 0x3e7   :  { %v12421_v29 = vadd.f32 %v8927_v1, %v5535_v52  ;;  %v3713_v37 = vpop.f32.mrf.mxu0  ;;  %8962 = vmatpush3.msra.mxu1 %v12366_v18 }
 0x3e8   :  { %v5928_v19 = vmax.f32 %v5924_v0, 0.0  ;;  %v5921_v56 = vmax.f32 %v5913_v53, %v5917_v50  ;;  %v5639_v25 = vpop.f32.mrf.mxu1  ;;  %8963 = vmatprep.subr.mxu1 %v8570_v62 }
 0x3e9   :  { %v12429_v54 = vadd.f32 %v5639_v25, %v5534_v10  ;;  %v3716_v60 = vpop.f32.mrf.mxu0  ;;  %8964 = vmatpush3.msra.mxu1 %v8570_v62 }
 0x3ea   :  { %v5925_v6 = vadd.f32 %v12250_v4, %v5921_v56  ;;  %8958 = vmatprep.mubr.msk.f32.mxu1 %vm4599_vm2, %v5928_v19  ;;  %8971 = vmatprep.subr.mxu1 %v12427_v36 }
 0x3eb   :  { %v3718_v18 = vpop.f32.mrf.mxu0 }
 0x3ec   :  { %v5929_v52 = vmax.f32 %v5925_v6, 0.0 }
 0x3ed   :  { %v3719_v15 = vpop.f32.mrf.mxu0 }
 0x3ee   :  { %v8930_v46 = vpop.f32.mrf.mxu1  ;;  %8959 = vmatmul.mubr.msk.f32.gmra.mxu1 %vm4599_vm2, %v5929_v52 }
 0x3ef   :  { %v12436_v49 = vadd.f32 %v8930_v46, %v12398_v16  ;;  %v3721_v26 = vpop.f32.mrf.mxu0 }
 0x3f0   :  { %v5649_v10 = vpop.f32.mrf.mxu1 }
 0x3f1   :  { %v12439_v22 = vadd.f32 %v5649_v10, %v12403_v14  ;;  %v3724_v41 = vpop.f32.mrf.mxu0 }
 0x3f3   :  { %v3726_v27 = vpop.f32.mrf.mxu0 }
 0x3f5   :  { %v3727_v32 = vpop.f32.mrf.mxu0 }
 0x3f7   :  { %v3729_v58 = vpop.f32.mrf.mxu0 }
 0x3f9   :  { %v3732_v13 = vpop.f32.mrf.mxu0 }
 0x3fa   :  { %v6034_v50 = vmax.f32 %v3716_v60, %v3732_v13 }
 0x3fb   :  { %v3734_v59 = vpop.f32.mrf.mxu0 }
 0x3fd   :  { %v3735_v23 = vpop.f32.mrf.mxu0 }
 0x3fe   :  { %v6035_v25 = vmax.f32 %v3719_v15, %v3735_v23  ;;  %v8576_v15 = vld [vmem:[%s12835_s3 + $0xd0] sm:$0xff] }
 0x3ff   :  { %v3737_v12 = vpop.f32.mrf.mxu0 }
 0x401   :  { %v3740_v38 = vpop.f32.mrf.mxu0 }
 0x402   :  { %v6036_v27 = vmax.f32 %v3724_v41, %v3740_v38 }
 0x403   :  { %v3742_v28 = vpop.f32.mrf.mxu0 }
 0x405   :  { %v3743_v61 = vpop.f32.mrf.mxu0 }
 0x406   :  { %v6037_v23 = vmax.f32 %v3727_v32, %v3743_v61 }
 0x407   :  { %v3745_v48 = vpop.f32.mrf.mxu0 }
 0x409   :  { %v3748_v43 = vpop.f32.mrf.mxu0 }
 0x40b   :  { %v3750_v16 = vpop.f32.mrf.mxu0 }
 0x40d   :  { %v3751_v44 = vpop.f32.mrf.mxu0 }
 0x40f   :  { %v3753_v45 = vpop.f32.mrf.mxu0 }
 0x411   :  { %v3756_v33 = vpop.f32.mrf.mxu0 }
 0x413   :  { %v3758_v62 = vpop.f32.mrf.mxu0 }
 0x415   :  { %v3759_v14 = vpop.f32.mrf.mxu0 }
 0x417   :  { %v3761_v53 = vpop.f32.mrf.mxu0 }
 0x419   :  { %v3764_v0 = vpop.f32.mrf.mxu0 }
 0x41a   :  { %v6038_v1 = vmax.f32 %v3748_v43, %v3764_v0 }
 0x41b   :  { %v3766_v37 = vpop.f32.mrf.mxu0 }
 0x41c   :  { %v6042_v19 = vmax.f32 %v6034_v50, %v6038_v1 }
 0x41d   :  { %v3767_v56 = vpop.f32.mrf.mxu0 }
 0x41e   :  { %v6046_v6 = vadd.f32 %v12250_v4, %v6042_v19  ;;  %v6039_v18 = vmax.f32 %v3751_v44, %v3767_v56  ;;  %v12456_v44 = vld [vmem:[%s12835_s3 + $0xe8] sm:$0xff] }
 0x41f   :  { %v3769_v52 = vpop.f32.mrf.mxu0 }
 0x420   :  { %v6050_v46 = vmax.f32 %v6046_v6, 0.0  ;;  %v6043_v26 = vmax.f32 %v6035_v25, %v6039_v18 }
 0x421   :  { %v3772_v10 = vpop.f32.mrf.mxu0 }
 0x422   :  { %v6047_v58 = vadd.f32 %v12250_v4, %v6043_v26  ;;  %v6040_v59 = vmax.f32 %v3756_v33, %v3772_v10  ;;  %8965 = vmatprep.mubr.msk.f32.mxu1 %vm4599_vm2, %v6050_v46 }
 0x423   :  { %v3774_v12 = vpop.f32.mrf.mxu0 }
 0x424   :  { %v6051_v60 = vmax.f32 %v6047_v58, 0.0  ;;  %v6044_v13 = vmax.f32 %v6036_v27, %v6040_v59 }
 0x425   :  { %v3775_v28 = vpop.f32.mrf.mxu0 }
 0x426   :  { %v6048_v48 = vadd.f32 %v12250_v4, %v6044_v13  ;;  %v6041_v43 = vmax.f32 %v3759_v14, %v3775_v28  ;;  %v8937_v16 = vpop.f32.mrf.mxu1  ;;  %8966 = vmatmul.mubr.msk.f32.vlgmr.msra.gmra.mxu1 %vm4599_vm2, %v6051_v60 }
 0x427   :  { %v12450_v41 = vadd.f32 %v8937_v16, %v12421_v29  ;;  %v3777_v38 = vpop.f32.mrf.mxu0  ;;  %8972 = vmatpush3.msra.mxu1 %v12427_v36 }
 0x428   :  { %v6052_v45 = vmax.f32 %v6048_v48, 0.0  ;;  %v6045_v33 = vmax.f32 %v6037_v23, %v6041_v43  ;;  %v5763_v32 = vpop.f32.mrf.mxu1  ;;  %8973 = vmatprep.subr.mxu1 %v8576_v15 }
 0x429   :  { %v12459_v61 = vadd.f32 %v5763_v32, %v12429_v54  ;;  %v3780_v62 = vpop.f32.mrf.mxu0  ;;  %8974 = vmatpush3.msra.mxu1 %v8576_v15 }
 0x42a   :  { %v6049_v29 = vadd.f32 %v12250_v4, %v6045_v33  ;;  %8968 = vmatprep.mubr.msk.f32.mxu1 %vm4599_vm2, %v6052_v45  ;;  %8981 = vmatprep.subr.mxu1 %v12456_v44 }
 0x42b   :  { %v3782_v36 = vpop.f32.mrf.mxu0 }
 0x42c   :  { %v6053_v14 = vmax.f32 %v6049_v29, 0.0 }
 0x42d   :  { %v3783_v53 = vpop.f32.mrf.mxu0 }
 0x42e   :  { %v8940_v0 = vpop.f32.mrf.mxu1  ;;  %8969 = vmatmul.mubr.msk.f32.gmra.mxu1 %vm4599_vm2, %v6053_v14 }
 0x42f   :  { %v12466_v50 = vadd.f32 %v8940_v0, %v12436_v49  ;;  %v3785_v1 = vpop.f32.mrf.mxu0 }
 0x430   :  { %v5773_v54 = vpop.f32.mrf.mxu1 }
 0x431   :  { %v12469_v37 = vadd.f32 %v5773_v54, %v12439_v22  ;;  %v3788_v19 = vpop.f32.mrf.mxu0 }
 0x433   :  { %v3790_v56 = vpop.f32.mrf.mxu0 }
 0x435   :  { %v3791_v25 = vpop.f32.mrf.mxu0 }
 0x437   :  { %v3793_v6 = vpop.f32.mrf.mxu0 }
 0x439   :  { %v3796_v18 = vpop.f32.mrf.mxu0 }
 0x43a   :  { %v6158_v43 = vmax.f32 %v3780_v62, %v3796_v18 }
 0x43b   :  { %v3798_v52 = vpop.f32.mrf.mxu0 }
 0x43d   :  { %v3799_v46 = vpop.f32.mrf.mxu0 }
 0x43e   :  { %v6159_v32 = vmax.f32 %v3783_v53, %v3799_v46  ;;  %v8582_v53 = vld [vmem:[%s12835_s3 + $0xe0] sm:$0xff] }
 0x43f   :  { %v3801_v26 = vpop.f32.mrf.mxu0 }
 0x441   :  { %v3804_v10 = vpop.f32.mrf.mxu0 }
 0x442   :  { %v6160_v56 = vmax.f32 %v3788_v19, %v3804_v10 }
 0x443   :  { %v3806_v27 = vpop.f32.mrf.mxu0 }
 0x445   :  { %v3807_v58 = vpop.f32.mrf.mxu0 }
 0x446   :  { %v6161_v46 = vmax.f32 %v3791_v25, %v3807_v58 }
 0x447   :  { %v3809_v59 = vpop.f32.mrf.mxu0 }
 0x449   :  { %v3812_v12 = vpop.f32.mrf.mxu0 }
 0x44b   :  { %v3814_v49 = vpop.f32.mrf.mxu0 }
 0x44d   :  { %v3815_v60 = vpop.f32.mrf.mxu0 }
 0x44f   :  { %v3817_v13 = vpop.f32.mrf.mxu0 }
 0x451   :  { %v3820_v28 = vpop.f32.mrf.mxu0 }
 0x453   :  { %v3822_v15 = vpop.f32.mrf.mxu0 }
 0x455   :  { %v3823_v22 = vpop.f32.mrf.mxu0 }
 0x457   :  { %v3825_v23 = vpop.f32.mrf.mxu0 }
 0x459   :  { %v3828_v48 = vpop.f32.mrf.mxu0 }
 0x45a   :  { %v6162_v16 = vmax.f32 %v3812_v12, %v3828_v48 }
 0x45b   :  { %v3830_v38 = vpop.f32.mrf.mxu0 }
 0x45c   :  { %v6166_v45 = vmax.f32 %v6158_v43, %v6162_v16 }
 0x45d   :  { %v3831_v33 = vpop.f32.mrf.mxu0 }
 0x45e   :  { %v6170_v29 = vadd.f32 %v12250_v4, %v6166_v45  ;;  %v6163_v36 = vmax.f32 %v3815_v60, %v3831_v33  ;;  %v8589_v60 = vld [vmem:[%s12835_s3 + $0xf8] sm:$0xff] }
 0x45f   :  { %v3833_v14 = vpop.f32.mrf.mxu0 }
 0x460   :  { %v6174_v0 = vmax.f32 %v6170_v29, 0.0  ;;  %v6167_v1 = vmax.f32 %v6159_v32, %v6163_v36 }
 0x461   :  { %v3836_v54 = vpop.f32.mrf.mxu0 }
 0x462   :  { %v6171_v6 = vadd.f32 %v12250_v4, %v6167_v1  ;;  %v6164_v52 = vmax.f32 %v3820_v28, %v3836_v54  ;;  %8975 = vmatprep.mubr.msk.f32.mxu1 %vm4599_vm2, %v6174_v0 }
 0x463   :  { %v3838_v26 = vpop.f32.mrf.mxu0 }
 0x464   :  { %v6175_v62 = vmax.f32 %v6171_v6, 0.0  ;;  %v6168_v18 = vmax.f32 %v6160_v56, %v6164_v52 }
 0x465   :  { %v3839_v27 = vpop.f32.mrf.mxu0 }
 0x466   :  { %v6172_v59 = vadd.f32 %v12250_v4, %v6168_v18  ;;  %v6165_v12 = vmax.f32 %v3823_v22, %v3839_v27  ;;  %v8947_v49 = vpop.f32.mrf.mxu1  ;;  %8976 = vmatmul.mubr.msk.f32.vlgmr.msra.gmra.mxu1 %vm4599_vm2, %v6175_v62 }
 0x467   :  { %v12480_v19 = vadd.f32 %v8947_v49, %v12450_v41  ;;  %v3841_v10 = vpop.f32.mrf.mxu0  ;;  %8982 = vmatpush3.msra.mxu1 %v12456_v44 }
 0x468   :  { %v6176_v13 = vmax.f32 %v6172_v59, 0.0  ;;  %v6169_v28 = vmax.f32 %v6161_v46, %v6165_v12  ;;  %v5887_v15 = vpop.f32.mrf.mxu1  ;;  %8983 = vmatprep.subr.mxu1 %v8582_v53  ;;  %v12893_v46 = vmax.f32 %v10239_v51, %v10283_v11 }
 0x469   :  { %v12487_v25 = vadd.f32 %v5887_v15, %v12459_v61  ;;  %v3844_v58 = vpop.f32.mrf.mxu0  ;;  %8984 = vmatpush3.msra.mxu1 %v8582_v53  ;;  %v12894_v15 = vmax.f32 %v10245_v55, %v10293_v17  ;;  %v8588_v55 = vld [vmem:[%s12835_s3 + $0xf0] sm:$0xff]  ;;  %v8595_v17 = vld [vmem:[%s12835_s3 + $0x108] sm:$0xff] }
 0x46a   :  { %v6173_v22 = vadd.f32 %v12250_v4, %v6169_v28  ;;  %8978 = vmatprep.mubr.msk.f32.mxu1 %vm4599_vm2, %v6176_v13  ;;  %8991 = vmatprep.subr.mxu1 %v8589_v60 }
 0x46b   :  { %v3846_v41 = vpop.f32.mrf.mxu0 }
 0x46c   :  { %v6177_v44 = vmax.f32 %v6173_v22, 0.0 }
 0x46d   :  { %v3847_v23 = vpop.f32.mrf.mxu0 }
 0x46e   :  { %v8950_v48 = vpop.f32.mrf.mxu1  ;;  %8979 = vmatmul.mubr.msk.f32.gmra.mxu1 %vm4599_vm2, %v6177_v44 }
 0x46f   :  { %v12493_v43 = vadd.f32 %v8950_v48, %v12466_v50  ;;  %v3849_v16 = vpop.f32.mrf.mxu0  ;;  %v12895_v48 = vld [vmem:[#allocation2_spill] sm:$0xff] }
 0x470   :  { %v5897_v38 = vpop.f32.mrf.mxu1  ;;  %v6419_v16 = vadd.f32 %v12250_v4, %v12895_v48  ;;  %v8606_v48 = vld [vmem:[%s12835_s3 + $0x120] sm:$0xff] }
 0x471   :  { %v12496_v61 = vadd.f32 %v5897_v38, %v12469_v37  ;;  %v3852_v45 = vpop.f32.mrf.mxu0 }
 0x473   :  { %v3854_v33 = vpop.f32.mrf.mxu0 }
 0x475   :  { %v3855_v32 = vpop.f32.mrf.mxu0 }
 0x477   :  { %v3857_v29 = vpop.f32.mrf.mxu0 }
 0x479   :  { %v3860_v36 = vpop.f32.mrf.mxu0 }
 0x47a   :  { %v6282_v62 = vmax.f32 %v3844_v58, %v3860_v36 }
 0x47b   :  { %v3862_v14 = vpop.f32.mrf.mxu0 }
 0x47c   :  { %v12898_v14 = vld [vmem:[#allocation5_spill] sm:$0xff] }
 0x47d   :  { %v3863_v0 = vpop.f32.mrf.mxu0 }
 0x47e   :  { %v6283_v49 = vmax.f32 %v3847_v23, %v3863_v0  ;;  %v6418_v23 = vadd.f32 %v12250_v4, %v10461_v24  ;;  %v6542_v0 = vadd.f32 %v12250_v4, %v12898_v14 }
 0x47f   :  { %v3865_v1 = vpop.f32.mrf.mxu0 }
 0x480   :  { %v6422_v24 = vmax.f32 %v6418_v23, 0.0  ;;  %v8594_v1 = vld [vmem:[%s12835_s3 + $0x100] sm:$0xff] }
 0x481   :  { %v3868_v54 = vpop.f32.mrf.mxu0 }
 0x482   :  { %v6284_v26 = vmax.f32 %v3852_v45, %v3868_v54  ;;  %v12896_v45 = vld [vmem:[#allocation3_spill] sm:$0xff]  ;;  %v8601_v54 = vld [vmem:[%s12835_s3 + $0x118] sm:$0xff] }
 0x483   :  { %v3870_v56 = vpop.f32.mrf.mxu0  ;;  %v6420_v33 = vadd.f32 %v12250_v4, %v12896_v45  ;;  %v12907_v45 = vld [vmem:[#allocation14_spill] sm:$0xff] }
 0x484   :  { %v6292_v59 = vmax.f32 %v6284_v26, %v12893_v46  ;;  %v6546_v26 = vmax.f32 %v6542_v0, 0.0  ;;  %v12902_v46 = vld [vmem:[#allocation9_spill] sm:$0xff]  ;;  %v12596_v0 = vld [vmem:[%s12836_s2] ss:$0 sm:$0xff] }
 0x485   :  { %v3871_v6 = vpop.f32.mrf.mxu0  ;;  %v6424_v36 = vmax.f32 %v6420_v33, 0.0  ;;  %v6791_v33 = vadd.f32 %v12250_v4, %v12907_v45 }
 0x486   :  { %v6285_v37 = vmax.f32 %v3855_v32, %v3871_v6  ;;  %v6296_v41 = vadd.f32 %v12250_v4, %v6292_v59  ;;  %v12897_v32 = vld [vmem:[#allocation4_spill] sm:$0xff]  ;;  %v12899_v6 = vld [vmem:[#allocation6_spill] sm:$0xff]  ;;  %v6666_v59 = vadd.f32 %v12250_v4, %v12902_v46 }
 0x487   :  { %v3873_v52 = vpop.f32.mrf.mxu0  ;;  %v6421_v29 = vadd.f32 %v12250_v4, %v12897_v32  ;;  %v6795_v14 = vmax.f32 %v6791_v33, 0.0  ;;  %v12913_v46 = vld [vmem:[#allocation20_spill] sm:$0xff] }
 0x488   :  { %v6293_v58 = vmax.f32 %v6285_v37, %v12894_v15  ;;  %v6543_v52 = vadd.f32 %v12250_v4, %v12899_v6  ;;  %v12903_v15 = vld [vmem:[#allocation10_spill] sm:$0xff]  ;;  %v8612_v6 = vld [vmem:[%s12835_s3 + $0x130] sm:$0xff] }
 0x489   :  { %v3876_v50 = vpop.f32.mrf.mxu0  ;;  %v6425_v56 = vmax.f32 %v6421_v29, 0.0  ;;  %v12908_v29 = vld [vmem:[#allocation15_spill] sm:$0xff] }
 0x48a   :  { %v6286_v18 = vmax.f32 %v3876_v50, %v10261_v63  ;;  %v6297_v51 = vadd.f32 %v12250_v4, %v6293_v58  ;;  %v12900_v50 = vld [vmem:[#allocation7_spill] sm:$0xff]  ;;  %v6667_v58 = vadd.f32 %v12250_v4, %v12903_v15  ;;  %v8625_v15 = vld [vmem:[%s12835_s3 + $0x158] sm:$0xff] }
 0x48b   :  { %v3878_v27 = vpop.f32.mrf.mxu0 }
 0x48c   :  { %v6290_v53 = vmax.f32 %v6282_v62, %v6286_v18  ;;  %v6301_v38 = vmax.f32 %v6297_v51, 0.0  ;;  %v6544_v62 = vadd.f32 %v12250_v4, %v12900_v50  ;;  %v6547_v18 = vmax.f32 %v6543_v52, 0.0  ;;  %v12901_v27 = vld [vmem:[#allocation8_spill] sm:$0xff]  ;;  %v8619_v52 = vld [vmem:[%s12835_s3 + $0x148] sm:$0xff]  ;;  %v12911_v50 = vld [vmem:[#allocation18_spill] sm:$0xff] }
 0x48d   :  { %v3879_v12 = vpop.f32.mrf.mxu0  ;;  %v6545_v37 = vadd.f32 %v12250_v4, %v12901_v27  ;;  %v6671_v51 = vmax.f32 %v6667_v58, 0.0  ;;  %v12912_v27 = vld [vmem:[#allocation19_spill] sm:$0xff] }
 0x48e   :  { %v6294_v10 = vadd.f32 %v12250_v4, %v6290_v53  ;;  %v6287_v13 = vmax.f32 %v3879_v12, %v10267_v3  ;;  %v6300_v3 = vmax.f32 %v6296_v41, 0.0  ;;  %v6548_v53 = vmax.f32 %v6544_v62, 0.0  ;;  %v8600_v12 = vld [vmem:[%s12835_s3 + $0x110] sm:$0xff]  ;;  %v12904_v41 = vld [vmem:[#allocation11_spill] sm:$0xff] }
 0x48f   :  { %v3881_v28 = vpop.f32.mrf.mxu0  ;;  %v6915_v62 = vadd.f32 %v12596_v0, %v12911_v50 }
 0x490   :  { %v6298_v22 = vmax.f32 %v6294_v10, 0.0  ;;  %v6291_v63 = vmax.f32 %v6283_v49, %v6287_v13  ;;  %v8607_v13 = vld [vmem:[%s12835_s3 + $0x128] sm:$0xff]  ;;  %v6549_v28 = vmax.f32 %v6545_v37, 0.0  ;;  %v6916_v37 = vadd.f32 %v12596_v0, %v12912_v27 }
 0x492   :  { %v6295_v44 = vadd.f32 %v12250_v4, %v6291_v63  ;;  %8985 = vmatprep.mubr.msk.f32.mxu1 %vm4599_vm2, %v6298_v22  ;;  %v6670_v63 = vmax.f32 %v6666_v59, 0.0  ;;  %v6917_v59 = vadd.f32 %v12596_v0, %v12913_v46 }
 0x494   :  { %v6299_v11 = vmax.f32 %v6295_v44, 0.0  ;;  %v6668_v44 = vadd.f32 %v12250_v4, %v12904_v41  ;;  %v6921_v58 = vmax.f32 %v6917_v59, 0.0 }
 0x496   :  { %8986 = vmatmul.mubr.msk.f32.vlgmr.msra.gmra.mxu1 %vm4599_vm2, %v6299_v11  ;;  %v12905_v11 = vld [vmem:[#allocation12_spill] sm:$0xff] }
 0x497   :  { %8992 = vmatpush3.msra.mxu1 %v8589_v60  ;;  %8988 = vmatprep.mubr.msk.f32.mxu1 %vm4599_vm2, %v6300_v3  ;;  %v6423_v60 = vmax.f32 %v6419_v16, 0.0  ;;  %v6669_v23 = vadd.f32 %v12250_v4, %v12905_v11  ;;  %v6672_v3 = vmax.f32 %v6668_v44, 0.0  ;;  %v12916_v44 = vld [vmem:[#allocation23_spill] sm:$0xff] }
 0x498   :  { %8993 = vmatprep.subr.mxu1 %v8588_v55 }
 0x499   :  { %8994 = vmatpush3.msra.mxu1 %v8588_v55  ;;  %v12906_v55 = vld [vmem:[#allocation13_spill] sm:$0xff] }
 0x49a   :  { %8989 = vmatmul.mubr.msk.f32.gmra.mxu1 %vm4599_vm2, %v6301_v38  ;;  %9001 = vmatprep.subr.mxu1 %v8595_v17  ;;  %v8613_v38 = vld [vmem:[%s12835_s3 + $0x138] sm:$0xff] }
 0x49b   :  { %8995 = vmatprep.mubr.msk.f32.mxu1 %vm4599_vm2, %v6422_v24  ;;  %v6673_v24 = vmax.f32 %v6669_v23, 0.0  ;;  %v12917_v23 = vld [vmem:[#allocation24_spill] sm:$0xff] }
 0x49e   :  { %8996 = vmatmul.mubr.msk.f32.vlgmr.msra.gmra.mxu1 %vm4599_vm2, %v6423_v60 }
 0x49f   :  { %9002 = vmatpush3.msra.mxu1 %v8595_v17  ;;  %8998 = vmatprep.mubr.msk.f32.mxu1 %vm4599_vm2, %v6424_v36  ;;  %v6790_v17 = vadd.f32 %v12250_v4, %v12906_v55  ;;  %v6792_v36 = vadd.f32 %v12250_v4, %v12908_v29  ;;  %v12910_v4 = vld [vmem:[#allocation17_spill] sm:$0xff]  ;;  %v7286_v29 = vadd.f32 %v12596_v0, %v11964_v35 }
 0x4a0   :  { %9003 = vmatprep.subr.mxu1 %v8594_v1  ;;  %v7288_v35 = vadd.f32 %v12596_v0, %v11995_v31  ;;  %v8643_v31 = vld [vmem:[%s12835_s3 + $0x188] sm:$0xff] }
 0x4a1   :  { %9004 = vmatpush3.msra.mxu1 %v8594_v1  ;;  %v6794_v32 = vmax.f32 %v6790_v17, 0.0  ;;  %v12909_v1 = vld [vmem:[#allocation16_spill] sm:$0xff]  ;;  %v7162_v17 = vadd.f32 %v12596_v0, %v11677_v30  ;;  %v7164_v30 = vadd.f32 %v12596_v0, %v11706_v57  ;;  %v8637_v57 = vld [vmem:[%s12835_s3 + $0x178] sm:$0xff] }
 0x4a2   :  { %8999 = vmatmul.mubr.msk.f32.gmra.mxu1 %vm4599_vm2, %v6425_v56  ;;  %9011 = vmatprep.subr.mxu1 %v8601_v54  ;;  %v6796_v56 = vmax.f32 %v6792_v36, 0.0 }
 0x4a3   :  { %9005 = vmatprep.mubr.msk.f32.mxu1 %vm4599_vm2, %v6546_v26  ;;  %v7166_v45 = vmax.f32 %v7162_v17, 0.0 }
 0x4a6   :  { %v8957_v49 = vpop.f32.mrf.mxu1  ;;  %9006 = vmatmul.mubr.msk.f32.vlgmr.msra.gmra.mxu1 %vm4599_vm2, %v6547_v18 }
 0x4a7   :  { %v12554_v10 = vadd.f32 %v8957_v49, %v12480_v19  ;;  %9012 = vmatpush3.msra.mxu1 %v8601_v54  ;;  %9008 = vmatprep.mubr.msk.f32.mxu1 %vm4599_vm2, %v6548_v53  ;;  %v6793_v54 = vadd.f32 %v12596_v0, %v12909_v1  ;;  %v6919_v53 = vmax.f32 %v6915_v62, 0.0  ;;  %v12914_v49 = vld [vmem:[#allocation21_spill] sm:$0xff]  ;;  %v7534_v62 = vadd.f32 %v12596_v0, %v12271_v47 }
 0x4a8   :  { %v6011_v22 = vpop.f32.mrf.mxu1  ;;  %9013 = vmatprep.subr.mxu1 %v8600_v12 }
 0x4a9   :  { %v12565_v19 = vadd.f32 %v6011_v22, %v12487_v25  ;;  %9014 = vmatpush3.msra.mxu1 %v8600_v12  ;;  %v6797_v26 = vmax.f32 %v6793_v54, 0.0  ;;  %v6920_v12 = vmax.f32 %v6916_v37, 0.0  ;;  %v12915_v22 = vld [vmem:[#allocation22_spill] sm:$0xff]  ;;  %v7289_v54 = vadd.f32 %v12596_v0, %v12016_v40 }
 0x4aa   :  { %9009 = vmatmul.mubr.msk.f32.gmra.mxu1 %vm4599_vm2, %v6549_v28  ;;  %9021 = vmatprep.subr.mxu1 %v8607_v13  ;;  %v8618_v28 = vld [vmem:[%s12835_s3 + $0x140] sm:$0xff]  ;;  %v7411_v40 = vadd.f32 %v12596_v0, %v12137_v5  ;;  %v7538_v27 = vmax.f32 %v7534_v62, 0.0  ;;  %v7537_v37 = vadd.f32 %v12596_v0, %v12305_v42 }
 0x4ab   :  { %9015 = vmatprep.mubr.msk.f32.mxu1 %vm4599_vm2, %v6670_v63  ;;  %v7039_v63 = vadd.f32 %v12596_v0, %v12915_v22  ;;  %v8642_v5 = vld [vmem:[%s12835_s3 + $0x180] sm:$0xff] }
 0x4ac   :  { %v7541_v59 = vmax.f32 %v7537_v37, 0.0  ;;  %v7669_v22 = vld [vmem:[%s12837_s5 + $0x40] sm:$0xff] }
 0x4ad   :  { %v7043_v11 = vmax.f32 %v7039_v63, 0.0  ;;  %v7668_v63 = vld [vmem:[%s12837_s5 + $0x38] sm:$0xff] }
 0x4ae   :  { %v8960_v25 = vpop.f32.mrf.mxu1  ;;  %9016 = vmatmul.mubr.msk.f32.vlgmr.msra.gmra.mxu1 %vm4599_vm2, %v6671_v51  ;;  %v7040_v51 = vadd.f32 %v12596_v0, %v12916_v44  ;;  %v7666_v44 = vld [vmem:[%s12837_s5 + $0x28] sm:$0xff] }
 0x4af   :  { %v12578_v16 = vadd.f32 %v8960_v25, %v12493_v43  ;;  %9022 = vmatpush3.msra.mxu1 %v8607_v13  ;;  %9018 = vmatprep.mubr.msk.f32.mxu1 %vm4599_vm2, %v6672_v3  ;;  %v7038_v13 = vadd.f32 %v12596_v0, %v12914_v49  ;;  %v7041_v3 = vadd.f32 %v12596_v0, %v12917_v23  ;;  %v8631_v25 = vld [vmem:[%s12835_s3 + $0x168] sm:$0xff] }
 0x4b0   :  { %v6021_v60 = vpop.f32.mrf.mxu1  ;;  %9023 = vmatprep.subr.mxu1 %v8606_v48  ;;  %v7044_v55 = vmax.f32 %v7040_v51, 0.0  ;;  %v7665_v51 = vld [vmem:[%s12837_s5 + $0x20] sm:$0xff] }
 0x4b1   :  { %v12589_v43 = vadd.f32 %v6021_v60, %v12496_v61  ;;  %9024 = vmatpush3.msra.mxu1 %v8606_v48  ;;  %v6914_v61 = vadd.f32 %v12596_v0, %v12910_v4  ;;  %v7042_v41 = vmax.f32 %v7038_v13, 0.0  ;;  %v8624_v48 = vld [vmem:[%s12835_s3 + $0x150] sm:$0xff]  ;;  %v7165_v60 = vadd.f32 %v12596_v0, %v11723_v34 }
 0x4b2   :  { %9019 = vmatmul.mubr.msk.f32.gmra.mxu1 %vm4599_vm2, %v6673_v24  ;;  %9031 = vmatprep.subr.mxu1 %v8613_v38  ;;  %v7163_v24 = vadd.f32 %v12596_v0, %v11693_v8  ;;  %v8630_v8 = vld [vmem:[%s12835_s3 + $0x160] sm:$0xff]  ;;  %v7287_v34 = vadd.f32 %v12596_v0, %v11981_v20  ;;  %v7410_v4 = vadd.f32 %v12596_v0, %v12124_v9  ;;  %v8636_v20 = vld [vmem:[%s12835_s3 + $0x170] sm:$0xff] }
 0x4b3   :  { %9025 = vmatprep.mubr.msk.f32.mxu1 %vm4599_vm2, %v6794_v32  ;;  %v6918_v18 = vmax.f32 %v6914_v61, 0.0  ;;  %v7168_v32 = vmax.f32 %v7164_v30, 0.0  ;;  %v7169_v36 = vmax.f32 %v7165_v60, 0.0  ;;  %v7293_v61 = vmax.f32 %v7289_v54, 0.0  ;;  %v12763_v60 = vld [vmem:[%s12838_s7 + $0x78] sm:$0xff] }
 0x4b4   :  { %v7167_v33 = vmax.f32 %v7163_v24, 0.0  ;;  %v7291_v1 = vmax.f32 %v7287_v34, 0.0  ;;  %v7412_v9 = vadd.f32 %v12596_v0, %v12145_v2 }
 0x4b6   :  { %9026 = vmatmul.mubr.msk.f32.vlgmr.msra.gmra.mxu1 %vm4599_vm2, %v6795_v14  ;;  %v7290_v14 = vmax.f32 %v7286_v29, 0.0  ;;  %v7416_v50 = vmax.f32 %v7412_v9, 0.0 }
 0x4b7   :  { %9032 = vmatpush3.msra.mxu1 %v8613_v38  ;;  %9028 = vmatprep.mubr.msk.f32.mxu1 %vm4599_vm2, %v6796_v56  ;;  %v7045_v38 = vmax.f32 %v7041_v3, 0.0  ;;  %v7292_v56 = vmax.f32 %v7288_v35, 0.0  ;;  %v7664_v3 = vld [vmem:[%s12837_s5 + $0x18] sm:$0xff] }
 0x4b8   :  { %9033 = vmatprep.subr.mxu1 %v8612_v6 }
 0x4b9   :  { %9034 = vmatpush3.msra.mxu1 %v8612_v6  ;;  %v7414_v6 = vmax.f32 %v7410_v4, 0.0 }
 0x4ba   :  { %9029 = vmatmul.mubr.msk.f32.gmra.mxu1 %vm4599_vm2, %v6797_v26  ;;  %9041 = vmatprep.subr.mxu1 %v8619_v52  ;;  %v7413_v26 = vadd.f32 %v12596_v0, %v12158_v7  ;;  %v7536_v7 = vadd.f32 %v12596_v0, %v12292_v21 }
 0x4bb   :  { %9035 = vmatprep.mubr.msk.f32.mxu1 %vm4599_vm2, %v6918_v18  ;;  %v7535_v18 = vadd.f32 %v12596_v0, %v12284_v39  ;;  %v7676_v0 = vld [vmem:[%s12837_s5 + $0x78] sm:$0xff] }
 0x4bc   :  { %v7417_v2 = vmax.f32 %v7413_v26, 0.0 }
 0x4bd   :  { %v7539_v47 = vmax.f32 %v7535_v18, 0.0 }
 0x4be   :  { %9036 = vmatmul.mubr.msk.f32.vlgmr.msra.gmra.mxu1 %vm4599_vm2, %v6919_v53  ;;  %v7540_v53 = vmax.f32 %v7536_v7, 0.0 }
 0x4bf   :  { %9042 = vmatpush3.msra.mxu1 %v8619_v52  ;;  %9038 = vmatprep.mubr.msk.f32.mxu1 %vm4599_vm2, %v6920_v12  ;;  %v7415_v52 = vmax.f32 %v7411_v40, 0.0 }
 0x4c0   :  { %9043 = vmatprep.subr.mxu1 %v8618_v28 }
 0x4c1   :  { %9044 = vmatpush3.msra.mxu1 %v8618_v28 }
 0x4c2   :  { %9039 = vmatmul.mubr.msk.f32.gmra.mxu1 %vm4599_vm2, %v6921_v58  ;;  %9051 = vmatprep.subr.mxu1 %v8625_v15  ;;  %v7670_v58 = vld [vmem:[%s12837_s5 + $0x48] sm:$0xff] }
 0x4c3   :  { %9045 = vmatprep.mubr.msk.f32.mxu1 %vm4599_vm2, %v7042_v41  ;;  %v7667_v41 = vld [vmem:[%s12837_s5 + $0x30] sm:$0xff] }
 0x4c6   :  { %9046 = vmatmul.mubr.msk.f32.vlgmr.msra.gmra.mxu1 %vm4599_vm2, %v7043_v11 }
 0x4c7   :  { %9052 = vmatpush3.msra.mxu1 %v8625_v15  ;;  %9048 = vmatprep.mubr.msk.f32.mxu1 %vm4599_vm2, %v7044_v55  ;;  %v7671_v15 = vld [vmem:[%s12837_s5 + $0x50] sm:$0xff] }
 0x4c8   :  { %9053 = vmatprep.subr.mxu1 %v8624_v48 }
 0x4c9   :  { %9054 = vmatpush3.msra.mxu1 %v8624_v48  ;;  %v7663_v48 = vld [vmem:[%s12837_s5 + $0x10] sm:$0xff] }
 0x4ca   :  { %9049 = vmatmul.mubr.msk.f32.gmra.mxu1 %vm4599_vm2, %v7045_v38  ;;  %9061 = vmatprep.subr.mxu1 %v8631_v25  ;;  %v7661_v38 = vld [vmem:[%s12837_s5] sm:$0xff] }
 0x4cb   :  { %9055 = vmatprep.mubr.msk.f32.mxu1 %vm4599_vm2, %v7166_v45 }
 0x4ce   :  { %9056 = vmatmul.mubr.msk.f32.vlgmr.msra.gmra.mxu1 %vm4599_vm2, %v7167_v33 }
 0x4cf   :  { %9062 = vmatpush3.msra.mxu1 %v8631_v25  ;;  %9058 = vmatprep.mubr.msk.f32.mxu1 %vm4599_vm2, %v7168_v32  ;;  %v7662_v25 = vld [vmem:[%s12837_s5 + $0x8] sm:$0xff] }
 0x4d0   :  { %9063 = vmatprep.subr.mxu1 %v8630_v8 }
 0x4d1   :  { %9064 = vmatpush3.msra.mxu1 %v8630_v8 }
 0x4d2   :  { %9059 = vmatmul.mubr.msk.f32.gmra.mxu1 %vm4599_vm2, %v7169_v36  ;;  %9071 = vmatprep.subr.mxu1 %v8637_v57 }
 0x4d3   :  { %9065 = vmatprep.mubr.msk.f32.mxu1 %vm4599_vm2, %v7290_v14 }
 0x4d6   :  { %9066 = vmatmul.mubr.msk.f32.vlgmr.msra.gmra.mxu1 %vm4599_vm2, %v7291_v1 }
 0x4d7   :  { %9072 = vmatpush3.msra.mxu1 %v8637_v57  ;;  %9068 = vmatprep.mubr.msk.f32.mxu1 %vm4599_vm2, %v7292_v56 }
 0x4d8   :  { %9073 = vmatprep.subr.mxu1 %v8636_v20 }
 0x4d9   :  { %9074 = vmatpush3.msra.mxu1 %v8636_v20 }
 0x4da   :  { %9069 = vmatmul.mubr.msk.f32.gmra.mxu1 %vm4599_vm2, %v7293_v61  ;;  %9081 = vmatprep.subr.mxu1 %v8643_v31 }
 0x4db   :  { %9075 = vmatprep.mubr.msk.f32.mxu1 %vm4599_vm2, %v7414_v6 }
 0x4de   :  { %9076 = vmatmul.mubr.msk.f32.vlgmr.msra.gmra.mxu1 %vm4599_vm2, %v7415_v52 }
 0x4df   :  { %9082 = vmatpush3.msra.mxu1 %v8643_v31  ;;  %9078 = vmatprep.mubr.msk.f32.mxu1 %vm4599_vm2, %v7416_v50 }
 0x4e0   :  { %9083 = vmatprep.subr.mxu1 %v8642_v5 }
 0x4e1   :  { %9084 = vmatpush3.msra.mxu1 %v8642_v5 }
 0x4e2   :  { %9079 = vmatmul.mubr.msk.f32.gmra.mxu1 %vm4599_vm2, %v7417_v2  ;;  %9091 = vmatprep.subr.mxu1 %v7676_v0 }
 0x4e3   :  { %9085 = vmatprep.mubr.msk.f32.mxu1 %vm4599_vm2, %v7538_v27 }
 0x4e6   :  { %v8967_v46 = vpop.f32.mrf.mxu1  ;;  %9086 = vmatmul.mubr.msk.f32.vlgmr.msra.gmra.mxu1 %vm4599_vm2, %v7539_v47 }
 0x4e7   :  { %v6155_v39 = vadd.f32 %v8967_v46, %v12554_v10  ;;  %9088 = vmatprep.mubr.msk.f32.mxu1 %vm4599_vm2, %v7540_v53  ;;  %9092 = vmatpush3.msra.mxu1 %v7676_v0  ;;  %v7675_v10 = vld [vmem:[%s12837_s5 + $0x70] sm:$0xff] }
 0x4e8   :  { %v6135_v12 = vpop.f32.mrf.mxu1  ;;  %9093 = vmatprep.subr.mxu1 %v7675_v10 }
 0x4e9   :  { %v6154_v21 = vadd.f32 %v6135_v12, %v12565_v19  ;;  %9094 = vmatpush3.msra.mxu1 %v7675_v10  ;;  %v7674_v19 = vld [vmem:[%s12837_s5 + $0x68] sm:$0xff] }
 0x4ea   :  { %9089 = vmatmul.mubr.msk.f32.gmra.mxu1 %vm4599_vm2, %v7541_v59  ;;  %9095 = vmatprep.subr.mxu1 %v7674_v19 }
 0x4eb   :  { %9096 = vmatpush3.msra.mxu1 %v7674_v19 }
 0x4ee   :  { %v8970_v49 = vpop.f32.mrf.mxu1 }
 0x4ef   :  { %v6157_v13 = vadd.f32 %v8970_v49, %v12578_v16  ;;  %v7673_v16 = vld [vmem:[%s12837_s5 + $0x60] sm:$0xff] }
 0x4f0   :  { %v6145_v28 = vpop.f32.mrf.mxu1  ;;  %9097 = vmatprep.subr.mxu1 %v7673_v16 }
 0x4f1   :  { %v6156_v42 = vadd.f32 %v6145_v28, %v12589_v43  ;;  %9098 = vmatpush3.msra.mxu1 %v7673_v16  ;;  %v7672_v43 = vld [vmem:[%s12837_s5 + $0x58] sm:$0xff] }
 0x4f2   :  { %9099 = vmatprep.subr.mxu1 %v7672_v43 }
 0x4f3   :  { %9100 = vmatpush3.msra.mxu1 %v7672_v43 }
 0x4f4   :  { %9101 = vmatprep.subr.mxu1 %v7671_v15 }
 0x4f5   :  { %9102 = vmatpush3.msra.mxu1 %v7671_v15 }
 0x4f6   :  { %9103 = vmatprep.subr.mxu1 %v7670_v58 }
 0x4f7   :  { %9104 = vmatpush3.msra.mxu1 %v7670_v58 }
 0x4f8   :  { %9105 = vmatprep.subr.mxu1 %v7669_v22 }
 0x4f9   :  { %9106 = vmatpush3.msra.mxu1 %v7669_v22 }
 0x4fa   :  { %9107 = vmatprep.subr.mxu1 %v7668_v63 }
 0x4fb   :  { %9108 = vmatpush3.msra.mxu1 %v7668_v63 }
 0x4fc   :  { %9109 = vmatprep.subr.mxu1 %v7667_v41 }
 0x4fd   :  { %9110 = vmatpush3.msra.mxu1 %v7667_v41 }
 0x4fe   :  { %9111 = vmatprep.subr.mxu1 %v7666_v44 }
 0x4ff   :  { %9112 = vmatpush3.msra.mxu1 %v7666_v44 }
 0x500   :  { %9113 = vmatprep.subr.mxu1 %v7665_v51 }
 0x501   :  { %9114 = vmatpush3.msra.mxu1 %v7665_v51 }
 0x502   :  { %9115 = vmatprep.subr.mxu1 %v7664_v3 }
 0x503   :  { %9116 = vmatpush3.msra.mxu1 %v7664_v3 }
 0x504   :  { %9117 = vmatprep.subr.mxu1 %v7663_v48 }
 0x505   :  { %9118 = vmatpush3.msra.mxu1 %v7663_v48 }
 0x506   :  { %9119 = vmatprep.subr.mxu1 %v7662_v25 }
 0x507   :  { %9120 = vmatpush3.msra.mxu1 %v7662_v25 }
 0x508   :  { %9121 = vmatprep.subr.mxu1 %v7661_v38 }
 0x509   :  { %9122 = vmatpush3.msra.mxu1 %v7661_v38 }
 0x50a   :  { %9129 = vmatprep.subr.mxu1 %v12763_v60 }
 0x526   :  { %v8977_v11 = vpop.f32.mrf.mxu1 }
 0x527   :  { %v6279_v23 = vadd.f32 %v8977_v11, %v6155_v39 }
 0x528   :  { %v6259_v55 = vpop.f32.mrf.mxu1 }
 0x529   :  { %v6278_v17 = vadd.f32 %v6259_v55, %v6154_v21 }
 0x52e   :  { %v8980_v24 = vpop.f32.mrf.mxu1 }
 0x52f   :  { %v6281_v45 = vadd.f32 %v8980_v24, %v6157_v13 }
 0x530   :  { %v6269_v30 = vpop.f32.mrf.mxu1 }
 0x531   :  { %v6280_v33 = vadd.f32 %v6269_v30, %v6156_v42 }
 0x556   :  { %v8987_v32 = vpop.f32.mrf.mxu1 }
 0x557   :  { %v6403_v39 = vadd.f32 %v8987_v32, %v6279_v23 }
 0x558   :  { %v6383_v29 = vpop.f32.mrf.mxu1 }
 0x559   :  { %v6402_v12 = vadd.f32 %v6383_v29, %v6278_v17 }
 0x55a   :  { %v8990_v8 = vpop.f32.mrf.mxu1 }
 0x55b   :  { %v6405_v13 = vadd.f32 %v8990_v8, %v6281_v45 }
 0x55c   :  { %v6393_v57 = vpop.f32.mrf.mxu1 }
 0x55d   :  { %v6404_v10 = vadd.f32 %v6393_v57, %v6280_v33 }
 0x55e   :  { %v8997_v36 = vpop.f32.mrf.mxu1 }
 0x55f   :  { %v6527_v21 = vadd.f32 %v8997_v36, %v6403_v39 }
 0x560   :  { %v6507_v34 = vpop.f32.mrf.mxu1 }
 0x561   :  { %v6526_v28 = vadd.f32 %v6507_v34, %v6402_v12 }
 0x562   :  { %v9000_v14 = vpop.f32.mrf.mxu1 }
 0x563   :  { %v6529_v19 = vadd.f32 %v9000_v14, %v6405_v13  ;;  %v7785_v13 = vld [vmem:[%s12838_s7 + $0x60] sm:$0xff] }
 0x564   :  { %v6517_v35 = vpop.f32.mrf.mxu1 }
 0x565   :  { %v6528_v58 = vadd.f32 %v6517_v35, %v6404_v10  ;;  %v7780_v10 = vld [vmem:[%s12838_s7 + $0x38] sm:$0xff] }
 0x566   :  { %v9007_v1 = vpop.f32.mrf.mxu1 }
 0x567   :  { %v6651_v42 = vadd.f32 %v9007_v1, %v6527_v21  ;;  %v7786_v21 = vld [vmem:[%s12838_s7 + $0x68] sm:$0xff] }
 0x568   :  { %v6631_v54 = vpop.f32.mrf.mxu1 }
 0x569   :  { %v6650_v16 = vadd.f32 %v6631_v54, %v6526_v28  ;;  %v7784_v28 = vld [vmem:[%s12838_s7 + $0x58] sm:$0xff] }
 0x56a   :  { %v9010_v56 = vpop.f32.mrf.mxu1 }
 0x56b   :  { %v6653_v22 = vadd.f32 %v9010_v56, %v6529_v19  ;;  %v7779_v19 = vld [vmem:[%s12838_s7 + $0x30] sm:$0xff] }
 0x56c   :  { %v6641_v4 = vpop.f32.mrf.mxu1 }
 0x56d   :  { %v6652_v51 = vadd.f32 %v6641_v4, %v6528_v58  ;;  %v7775_v58 = vld [vmem:[%s12838_s7 + $0x10] sm:$0xff] }
 0x56e   :  { %v9017_v20 = vpop.f32.mrf.mxu1 }
 0x56f   :  { %v6775_v43 = vadd.f32 %v9017_v20, %v6651_v42  ;;  %v7782_v42 = vld [vmem:[%s12838_s7 + $0x48] sm:$0xff] }
 0x570   :  { %v6755_v31 = vpop.f32.mrf.mxu1 }
 0x571   :  { %v6774_v63 = vadd.f32 %v6755_v31, %v6650_v16  ;;  %v7778_v16 = vld [vmem:[%s12838_s7 + $0x28] sm:$0xff] }
 0x572   :  { %v9020_v61 = vpop.f32.mrf.mxu1 }
 0x573   :  { %v6777_v11 = vadd.f32 %v9020_v61, %v6653_v22  ;;  %v7774_v22 = vld [vmem:[%s12838_s7 + $0x8] sm:$0xff] }
 0x574   :  { %v6765_v40 = vpop.f32.mrf.mxu1 }
 0x575   :  { %v6776_v17 = vadd.f32 %v6765_v40, %v6652_v51 }
 0x576   :  { %v9027_v6 = vpop.f32.mrf.mxu1 }
 0x577   :  { %v6899_v41 = vadd.f32 %v9027_v6, %v6775_v43  ;;  %v8648_v6 = vld [vmem:[%s12839_s4] ss:$0 sm:$0xff] }
 0x578   :  { %v6879_v9 = vpop.f32.mrf.mxu1  ;;  %v7777_v43 = vld [vmem:[%s12838_s7 + $0x20] sm:$0xff] }
 0x579   :  { %v6898_v23 = vadd.f32 %v6879_v9, %v6774_v63  ;;  %v7773_v63 = vld [vmem:[%s12838_s7] sm:$0xff] }
 0x57a   :  { %v9030_v52 = vpop.f32.mrf.mxu1 }
 0x57b   :  { %v6901_v48 = vadd.f32 %v9030_v52, %v6777_v11 }
 0x57c   :  { %v6889_v26 = vpop.f32.mrf.mxu1 }
 0x57d   :  { %v6900_v45 = vadd.f32 %v6889_v26, %v6776_v17 }
 0x57e   :  { %v9037_v50 = vpop.f32.mrf.mxu1 }
 0x57f   :  { %v7023_v3 = vadd.f32 %v9037_v50, %v6899_v41  ;;  %v8649_v41 = vld [vmem:[%s12840_s6] ss:$0 sm:$0xff] }
 0x580   :  { %v7003_v62 = vpop.f32.mrf.mxu1 }
 0x581   :  { %v7022_v25 = vadd.f32 %v7003_v62, %v6898_v23 }
 0x582   :  { %v9040_v5 = vpop.f32.mrf.mxu1 }
 0x583   :  { %v7025_v30 = vadd.f32 %v9040_v5, %v6901_v48 }
 0x584   :  { %v7013_v2 = vpop.f32.mrf.mxu1 }
 0x585   :  { %v7024_v8 = vadd.f32 %v7013_v2, %v6900_v45 }
 0x586   :  { %v9047_v18 = vpop.f32.mrf.mxu1 }
 0x587   :  { %v7147_v38 = vadd.f32 %v9047_v18, %v7023_v3 }
 0x588   :  { %v7127_v27 = vpop.f32.mrf.mxu1 }
 0x589   :  { %v7146_v33 = vadd.f32 %v7127_v27, %v7022_v25 }
 0x58a   :  { %v9050_v7 = vpop.f32.mrf.mxu1 }
 0x58b   :  { %v7149_v57 = vadd.f32 %v9050_v7, %v7025_v30  ;;  %v8650_v30 = vld [vmem:[%s12841_s8] ss:$0 sm:$0xff] }
 0x58c   :  { %v7137_v47 = vpop.f32.mrf.mxu1 }
 0x58d   :  { %v7148_v35 = vadd.f32 %v7137_v47, %v7024_v8 }
 0x58e   :  { %v9057_v37 = vpop.f32.mrf.mxu1 }
 0x58f   :  { %v7271_v32 = vadd.f32 %v9057_v37, %v7147_v38 }
 0x590   :  { %v7251_v53 = vpop.f32.mrf.mxu1 }
 0x591   :  { %v7270_v36 = vadd.f32 %v7251_v53, %v7146_v33 }
 0x592   :  { %v9060_v46 = vpop.f32.mrf.mxu1 }
 0x593   :  { %v7273_v1 = vadd.f32 %v9060_v46, %v7149_v57 }
 0x594   :  { %v7261_v59 = vpop.f32.mrf.mxu1 }
 0x595   :  { %v7272_v20 = vadd.f32 %v7261_v59, %v7148_v35  ;;  %v7787_v59 = vld [vmem:[%s12838_s7 + $0x70] sm:$0xff] }
 0x596   :  { %v9067_v49 = vpop.f32.mrf.mxu1 }
 0x597   :  { %v7395_v34 = vadd.f32 %v9067_v49, %v7271_v32 }
 0x598   :  { %v7375_v0 = vpop.f32.mrf.mxu1 }
 0x599   :  { %v7394_v54 = vadd.f32 %v7375_v0, %v7270_v36  ;;  %v7781_v0 = vld [vmem:[%s12838_s7 + $0x40] sm:$0xff] }
 0x59a   :  { %v9070_v15 = vpop.f32.mrf.mxu1 }
 0x59b   :  { %v7397_v31 = vadd.f32 %v9070_v15, %v7273_v1  ;;  %v7776_v15 = vld [vmem:[%s12838_s7 + $0x18] sm:$0xff] }
 0x59c   :  { %v7385_v44 = vpop.f32.mrf.mxu1 }
 0x59d   :  { %v7396_v52 = vadd.f32 %v7385_v44, %v7272_v20 }
 0x59e   :  { %v9077_v55 = vpop.f32.mrf.mxu1 }
 0x59f   :  { %v7519_v56 = vadd.f32 %v9077_v55, %v7395_v34 }
 0x5a0   :  { %v7499_v24 = vpop.f32.mrf.mxu1 }
 0x5a1   :  { %v7518_v61 = vadd.f32 %v7499_v24, %v7394_v54 }
 0x5a2   :  { %v9080_v29 = vpop.f32.mrf.mxu1 }
 0x5a3   :  { %v7521_v26 = vadd.f32 %v9080_v29, %v7397_v31 }
 0x5a4   :  { %v7509_v14 = vpop.f32.mrf.mxu1 }
 0x5a5   :  { %v7520_v2 = vadd.f32 %v7509_v14, %v7396_v52 }
 0x5a6   :  { %v9087_v4 = vpop.f32.mrf.mxu1 }
 0x5a7   :  { %v7643_v40 = vadd.f32 %v9087_v4, %v7519_v56 }
 0x5a8   :  { %v7623_v9 = vpop.f32.mrf.mxu1 }
 0x5a9   :  { %v7642_v50 = vadd.f32 %v7623_v9, %v7518_v61  ;;  %v7654_v62 = vadd.f32 %v8648_v6, %v7643_v40 }
 0x5aa   :  { %v9090_v5 = vpop.f32.mrf.mxu1 }
 0x5ab   :  { %v7653_v18 = vadd.f32 %v8648_v6, %v7642_v50  ;;  %v7645_v27 = vadd.f32 %v9090_v5, %v7521_v26  ;;  %v7658_v53 = vmax.f32 %v7654_v62, 0.0 }
 0x5ac   :  { %v7633_v7 = vpop.f32.mrf.mxu1 }
 0x5ad   :  { %v7657_v47 = vmax.f32 %v7653_v18, 0.0  ;;  %v7644_v37 = vadd.f32 %v7633_v7, %v7520_v2  ;;  %v7656_v46 = vadd.f32 %v8648_v6, %v7645_v27 }
 0x5af   :  { %v7655_v39 = vadd.f32 %v8648_v6, %v7644_v37  ;;  %9123 = vmatprep.mubr.f32.mxu1 %v7657_v47  ;;  %v7660_v49 = vmax.f32 %v7656_v46, 0.0 }
 0x5b0   :  { %9124 = vmatmul.mubr.f32.vlgmr.msra.gmra.mxu1 %v7658_v53 }
 0x5b1   :  { %v7659_v12 = vmax.f32 %v7655_v39, 0.0  ;;  %9130 = vmatpush3.msra.mxu1 %v12763_v60  ;;  %v7783_v60 = vld [vmem:[%s12838_s7 + $0x50] sm:$0xff] }
 0x5b2   :  { %9131 = vmatprep.subr.mxu1 %v7787_v59 }
 0x5b3   :  { %9126 = vmatprep.mubr.f32.mxu1 %v7659_v12  ;;  %9132 = vmatpush3.msra.mxu1 %v7787_v59 }
 0x5b4   :  { %9127 = vmatmul.mubr.f32.gmra.mxu1 %v7660_v49  ;;  %9133 = vmatprep.subr.mxu1 %v7786_v21 }
 0x5b5   :  { %9134 = vmatpush3.msra.mxu1 %v7786_v21 }
 0x5b6   :  { %9135 = vmatprep.subr.mxu1 %v7785_v13 }
 0x5b7   :  { %9136 = vmatpush3.msra.mxu1 %v7785_v13 }
 0x5b8   :  { %9137 = vmatprep.subr.mxu1 %v7784_v28 }
 0x5b9   :  { %9138 = vmatpush3.msra.mxu1 %v7784_v28 }
 0x5ba   :  { %9139 = vmatprep.subr.mxu1 %v7783_v60 }
 0x5bb   :  { %9140 = vmatpush3.msra.mxu1 %v7783_v60 }
 0x5bc   :  { %9141 = vmatprep.subr.mxu1 %v7782_v42 }
 0x5bd   :  { %9142 = vmatpush3.msra.mxu1 %v7782_v42 }
 0x5be   :  { %9143 = vmatprep.subr.mxu1 %v7781_v0 }
 0x5bf   :  { %9144 = vmatpush3.msra.mxu1 %v7781_v0 }
 0x5c0   :  { %9145 = vmatprep.subr.mxu1 %v7780_v10 }
 0x5c1   :  { %9146 = vmatpush3.msra.mxu1 %v7780_v10 }
 0x5c2   :  { %9147 = vmatprep.subr.mxu1 %v7779_v19 }
 0x5c3   :  { %9148 = vmatpush3.msra.mxu1 %v7779_v19 }
 0x5c4   :  { %9149 = vmatprep.subr.mxu1 %v7778_v16 }
 0x5c5   :  { %9150 = vmatpush3.msra.mxu1 %v7778_v16 }
 0x5c6   :  { %9151 = vmatprep.subr.mxu1 %v7777_v43 }
 0x5c7   :  { %9152 = vmatpush3.msra.mxu1 %v7777_v43 }
 0x5c8   :  { %9153 = vmatprep.subr.mxu1 %v7776_v15 }
 0x5c9   :  { %9154 = vmatpush3.msra.mxu1 %v7776_v15 }
 0x5ca   :  { %9155 = vmatprep.subr.mxu1 %v7775_v58 }
 0x5cb   :  { %9156 = vmatpush3.msra.mxu1 %v7775_v58 }
 0x5cc   :  { %9157 = vmatprep.subr.mxu1 %v7774_v22 }
 0x5cd   :  { %9158 = vmatpush3.msra.mxu1 %v7774_v22 }
 0x5ce   :  { %9159 = vmatprep.subr.mxu1 %v7773_v63 }
 0x5cf   :  { %9160 = vmatpush3.msra.mxu1 %v7773_v63 }
 0x670   :  { %v9125_v44 = vpop.f32.mrf.mxu1 }
 0x671   :  { %v7756_v51 = vadd.f32 %v9125_v44, %v8649_v41 }
 0x672   :  { %v7750_v11 = vpop.f32.mrf.mxu1 }
 0x673   :  { %v7751_v23 = vadd.f32 %v8649_v41, %v7750_v11  ;;  %v7770_v17 = vmax.f32 %v7756_v51, 0.0 }
 0x674   :  { %v9128_v3 = vpop.f32.mrf.mxu1 }
 0x675   :  { %v7769_v55 = vmax.f32 %v7751_v23, 0.0  ;;  %v7766_v48 = vadd.f32 %v9128_v3, %v8649_v41 }
 0x676   :  { %v7760_v25 = vpop.f32.mrf.mxu1 }
 0x677   :  { %v7761_v38 = vadd.f32 %v8649_v41, %v7760_v25  ;;  %9161 = vmatprep.mubr.f32.mxu1 %v7769_v55  ;;  %v7772_v45 = vmax.f32 %v7766_v48, 0.0 }
 0x678   :  { %9162 = vmatmul.mubr.f32.vlgmr.msra.gmra.mxu1 %v7770_v17 }
 0x679   :  { %v7771_v24 = vmax.f32 %v7761_v38, 0.0 }
 0x67b   :  { %9164 = vmatprep.mubr.f32.mxu1 %v7771_v24 }
 0x67c   :  { %9165 = vmatmul.mubr.f32.gmra.mxu1 %v7772_v45 }
 0x738   :  { %v9163_v33 = vpop.f32.mrf.mxu1 }
 0x739   :  { %v7868_v32 = vadd.f32 %v9163_v33, %v8650_v30 }
 0x73a   :  { %v7862_v29 = vpop.f32.mrf.mxu1 }
 0x73b   :  { %7882 = vst [vmem:[%s12842_s9 + $0x8] sm:$0xff] %v7868_v32  ;;  %v7863_v8 = vadd.f32 %v8650_v30, %v7862_v29 }
 0x73c   :  { %v9166_v57 = vpop.f32.mrf.mxu1 }
 0x73d   :  { %7881 = vst [vmem:[%s12842_s9] sm:$0xff] %v7863_v8  ;;  %v7878_v36 = vadd.f32 %v9166_v57, %v8650_v30 }
 0x73e   :  { %v7872_v34 = vpop.f32.mrf.mxu1 }
 0x73f   :  { %7884 = vst [vmem:[%s12842_s9 + $0x18] sm:$0xff] %v7878_v36  ;;  %v7873_v14 = vadd.f32 %v8650_v30, %v7872_v34 }
 0x741   :  { %7883 = vst [vmem:[%s12842_s9 + $0x10] sm:$0xff] %v7873_v14 }

</bundles_post_ra>
